<compile_context>
chip_gen: v6e
topology: v6e:2x2x1
jax: 0.10.0
libtpu: 0.0.40
codegen_flags: <defaults>
</compile_context>

<pallas_src>
import functools

import jax
import jax.numpy as jnp
from jax.experimental import pallas as pl
from jax.experimental.pallas import tpu as pltpu

LANE = 128                 # lane width -> pad channel dims to multiples of this
DEFAULT_TILE_M = 1024      # flattened-spatial rows per output tile (>=512 per roofline data)


def _round_up(x, m):
    return (x + m - 1) // m * m


def _vmem_limit_bytes():
    # Generation-aware scoped-VMEM budget: ~75% of physical VMEM, capped at 100 MiB
    # (v5e/v6e: 128 MiB physical -> 96 MiB; v7x: 64 MiB physical -> 48 MiB).
    try:
        cap = int(pltpu.get_tpu_info().vmem_capacity_bytes)
        return max(32 << 20, min(100 << 20, (cap * 3) // 4))
    except Exception:
        return 32 << 20


VMEM_LIMIT = _vmem_limit_bytes()


# ----------------------------- Pallas kernels --------------------------------------- #

def fused_conv_kernel(x_ref, w_ref, b_ref, o_ref, acc_ref, *, taps, tm, single_tile):
    """One (image, M-tile) step of a fused 3x3 conv: 9 shifted-slice tap matmuls.

    x_ref:   (L, Cin)        bf16  flattened (stride-2: parity-plane-split) padded image,
                                   VMEM-resident across the M-tile grid axis.
    w_ref:   (9, Cin, Cout)  bf16  folded RepVGG weights, one (Cin, Cout) slab per tap.
    b_ref:   (1, Cout)       f32   folded bias.
    o_ref:   (tm, Cout)      bf16  relu(conv + bias) for this output row tile.
    acc_ref: (tm, Cout)      f32   VMEM scratch accumulator.
    """
    m0 = 0 if single_tile else pl.program_id(1) * tm
    for t, base in enumerate(taps):
        xt = x_ref[pl.ds(m0 + base, tm), :]            # tap t = contiguous shifted slice
        contrib = jnp.dot(xt, w_ref[t], preferred_element_type=jnp.float32)
        if t == 0:
            acc_ref[...] = contrib
        else:
            acc_ref[...] += contrib
    o_ref[...] = jnp.maximum(acc_ref[...] + b_ref[...], 0.0).astype(o_ref.dtype)


def fused_conv_relu(x_flat, w_taps, bias, taps, m_out, *, tile_m=DEFAULT_TILE_M):
    """relu(conv3x3(x) + bias) on the flattened-tap representation.

    x_flat: (N, L, Cin) bf16, w_taps: (9, Cin, Cout) bf16, bias: (1, Cout) f32.
    Returns (N, m_pad, Cout) bf16; rows >= m_out and padded columns are garbage and are
    sliced off by the caller.
    """
    N, L, cin = x_flat.shape
    cout = w_taps.shape[2]
    if m_out <= tile_m:
        tm, n_m = m_out, 1                             # single tile: full-extent block
    else:
        tm, n_m = tile_m, pl.cdiv(m_out, tile_m)       # tile_m is a multiple of 8
    m_pad = tm * n_m
    need = m_pad + max(taps)                           # keep every tap slice in bounds
    if L < need:
        x_flat = jnp.pad(x_flat, ((0, 0), (0, need - L), (0, 0)))
        L = need

    cost = pl.CostEstimate(
        flops=2 * N * m_pad * 9 * cin * cout,
        transcendentals=0,
        bytes_accessed=(N * L * cin + 9 * cin * cout + N * m_pad * cout) * 2 + cout * 4)

    kernel = functools.partial(fused_conv_kernel, taps=tuple(taps), tm=tm,
                               single_tile=(n_m == 1))
    return pl.pallas_call(
        kernel,
        out_shape=jax.ShapeDtypeStruct((N, m_pad, cout), jnp.bfloat16),
        grid=(N, n_m),
        in_specs=[pl.BlockSpec((None, L, cin), lambda n, m: (n, 0, 0)),   # image, resident over m
                  pl.BlockSpec((9, cin, cout), lambda n, m: (0, 0, 0)),   # resident weights
                  pl.BlockSpec((1, cout), lambda n, m: (0, 0))],          # resident bias
        out_specs=pl.BlockSpec((None, tm, cout), lambda n, m: (n, m, 0)), # lane-dense out
        scratch_shapes=[pltpu.VMEM((tm, cout), jnp.float32)],
        compiler_params=pltpu.CompilerParams(
            dimension_semantics=("parallel", "parallel"),                 # megacore-friendly
            vmem_limit_bytes=VMEM_LIMIT),
        cost_estimate=cost,
    )(x_flat, w_taps, bias)


def head_kernel(x_ref, w_ref, b_ref, o_ref, acc_ref, *, hw_total):
    # Grid axis 0 tiles the H*W reduction; pooled sum accumulated in VMEM scratch.
    j = pl.program_id(0)

    @pl.when(j == 0)
    def _():
        acc_ref[...] = jnp.zeros_like(acc_ref)

    acc_ref[...] += jnp.sum(x_ref[...].astype(jnp.float32), axis=1)

    @pl.when(j == pl.num_programs(0) - 1)
    def _():
        feat = (acc_ref[...] * (1.0 / hw_total)).astype(jnp.bfloat16)  # global avg pool
        o_ref[...] = (jnp.dot(feat, w_ref[...], preferred_element_type=jnp.float32)
                      + b_ref[...]).astype(o_ref.dtype)


def head_call(x, w, b, *, tile_hw=512):
    """Adaptive average pool over HW + linear.  x: (N, HW, C) bf16, w: (C, ncls_pad) bf16."""
    N, HW, C = x.shape
    ncls = w.shape[1]
    thw = min(tile_hw, HW)
    HWp = _round_up(HW, thw)
    if HWp != HW:                                   # zero-pad HW tiles (sum unaffected)
        x = jnp.pad(x, ((0, 0), (0, HWp - HW), (0, 0)))
    grid = (HWp // thw,)
    kernel = functools.partial(head_kernel, hw_total=float(HW))
    return pl.pallas_call(
        kernel,
        out_shape=jax.ShapeDtypeStruct((N, ncls), jnp.float32),
        grid=grid,
        in_specs=[pl.BlockSpec((N, thw, C), lambda j: (0, j, 0)),
                  pl.BlockSpec((C, ncls), lambda j: (0, 0)),
                  pl.BlockSpec((1, ncls), lambda j: (0, 0))],
        out_specs=pl.BlockSpec((N, ncls), lambda j: (0, 0)),    # resident across reduction
        scratch_shapes=[pltpu.VMEM((N, C), jnp.float32)],
        compiler_params=pltpu.CompilerParams(
            dimension_semantics=("arbitrary",),                 # reduction axis
            vmem_limit_bytes=VMEM_LIMIT),
    )(x, w, b)


# ------------------------------ plain-JAX glue --------------------------------------- #

def conv_block(x, params):
    """One fused RepVGG block: 3x3 conv (stride 1 or 2, pad 1) + bias + ReLU, NHWC bf16."""
    w_taps, bias, stride = params
    N, H, W, C = x.shape
    cin_pad, cout = w_taps.shape[1], w_taps.shape[2]
    Ho = (H - 1) // stride + 1
    Wo = (W - 1) // stride + 1
    if C < cin_pad:                                    # stem: zero-pad 3 -> 16 channels
        x = jnp.pad(x, ((0, 0), (0, 0), (0, 0), (0, cin_pad - C)))

    if stride == 1:
        # Flatten the zero-padded image; tap (kh,kw) is a contiguous slice at kh*Wrow+kw.
        Wrow = Wo + 2
        xp = jnp.pad(x, ((0, 0), (1, 1), (1, 1), (0, 0)))
        x_flat = xp.reshape(N, (Ho + 2) * Wrow, cin_pad)
        taps = [kh * Wrow + kw for kh in range(3) for kw in range(3)]
    else:
        # Stride 2: split the padded image into 4 row/col parity planes (2x2 space-to-
        # depth); every tap becomes a contiguous slice of one plane.
        Wrow, Hs = Wo + 1, Ho + 1
        xp = jnp.pad(x, ((0, 0), (1, 2 * Hs - 1 - H), (1, 2 * Wrow - 1 - W), (0, 0)))
        planes = xp.reshape(N, Hs, 2, Wrow, 2, cin_pad).transpose(0, 2, 4, 1, 3, 5)
        x_flat = planes.reshape(N, 4 * Hs * Wrow, cin_pad)
        Lp = Hs * Wrow
        taps = [((kh % 2) * 2 + (kw % 2)) * Lp + (kh // 2) * Wrow + (kw // 2)
                for kh in range(3) for kw in range(3)]

    m_out = Ho * Wrow                                  # output rows carry Wrow (padded) cols
    out = fused_conv_relu(x_flat, w_taps, bias, taps, m_out)
    return out[:, :m_out, :].reshape(N, Ho, Wrow, cout)[:, :, :Wo, :]


def make_fused_block_params(key, cin, cout, stride, cin_pad, cout_pad):
    """RepVGG block with BN folded (eval mode, default BN init) into one 3x3 conv,
    zero-padded to lane-dense (cin_pad, cout_pad) channel counts, stacked per tap (bf16)."""
    k3, k1 = jax.random.split(key)
    w3 = jax.random.normal(k3, (cout, cin, 3, 3), jnp.float32) * 0.1
    w1 = jax.random.normal(k1, (cout, cin, 1, 1), jnp.float32) * 0.1
    eps = 1e-5
    scale = 1.0 / jnp.sqrt(1.0 + eps)              # gamma=1, mean=0, var=1
    wf = w3 * scale
    wf = wf.at[:, :, 1, 1].add(w1[:, :, 0, 0] * scale)
    if stride == 1 and cin == cout:                # identity (BN-only) branch
        wf = wf.at[:, :, 1, 1].add(jnp.eye(cout, dtype=jnp.float32) * scale)
    # Embed into zero-padded channel dims: padded inputs are always zero activations and
    # padded outputs get zero weight + zero bias -> ReLU(0) = 0, so semantics unchanged.
    wpad = jnp.zeros((cout_pad, cin_pad, 3, 3), jnp.float32).at[:cout, :cin].set(wf)
    w_hwio = jnp.transpose(wpad, (2, 3, 1, 0))     # (3, 3, cin_pad, cout_pad)
    w_taps = w_hwio.reshape(9, cin_pad, cout_pad).astype(jnp.bfloat16)
    bias = jnp.zeros((1, cout_pad), jnp.float32)   # beta=0, running_mean=0 -> zero bias
    return w_taps, bias, stride


def build_repvgg_params(key, in_channels=3, num_classes=10,
                        blocks=(2, 1, 1, 1), multipl=(0.25, 0.25, 0.25, 0.25)):
    # Mirrors REPVGG.__init__ layer construction exactly.
    cfg = []
    out_c = min(64, int(64 * multipl[0]))
    cfg.append((in_channels, out_c, 2))
    in_c = out_c
    for i in range(4):
        out_c = int(64 * 2 ** i * multipl[i])
        cfg.append((in_c, out_c, 2))
        in_c = out_c
        for _ in range(blocks[i] - 1):
            cfg.append((in_c, out_c, 1))
        in_c = out_c

    keys = jax.random.split(key, len(cfg) + 1)
    block_params = []
    cin_pad = _round_up(in_channels, 16)           # stem: tap matmuls with K=16 (bf16 tile)
    for k, (ci, co, s) in zip(keys[:-1], cfg):
        cout_pad = _round_up(co, LANE)
        block_params.append(make_fused_block_params(k, ci, co, s, cin_pad, cout_pad))
        cin_pad = cout_pad

    lin_in = int(512 * multipl[3])
    c_pad = cin_pad                                # channels of the final feature map
    ncls_pad = _round_up(num_classes, LANE)
    kw, _ = jax.random.split(keys[-1])
    Wl = jax.random.normal(kw, (lin_in, num_classes), jnp.float32) * 0.05
    Wl_pad = (jnp.zeros((c_pad, ncls_pad), jnp.float32)
              .at[:lin_in, :num_classes].set(Wl).astype(jnp.bfloat16))
    bl_pad = jnp.zeros((1, ncls_pad), jnp.float32)
    return block_params, (Wl_pad, bl_pad, num_classes)


def repvgg_forward(x_nchw, block_params, head_params):
    x = jnp.transpose(x_nchw, (0, 2, 3, 1)).astype(jnp.bfloat16)   # NCHW -> NHWC, bf16
    for params in block_params:
        x = conv_block(x, params)                                  # fused Pallas conv+ReLU
    N, H, W, C = x.shape
    Wl, bl, ncls = head_params
    logits = head_call(x.reshape(N, H * W, C), Wl, bl)             # Pallas pool + linear
    return logits[:, :ncls]                                        # drop lane padding


def repvgg_reference(x_nchw, block_params, head_params):
    """Pure-JAX reference (lax conv) with matched bf16 activation/weight precision."""
    x = jnp.transpose(x_nchw, (0, 2, 3, 1)).astype(jnp.bfloat16).astype(jnp.float32)
    for w_taps, b, s in block_params:
        _, cinp, coutp = w_taps.shape
        if x.shape[-1] < cinp:
            x = jnp.pad(x, ((0, 0), (0, 0), (0, 0), (0, cinp - x.shape[-1])))
        w_hwio = w_taps.astype(jnp.float32).reshape(3, 3, cinp, coutp)
        y = jax.lax.conv_general_dilated(
            x, w_hwio, window_strides=(s, s), padding=((1, 1), (1, 1)),
            dimension_numbers=("NHWC", "HWIO", "NHWC"))
        x = jnp.maximum(y + b.reshape(1, 1, 1, coutp), 0.0)
        x = x.astype(jnp.bfloat16).astype(jnp.float32)   # match bf16 activation storage
    feat = jnp.mean(x, axis=(1, 2))
    Wl, bl, ncls = head_params
    logits = jnp.dot(feat.astype(jnp.bfloat16), Wl,
                     preferred_element_type=jnp.float32) + bl
    return logits[:, :ncls]


# ------------------------------------ main -------------------------------------------- #

if __name__ == "__main__":
    key = jax.random.PRNGKey(0)
    kx, kp = jax.random.split(key)

    # PyTorch-style NCHW input (small synthetic shapes).
    x = jax.random.normal(kx, (2, 3, 32, 32), jnp.float32)

    block_params, head_params = build_repvgg_params(
        kp, in_channels=3, num_classes=10,
        blocks=(2, 1, 1, 1), multipl=(0.25, 0.25, 0.25, 0.25))

    @jax.jit
    def fwd(inp):
        return repvgg_forward(inp, block_params, head_params)

    logits = jax.block_until_ready(fwd(x))
    assert logits.shape == (2, 10), logits.shape

    ref = repvgg_reference(x, block_params, head_params)
    if not bool(jnp.allclose(logits, ref, atol=1e-2, rtol=1e-2)):
        raise AssertionError("Pallas REPVGG output mismatch vs. pure-JAX reference")

    print("KERNEL_OK")
</pallas_src>

<mosaic_0001>
module attributes {stable_mosaic.version = 11 : i64} {
  func.func @fused_conv_kernel(%arg0: i32, %arg1: i32, %arg2: memref<1x1156x16xbf16, #tpu.memory_space<vmem>>, %arg3: memref<9x16x128xbf16, #tpu.memory_space<vmem>>, %arg4: memref<1x128xf32, #tpu.memory_space<vmem>>, %arg5: memref<1x272x128xbf16, #tpu.memory_space<vmem>>, %arg6: memref<272x128xf32, #tpu.memory_space<vmem>>) attributes {dimension_semantics = [#tpu.dimension_semantics<parallel>, #tpu.dimension_semantics<parallel>], iteration_bounds = array<i64: 2, 1>, scalar_prefetch = 0 : i64, scratch_operands = 1 : i64, tpu.core_type = #tpu.core_type<tc>, window_params = [{transform_indices = @transform_0, window_bounds = array<i64: 1, 1156, 16>}, {pipeline_mode = #tpu.pipeline_mode<synchronous>, transform_indices = @transform_1, window_bounds = array<i64: 9, 16, 128>}, {pipeline_mode = #tpu.pipeline_mode<synchronous>, transform_indices = @transform_2, window_bounds = array<i64: 1, 128>}, {transform_indices = @transform_3, window_bounds = array<i64: 1, 272, 128>}]} {
    %c0 = arith.constant 0 : index
    %c0_0 = arith.constant 0 : index
    %c0_1 = arith.constant 0 : index
    %0 = vector.load %arg2[%c0, %c0_0, %c0_1] : memref<1x1156x16xbf16, #tpu.memory_space<vmem>>, vector<1x272x16xbf16>
    %1 = vector.shape_cast %0 : vector<1x272x16xbf16> to vector<272x16xbf16>
    %c0_2 = arith.constant 0 : index
    %c0_3 = arith.constant 0 : index
    %c0_4 = arith.constant 0 : index
    %2 = vector.load %arg3[%c0_2, %c0_3, %c0_4] : memref<9x16x128xbf16, #tpu.memory_space<vmem>>, vector<1x16x128xbf16>
    %3 = vector.shape_cast %2 : vector<1x16x128xbf16> to vector<16x128xbf16>
    %cst = arith.constant dense<0.000000e+00> : vector<272x128xf32>
    %4 = tpu.matmul %1, %3, %cst {dimension_numbers = #tpu.dot_dimension_numbers<[1], [0], [0], [1], [0, 0, 1, 1], [], []>} : vector<272x16xbf16>, vector<16x128xbf16>, vector<272x128xf32> -> vector<272x128xf32>
    %c0_5 = arith.constant 0 : index
    %c0_6 = arith.constant 0 : index
    %5 = vector.load %arg6[%c0_5, %c0_6] : memref<272x128xf32, #tpu.memory_space<vmem>>, vector<272x128xf32>
    tpu.vector_store %arg6[%c0_5, %c0_6], %4 {strides = array<i32>} : memref<272x128xf32, #tpu.memory_space<vmem>>, vector<272x128xf32>,
    %c0_7 = arith.constant 0 : index
    %c289 = arith.constant 289 : index
    %c0_8 = arith.constant 0 : index
    %6 = vector.load %arg2[%c0_7, %c289, %c0_8] : memref<1x1156x16xbf16, #tpu.memory_space<vmem>>, vector<1x272x16xbf16>
    %7 = vector.shape_cast %6 : vector<1x272x16xbf16> to vector<272x16xbf16>
    %c1 = arith.constant 1 : index
    %c0_9 = arith.constant 0 : index
    %c0_10 = arith.constant 0 : index
    %8 = vector.load %arg3[%c1, %c0_9, %c0_10] : memref<9x16x128xbf16, #tpu.memory_space<vmem>>, vector<1x16x128xbf16>
    %9 = vector.shape_cast %8 : vector<1x16x128xbf16> to vector<16x128xbf16>
    %cst_11 = arith.constant dense<0.000000e+00> : vector<272x128xf32>
    %10 = tpu.matmul %7, %9, %cst_11 {dimension_numbers = #tpu.dot_dimension_numbers<[1], [0], [0], [1], [0, 0, 1, 1], [], []>} : vector<272x16xbf16>, vector<16x128xbf16>, vector<272x128xf32> -> vector<272x128xf32>
    %c0_12 = arith.constant 0 : index
    %c0_13 = arith.constant 0 : index
    %11 = vector.load %arg6[%c0_12, %c0_13] : memref<272x128xf32, #tpu.memory_space<vmem>>, vector<272x128xf32>
    %12 = arith.addf %11, %10 : vector<272x128xf32>
    %c0_14 = arith.constant 0 : index
    %c0_15 = arith.constant 0 : index
    %13 = vector.load %arg6[%c0_14, %c0_15] : memref<272x128xf32, #tpu.memory_space<vmem>>, vector<272x128xf32>
    tpu.vector_store %arg6[%c0_14, %c0_15], %12 {strides = array<i32>} : memref<272x128xf32, #tpu.memory_space<vmem>>, vector<272x128xf32>,
    %c0_16 = arith.constant 0 : index
    %c1_17 = arith.constant 1 : index
    %c0_18 = arith.constant 0 : index
    %14 = vector.load %arg2[%c0_16, %c1_17, %c0_18] : memref<1x1156x16xbf16, #tpu.memory_space<vmem>>, vector<1x272x16xbf16>
    %15 = vector.shape_cast %14 : vector<1x272x16xbf16> to vector<272x16xbf16>
    %c2 = arith.constant 2 : index
    %c0_19 = arith.constant 0 : index
    %c0_20 = arith.constant 0 : index
    %16 = vector.load %arg3[%c2, %c0_19, %c0_20] : memref<9x16x128xbf16, #tpu.memory_space<vmem>>, vector<1x16x128xbf16>
    %17 = vector.shape_cast %16 : vector<1x16x128xbf16> to vector<16x128xbf16>
    %cst_21 = arith.constant dense<0.000000e+00> : vector<272x128xf32>
    %18 = tpu.matmul %15, %17, %cst_21 {dimension_numbers = #tpu.dot_dimension_numbers<[1], [0], [0], [1], [0, 0, 1, 1], [], []>} : vector<272x16xbf16>, vector<16x128xbf16>, vector<272x128xf32> -> vector<272x128xf32>
    %c0_22 = arith.constant 0 : index
    %c0_23 = arith.constant 0 : index
    %19 = vector.load %arg6[%c0_22, %c0_23] : memref<272x128xf32, #tpu.memory_space<vmem>>, vector<272x128xf32>
    %20 = arith.addf %19, %18 : vector<272x128xf32>
    %c0_24 = arith.constant 0 : index
    %c0_25 = arith.constant 0 : index
    %21 = vector.load %arg6[%c0_24, %c0_25] : memref<272x128xf32, #tpu.memory_space<vmem>>, vector<272x128xf32>
    tpu.vector_store %arg6[%c0_24, %c0_25], %20 {strides = array<i32>} : memref<272x128xf32, #tpu.memory_space<vmem>>, vector<272x128xf32>,
    %c0_26 = arith.constant 0 : index
    %c578 = arith.constant 578 : index
    %c0_27 = arith.constant 0 : index
    %22 = vector.load %arg2[%c0_26, %c578, %c0_27] : memref<1x1156x16xbf16, #tpu.memory_space<vmem>>, vector<1x272x16xbf16>
    %23 = vector.shape_cast %22 : vector<1x272x16xbf16> to vector<272x16xbf16>
    %c3 = arith.constant 3 : index
    %c0_28 = arith.constant 0 : index
    %c0_29 = arith.constant 0 : index
    %24 = vector.load %arg3[%c3, %c0_28, %c0_29] : memref<9x16x128xbf16, #tpu.memory_space<vmem>>, vector<1x16x128xbf16>
    %25 = vector.shape_cast %24 : vector<1x16x128xbf16> to vector<16x128xbf16>
    %cst_30 = arith.constant dense<0.000000e+00> : vector<272x128xf32>
    %26 = tpu.matmul %23, %25, %cst_30 {dimension_numbers = #tpu.dot_dimension_numbers<[1], [0], [0], [1], [0, 0, 1, 1], [], []>} : vector<272x16xbf16>, vector<16x128xbf16>, vector<272x128xf32> -> vector<272x128xf32>
    %c0_31 = arith.constant 0 : index
    %c0_32 = arith.constant 0 : index
    %27 = vector.load %arg6[%c0_31, %c0_32] : memref<272x128xf32, #tpu.memory_space<vmem>>, vector<272x128xf32>
    %28 = arith.addf %27, %26 : vector<272x128xf32>
    %c0_33 = arith.constant 0 : index
    %c0_34 = arith.constant 0 : index
    %29 = vector.load %arg6[%c0_33, %c0_34] : memref<272x128xf32, #tpu.memory_space<vmem>>, vector<272x128xf32>
    tpu.vector_store %arg6[%c0_33, %c0_34], %28 {strides = array<i32>} : memref<272x128xf32, #tpu.memory_space<vmem>>, vector<272x128xf32>,
    %c0_35 = arith.constant 0 : index
    %c867 = arith.constant 867 : index
    %c0_36 = arith.constant 0 : index
    %30 = vector.load %arg2[%c0_35, %c867, %c0_36] : memref<1x1156x16xbf16, #tpu.memory_space<vmem>>, vector<1x272x16xbf16>
    %31 = vector.shape_cast %30 : vector<1x272x16xbf16> to vector<272x16xbf16>
    %c4 = arith.constant 4 : index
    %c0_37 = arith.constant 0 : index
    %c0_38 = arith.constant 0 : index
    %32 = vector.load %arg3[%c4, %c0_37, %c0_38] : memref<9x16x128xbf16, #tpu.memory_space<vmem>>, vector<1x16x128xbf16>
    %33 = vector.shape_cast %32 : vector<1x16x128xbf16> to vector<16x128xbf16>
    %cst_39 = arith.constant dense<0.000000e+00> : vector<272x128xf32>
    %34 = tpu.matmul %31, %33, %cst_39 {dimension_numbers = #tpu.dot_dimension_numbers<[1], [0], [0], [1], [0, 0, 1, 1], [], []>} : vector<272x16xbf16>, vector<16x128xbf16>, vector<272x128xf32> -> vector<272x128xf32>
    %c0_40 = arith.constant 0 : index
    %c0_41 = arith.constant 0 : index
    %35 = vector.load %arg6[%c0_40, %c0_41] : memref<272x128xf32, #tpu.memory_space<vmem>>, vector<272x128xf32>
    %36 = arith.addf %35, %34 : vector<272x128xf32>
    %c0_42 = arith.constant 0 : index
    %c0_43 = arith.constant 0 : index
    %37 = vector.load %arg6[%c0_42, %c0_43] : memref<272x128xf32, #tpu.memory_space<vmem>>, vector<272x128xf32>
    tpu.vector_store %arg6[%c0_42, %c0_43], %36 {strides = array<i32>} : memref<272x128xf32, #tpu.memory_space<vmem>>, vector<272x128xf32>,
    %c0_44 = arith.constant 0 : index
    %c579 = arith.constant 579 : index
    %c0_45 = arith.constant 0 : index
    %38 = vector.load %arg2[%c0_44, %c579, %c0_45] : memref<1x1156x16xbf16, #tpu.memory_space<vmem>>, vector<1x272x16xbf16>
    %39 = vector.shape_cast %38 : vector<1x272x16xbf16> to vector<272x16xbf16>
    %c5 = arith.constant 5 : index
    %c0_46 = arith.constant 0 : index
    %c0_47 = arith.constant 0 : index
    %40 = vector.load %arg3[%c5, %c0_46, %c0_47] : memref<9x16x128xbf16, #tpu.memory_space<vmem>>, vector<1x16x128xbf16>
    %41 = vector.shape_cast %40 : vector<1x16x128xbf16> to vector<16x128xbf16>
    %cst_48 = arith.constant dense<0.000000e+00> : vector<272x128xf32>
    %42 = tpu.matmul %39, %41, %cst_48 {dimension_numbers = #tpu.dot_dimension_numbers<[1], [0], [0], [1], [0, 0, 1, 1], [], []>} : vector<272x16xbf16>, vector<16x128xbf16>, vector<272x128xf32> -> vector<272x128xf32>
    %c0_49 = arith.constant 0 : index
    %c0_50 = arith.constant 0 : index
    %43 = vector.load %arg6[%c0_49, %c0_50] : memref<272x128xf32, #tpu.memory_space<vmem>>, vector<272x128xf32>
    %44 = arith.addf %43, %42 : vector<272x128xf32>
    %c0_51 = arith.constant 0 : index
    %c0_52 = arith.constant 0 : index
    %45 = vector.load %arg6[%c0_51, %c0_52] : memref<272x128xf32, #tpu.memory_space<vmem>>, vector<272x128xf32>
    tpu.vector_store %arg6[%c0_51, %c0_52], %44 {strides = array<i32>} : memref<272x128xf32, #tpu.memory_space<vmem>>, vector<272x128xf32>,
    %c0_53 = arith.constant 0 : index
    %c17 = arith.constant 17 : index
    %c0_54 = arith.constant 0 : index
    %46 = vector.load %arg2[%c0_53, %c17, %c0_54] : memref<1x1156x16xbf16, #tpu.memory_space<vmem>>, vector<1x272x16xbf16>
    %47 = vector.shape_cast %46 : vector<1x272x16xbf16> to vector<272x16xbf16>
    %c6 = arith.constant 6 : index
    %c0_55 = arith.constant 0 : index
    %c0_56 = arith.constant 0 : index
    %48 = vector.load %arg3[%c6, %c0_55, %c0_56] : memref<9x16x128xbf16, #tpu.memory_space<vmem>>, vector<1x16x128xbf16>
    %49 = vector.shape_cast %48 : vector<1x16x128xbf16> to vector<16x128xbf16>
    %cst_57 = arith.constant dense<0.000000e+00> : vector<272x128xf32>
    %50 = tpu.matmul %47, %49, %cst_57 {dimension_numbers = #tpu.dot_dimension_numbers<[1], [0], [0], [1], [0, 0, 1, 1], [], []>} : vector<272x16xbf16>, vector<16x128xbf16>, vector<272x128xf32> -> vector<272x128xf32>
    %c0_58 = arith.constant 0 : index
    %c0_59 = arith.constant 0 : index
    %51 = vector.load %arg6[%c0_58, %c0_59] : memref<272x128xf32, #tpu.memory_space<vmem>>, vector<272x128xf32>
    %52 = arith.addf %51, %50 : vector<272x128xf32>
    %c0_60 = arith.constant 0 : index
    %c0_61 = arith.constant 0 : index
    %53 = vector.load %arg6[%c0_60, %c0_61] : memref<272x128xf32, #tpu.memory_space<vmem>>, vector<272x128xf32>
    tpu.vector_store %arg6[%c0_60, %c0_61], %52 {strides = array<i32>} : memref<272x128xf32, #tpu.memory_space<vmem>>, vector<272x128xf32>,
    %c0_62 = arith.constant 0 : index
    %c306 = arith.constant 306 : index
    %c0_63 = arith.constant 0 : index
    %54 = vector.load %arg2[%c0_62, %c306, %c0_63] : memref<1x1156x16xbf16, #tpu.memory_space<vmem>>, vector<1x272x16xbf16>
    %55 = vector.shape_cast %54 : vector<1x272x16xbf16> to vector<272x16xbf16>
    %c7 = arith.constant 7 : index
    %c0_64 = arith.constant 0 : index
    %c0_65 = arith.constant 0 : index
    %56 = vector.load %arg3[%c7, %c0_64, %c0_65] : memref<9x16x128xbf16, #tpu.memory_space<vmem>>, vector<1x16x128xbf16>
    %57 = vector.shape_cast %56 : vector<1x16x128xbf16> to vector<16x128xbf16>
    %cst_66 = arith.constant dense<0.000000e+00> : vector<272x128xf32>
    %58 = tpu.matmul %55, %57, %cst_66 {dimension_numbers = #tpu.dot_dimension_numbers<[1], [0], [0], [1], [0, 0, 1, 1], [], []>} : vector<272x16xbf16>, vector<16x128xbf16>, vector<272x128xf32> -> vector<272x128xf32>
    %c0_67 = arith.constant 0 : index
    %c0_68 = arith.constant 0 : index
    %59 = vector.load %arg6[%c0_67, %c0_68] : memref<272x128xf32, #tpu.memory_space<vmem>>, vector<272x128xf32>
    %60 = arith.addf %59, %58 : vector<272x128xf32>
    %c0_69 = arith.constant 0 : index
    %c0_70 = arith.constant 0 : index
    %61 = vector.load %arg6[%c0_69, %c0_70] : memref<272x128xf32, #tpu.memory_space<vmem>>, vector<272x128xf32>
    tpu.vector_store %arg6[%c0_69, %c0_70], %60 {strides = array<i32>} : memref<272x128xf32, #tpu.memory_space<vmem>>, vector<272x128xf32>,
    %c0_71 = arith.constant 0 : index
    %c18 = arith.constant 18 : index
    %c0_72 = arith.constant 0 : index
    %62 = vector.load %arg2[%c0_71, %c18, %c0_72] : memref<1x1156x16xbf16, #tpu.memory_space<vmem>>, vector<1x272x16xbf16>
    %63 = vector.shape_cast %62 : vector<1x272x16xbf16> to vector<272x16xbf16>
    %c8 = arith.constant 8 : index
    %c0_73 = arith.constant 0 : index
    %c0_74 = arith.constant 0 : index
    %64 = vector.load %arg3[%c8, %c0_73, %c0_74] : memref<9x16x128xbf16, #tpu.memory_space<vmem>>, vector<1x16x128xbf16>
    %65 = vector.shape_cast %64 : vector<1x16x128xbf16> to vector<16x128xbf16>
    %cst_75 = arith.constant dense<0.000000e+00> : vector<272x128xf32>
    %66 = tpu.matmul %63, %65, %cst_75 {dimension_numbers = #tpu.dot_dimension_numbers<[1], [0], [0], [1], [0, 0, 1, 1], [], []>} : vector<272x16xbf16>, vector<16x128xbf16>, vector<272x128xf32> -> vector<272x128xf32>
    %c0_76 = arith.constant 0 : index
    %c0_77 = arith.constant 0 : index
    %67 = vector.load %arg6[%c0_76, %c0_77] : memref<272x128xf32, #tpu.memory_space<vmem>>, vector<272x128xf32>
    %68 = arith.addf %67, %66 : vector<272x128xf32>
    %c0_78 = arith.constant 0 : index
    %c0_79 = arith.constant 0 : index
    %69 = vector.load %arg6[%c0_78, %c0_79] : memref<272x128xf32, #tpu.memory_space<vmem>>, vector<272x128xf32>
    tpu.vector_store %arg6[%c0_78, %c0_79], %68 {strides = array<i32>} : memref<272x128xf32, #tpu.memory_space<vmem>>, vector<272x128xf32>,
    %c0_80 = arith.constant 0 : index
    %c0_81 = arith.constant 0 : index
    %70 = vector.load %arg6[%c0_80, %c0_81] : memref<272x128xf32, #tpu.memory_space<vmem>>, vector<272x128xf32>
    %c0_82 = arith.constant 0 : index
    %c0_83 = arith.constant 0 : index
    %71 = vector.load %arg4[%c0_82, %c0_83] : memref<1x128xf32, #tpu.memory_space<vmem>>, vector<1x128xf32>
    %72 = vector.broadcast %71 : vector<1x128xf32> to vector<272x128xf32>
    %73 = arith.addf %70, %72 : vector<272x128xf32>
    %cst_84 = arith.constant 0.000000e+00 : f32
    %74 = vector.broadcast %cst_84 : f32 to vector<272x128xf32>
    %75 = arith.maximumf %73, %74 : vector<272x128xf32>
    %76 = arith.truncf %75 : vector<272x128xf32> to vector<272x128xbf16>
    %c0_85 = arith.constant 0 : index
    %c0_86 = arith.constant 0 : index
    %c0_87 = arith.constant 0 : index
    %77 = vector.load %arg5[%c0_85, %c0_86, %c0_87] : memref<1x272x128xbf16, #tpu.memory_space<vmem>>, vector<1x272x128xbf16>
    %78 = vector.shape_cast %77 : vector<1x272x128xbf16> to vector<272x128xbf16>
    %79 = vector.shape_cast %76 : vector<272x128xbf16> to vector<1x272x128xbf16>
    tpu.vector_store %arg5[%c0_85, %c0_86, %c0_87], %79 {strides = array<i32>} : memref<1x272x128xbf16, #tpu.memory_space<vmem>>, vector<1x272x128xbf16>,
    return
  }
  func.func @transform_0(%arg0: i32, %arg1: i32) -> (i32, i32, i32) {
    %c0_i32 = arith.constant 0 : i32
    %c0_i32_0 = arith.constant 0 : i32
    %c0_i32_1 = arith.constant 0 : i32
    return %arg0, %c0_i32, %c0_i32_0 : i32, i32, i32
  }
  func.func @transform_1(%arg0: i32, %arg1: i32) -> (i32, i32, i32) {
    %c0_i32 = arith.constant 0 : i32
    %c0_i32_0 = arith.constant 0 : i32
    %c0_i32_1 = arith.constant 0 : i32
    %c0_i32_2 = arith.constant 0 : i32
    return %c0_i32, %c0_i32_0, %c0_i32_1 : i32, i32, i32
  }
  func.func @transform_2(%arg0: i32, %arg1: i32) -> (i32, i32) {
    %c0_i32 = arith.constant 0 : i32
    %c0_i32_0 = arith.constant 0 : i32
    %c0_i32_1 = arith.constant 0 : i32
    return %c0_i32, %c0_i32_0 : i32, i32
  }
  func.func @transform_3(%arg0: i32, %arg1: i32) -> (i32, i32, i32) {
    %c0_i32 = arith.constant 0 : i32
    %c0_i32_0 = arith.constant 0 : i32
    return %arg0, %arg1, %c0_i32 : i32, i32, i32
  }
}

module attributes {stable_mosaic.version = 11 : i64} {
  func.func @fused_conv_kernel(%arg0: i32, %arg1: i32, %arg2: memref<1x324x128xbf16, #tpu.memory_space<vmem>>, %arg3: memref<9x128x128xbf16, #tpu.memory_space<vmem>>, %arg4: memref<1x128xf32, #tpu.memory_space<vmem>>, %arg5: memref<1x72x128xbf16, #tpu.memory_space<vmem>>, %arg6: memref<72x128xf32, #tpu.memory_space<vmem>>) attributes {dimension_semantics = [#tpu.dimension_semantics<parallel>, #tpu.dimension_semantics<parallel>], iteration_bounds = array<i64: 2, 1>, scalar_prefetch = 0 : i64, scratch_operands = 1 : i64, tpu.core_type = #tpu.core_type<tc>, window_params = [{transform_indices = @transform_0, window_bounds = array<i64: 1, 324, 128>}, {pipeline_mode = #tpu.pipeline_mode<synchronous>, transform_indices = @transform_1, window_bounds = array<i64: 9, 128, 128>}, {pipeline_mode = #tpu.pipeline_mode<synchronous>, transform_indices = @transform_2, window_bounds = array<i64: 1, 128>}, {transform_indices = @transform_3, window_bounds = array<i64: 1, 72, 128>}]} {
    %c0 = arith.constant 0 : index
    %c0_0 = arith.constant 0 : index
    %c0_1 = arith.constant 0 : index
    %0 = vector.load %arg2[%c0, %c0_0, %c0_1] : memref<1x324x128xbf16, #tpu.memory_space<vmem>>, vector<1x72x128xbf16>
    %1 = vector.shape_cast %0 : vector<1x72x128xbf16> to vector<72x128xbf16>
    %c0_2 = arith.constant 0 : index
    %c0_3 = arith.constant 0 : index
    %c0_4 = arith.constant 0 : index
    %2 = vector.load %arg3[%c0_2, %c0_3, %c0_4] : memref<9x128x128xbf16, #tpu.memory_space<vmem>>, vector<1x128x128xbf16>
    %3 = vector.shape_cast %2 : vector<1x128x128xbf16> to vector<128x128xbf16>
    %cst = arith.constant dense<0.000000e+00> : vector<72x128xf32>
    %4 = tpu.matmul %1, %3, %cst {dimension_numbers = #tpu.dot_dimension_numbers<[1], [0], [0], [1], [0, 0, 1, 1], [], []>} : vector<72x128xbf16>, vector<128x128xbf16>, vector<72x128xf32> -> vector<72x128xf32>
    %c0_5 = arith.constant 0 : index
    %c0_6 = arith.constant 0 : index
    %5 = vector.load %arg6[%c0_5, %c0_6] : memref<72x128xf32, #tpu.memory_space<vmem>>, vector<72x128xf32>
    tpu.vector_store %arg6[%c0_5, %c0_6], %4 {strides = array<i32>} : memref<72x128xf32, #tpu.memory_space<vmem>>, vector<72x128xf32>,
    %c0_7 = arith.constant 0 : index
    %c81 = arith.constant 81 : index
    %c0_8 = arith.constant 0 : index
    %6 = vector.load %arg2[%c0_7, %c81, %c0_8] : memref<1x324x128xbf16, #tpu.memory_space<vmem>>, vector<1x72x128xbf16>
    %7 = vector.shape_cast %6 : vector<1x72x128xbf16> to vector<72x128xbf16>
    %c1 = arith.constant 1 : index
    %c0_9 = arith.constant 0 : index
    %c0_10 = arith.constant 0 : index
    %8 = vector.load %arg3[%c1, %c0_9, %c0_10] : memref<9x128x128xbf16, #tpu.memory_space<vmem>>, vector<1x128x128xbf16>
    %9 = vector.shape_cast %8 : vector<1x128x128xbf16> to vector<128x128xbf16>
    %cst_11 = arith.constant dense<0.000000e+00> : vector<72x128xf32>
    %10 = tpu.matmul %7, %9, %cst_11 {dimension_numbers = #tpu.dot_dimension_numbers<[1], [0], [0], [1], [0, 0, 1, 1], [], []>} : vector<72x128xbf16>, vector<128x128xbf16>, vector<72x128xf32> -> vector<72x128xf32>
    %c0_12 = arith.constant 0 : index
    %c0_13 = arith.constant 0 : index
    %11 = vector.load %arg6[%c0_12, %c0_13] : memref<72x128xf32, #tpu.memory_space<vmem>>, vector<72x128xf32>
    %12 = arith.addf %11, %10 : vector<72x128xf32>
    %c0_14 = arith.constant 0 : index
    %c0_15 = arith.constant 0 : index
    %13 = vector.load %arg6[%c0_14, %c0_15] : memref<72x128xf32, #tpu.memory_space<vmem>>, vector<72x128xf32>
    tpu.vector_store %arg6[%c0_14, %c0_15], %12 {strides = array<i32>} : memref<72x128xf32, #tpu.memory_space<vmem>>, vector<72x128xf32>,
    %c0_16 = arith.constant 0 : index
    %c1_17 = arith.constant 1 : index
    %c0_18 = arith.constant 0 : index
    %14 = vector.load %arg2[%c0_16, %c1_17, %c0_18] : memref<1x324x128xbf16, #tpu.memory_space<vmem>>, vector<1x72x128xbf16>
    %15 = vector.shape_cast %14 : vector<1x72x128xbf16> to vector<72x128xbf16>
    %c2 = arith.constant 2 : index
    %c0_19 = arith.constant 0 : index
    %c0_20 = arith.constant 0 : index
    %16 = vector.load %arg3[%c2, %c0_19, %c0_20] : memref<9x128x128xbf16, #tpu.memory_space<vmem>>, vector<1x128x128xbf16>
    %17 = vector.shape_cast %16 : vector<1x128x128xbf16> to vector<128x128xbf16>
    %cst_21 = arith.constant dense<0.000000e+00> : vector<72x128xf32>
    %18 = tpu.matmul %15, %17, %cst_21 {dimension_numbers = #tpu.dot_dimension_numbers<[1], [0], [0], [1], [0, 0, 1, 1], [], []>} : vector<72x128xbf16>, vector<128x128xbf16>, vector<72x128xf32> -> vector<72x128xf32>
    %c0_22 = arith.constant 0 : index
    %c0_23 = arith.constant 0 : index
    %19 = vector.load %arg6[%c0_22, %c0_23] : memref<72x128xf32, #tpu.memory_space<vmem>>, vector<72x128xf32>
    %20 = arith.addf %19, %18 : vector<72x128xf32>
    %c0_24 = arith.constant 0 : index
    %c0_25 = arith.constant 0 : index
    %21 = vector.load %arg6[%c0_24, %c0_25] : memref<72x128xf32, #tpu.memory_space<vmem>>, vector<72x128xf32>
    tpu.vector_store %arg6[%c0_24, %c0_25], %20 {strides = array<i32>} : memref<72x128xf32, #tpu.memory_space<vmem>>, vector<72x128xf32>,
    %c0_26 = arith.constant 0 : index
    %c162 = arith.constant 162 : index
    %c0_27 = arith.constant 0 : index
    %22 = vector.load %arg2[%c0_26, %c162, %c0_27] : memref<1x324x128xbf16, #tpu.memory_space<vmem>>, vector<1x72x128xbf16>
    %23 = vector.shape_cast %22 : vector<1x72x128xbf16> to vector<72x128xbf16>
    %c3 = arith.constant 3 : index
    %c0_28 = arith.constant 0 : index
    %c0_29 = arith.constant 0 : index
    %24 = vector.load %arg3[%c3, %c0_28, %c0_29] : memref<9x128x128xbf16, #tpu.memory_space<vmem>>, vector<1x128x128xbf16>
    %25 = vector.shape_cast %24 : vector<1x128x128xbf16> to vector<128x128xbf16>
    %cst_30 = arith.constant dense<0.000000e+00> : vector<72x128xf32>
    %26 = tpu.matmul %23, %25, %cst_30 {dimension_numbers = #tpu.dot_dimension_numbers<[1], [0], [0], [1], [0, 0, 1, 1], [], []>} : vector<72x128xbf16>, vector<128x128xbf16>, vector<72x128xf32> -> vector<72x128xf32>
    %c0_31 = arith.constant 0 : index
    %c0_32 = arith.constant 0 : index
    %27 = vector.load %arg6[%c0_31, %c0_32] : memref<72x128xf32, #tpu.memory_space<vmem>>, vector<72x128xf32>
    %28 = arith.addf %27, %26 : vector<72x128xf32>
    %c0_33 = arith.constant 0 : index
    %c0_34 = arith.constant 0 : index
    %29 = vector.load %arg6[%c0_33, %c0_34] : memref<72x128xf32, #tpu.memory_space<vmem>>, vector<72x128xf32>
    tpu.vector_store %arg6[%c0_33, %c0_34], %28 {strides = array<i32>} : memref<72x128xf32, #tpu.memory_space<vmem>>, vector<72x128xf32>,
    %c0_35 = arith.constant 0 : index
    %c243 = arith.constant 243 : index
    %c0_36 = arith.constant 0 : index
    %30 = vector.load %arg2[%c0_35, %c243, %c0_36] : memref<1x324x128xbf16, #tpu.memory_space<vmem>>, vector<1x72x128xbf16>
    %31 = vector.shape_cast %30 : vector<1x72x128xbf16> to vector<72x128xbf16>
    %c4 = arith.constant 4 : index
    %c0_37 = arith.constant 0 : index
    %c0_38 = arith.constant 0 : index
    %32 = vector.load %arg3[%c4, %c0_37, %c0_38] : memref<9x128x128xbf16, #tpu.memory_space<vmem>>, vector<1x128x128xbf16>
    %33 = vector.shape_cast %32 : vector<1x128x128xbf16> to vector<128x128xbf16>
    %cst_39 = arith.constant dense<0.000000e+00> : vector<72x128xf32>
    %34 = tpu.matmul %31, %33, %cst_39 {dimension_numbers = #tpu.dot_dimension_numbers<[1], [0], [0], [1], [0, 0, 1, 1], [], []>} : vector<72x128xbf16>, vector<128x128xbf16>, vector<72x128xf32> -> vector<72x128xf32>
    %c0_40 = arith.constant 0 : index
    %c0_41 = arith.constant 0 : index
    %35 = vector.load %arg6[%c0_40, %c0_41] : memref<72x128xf32, #tpu.memory_space<vmem>>, vector<72x128xf32>
    %36 = arith.addf %35, %34 : vector<72x128xf32>
    %c0_42 = arith.constant 0 : index
    %c0_43 = arith.constant 0 : index
    %37 = vector.load %arg6[%c0_42, %c0_43] : memref<72x128xf32, #tpu.memory_space<vmem>>, vector<72x128xf32>
    tpu.vector_store %arg6[%c0_42, %c0_43], %36 {strides = array<i32>} : memref<72x128xf32, #tpu.memory_space<vmem>>, vector<72x128xf32>,
    %c0_44 = arith.constant 0 : index
    %c163 = arith.constant 163 : index
    %c0_45 = arith.constant 0 : index
    %38 = vector.load %arg2[%c0_44, %c163, %c0_45] : memref<1x324x128xbf16, #tpu.memory_space<vmem>>, vector<1x72x128xbf16>
    %39 = vector.shape_cast %38 : vector<1x72x128xbf16> to vector<72x128xbf16>
    %c5 = arith.constant 5 : index
    %c0_46 = arith.constant 0 : index
    %c0_47 = arith.constant 0 : index
    %40 = vector.load %arg3[%c5, %c0_46, %c0_47] : memref<9x128x128xbf16, #tpu.memory_space<vmem>>, vector<1x128x128xbf16>
    %41 = vector.shape_cast %40 : vector<1x128x128xbf16> to vector<128x128xbf16>
    %cst_48 = arith.constant dense<0.000000e+00> : vector<72x128xf32>
    %42 = tpu.matmul %39, %41, %cst_48 {dimension_numbers = #tpu.dot_dimension_numbers<[1], [0], [0], [1], [0, 0, 1, 1], [], []>} : vector<72x128xbf16>, vector<128x128xbf16>, vector<72x128xf32> -> vector<72x128xf32>
    %c0_49 = arith.constant 0 : index
    %c0_50 = arith.constant 0 : index
    %43 = vector.load %arg6[%c0_49, %c0_50] : memref<72x128xf32, #tpu.memory_space<vmem>>, vector<72x128xf32>
    %44 = arith.addf %43, %42 : vector<72x128xf32>
    %c0_51 = arith.constant 0 : index
    %c0_52 = arith.constant 0 : index
    %45 = vector.load %arg6[%c0_51, %c0_52] : memref<72x128xf32, #tpu.memory_space<vmem>>, vector<72x128xf32>
    tpu.vector_store %arg6[%c0_51, %c0_52], %44 {strides = array<i32>} : memref<72x128xf32, #tpu.memory_space<vmem>>, vector<72x128xf32>,
    %c0_53 = arith.constant 0 : index
    %c9 = arith.constant 9 : index
    %c0_54 = arith.constant 0 : index
    %46 = vector.load %arg2[%c0_53, %c9, %c0_54] : memref<1x324x128xbf16, #tpu.memory_space<vmem>>, vector<1x72x128xbf16>
    %47 = vector.shape_cast %46 : vector<1x72x128xbf16> to vector<72x128xbf16>
    %c6 = arith.constant 6 : index
    %c0_55 = arith.constant 0 : index
    %c0_56 = arith.constant 0 : index
    %48 = vector.load %arg3[%c6, %c0_55, %c0_56] : memref<9x128x128xbf16, #tpu.memory_space<vmem>>, vector<1x128x128xbf16>
    %49 = vector.shape_cast %48 : vector<1x128x128xbf16> to vector<128x128xbf16>
    %cst_57 = arith.constant dense<0.000000e+00> : vector<72x128xf32>
    %50 = tpu.matmul %47, %49, %cst_57 {dimension_numbers = #tpu.dot_dimension_numbers<[1], [0], [0], [1], [0, 0, 1, 1], [], []>} : vector<72x128xbf16>, vector<128x128xbf16>, vector<72x128xf32> -> vector<72x128xf32>
    %c0_58 = arith.constant 0 : index
    %c0_59 = arith.constant 0 : index
    %51 = vector.load %arg6[%c0_58, %c0_59] : memref<72x128xf32, #tpu.memory_space<vmem>>, vector<72x128xf32>
    %52 = arith.addf %51, %50 : vector<72x128xf32>
    %c0_60 = arith.constant 0 : index
    %c0_61 = arith.constant 0 : index
    %53 = vector.load %arg6[%c0_60, %c0_61] : memref<72x128xf32, #tpu.memory_space<vmem>>, vector<72x128xf32>
    tpu.vector_store %arg6[%c0_60, %c0_61], %52 {strides = array<i32>} : memref<72x128xf32, #tpu.memory_space<vmem>>, vector<72x128xf32>,
    %c0_62 = arith.constant 0 : index
    %c90 = arith.constant 90 : index
    %c0_63 = arith.constant 0 : index
    %54 = vector.load %arg2[%c0_62, %c90, %c0_63] : memref<1x324x128xbf16, #tpu.memory_space<vmem>>, vector<1x72x128xbf16>
    %55 = vector.shape_cast %54 : vector<1x72x128xbf16> to vector<72x128xbf16>
    %c7 = arith.constant 7 : index
    %c0_64 = arith.constant 0 : index
    %c0_65 = arith.constant 0 : index
    %56 = vector.load %arg3[%c7, %c0_64, %c0_65] : memref<9x128x128xbf16, #tpu.memory_space<vmem>>, vector<1x128x128xbf16>
    %57 = vector.shape_cast %56 : vector<1x128x128xbf16> to vector<128x128xbf16>
    %cst_66 = arith.constant dense<0.000000e+00> : vector<72x128xf32>
    %58 = tpu.matmul %55, %57, %cst_66 {dimension_numbers = #tpu.dot_dimension_numbers<[1], [0], [0], [1], [0, 0, 1, 1], [], []>} : vector<72x128xbf16>, vector<128x128xbf16>, vector<72x128xf32> -> vector<72x128xf32>
    %c0_67 = arith.constant 0 : index
    %c0_68 = arith.constant 0 : index
    %59 = vector.load %arg6[%c0_67, %c0_68] : memref<72x128xf32, #tpu.memory_space<vmem>>, vector<72x128xf32>
    %60 = arith.addf %59, %58 : vector<72x128xf32>
    %c0_69 = arith.constant 0 : index
    %c0_70 = arith.constant 0 : index
    %61 = vector.load %arg6[%c0_69, %c0_70] : memref<72x128xf32, #tpu.memory_space<vmem>>, vector<72x128xf32>
    tpu.vector_store %arg6[%c0_69, %c0_70], %60 {strides = array<i32>} : memref<72x128xf32, #tpu.memory_space<vmem>>, vector<72x128xf32>,
    %c0_71 = arith.constant 0 : index
    %c10 = arith.constant 10 : index
    %c0_72 = arith.constant 0 : index
    %62 = vector.load %arg2[%c0_71, %c10, %c0_72] : memref<1x324x128xbf16, #tpu.memory_space<vmem>>, vector<1x72x128xbf16>
    %63 = vector.shape_cast %62 : vector<1x72x128xbf16> to vector<72x128xbf16>
    %c8 = arith.constant 8 : index
    %c0_73 = arith.constant 0 : index
    %c0_74 = arith.constant 0 : index
    %64 = vector.load %arg3[%c8, %c0_73, %c0_74] : memref<9x128x128xbf16, #tpu.memory_space<vmem>>, vector<1x128x128xbf16>
    %65 = vector.shape_cast %64 : vector<1x128x128xbf16> to vector<128x128xbf16>
    %cst_75 = arith.constant dense<0.000000e+00> : vector<72x128xf32>
    %66 = tpu.matmul %63, %65, %cst_75 {dimension_numbers = #tpu.dot_dimension_numbers<[1], [0], [0], [1], [0, 0, 1, 1], [], []>} : vector<72x128xbf16>, vector<128x128xbf16>, vector<72x128xf32> -> vector<72x128xf32>
    %c0_76 = arith.constant 0 : index
    %c0_77 = arith.constant 0 : index
    %67 = vector.load %arg6[%c0_76, %c0_77] : memref<72x128xf32, #tpu.memory_space<vmem>>, vector<72x128xf32>
    %68 = arith.addf %67, %66 : vector<72x128xf32>
    %c0_78 = arith.constant 0 : index
    %c0_79 = arith.constant 0 : index
    %69 = vector.load %arg6[%c0_78, %c0_79] : memref<72x128xf32, #tpu.memory_space<vmem>>, vector<72x128xf32>
    tpu.vector_store %arg6[%c0_78, %c0_79], %68 {strides = array<i32>} : memref<72x128xf32, #tpu.memory_space<vmem>>, vector<72x128xf32>,
    %c0_80 = arith.constant 0 : index
    %c0_81 = arith.constant 0 : index
    %70 = vector.load %arg6[%c0_80, %c0_81] : memref<72x128xf32, #tpu.memory_space<vmem>>, vector<72x128xf32>
    %c0_82 = arith.constant 0 : index
    %c0_83 = arith.constant 0 : index
    %71 = vector.load %arg4[%c0_82, %c0_83] : memref<1x128xf32, #tpu.memory_space<vmem>>, vector<1x128xf32>
    %72 = vector.broadcast %71 : vector<1x128xf32> to vector<72x128xf32>
    %73 = arith.addf %70, %72 : vector<72x128xf32>
    %cst_84 = arith.constant 0.000000e+00 : f32
    %74 = vector.broadcast %cst_84 : f32 to vector<72x128xf32>
    %75 = arith.maximumf %73, %74 : vector<72x128xf32>
    %76 = arith.truncf %75 : vector<72x128xf32> to vector<72x128xbf16>
    %c0_85 = arith.constant 0 : index
    %c0_86 = arith.constant 0 : index
    %c0_87 = arith.constant 0 : index
    %77 = vector.load %arg5[%c0_85, %c0_86, %c0_87] : memref<1x72x128xbf16, #tpu.memory_space<vmem>>, vector<1x72x128xbf16>
    %78 = vector.shape_cast %77 : vector<1x72x128xbf16> to vector<72x128xbf16>
    %79 = vector.shape_cast %76 : vector<72x128xbf16> to vector<1x72x128xbf16>
    tpu.vector_store %arg5[%c0_85, %c0_86, %c0_87], %79 {strides = array<i32>} : memref<1x72x128xbf16, #tpu.memory_space<vmem>>, vector<1x72x128xbf16>,
    return
  }
  func.func @transform_0(%arg0: i32, %arg1: i32) -> (i32, i32, i32) {
    %c0_i32 = arith.constant 0 : i32
    %c0_i32_0 = arith.constant 0 : i32
    %c0_i32_1 = arith.constant 0 : i32
    return %arg0, %c0_i32, %c0_i32_0 : i32, i32, i32
  }
  func.func @transform_1(%arg0: i32, %arg1: i32) -> (i32, i32, i32) {
    %c0_i32 = arith.constant 0 : i32
    %c0_i32_0 = arith.constant 0 : i32
    %c0_i32_1 = arith.constant 0 : i32
    %c0_i32_2 = arith.constant 0 : i32
    return %c0_i32, %c0_i32_0, %c0_i32_1 : i32, i32, i32
  }
  func.func @transform_2(%arg0: i32, %arg1: i32) -> (i32, i32) {
    %c0_i32 = arith.constant 0 : i32
    %c0_i32_0 = arith.constant 0 : i32
    %c0_i32_1 = arith.constant 0 : i32
    return %c0_i32, %c0_i32_0 : i32, i32
  }
  func.func @transform_3(%arg0: i32, %arg1: i32) -> (i32, i32, i32) {
    %c0_i32 = arith.constant 0 : i32
    %c0_i32_0 = arith.constant 0 : i32
    return %arg0, %arg1, %c0_i32 : i32, i32, i32
  }
}

module attributes {stable_mosaic.version = 11 : i64} {
  func.func @fused_conv_kernel(%arg0: i32, %arg1: i32, %arg2: memref<1x102x128xbf16, #tpu.memory_space<vmem>>, %arg3: memref<9x128x128xbf16, #tpu.memory_space<vmem>>, %arg4: memref<1x128xf32, #tpu.memory_space<vmem>>, %arg5: memref<1x80x128xbf16, #tpu.memory_space<vmem>>, %arg6: memref<80x128xf32, #tpu.memory_space<vmem>>) attributes {dimension_semantics = [#tpu.dimension_semantics<parallel>, #tpu.dimension_semantics<parallel>], iteration_bounds = array<i64: 2, 1>, scalar_prefetch = 0 : i64, scratch_operands = 1 : i64, tpu.core_type = #tpu.core_type<tc>, window_params = [{transform_indices = @transform_0, window_bounds = array<i64: 1, 102, 128>}, {pipeline_mode = #tpu.pipeline_mode<synchronous>, transform_indices = @transform_1, window_bounds = array<i64: 9, 128, 128>}, {pipeline_mode = #tpu.pipeline_mode<synchronous>, transform_indices = @transform_2, window_bounds = array<i64: 1, 128>}, {transform_indices = @transform_3, window_bounds = array<i64: 1, 80, 128>}]} {
    %c0 = arith.constant 0 : index
    %c0_0 = arith.constant 0 : index
    %c0_1 = arith.constant 0 : index
    %0 = vector.load %arg2[%c0, %c0_0, %c0_1] : memref<1x102x128xbf16, #tpu.memory_space<vmem>>, vector<1x80x128xbf16>
    %1 = vector.shape_cast %0 : vector<1x80x128xbf16> to vector<80x128xbf16>
    %c0_2 = arith.constant 0 : index
    %c0_3 = arith.constant 0 : index
    %c0_4 = arith.constant 0 : index
    %2 = vector.load %arg3[%c0_2, %c0_3, %c0_4] : memref<9x128x128xbf16, #tpu.memory_space<vmem>>, vector<1x128x128xbf16>
    %3 = vector.shape_cast %2 : vector<1x128x128xbf16> to vector<128x128xbf16>
    %cst = arith.constant dense<0.000000e+00> : vector<80x128xf32>
    %4 = tpu.matmul %1, %3, %cst {dimension_numbers = #tpu.dot_dimension_numbers<[1], [0], [0], [1], [0, 0, 1, 1], [], []>} : vector<80x128xbf16>, vector<128x128xbf16>, vector<80x128xf32> -> vector<80x128xf32>
    %c0_5 = arith.constant 0 : index
    %c0_6 = arith.constant 0 : index
    %5 = vector.load %arg6[%c0_5, %c0_6] : memref<80x128xf32, #tpu.memory_space<vmem>>, vector<80x128xf32>
    tpu.vector_store %arg6[%c0_5, %c0_6], %4 {strides = array<i32>} : memref<80x128xf32, #tpu.memory_space<vmem>>, vector<80x128xf32>,
    %c0_7 = arith.constant 0 : index
    %c1 = arith.constant 1 : index
    %c0_8 = arith.constant 0 : index
    %6 = vector.load %arg2[%c0_7, %c1, %c0_8] : memref<1x102x128xbf16, #tpu.memory_space<vmem>>, vector<1x80x128xbf16>
    %7 = vector.shape_cast %6 : vector<1x80x128xbf16> to vector<80x128xbf16>
    %c1_9 = arith.constant 1 : index
    %c0_10 = arith.constant 0 : index
    %c0_11 = arith.constant 0 : index
    %8 = vector.load %arg3[%c1_9, %c0_10, %c0_11] : memref<9x128x128xbf16, #tpu.memory_space<vmem>>, vector<1x128x128xbf16>
    %9 = vector.shape_cast %8 : vector<1x128x128xbf16> to vector<128x128xbf16>
    %cst_12 = arith.constant dense<0.000000e+00> : vector<80x128xf32>
    %10 = tpu.matmul %7, %9, %cst_12 {dimension_numbers = #tpu.dot_dimension_numbers<[1], [0], [0], [1], [0, 0, 1, 1], [], []>} : vector<80x128xbf16>, vector<128x128xbf16>, vector<80x128xf32> -> vector<80x128xf32>
    %c0_13 = arith.constant 0 : index
    %c0_14 = arith.constant 0 : index
    %11 = vector.load %arg6[%c0_13, %c0_14] : memref<80x128xf32, #tpu.memory_space<vmem>>, vector<80x128xf32>
    %12 = arith.addf %11, %10 : vector<80x128xf32>
    %c0_15 = arith.constant 0 : index
    %c0_16 = arith.constant 0 : index
    %13 = vector.load %arg6[%c0_15, %c0_16] : memref<80x128xf32, #tpu.memory_space<vmem>>, vector<80x128xf32>
    tpu.vector_store %arg6[%c0_15, %c0_16], %12 {strides = array<i32>} : memref<80x128xf32, #tpu.memory_space<vmem>>, vector<80x128xf32>,
    %c0_17 = arith.constant 0 : index
    %c2 = arith.constant 2 : index
    %c0_18 = arith.constant 0 : index
    %14 = vector.load %arg2[%c0_17, %c2, %c0_18] : memref<1x102x128xbf16, #tpu.memory_space<vmem>>, vector<1x80x128xbf16>
    %15 = vector.shape_cast %14 : vector<1x80x128xbf16> to vector<80x128xbf16>
    %c2_19 = arith.constant 2 : index
    %c0_20 = arith.constant 0 : index
    %c0_21 = arith.constant 0 : index
    %16 = vector.load %arg3[%c2_19, %c0_20, %c0_21] : memref<9x128x128xbf16, #tpu.memory_space<vmem>>, vector<1x128x128xbf16>
    %17 = vector.shape_cast %16 : vector<1x128x128xbf16> to vector<128x128xbf16>
    %cst_22 = arith.constant dense<0.000000e+00> : vector<80x128xf32>
    %18 = tpu.matmul %15, %17, %cst_22 {dimension_numbers = #tpu.dot_dimension_numbers<[1], [0], [0], [1], [0, 0, 1, 1], [], []>} : vector<80x128xbf16>, vector<128x128xbf16>, vector<80x128xf32> -> vector<80x128xf32>
    %c0_23 = arith.constant 0 : index
    %c0_24 = arith.constant 0 : index
    %19 = vector.load %arg6[%c0_23, %c0_24] : memref<80x128xf32, #tpu.memory_space<vmem>>, vector<80x128xf32>
    %20 = arith.addf %19, %18 : vector<80x128xf32>
    %c0_25 = arith.constant 0 : index
    %c0_26 = arith.constant 0 : index
    %21 = vector.load %arg6[%c0_25, %c0_26] : memref<80x128xf32, #tpu.memory_space<vmem>>, vector<80x128xf32>
    tpu.vector_store %arg6[%c0_25, %c0_26], %20 {strides = array<i32>} : memref<80x128xf32, #tpu.memory_space<vmem>>, vector<80x128xf32>,
    %c0_27 = arith.constant 0 : index
    %c10 = arith.constant 10 : index
    %c0_28 = arith.constant 0 : index
    %22 = vector.load %arg2[%c0_27, %c10, %c0_28] : memref<1x102x128xbf16, #tpu.memory_space<vmem>>, vector<1x80x128xbf16>
    %23 = vector.shape_cast %22 : vector<1x80x128xbf16> to vector<80x128xbf16>
    %c3 = arith.constant 3 : index
    %c0_29 = arith.constant 0 : index
    %c0_30 = arith.constant 0 : index
    %24 = vector.load %arg3[%c3, %c0_29, %c0_30] : memref<9x128x128xbf16, #tpu.memory_space<vmem>>, vector<1x128x128xbf16>
    %25 = vector.shape_cast %24 : vector<1x128x128xbf16> to vector<128x128xbf16>
    %cst_31 = arith.constant dense<0.000000e+00> : vector<80x128xf32>
    %26 = tpu.matmul %23, %25, %cst_31 {dimension_numbers = #tpu.dot_dimension_numbers<[1], [0], [0], [1], [0, 0, 1, 1], [], []>} : vector<80x128xbf16>, vector<128x128xbf16>, vector<80x128xf32> -> vector<80x128xf32>
    %c0_32 = arith.constant 0 : index
    %c0_33 = arith.constant 0 : index
    %27 = vector.load %arg6[%c0_32, %c0_33] : memref<80x128xf32, #tpu.memory_space<vmem>>, vector<80x128xf32>
    %28 = arith.addf %27, %26 : vector<80x128xf32>
    %c0_34 = arith.constant 0 : index
    %c0_35 = arith.constant 0 : index
    %29 = vector.load %arg6[%c0_34, %c0_35] : memref<80x128xf32, #tpu.memory_space<vmem>>, vector<80x128xf32>
    tpu.vector_store %arg6[%c0_34, %c0_35], %28 {strides = array<i32>} : memref<80x128xf32, #tpu.memory_space<vmem>>, vector<80x128xf32>,
    %c0_36 = arith.constant 0 : index
    %c11 = arith.constant 11 : index
    %c0_37 = arith.constant 0 : index
    %30 = vector.load %arg2[%c0_36, %c11, %c0_37] : memref<1x102x128xbf16, #tpu.memory_space<vmem>>, vector<1x80x128xbf16>
    %31 = vector.shape_cast %30 : vector<1x80x128xbf16> to vector<80x128xbf16>
    %c4 = arith.constant 4 : index
    %c0_38 = arith.constant 0 : index
    %c0_39 = arith.constant 0 : index
    %32 = vector.load %arg3[%c4, %c0_38, %c0_39] : memref<9x128x128xbf16, #tpu.memory_space<vmem>>, vector<1x128x128xbf16>
    %33 = vector.shape_cast %32 : vector<1x128x128xbf16> to vector<128x128xbf16>
    %cst_40 = arith.constant dense<0.000000e+00> : vector<80x128xf32>
    %34 = tpu.matmul %31, %33, %cst_40 {dimension_numbers = #tpu.dot_dimension_numbers<[1], [0], [0], [1], [0, 0, 1, 1], [], []>} : vector<80x128xbf16>, vector<128x128xbf16>, vector<80x128xf32> -> vector<80x128xf32>
    %c0_41 = arith.constant 0 : index
    %c0_42 = arith.constant 0 : index
    %35 = vector.load %arg6[%c0_41, %c0_42] : memref<80x128xf32, #tpu.memory_space<vmem>>, vector<80x128xf32>
    %36 = arith.addf %35, %34 : vector<80x128xf32>
    %c0_43 = arith.constant 0 : index
    %c0_44 = arith.constant 0 : index
    %37 = vector.load %arg6[%c0_43, %c0_44] : memref<80x128xf32, #tpu.memory_space<vmem>>, vector<80x128xf32>
    tpu.vector_store %arg6[%c0_43, %c0_44], %36 {strides = array<i32>} : memref<80x128xf32, #tpu.memory_space<vmem>>, vector<80x128xf32>,
    %c0_45 = arith.constant 0 : index
    %c12 = arith.constant 12 : index
    %c0_46 = arith.constant 0 : index
    %38 = vector.load %arg2[%c0_45, %c12, %c0_46] : memref<1x102x128xbf16, #tpu.memory_space<vmem>>, vector<1x80x128xbf16>
    %39 = vector.shape_cast %38 : vector<1x80x128xbf16> to vector<80x128xbf16>
    %c5 = arith.constant 5 : index
    %c0_47 = arith.constant 0 : index
    %c0_48 = arith.constant 0 : index
    %40 = vector.load %arg3[%c5, %c0_47, %c0_48] : memref<9x128x128xbf16, #tpu.memory_space<vmem>>, vector<1x128x128xbf16>
    %41 = vector.shape_cast %40 : vector<1x128x128xbf16> to vector<128x128xbf16>
    %cst_49 = arith.constant dense<0.000000e+00> : vector<80x128xf32>
    %42 = tpu.matmul %39, %41, %cst_49 {dimension_numbers = #tpu.dot_dimension_numbers<[1], [0], [0], [1], [0, 0, 1, 1], [], []>} : vector<80x128xbf16>, vector<128x128xbf16>, vector<80x128xf32> -> vector<80x128xf32>
    %c0_50 = arith.constant 0 : index
    %c0_51 = arith.constant 0 : index
    %43 = vector.load %arg6[%c0_50, %c0_51] : memref<80x128xf32, #tpu.memory_space<vmem>>, vector<80x128xf32>
    %44 = arith.addf %43, %42 : vector<80x128xf32>
    %c0_52 = arith.constant 0 : index
    %c0_53 = arith.constant 0 : index
    %45 = vector.load %arg6[%c0_52, %c0_53] : memref<80x128xf32, #tpu.memory_space<vmem>>, vector<80x128xf32>
    tpu.vector_store %arg6[%c0_52, %c0_53], %44 {strides = array<i32>} : memref<80x128xf32, #tpu.memory_space<vmem>>, vector<80x128xf32>,
    %c0_54 = arith.constant 0 : index
    %c20 = arith.constant 20 : index
    %c0_55 = arith.constant 0 : index
    %46 = vector.load %arg2[%c0_54, %c20, %c0_55] : memref<1x102x128xbf16, #tpu.memory_space<vmem>>, vector<1x80x128xbf16>
    %47 = vector.shape_cast %46 : vector<1x80x128xbf16> to vector<80x128xbf16>
    %c6 = arith.constant 6 : index
    %c0_56 = arith.constant 0 : index
    %c0_57 = arith.constant 0 : index
    %48 = vector.load %arg3[%c6, %c0_56, %c0_57] : memref<9x128x128xbf16, #tpu.memory_space<vmem>>, vector<1x128x128xbf16>
    %49 = vector.shape_cast %48 : vector<1x128x128xbf16> to vector<128x128xbf16>
    %cst_58 = arith.constant dense<0.000000e+00> : vector<80x128xf32>
    %50 = tpu.matmul %47, %49, %cst_58 {dimension_numbers = #tpu.dot_dimension_numbers<[1], [0], [0], [1], [0, 0, 1, 1], [], []>} : vector<80x128xbf16>, vector<128x128xbf16>, vector<80x128xf32> -> vector<80x128xf32>
    %c0_59 = arith.constant 0 : index
    %c0_60 = arith.constant 0 : index
    %51 = vector.load %arg6[%c0_59, %c0_60] : memref<80x128xf32, #tpu.memory_space<vmem>>, vector<80x128xf32>
    %52 = arith.addf %51, %50 : vector<80x128xf32>
    %c0_61 = arith.constant 0 : index
    %c0_62 = arith.constant 0 : index
    %53 = vector.load %arg6[%c0_61, %c0_62] : memref<80x128xf32, #tpu.memory_space<vmem>>, vector<80x128xf32>
    tpu.vector_store %arg6[%c0_61, %c0_62], %52 {strides = array<i32>} : memref<80x128xf32, #tpu.memory_space<vmem>>, vector<80x128xf32>,
    %c0_63 = arith.constant 0 : index
    %c21 = arith.constant 21 : index
    %c0_64 = arith.constant 0 : index
    %54 = vector.load %arg2[%c0_63, %c21, %c0_64] : memref<1x102x128xbf16, #tpu.memory_space<vmem>>, vector<1x80x128xbf16>
    %55 = vector.shape_cast %54 : vector<1x80x128xbf16> to vector<80x128xbf16>
    %c7 = arith.constant 7 : index
    %c0_65 = arith.constant 0 : index
    %c0_66 = arith.constant 0 : index
    %56 = vector.load %arg3[%c7, %c0_65, %c0_66] : memref<9x128x128xbf16, #tpu.memory_space<vmem>>, vector<1x128x128xbf16>
    %57 = vector.shape_cast %56 : vector<1x128x128xbf16> to vector<128x128xbf16>
    %cst_67 = arith.constant dense<0.000000e+00> : vector<80x128xf32>
    %58 = tpu.matmul %55, %57, %cst_67 {dimension_numbers = #tpu.dot_dimension_numbers<[1], [0], [0], [1], [0, 0, 1, 1], [], []>} : vector<80x128xbf16>, vector<128x128xbf16>, vector<80x128xf32> -> vector<80x128xf32>
    %c0_68 = arith.constant 0 : index
    %c0_69 = arith.constant 0 : index
    %59 = vector.load %arg6[%c0_68, %c0_69] : memref<80x128xf32, #tpu.memory_space<vmem>>, vector<80x128xf32>
    %60 = arith.addf %59, %58 : vector<80x128xf32>
    %c0_70 = arith.constant 0 : index
    %c0_71 = arith.constant 0 : index
    %61 = vector.load %arg6[%c0_70, %c0_71] : memref<80x128xf32, #tpu.memory_space<vmem>>, vector<80x128xf32>
    tpu.vector_store %arg6[%c0_70, %c0_71], %60 {strides = array<i32>} : memref<80x128xf32, #tpu.memory_space<vmem>>, vector<80x128xf32>,
    %c0_72 = arith.constant 0 : index
    %c22 = arith.constant 22 : index
    %c0_73 = arith.constant 0 : index
    %62 = vector.load %arg2[%c0_72, %c22, %c0_73] : memref<1x102x128xbf16, #tpu.memory_space<vmem>>, vector<1x80x128xbf16>
    %63 = vector.shape_cast %62 : vector<1x80x128xbf16> to vector<80x128xbf16>
    %c8 = arith.constant 8 : index
    %c0_74 = arith.constant 0 : index
    %c0_75 = arith.constant 0 : index
    %64 = vector.load %arg3[%c8, %c0_74, %c0_75] : memref<9x128x128xbf16, #tpu.memory_space<vmem>>, vector<1x128x128xbf16>
    %65 = vector.shape_cast %64 : vector<1x128x128xbf16> to vector<128x128xbf16>
    %cst_76 = arith.constant dense<0.000000e+00> : vector<80x128xf32>
    %66 = tpu.matmul %63, %65, %cst_76 {dimension_numbers = #tpu.dot_dimension_numbers<[1], [0], [0], [1], [0, 0, 1, 1], [], []>} : vector<80x128xbf16>, vector<128x128xbf16>, vector<80x128xf32> -> vector<80x128xf32>
    %c0_77 = arith.constant 0 : index
    %c0_78 = arith.constant 0 : index
    %67 = vector.load %arg6[%c0_77, %c0_78] : memref<80x128xf32, #tpu.memory_space<vmem>>, vector<80x128xf32>
    %68 = arith.addf %67, %66 : vector<80x128xf32>
    %c0_79 = arith.constant 0 : index
    %c0_80 = arith.constant 0 : index
    %69 = vector.load %arg6[%c0_79, %c0_80] : memref<80x128xf32, #tpu.memory_space<vmem>>, vector<80x128xf32>
    tpu.vector_store %arg6[%c0_79, %c0_80], %68 {strides = array<i32>} : memref<80x128xf32, #tpu.memory_space<vmem>>, vector<80x128xf32>,
    %c0_81 = arith.constant 0 : index
    %c0_82 = arith.constant 0 : index
    %70 = vector.load %arg6[%c0_81, %c0_82] : memref<80x128xf32, #tpu.memory_space<vmem>>, vector<80x128xf32>
    %c0_83 = arith.constant 0 : index
    %c0_84 = arith.constant 0 : index
    %71 = vector.load %arg4[%c0_83, %c0_84] : memref<1x128xf32, #tpu.memory_space<vmem>>, vector<1x128xf32>
    %72 = vector.broadcast %71 : vector<1x128xf32> to vector<80x128xf32>
    %73 = arith.addf %70, %72 : vector<80x128xf32>
    %cst_85 = arith.constant 0.000000e+00 : f32
    %74 = vector.broadcast %cst_85 : f32 to vector<80x128xf32>
    %75 = arith.maximumf %73, %74 : vector<80x128xf32>
    %76 = arith.truncf %75 : vector<80x128xf32> to vector<80x128xbf16>
    %c0_86 = arith.constant 0 : index
    %c0_87 = arith.constant 0 : index
    %c0_88 = arith.constant 0 : index
    %77 = vector.load %arg5[%c0_86, %c0_87, %c0_88] : memref<1x80x128xbf16, #tpu.memory_space<vmem>>, vector<1x80x128xbf16>
    %78 = vector.shape_cast %77 : vector<1x80x128xbf16> to vector<80x128xbf16>
    %79 = vector.shape_cast %76 : vector<80x128xbf16> to vector<1x80x128xbf16>
    tpu.vector_store %arg5[%c0_86, %c0_87, %c0_88], %79 {strides = array<i32>} : memref<1x80x128xbf16, #tpu.memory_space<vmem>>, vector<1x80x128xbf16>,
    return
  }
  func.func @transform_0(%arg0: i32, %arg1: i32) -> (i32, i32, i32) {
    %c0_i32 = arith.constant 0 : i32
    %c0_i32_0 = arith.constant 0 : i32
    %c0_i32_1 = arith.constant 0 : i32
    return %arg0, %c0_i32, %c0_i32_0 : i32, i32, i32
  }
  func.func @transform_1(%arg0: i32, %arg1: i32) -> (i32, i32, i32) {
    %c0_i32 = arith.constant 0 : i32
    %c0_i32_0 = arith.constant 0 : i32
    %c0_i32_1 = arith.constant 0 : i32
    %c0_i32_2 = arith.constant 0 : i32
    return %c0_i32, %c0_i32_0, %c0_i32_1 : i32, i32, i32
  }
  func.func @transform_2(%arg0: i32, %arg1: i32) -> (i32, i32) {
    %c0_i32 = arith.constant 0 : i32
    %c0_i32_0 = arith.constant 0 : i32
    %c0_i32_1 = arith.constant 0 : i32
    return %c0_i32, %c0_i32_0 : i32, i32
  }
  func.func @transform_3(%arg0: i32, %arg1: i32) -> (i32, i32, i32) {
    %c0_i32 = arith.constant 0 : i32
    %c0_i32_0 = arith.constant 0 : i32
    return %arg0, %arg1, %c0_i32 : i32, i32, i32
  }
}

module attributes {stable_mosaic.version = 11 : i64} {
  func.func @fused_conv_kernel(%arg0: i32, %arg1: i32, %arg2: memref<1x100x128xbf16, #tpu.memory_space<vmem>>, %arg3: memref<9x128x128xbf16, #tpu.memory_space<vmem>>, %arg4: memref<1x128xf32, #tpu.memory_space<vmem>>, %arg5: memref<1x20x128xbf16, #tpu.memory_space<vmem>>, %arg6: memref<20x128xf32, #tpu.memory_space<vmem>>) attributes {dimension_semantics = [#tpu.dimension_semantics<parallel>, #tpu.dimension_semantics<parallel>], iteration_bounds = array<i64: 2, 1>, scalar_prefetch = 0 : i64, scratch_operands = 1 : i64, tpu.core_type = #tpu.core_type<tc>, window_params = [{transform_indices = @transform_0, window_bounds = array<i64: 1, 100, 128>}, {pipeline_mode = #tpu.pipeline_mode<synchronous>, transform_indices = @transform_1, window_bounds = array<i64: 9, 128, 128>}, {pipeline_mode = #tpu.pipeline_mode<synchronous>, transform_indices = @transform_2, window_bounds = array<i64: 1, 128>}, {transform_indices = @transform_3, window_bounds = array<i64: 1, 20, 128>}]} {
    %c0 = arith.constant 0 : index
    %c0_0 = arith.constant 0 : index
    %c0_1 = arith.constant 0 : index
    %0 = vector.load %arg2[%c0, %c0_0, %c0_1] : memref<1x100x128xbf16, #tpu.memory_space<vmem>>, vector<1x20x128xbf16>
    %1 = vector.shape_cast %0 : vector<1x20x128xbf16> to vector<20x128xbf16>
    %c0_2 = arith.constant 0 : index
    %c0_3 = arith.constant 0 : index
    %c0_4 = arith.constant 0 : index
    %2 = vector.load %arg3[%c0_2, %c0_3, %c0_4] : memref<9x128x128xbf16, #tpu.memory_space<vmem>>, vector<1x128x128xbf16>
    %3 = vector.shape_cast %2 : vector<1x128x128xbf16> to vector<128x128xbf16>
    %cst = arith.constant dense<0.000000e+00> : vector<20x128xf32>
    %4 = tpu.matmul %1, %3, %cst {dimension_numbers = #tpu.dot_dimension_numbers<[1], [0], [0], [1], [0, 0, 1, 1], [], []>} : vector<20x128xbf16>, vector<128x128xbf16>, vector<20x128xf32> -> vector<20x128xf32>
    %c0_5 = arith.constant 0 : index
    %c0_6 = arith.constant 0 : index
    %5 = vector.load %arg6[%c0_5, %c0_6] : memref<20x128xf32, #tpu.memory_space<vmem>>, vector<20x128xf32>
    tpu.vector_store %arg6[%c0_5, %c0_6], %4 {strides = array<i32>} : memref<20x128xf32, #tpu.memory_space<vmem>>, vector<20x128xf32>,
    %c0_7 = arith.constant 0 : index
    %c25 = arith.constant 25 : index
    %c0_8 = arith.constant 0 : index
    %6 = vector.load %arg2[%c0_7, %c25, %c0_8] : memref<1x100x128xbf16, #tpu.memory_space<vmem>>, vector<1x20x128xbf16>
    %7 = vector.shape_cast %6 : vector<1x20x128xbf16> to vector<20x128xbf16>
    %c1 = arith.constant 1 : index
    %c0_9 = arith.constant 0 : index
    %c0_10 = arith.constant 0 : index
    %8 = vector.load %arg3[%c1, %c0_9, %c0_10] : memref<9x128x128xbf16, #tpu.memory_space<vmem>>, vector<1x128x128xbf16>
    %9 = vector.shape_cast %8 : vector<1x128x128xbf16> to vector<128x128xbf16>
    %cst_11 = arith.constant dense<0.000000e+00> : vector<20x128xf32>
    %10 = tpu.matmul %7, %9, %cst_11 {dimension_numbers = #tpu.dot_dimension_numbers<[1], [0], [0], [1], [0, 0, 1, 1], [], []>} : vector<20x128xbf16>, vector<128x128xbf16>, vector<20x128xf32> -> vector<20x128xf32>
    %c0_12 = arith.constant 0 : index
    %c0_13 = arith.constant 0 : index
    %11 = vector.load %arg6[%c0_12, %c0_13] : memref<20x128xf32, #tpu.memory_space<vmem>>, vector<20x128xf32>
    %12 = arith.addf %11, %10 : vector<20x128xf32>
    %c0_14 = arith.constant 0 : index
    %c0_15 = arith.constant 0 : index
    %13 = vector.load %arg6[%c0_14, %c0_15] : memref<20x128xf32, #tpu.memory_space<vmem>>, vector<20x128xf32>
    tpu.vector_store %arg6[%c0_14, %c0_15], %12 {strides = array<i32>} : memref<20x128xf32, #tpu.memory_space<vmem>>, vector<20x128xf32>,
    %c0_16 = arith.constant 0 : index
    %c1_17 = arith.constant 1 : index
    %c0_18 = arith.constant 0 : index
    %14 = vector.load %arg2[%c0_16, %c1_17, %c0_18] : memref<1x100x128xbf16, #tpu.memory_space<vmem>>, vector<1x20x128xbf16>
    %15 = vector.shape_cast %14 : vector<1x20x128xbf16> to vector<20x128xbf16>
    %c2 = arith.constant 2 : index
    %c0_19 = arith.constant 0 : index
    %c0_20 = arith.constant 0 : index
    %16 = vector.load %arg3[%c2, %c0_19, %c0_20] : memref<9x128x128xbf16, #tpu.memory_space<vmem>>, vector<1x128x128xbf16>
    %17 = vector.shape_cast %16 : vector<1x128x128xbf16> to vector<128x128xbf16>
    %cst_21 = arith.constant dense<0.000000e+00> : vector<20x128xf32>
    %18 = tpu.matmul %15, %17, %cst_21 {dimension_numbers = #tpu.dot_dimension_numbers<[1], [0], [0], [1], [0, 0, 1, 1], [], []>} : vector<20x128xbf16>, vector<128x128xbf16>, vector<20x128xf32> -> vector<20x128xf32>
    %c0_22 = arith.constant 0 : index
    %c0_23 = arith.constant 0 : index
    %19 = vector.load %arg6[%c0_22, %c0_23] : memref<20x128xf32, #tpu.memory_space<vmem>>, vector<20x128xf32>
    %20 = arith.addf %19, %18 : vector<20x128xf32>
    %c0_24 = arith.constant 0 : index
    %c0_25 = arith.constant 0 : index
    %21 = vector.load %arg6[%c0_24, %c0_25] : memref<20x128xf32, #tpu.memory_space<vmem>>, vector<20x128xf32>
    tpu.vector_store %arg6[%c0_24, %c0_25], %20 {strides = array<i32>} : memref<20x128xf32, #tpu.memory_space<vmem>>, vector<20x128xf32>,
    %c0_26 = arith.constant 0 : index
    %c50 = arith.constant 50 : index
    %c0_27 = arith.constant 0 : index
    %22 = vector.load %arg2[%c0_26, %c50, %c0_27] : memref<1x100x128xbf16, #tpu.memory_space<vmem>>, vector<1x20x128xbf16>
    %23 = vector.shape_cast %22 : vector<1x20x128xbf16> to vector<20x128xbf16>
    %c3 = arith.constant 3 : index
    %c0_28 = arith.constant 0 : index
    %c0_29 = arith.constant 0 : index
    %24 = vector.load %arg3[%c3, %c0_28, %c0_29] : memref<9x128x128xbf16, #tpu.memory_space<vmem>>, vector<1x128x128xbf16>
    %25 = vector.shape_cast %24 : vector<1x128x128xbf16> to vector<128x128xbf16>
    %cst_30 = arith.constant dense<0.000000e+00> : vector<20x128xf32>
    %26 = tpu.matmul %23, %25, %cst_30 {dimension_numbers = #tpu.dot_dimension_numbers<[1], [0], [0], [1], [0, 0, 1, 1], [], []>} : vector<20x128xbf16>, vector<128x128xbf16>, vector<20x128xf32> -> vector<20x128xf32>
    %c0_31 = arith.constant 0 : index
    %c0_32 = arith.constant 0 : index
    %27 = vector.load %arg6[%c0_31, %c0_32] : memref<20x128xf32, #tpu.memory_space<vmem>>, vector<20x128xf32>
    %28 = arith.addf %27, %26 : vector<20x128xf32>
    %c0_33 = arith.constant 0 : index
    %c0_34 = arith.constant 0 : index
    %29 = vector.load %arg6[%c0_33, %c0_34] : memref<20x128xf32, #tpu.memory_space<vmem>>, vector<20x128xf32>
    tpu.vector_store %arg6[%c0_33, %c0_34], %28 {strides = array<i32>} : memref<20x128xf32, #tpu.memory_space<vmem>>, vector<20x128xf32>,
    %c0_35 = arith.constant 0 : index
    %c75 = arith.constant 75 : index
    %c0_36 = arith.constant 0 : index
    %30 = vector.load %arg2[%c0_35, %c75, %c0_36] : memref<1x100x128xbf16, #tpu.memory_space<vmem>>, vector<1x20x128xbf16>
    %31 = vector.shape_cast %30 : vector<1x20x128xbf16> to vector<20x128xbf16>
    %c4 = arith.constant 4 : index
    %c0_37 = arith.constant 0 : index
    %c0_38 = arith.constant 0 : index
    %32 = vector.load %arg3[%c4, %c0_37, %c0_38] : memref<9x128x128xbf16, #tpu.memory_space<vmem>>, vector<1x128x128xbf16>
    %33 = vector.shape_cast %32 : vector<1x128x128xbf16> to vector<128x128xbf16>
    %cst_39 = arith.constant dense<0.000000e+00> : vector<20x128xf32>
    %34 = tpu.matmul %31, %33, %cst_39 {dimension_numbers = #tpu.dot_dimension_numbers<[1], [0], [0], [1], [0, 0, 1, 1], [], []>} : vector<20x128xbf16>, vector<128x128xbf16>, vector<20x128xf32> -> vector<20x128xf32>
    %c0_40 = arith.constant 0 : index
    %c0_41 = arith.constant 0 : index
    %35 = vector.load %arg6[%c0_40, %c0_41] : memref<20x128xf32, #tpu.memory_space<vmem>>, vector<20x128xf32>
    %36 = arith.addf %35, %34 : vector<20x128xf32>
    %c0_42 = arith.constant 0 : index
    %c0_43 = arith.constant 0 : index
    %37 = vector.load %arg6[%c0_42, %c0_43] : memref<20x128xf32, #tpu.memory_space<vmem>>, vector<20x128xf32>
    tpu.vector_store %arg6[%c0_42, %c0_43], %36 {strides = array<i32>} : memref<20x128xf32, #tpu.memory_space<vmem>>, vector<20x128xf32>,
    %c0_44 = arith.constant 0 : index
    %c51 = arith.constant 51 : index
    %c0_45 = arith.constant 0 : index
    %38 = vector.load %arg2[%c0_44, %c51, %c0_45] : memref<1x100x128xbf16, #tpu.memory_space<vmem>>, vector<1x20x128xbf16>
    %39 = vector.shape_cast %38 : vector<1x20x128xbf16> to vector<20x128xbf16>
    %c5 = arith.constant 5 : index
    %c0_46 = arith.constant 0 : index
    %c0_47 = arith.constant 0 : index
    %40 = vector.load %arg3[%c5, %c0_46, %c0_47] : memref<9x128x128xbf16, #tpu.memory_space<vmem>>, vector<1x128x128xbf16>
    %41 = vector.shape_cast %40 : vector<1x128x128xbf16> to vector<128x128xbf16>
    %cst_48 = arith.constant dense<0.000000e+00> : vector<20x128xf32>
    %42 = tpu.matmul %39, %41, %cst_48 {dimension_numbers = #tpu.dot_dimension_numbers<[1], [0], [0], [1], [0, 0, 1, 1], [], []>} : vector<20x128xbf16>, vector<128x128xbf16>, vector<20x128xf32> -> vector<20x128xf32>
    %c0_49 = arith.constant 0 : index
    %c0_50 = arith.constant 0 : index
    %43 = vector.load %arg6[%c0_49, %c0_50] : memref<20x128xf32, #tpu.memory_space<vmem>>, vector<20x128xf32>
    %44 = arith.addf %43, %42 : vector<20x128xf32>
    %c0_51 = arith.constant 0 : index
    %c0_52 = arith.constant 0 : index
    %45 = vector.load %arg6[%c0_51, %c0_52] : memref<20x128xf32, #tpu.memory_space<vmem>>, vector<20x128xf32>
    tpu.vector_store %arg6[%c0_51, %c0_52], %44 {strides = array<i32>} : memref<20x128xf32, #tpu.memory_space<vmem>>, vector<20x128xf32>,
    %c0_53 = arith.constant 0 : index
    %c5_54 = arith.constant 5 : index
    %c0_55 = arith.constant 0 : index
    %46 = vector.load %arg2[%c0_53, %c5_54, %c0_55] : memref<1x100x128xbf16, #tpu.memory_space<vmem>>, vector<1x20x128xbf16>
    %47 = vector.shape_cast %46 : vector<1x20x128xbf16> to vector<20x128xbf16>
    %c6 = arith.constant 6 : index
    %c0_56 = arith.constant 0 : index
    %c0_57 = arith.constant 0 : index
    %48 = vector.load %arg3[%c6, %c0_56, %c0_57] : memref<9x128x128xbf16, #tpu.memory_space<vmem>>, vector<1x128x128xbf16>
    %49 = vector.shape_cast %48 : vector<1x128x128xbf16> to vector<128x128xbf16>
    %cst_58 = arith.constant dense<0.000000e+00> : vector<20x128xf32>
    %50 = tpu.matmul %47, %49, %cst_58 {dimension_numbers = #tpu.dot_dimension_numbers<[1], [0], [0], [1], [0, 0, 1, 1], [], []>} : vector<20x128xbf16>, vector<128x128xbf16>, vector<20x128xf32> -> vector<20x128xf32>
    %c0_59 = arith.constant 0 : index
    %c0_60 = arith.constant 0 : index
    %51 = vector.load %arg6[%c0_59, %c0_60] : memref<20x128xf32, #tpu.memory_space<vmem>>, vector<20x128xf32>
    %52 = arith.addf %51, %50 : vector<20x128xf32>
    %c0_61 = arith.constant 0 : index
    %c0_62 = arith.constant 0 : index
    %53 = vector.load %arg6[%c0_61, %c0_62] : memref<20x128xf32, #tpu.memory_space<vmem>>, vector<20x128xf32>
    tpu.vector_store %arg6[%c0_61, %c0_62], %52 {strides = array<i32>} : memref<20x128xf32, #tpu.memory_space<vmem>>, vector<20x128xf32>,
    %c0_63 = arith.constant 0 : index
    %c30 = arith.constant 30 : index
    %c0_64 = arith.constant 0 : index
    %54 = vector.load %arg2[%c0_63, %c30, %c0_64] : memref<1x100x128xbf16, #tpu.memory_space<vmem>>, vector<1x20x128xbf16>
    %55 = vector.shape_cast %54 : vector<1x20x128xbf16> to vector<20x128xbf16>
    %c7 = arith.constant 7 : index
    %c0_65 = arith.constant 0 : index
    %c0_66 = arith.constant 0 : index
    %56 = vector.load %arg3[%c7, %c0_65, %c0_66] : memref<9x128x128xbf16, #tpu.memory_space<vmem>>, vector<1x128x128xbf16>
    %57 = vector.shape_cast %56 : vector<1x128x128xbf16> to vector<128x128xbf16>
    %cst_67 = arith.constant dense<0.000000e+00> : vector<20x128xf32>
    %58 = tpu.matmul %55, %57, %cst_67 {dimension_numbers = #tpu.dot_dimension_numbers<[1], [0], [0], [1], [0, 0, 1, 1], [], []>} : vector<20x128xbf16>, vector<128x128xbf16>, vector<20x128xf32> -> vector<20x128xf32>
    %c0_68 = arith.constant 0 : index
    %c0_69 = arith.constant 0 : index
    %59 = vector.load %arg6[%c0_68, %c0_69] : memref<20x128xf32, #tpu.memory_space<vmem>>, vector<20x128xf32>
    %60 = arith.addf %59, %58 : vector<20x128xf32>
    %c0_70 = arith.constant 0 : index
    %c0_71 = arith.constant 0 : index
    %61 = vector.load %arg6[%c0_70, %c0_71] : memref<20x128xf32, #tpu.memory_space<vmem>>, vector<20x128xf32>
    tpu.vector_store %arg6[%c0_70, %c0_71], %60 {strides = array<i32>} : memref<20x128xf32, #tpu.memory_space<vmem>>, vector<20x128xf32>,
    %c0_72 = arith.constant 0 : index
    %c6_73 = arith.constant 6 : index
    %c0_74 = arith.constant 0 : index
    %62 = vector.load %arg2[%c0_72, %c6_73, %c0_74] : memref<1x100x128xbf16, #tpu.memory_space<vmem>>, vector<1x20x128xbf16>
    %63 = vector.shape_cast %62 : vector<1x20x128xbf16> to vector<20x128xbf16>
    %c8 = arith.constant 8 : index
    %c0_75 = arith.constant 0 : index
    %c0_76 = arith.constant 0 : index
    %64 = vector.load %arg3[%c8, %c0_75, %c0_76] : memref<9x128x128xbf16, #tpu.memory_space<vmem>>, vector<1x128x128xbf16>
    %65 = vector.shape_cast %64 : vector<1x128x128xbf16> to vector<128x128xbf16>
    %cst_77 = arith.constant dense<0.000000e+00> : vector<20x128xf32>
    %66 = tpu.matmul %63, %65, %cst_77 {dimension_numbers = #tpu.dot_dimension_numbers<[1], [0], [0], [1], [0, 0, 1, 1], [], []>} : vector<20x128xbf16>, vector<128x128xbf16>, vector<20x128xf32> -> vector<20x128xf32>
    %c0_78 = arith.constant 0 : index
    %c0_79 = arith.constant 0 : index
    %67 = vector.load %arg6[%c0_78, %c0_79] : memref<20x128xf32, #tpu.memory_space<vmem>>, vector<20x128xf32>
    %68 = arith.addf %67, %66 : vector<20x128xf32>
    %c0_80 = arith.constant 0 : index
    %c0_81 = arith.constant 0 : index
    %69 = vector.load %arg6[%c0_80, %c0_81] : memref<20x128xf32, #tpu.memory_space<vmem>>, vector<20x128xf32>
    tpu.vector_store %arg6[%c0_80, %c0_81], %68 {strides = array<i32>} : memref<20x128xf32, #tpu.memory_space<vmem>>, vector<20x128xf32>,
    %c0_82 = arith.constant 0 : index
    %c0_83 = arith.constant 0 : index
    %70 = vector.load %arg6[%c0_82, %c0_83] : memref<20x128xf32, #tpu.memory_space<vmem>>, vector<20x128xf32>
    %c0_84 = arith.constant 0 : index
    %c0_85 = arith.constant 0 : index
    %71 = vector.load %arg4[%c0_84, %c0_85] : memref<1x128xf32, #tpu.memory_space<vmem>>, vector<1x128xf32>
    %72 = vector.broadcast %71 : vector<1x128xf32> to vector<20x128xf32>
    %73 = arith.addf %70, %72 : vector<20x128xf32>
    %cst_86 = arith.constant 0.000000e+00 : f32
    %74 = vector.broadcast %cst_86 : f32 to vector<20x128xf32>
    %75 = arith.maximumf %73, %74 : vector<20x128xf32>
    %76 = arith.truncf %75 : vector<20x128xf32> to vector<20x128xbf16>
    %c0_87 = arith.constant 0 : index
    %c0_88 = arith.constant 0 : index
    %c0_89 = arith.constant 0 : index
    %77 = vector.load %arg5[%c0_87, %c0_88, %c0_89] : memref<1x20x128xbf16, #tpu.memory_space<vmem>>, vector<1x20x128xbf16>
    %78 = vector.shape_cast %77 : vector<1x20x128xbf16> to vector<20x128xbf16>
    %79 = vector.shape_cast %76 : vector<20x128xbf16> to vector<1x20x128xbf16>
    tpu.vector_store %arg5[%c0_87, %c0_88, %c0_89], %79 {strides = array<i32>} : memref<1x20x128xbf16, #tpu.memory_space<vmem>>, vector<1x20x128xbf16>,
    return
  }
  func.func @transform_0(%arg0: i32, %arg1: i32) -> (i32, i32, i32) {
    %c0_i32 = arith.constant 0 : i32
    %c0_i32_0 = arith.constant 0 : i32
    %c0_i32_1 = arith.constant 0 : i32
    return %arg0, %c0_i32, %c0_i32_0 : i32, i32, i32
  }
  func.func @transform_1(%arg0: i32, %arg1: i32) -> (i32, i32, i32) {
    %c0_i32 = arith.constant 0 : i32
    %c0_i32_0 = arith.constant 0 : i32
    %c0_i32_1 = arith.constant 0 : i32
    %c0_i32_2 = arith.constant 0 : i32
    return %c0_i32, %c0_i32_0, %c0_i32_1 : i32, i32, i32
  }
  func.func @transform_2(%arg0: i32, %arg1: i32) -> (i32, i32) {
    %c0_i32 = arith.constant 0 : i32
    %c0_i32_0 = arith.constant 0 : i32
    %c0_i32_1 = arith.constant 0 : i32
    return %c0_i32, %c0_i32_0 : i32, i32
  }
  func.func @transform_3(%arg0: i32, %arg1: i32) -> (i32, i32, i32) {
    %c0_i32 = arith.constant 0 : i32
    %c0_i32_0 = arith.constant 0 : i32
    return %arg0, %arg1, %c0_i32 : i32, i32, i32
  }
}

module attributes {stable_mosaic.version = 11 : i64} {
  func.func @fused_conv_kernel(%arg0: i32, %arg1: i32, %arg2: memref<1x36x128xbf16, #tpu.memory_space<vmem>>, %arg3: memref<9x128x128xbf16, #tpu.memory_space<vmem>>, %arg4: memref<1x128xf32, #tpu.memory_space<vmem>>, %arg5: memref<1x6x128xbf16, #tpu.memory_space<vmem>>, %arg6: memref<6x128xf32, #tpu.memory_space<vmem>>) attributes {dimension_semantics = [#tpu.dimension_semantics<parallel>, #tpu.dimension_semantics<parallel>], iteration_bounds = array<i64: 2, 1>, scalar_prefetch = 0 : i64, scratch_operands = 1 : i64, tpu.core_type = #tpu.core_type<tc>, window_params = [{transform_indices = @transform_0, window_bounds = array<i64: 1, 36, 128>}, {pipeline_mode = #tpu.pipeline_mode<synchronous>, transform_indices = @transform_1, window_bounds = array<i64: 9, 128, 128>}, {pipeline_mode = #tpu.pipeline_mode<synchronous>, transform_indices = @transform_2, window_bounds = array<i64: 1, 128>}, {transform_indices = @transform_3, window_bounds = array<i64: 1, 6, 128>}]} {
    %c0 = arith.constant 0 : index
    %c0_0 = arith.constant 0 : index
    %c0_1 = arith.constant 0 : index
    %0 = vector.load %arg2[%c0, %c0_0, %c0_1] : memref<1x36x128xbf16, #tpu.memory_space<vmem>>, vector<1x6x128xbf16>
    %1 = vector.shape_cast %0 : vector<1x6x128xbf16> to vector<6x128xbf16>
    %c0_2 = arith.constant 0 : index
    %c0_3 = arith.constant 0 : index
    %c0_4 = arith.constant 0 : index
    %2 = vector.load %arg3[%c0_2, %c0_3, %c0_4] : memref<9x128x128xbf16, #tpu.memory_space<vmem>>, vector<1x128x128xbf16>
    %3 = vector.shape_cast %2 : vector<1x128x128xbf16> to vector<128x128xbf16>
    %cst = arith.constant dense<0.000000e+00> : vector<6x128xf32>
    %4 = tpu.matmul %1, %3, %cst {dimension_numbers = #tpu.dot_dimension_numbers<[1], [0], [0], [1], [0, 0, 1, 1], [], []>} : vector<6x128xbf16>, vector<128x128xbf16>, vector<6x128xf32> -> vector<6x128xf32>
    %c0_5 = arith.constant 0 : index
    %c0_6 = arith.constant 0 : index
    %5 = vector.load %arg6[%c0_5, %c0_6] : memref<6x128xf32, #tpu.memory_space<vmem>>, vector<6x128xf32>
    tpu.vector_store %arg6[%c0_5, %c0_6], %4 {strides = array<i32>} : memref<6x128xf32, #tpu.memory_space<vmem>>, vector<6x128xf32>,
    %c0_7 = arith.constant 0 : index
    %c9 = arith.constant 9 : index
    %c0_8 = arith.constant 0 : index
    %6 = vector.load %arg2[%c0_7, %c9, %c0_8] : memref<1x36x128xbf16, #tpu.memory_space<vmem>>, vector<1x6x128xbf16>
    %7 = vector.shape_cast %6 : vector<1x6x128xbf16> to vector<6x128xbf16>
    %c1 = arith.constant 1 : index
    %c0_9 = arith.constant 0 : index
    %c0_10 = arith.constant 0 : index
    %8 = vector.load %arg3[%c1, %c0_9, %c0_10] : memref<9x128x128xbf16, #tpu.memory_space<vmem>>, vector<1x128x128xbf16>
    %9 = vector.shape_cast %8 : vector<1x128x128xbf16> to vector<128x128xbf16>
    %cst_11 = arith.constant dense<0.000000e+00> : vector<6x128xf32>
    %10 = tpu.matmul %7, %9, %cst_11 {dimension_numbers = #tpu.dot_dimension_numbers<[1], [0], [0], [1], [0, 0, 1, 1], [], []>} : vector<6x128xbf16>, vector<128x128xbf16>, vector<6x128xf32> -> vector<6x128xf32>
    %c0_12 = arith.constant 0 : index
    %c0_13 = arith.constant 0 : index
    %11 = vector.load %arg6[%c0_12, %c0_13] : memref<6x128xf32, #tpu.memory_space<vmem>>, vector<6x128xf32>
    %12 = arith.addf %11, %10 : vector<6x128xf32>
    %c0_14 = arith.constant 0 : index
    %c0_15 = arith.constant 0 : index
    %13 = vector.load %arg6[%c0_14, %c0_15] : memref<6x128xf32, #tpu.memory_space<vmem>>, vector<6x128xf32>
    tpu.vector_store %arg6[%c0_14, %c0_15], %12 {strides = array<i32>} : memref<6x128xf32, #tpu.memory_space<vmem>>, vector<6x128xf32>,
    %c0_16 = arith.constant 0 : index
    %c1_17 = arith.constant 1 : index
    %c0_18 = arith.constant 0 : index
    %14 = vector.load %arg2[%c0_16, %c1_17, %c0_18] : memref<1x36x128xbf16, #tpu.memory_space<vmem>>, vector<1x6x128xbf16>
    %15 = vector.shape_cast %14 : vector<1x6x128xbf16> to vector<6x128xbf16>
    %c2 = arith.constant 2 : index
    %c0_19 = arith.constant 0 : index
    %c0_20 = arith.constant 0 : index
    %16 = vector.load %arg3[%c2, %c0_19, %c0_20] : memref<9x128x128xbf16, #tpu.memory_space<vmem>>, vector<1x128x128xbf16>
    %17 = vector.shape_cast %16 : vector<1x128x128xbf16> to vector<128x128xbf16>
    %cst_21 = arith.constant dense<0.000000e+00> : vector<6x128xf32>
    %18 = tpu.matmul %15, %17, %cst_21 {dimension_numbers = #tpu.dot_dimension_numbers<[1], [0], [0], [1], [0, 0, 1, 1], [], []>} : vector<6x128xbf16>, vector<128x128xbf16>, vector<6x128xf32> -> vector<6x128xf32>
    %c0_22 = arith.constant 0 : index
    %c0_23 = arith.constant 0 : index
    %19 = vector.load %arg6[%c0_22, %c0_23] : memref<6x128xf32, #tpu.memory_space<vmem>>, vector<6x128xf32>
    %20 = arith.addf %19, %18 : vector<6x128xf32>
    %c0_24 = arith.constant 0 : index
    %c0_25 = arith.constant 0 : index
    %21 = vector.load %arg6[%c0_24, %c0_25] : memref<6x128xf32, #tpu.memory_space<vmem>>, vector<6x128xf32>
    tpu.vector_store %arg6[%c0_24, %c0_25], %20 {strides = array<i32>} : memref<6x128xf32, #tpu.memory_space<vmem>>, vector<6x128xf32>,
    %c0_26 = arith.constant 0 : index
    %c18 = arith.constant 18 : index
    %c0_27 = arith.constant 0 : index
    %22 = vector.load %arg2[%c0_26, %c18, %c0_27] : memref<1x36x128xbf16, #tpu.memory_space<vmem>>, vector<1x6x128xbf16>
    %23 = vector.shape_cast %22 : vector<1x6x128xbf16> to vector<6x128xbf16>
    %c3 = arith.constant 3 : index
    %c0_28 = arith.constant 0 : index
    %c0_29 = arith.constant 0 : index
    %24 = vector.load %arg3[%c3, %c0_28, %c0_29] : memref<9x128x128xbf16, #tpu.memory_space<vmem>>, vector<1x128x128xbf16>
    %25 = vector.shape_cast %24 : vector<1x128x128xbf16> to vector<128x128xbf16>
    %cst_30 = arith.constant dense<0.000000e+00> : vector<6x128xf32>
    %26 = tpu.matmul %23, %25, %cst_30 {dimension_numbers = #tpu.dot_dimension_numbers<[1], [0], [0], [1], [0, 0, 1, 1], [], []>} : vector<6x128xbf16>, vector<128x128xbf16>, vector<6x128xf32> -> vector<6x128xf32>
    %c0_31 = arith.constant 0 : index
    %c0_32 = arith.constant 0 : index
    %27 = vector.load %arg6[%c0_31, %c0_32] : memref<6x128xf32, #tpu.memory_space<vmem>>, vector<6x128xf32>
    %28 = arith.addf %27, %26 : vector<6x128xf32>
    %c0_33 = arith.constant 0 : index
    %c0_34 = arith.constant 0 : index
    %29 = vector.load %arg6[%c0_33, %c0_34] : memref<6x128xf32, #tpu.memory_space<vmem>>, vector<6x128xf32>
    tpu.vector_store %arg6[%c0_33, %c0_34], %28 {strides = array<i32>} : memref<6x128xf32, #tpu.memory_space<vmem>>, vector<6x128xf32>,
    %c0_35 = arith.constant 0 : index
    %c27 = arith.constant 27 : index
    %c0_36 = arith.constant 0 : index
    %30 = vector.load %arg2[%c0_35, %c27, %c0_36] : memref<1x36x128xbf16, #tpu.memory_space<vmem>>, vector<1x6x128xbf16>
    %31 = vector.shape_cast %30 : vector<1x6x128xbf16> to vector<6x128xbf16>
    %c4 = arith.constant 4 : index
    %c0_37 = arith.constant 0 : index
    %c0_38 = arith.constant 0 : index
    %32 = vector.load %arg3[%c4, %c0_37, %c0_38] : memref<9x128x128xbf16, #tpu.memory_space<vmem>>, vector<1x128x128xbf16>
    %33 = vector.shape_cast %32 : vector<1x128x128xbf16> to vector<128x128xbf16>
    %cst_39 = arith.constant dense<0.000000e+00> : vector<6x128xf32>
    %34 = tpu.matmul %31, %33, %cst_39 {dimension_numbers = #tpu.dot_dimension_numbers<[1], [0], [0], [1], [0, 0, 1, 1], [], []>} : vector<6x128xbf16>, vector<128x128xbf16>, vector<6x128xf32> -> vector<6x128xf32>
    %c0_40 = arith.constant 0 : index
    %c0_41 = arith.constant 0 : index
    %35 = vector.load %arg6[%c0_40, %c0_41] : memref<6x128xf32, #tpu.memory_space<vmem>>, vector<6x128xf32>
    %36 = arith.addf %35, %34 : vector<6x128xf32>
    %c0_42 = arith.constant 0 : index
    %c0_43 = arith.constant 0 : index
    %37 = vector.load %arg6[%c0_42, %c0_43] : memref<6x128xf32, #tpu.memory_space<vmem>>, vector<6x128xf32>
    tpu.vector_store %arg6[%c0_42, %c0_43], %36 {strides = array<i32>} : memref<6x128xf32, #tpu.memory_space<vmem>>, vector<6x128xf32>,
    %c0_44 = arith.constant 0 : index
    %c19 = arith.constant 19 : index
    %c0_45 = arith.constant 0 : index
    %38 = vector.load %arg2[%c0_44, %c19, %c0_45] : memref<1x36x128xbf16, #tpu.memory_space<vmem>>, vector<1x6x128xbf16>
    %39 = vector.shape_cast %38 : vector<1x6x128xbf16> to vector<6x128xbf16>
    %c5 = arith.constant 5 : index
    %c0_46 = arith.constant 0 : index
    %c0_47 = arith.constant 0 : index
    %40 = vector.load %arg3[%c5, %c0_46, %c0_47] : memref<9x128x128xbf16, #tpu.memory_space<vmem>>, vector<1x128x128xbf16>
    %41 = vector.shape_cast %40 : vector<1x128x128xbf16> to vector<128x128xbf16>
    %cst_48 = arith.constant dense<0.000000e+00> : vector<6x128xf32>
    %42 = tpu.matmul %39, %41, %cst_48 {dimension_numbers = #tpu.dot_dimension_numbers<[1], [0], [0], [1], [0, 0, 1, 1], [], []>} : vector<6x128xbf16>, vector<128x128xbf16>, vector<6x128xf32> -> vector<6x128xf32>
    %c0_49 = arith.constant 0 : index
    %c0_50 = arith.constant 0 : index
    %43 = vector.load %arg6[%c0_49, %c0_50] : memref<6x128xf32, #tpu.memory_space<vmem>>, vector<6x128xf32>
    %44 = arith.addf %43, %42 : vector<6x128xf32>
    %c0_51 = arith.constant 0 : index
    %c0_52 = arith.constant 0 : index
    %45 = vector.load %arg6[%c0_51, %c0_52] : memref<6x128xf32, #tpu.memory_space<vmem>>, vector<6x128xf32>
    tpu.vector_store %arg6[%c0_51, %c0_52], %44 {strides = array<i32>} : memref<6x128xf32, #tpu.memory_space<vmem>>, vector<6x128xf32>,
    %c0_53 = arith.constant 0 : index
    %c3_54 = arith.constant 3 : index
    %c0_55 = arith.constant 0 : index
    %46 = vector.load %arg2[%c0_53, %c3_54, %c0_55] : memref<1x36x128xbf16, #tpu.memory_space<vmem>>, vector<1x6x128xbf16>
    %47 = vector.shape_cast %46 : vector<1x6x128xbf16> to vector<6x128xbf16>
    %c6 = arith.constant 6 : index
    %c0_56 = arith.constant 0 : index
    %c0_57 = arith.constant 0 : index
    %48 = vector.load %arg3[%c6, %c0_56, %c0_57] : memref<9x128x128xbf16, #tpu.memory_space<vmem>>, vector<1x128x128xbf16>
    %49 = vector.shape_cast %48 : vector<1x128x128xbf16> to vector<128x128xbf16>
    %cst_58 = arith.constant dense<0.000000e+00> : vector<6x128xf32>
    %50 = tpu.matmul %47, %49, %cst_58 {dimension_numbers = #tpu.dot_dimension_numbers<[1], [0], [0], [1], [0, 0, 1, 1], [], []>} : vector<6x128xbf16>, vector<128x128xbf16>, vector<6x128xf32> -> vector<6x128xf32>
    %c0_59 = arith.constant 0 : index
    %c0_60 = arith.constant 0 : index
    %51 = vector.load %arg6[%c0_59, %c0_60] : memref<6x128xf32, #tpu.memory_space<vmem>>, vector<6x128xf32>
    %52 = arith.addf %51, %50 : vector<6x128xf32>
    %c0_61 = arith.constant 0 : index
    %c0_62 = arith.constant 0 : index
    %53 = vector.load %arg6[%c0_61, %c0_62] : memref<6x128xf32, #tpu.memory_space<vmem>>, vector<6x128xf32>
    tpu.vector_store %arg6[%c0_61, %c0_62], %52 {strides = array<i32>} : memref<6x128xf32, #tpu.memory_space<vmem>>, vector<6x128xf32>,
    %c0_63 = arith.constant 0 : index
    %c12 = arith.constant 12 : index
    %c0_64 = arith.constant 0 : index
    %54 = vector.load %arg2[%c0_63, %c12, %c0_64] : memref<1x36x128xbf16, #tpu.memory_space<vmem>>, vector<1x6x128xbf16>
    %55 = vector.shape_cast %54 : vector<1x6x128xbf16> to vector<6x128xbf16>
    %c7 = arith.constant 7 : index
    %c0_65 = arith.constant 0 : index
    %c0_66 = arith.constant 0 : index
    %56 = vector.load %arg3[%c7, %c0_65, %c0_66] : memref<9x128x128xbf16, #tpu.memory_space<vmem>>, vector<1x128x128xbf16>
    %57 = vector.shape_cast %56 : vector<1x128x128xbf16> to vector<128x128xbf16>
    %cst_67 = arith.constant dense<0.000000e+00> : vector<6x128xf32>
    %58 = tpu.matmul %55, %57, %cst_67 {dimension_numbers = #tpu.dot_dimension_numbers<[1], [0], [0], [1], [0, 0, 1, 1], [], []>} : vector<6x128xbf16>, vector<128x128xbf16>, vector<6x128xf32> -> vector<6x128xf32>
    %c0_68 = arith.constant 0 : index
    %c0_69 = arith.constant 0 : index
    %59 = vector.load %arg6[%c0_68, %c0_69] : memref<6x128xf32, #tpu.memory_space<vmem>>, vector<6x128xf32>
    %60 = arith.addf %59, %58 : vector<6x128xf32>
    %c0_70 = arith.constant 0 : index
    %c0_71 = arith.constant 0 : index
    %61 = vector.load %arg6[%c0_70, %c0_71] : memref<6x128xf32, #tpu.memory_space<vmem>>, vector<6x128xf32>
    tpu.vector_store %arg6[%c0_70, %c0_71], %60 {strides = array<i32>} : memref<6x128xf32, #tpu.memory_space<vmem>>, vector<6x128xf32>,
    %c0_72 = arith.constant 0 : index
    %c4_73 = arith.constant 4 : index
    %c0_74 = arith.constant 0 : index
    %62 = vector.load %arg2[%c0_72, %c4_73, %c0_74] : memref<1x36x128xbf16, #tpu.memory_space<vmem>>, vector<1x6x128xbf16>
    %63 = vector.shape_cast %62 : vector<1x6x128xbf16> to vector<6x128xbf16>
    %c8 = arith.constant 8 : index
    %c0_75 = arith.constant 0 : index
    %c0_76 = arith.constant 0 : index
    %64 = vector.load %arg3[%c8, %c0_75, %c0_76] : memref<9x128x128xbf16, #tpu.memory_space<vmem>>, vector<1x128x128xbf16>
    %65 = vector.shape_cast %64 : vector<1x128x128xbf16> to vector<128x128xbf16>
    %cst_77 = arith.constant dense<0.000000e+00> : vector<6x128xf32>
    %66 = tpu.matmul %63, %65, %cst_77 {dimension_numbers = #tpu.dot_dimension_numbers<[1], [0], [0], [1], [0, 0, 1, 1], [], []>} : vector<6x128xbf16>, vector<128x128xbf16>, vector<6x128xf32> -> vector<6x128xf32>
    %c0_78 = arith.constant 0 : index
    %c0_79 = arith.constant 0 : index
    %67 = vector.load %arg6[%c0_78, %c0_79] : memref<6x128xf32, #tpu.memory_space<vmem>>, vector<6x128xf32>
    %68 = arith.addf %67, %66 : vector<6x128xf32>
    %c0_80 = arith.constant 0 : index
    %c0_81 = arith.constant 0 : index
    %69 = vector.load %arg6[%c0_80, %c0_81] : memref<6x128xf32, #tpu.memory_space<vmem>>, vector<6x128xf32>
    tpu.vector_store %arg6[%c0_80, %c0_81], %68 {strides = array<i32>} : memref<6x128xf32, #tpu.memory_space<vmem>>, vector<6x128xf32>,
    %c0_82 = arith.constant 0 : index
    %c0_83 = arith.constant 0 : index
    %70 = vector.load %arg6[%c0_82, %c0_83] : memref<6x128xf32, #tpu.memory_space<vmem>>, vector<6x128xf32>
    %c0_84 = arith.constant 0 : index
    %c0_85 = arith.constant 0 : index
    %71 = vector.load %arg4[%c0_84, %c0_85] : memref<1x128xf32, #tpu.memory_space<vmem>>, vector<1x128xf32>
    %72 = vector.broadcast %71 : vector<1x128xf32> to vector<6x128xf32>
    %73 = arith.addf %70, %72 : vector<6x128xf32>
    %cst_86 = arith.constant 0.000000e+00 : f32
    %74 = vector.broadcast %cst_86 : f32 to vector<6x128xf32>
    %75 = arith.maximumf %73, %74 : vector<6x128xf32>
    %76 = arith.truncf %75 : vector<6x128xf32> to vector<6x128xbf16>
    %c0_87 = arith.constant 0 : index
    %c0_88 = arith.constant 0 : index
    %c0_89 = arith.constant 0 : index
    %77 = vector.load %arg5[%c0_87, %c0_88, %c0_89] : memref<1x6x128xbf16, #tpu.memory_space<vmem>>, vector<1x6x128xbf16>
    %78 = vector.shape_cast %77 : vector<1x6x128xbf16> to vector<6x128xbf16>
    %79 = vector.shape_cast %76 : vector<6x128xbf16> to vector<1x6x128xbf16>
    tpu.vector_store %arg5[%c0_87, %c0_88, %c0_89], %79 {strides = array<i32>} : memref<1x6x128xbf16, #tpu.memory_space<vmem>>, vector<1x6x128xbf16>,
    return
  }
  func.func @transform_0(%arg0: i32, %arg1: i32) -> (i32, i32, i32) {
    %c0_i32 = arith.constant 0 : i32
    %c0_i32_0 = arith.constant 0 : i32
    %c0_i32_1 = arith.constant 0 : i32
    return %arg0, %c0_i32, %c0_i32_0 : i32, i32, i32
  }
  func.func @transform_1(%arg0: i32, %arg1: i32) -> (i32, i32, i32) {
    %c0_i32 = arith.constant 0 : i32
    %c0_i32_0 = arith.constant 0 : i32
    %c0_i32_1 = arith.constant 0 : i32
    %c0_i32_2 = arith.constant 0 : i32
    return %c0_i32, %c0_i32_0, %c0_i32_1 : i32, i32, i32
  }
  func.func @transform_2(%arg0: i32, %arg1: i32) -> (i32, i32) {
    %c0_i32 = arith.constant 0 : i32
    %c0_i32_0 = arith.constant 0 : i32
    %c0_i32_1 = arith.constant 0 : i32
    return %c0_i32, %c0_i32_0 : i32, i32
  }
  func.func @transform_3(%arg0: i32, %arg1: i32) -> (i32, i32, i32) {
    %c0_i32 = arith.constant 0 : i32
    %c0_i32_0 = arith.constant 0 : i32
    return %arg0, %arg1, %c0_i32 : i32, i32, i32
  }
}

module attributes {stable_mosaic.version = 11 : i64} {
  func.func @fused_conv_kernel(%arg0: i32, %arg1: i32, %arg2: memref<1x16x128xbf16, #tpu.memory_space<vmem>>, %arg3: memref<9x128x128xbf16, #tpu.memory_space<vmem>>, %arg4: memref<1x128xf32, #tpu.memory_space<vmem>>, %arg5: memref<1x2x128xbf16, #tpu.memory_space<vmem>>, %arg6: memref<2x128xf32, #tpu.memory_space<vmem>>) attributes {dimension_semantics = [#tpu.dimension_semantics<parallel>, #tpu.dimension_semantics<parallel>], iteration_bounds = array<i64: 2, 1>, scalar_prefetch = 0 : i64, scratch_operands = 1 : i64, tpu.core_type = #tpu.core_type<tc>, window_params = [{transform_indices = @transform_0, window_bounds = array<i64: 1, 16, 128>}, {pipeline_mode = #tpu.pipeline_mode<synchronous>, transform_indices = @transform_1, window_bounds = array<i64: 9, 128, 128>}, {pipeline_mode = #tpu.pipeline_mode<synchronous>, transform_indices = @transform_2, window_bounds = array<i64: 1, 128>}, {transform_indices = @transform_3, window_bounds = array<i64: 1, 2, 128>}]} {
    %c0 = arith.constant 0 : index
    %c0_0 = arith.constant 0 : index
    %c0_1 = arith.constant 0 : index
    %0 = vector.load %arg2[%c0, %c0_0, %c0_1] : memref<1x16x128xbf16, #tpu.memory_space<vmem>>, vector<1x2x128xbf16>
    %1 = vector.shape_cast %0 : vector<1x2x128xbf16> to vector<2x128xbf16>
    %c0_2 = arith.constant 0 : index
    %c0_3 = arith.constant 0 : index
    %c0_4 = arith.constant 0 : index
    %2 = vector.load %arg3[%c0_2, %c0_3, %c0_4] : memref<9x128x128xbf16, #tpu.memory_space<vmem>>, vector<1x128x128xbf16>
    %3 = vector.shape_cast %2 : vector<1x128x128xbf16> to vector<128x128xbf16>
    %cst = arith.constant dense<0.000000e+00> : vector<2x128xf32>
    %4 = tpu.matmul %1, %3, %cst {dimension_numbers = #tpu.dot_dimension_numbers<[1], [0], [0], [1], [0, 0, 1, 1], [], []>} : vector<2x128xbf16>, vector<128x128xbf16>, vector<2x128xf32> -> vector<2x128xf32>
    %c0_5 = arith.constant 0 : index
    %c0_6 = arith.constant 0 : index
    %5 = vector.load %arg6[%c0_5, %c0_6] : memref<2x128xf32, #tpu.memory_space<vmem>>, vector<2x128xf32>
    tpu.vector_store %arg6[%c0_5, %c0_6], %4 {strides = array<i32>} : memref<2x128xf32, #tpu.memory_space<vmem>>, vector<2x128xf32>,
    %c0_7 = arith.constant 0 : index
    %c4 = arith.constant 4 : index
    %c0_8 = arith.constant 0 : index
    %6 = vector.load %arg2[%c0_7, %c4, %c0_8] : memref<1x16x128xbf16, #tpu.memory_space<vmem>>, vector<1x2x128xbf16>
    %7 = vector.shape_cast %6 : vector<1x2x128xbf16> to vector<2x128xbf16>
    %c1 = arith.constant 1 : index
    %c0_9 = arith.constant 0 : index
    %c0_10 = arith.constant 0 : index
    %8 = vector.load %arg3[%c1, %c0_9, %c0_10] : memref<9x128x128xbf16, #tpu.memory_space<vmem>>, vector<1x128x128xbf16>
    %9 = vector.shape_cast %8 : vector<1x128x128xbf16> to vector<128x128xbf16>
    %cst_11 = arith.constant dense<0.000000e+00> : vector<2x128xf32>
    %10 = tpu.matmul %7, %9, %cst_11 {dimension_numbers = #tpu.dot_dimension_numbers<[1], [0], [0], [1], [0, 0, 1, 1], [], []>} : vector<2x128xbf16>, vector<128x128xbf16>, vector<2x128xf32> -> vector<2x128xf32>
    %c0_12 = arith.constant 0 : index
    %c0_13 = arith.constant 0 : index
    %11 = vector.load %arg6[%c0_12, %c0_13] : memref<2x128xf32, #tpu.memory_space<vmem>>, vector<2x128xf32>
    %12 = arith.addf %11, %10 : vector<2x128xf32>
    %c0_14 = arith.constant 0 : index
    %c0_15 = arith.constant 0 : index
    %13 = vector.load %arg6[%c0_14, %c0_15] : memref<2x128xf32, #tpu.memory_space<vmem>>, vector<2x128xf32>
    tpu.vector_store %arg6[%c0_14, %c0_15], %12 {strides = array<i32>} : memref<2x128xf32, #tpu.memory_space<vmem>>, vector<2x128xf32>,
    %c0_16 = arith.constant 0 : index
    %c1_17 = arith.constant 1 : index
    %c0_18 = arith.constant 0 : index
    %14 = vector.load %arg2[%c0_16, %c1_17, %c0_18] : memref<1x16x128xbf16, #tpu.memory_space<vmem>>, vector<1x2x128xbf16>
    %15 = vector.shape_cast %14 : vector<1x2x128xbf16> to vector<2x128xbf16>
    %c2 = arith.constant 2 : index
    %c0_19 = arith.constant 0 : index
    %c0_20 = arith.constant 0 : index
    %16 = vector.load %arg3[%c2, %c0_19, %c0_20] : memref<9x128x128xbf16, #tpu.memory_space<vmem>>, vector<1x128x128xbf16>
    %17 = vector.shape_cast %16 : vector<1x128x128xbf16> to vector<128x128xbf16>
    %cst_21 = arith.constant dense<0.000000e+00> : vector<2x128xf32>
    %18 = tpu.matmul %15, %17, %cst_21 {dimension_numbers = #tpu.dot_dimension_numbers<[1], [0], [0], [1], [0, 0, 1, 1], [], []>} : vector<2x128xbf16>, vector<128x128xbf16>, vector<2x128xf32> -> vector<2x128xf32>
    %c0_22 = arith.constant 0 : index
    %c0_23 = arith.constant 0 : index
    %19 = vector.load %arg6[%c0_22, %c0_23] : memref<2x128xf32, #tpu.memory_space<vmem>>, vector<2x128xf32>
    %20 = arith.addf %19, %18 : vector<2x128xf32>
    %c0_24 = arith.constant 0 : index
    %c0_25 = arith.constant 0 : index
    %21 = vector.load %arg6[%c0_24, %c0_25] : memref<2x128xf32, #tpu.memory_space<vmem>>, vector<2x128xf32>
    tpu.vector_store %arg6[%c0_24, %c0_25], %20 {strides = array<i32>} : memref<2x128xf32, #tpu.memory_space<vmem>>, vector<2x128xf32>,
    %c0_26 = arith.constant 0 : index
    %c8 = arith.constant 8 : index
    %c0_27 = arith.constant 0 : index
    %22 = vector.load %arg2[%c0_26, %c8, %c0_27] : memref<1x16x128xbf16, #tpu.memory_space<vmem>>, vector<1x2x128xbf16>
    %23 = vector.shape_cast %22 : vector<1x2x128xbf16> to vector<2x128xbf16>
    %c3 = arith.constant 3 : index
    %c0_28 = arith.constant 0 : index
    %c0_29 = arith.constant 0 : index
    %24 = vector.load %arg3[%c3, %c0_28, %c0_29] : memref<9x128x128xbf16, #tpu.memory_space<vmem>>, vector<1x128x128xbf16>
    %25 = vector.shape_cast %24 : vector<1x128x128xbf16> to vector<128x128xbf16>
    %cst_30 = arith.constant dense<0.000000e+00> : vector<2x128xf32>
    %26 = tpu.matmul %23, %25, %cst_30 {dimension_numbers = #tpu.dot_dimension_numbers<[1], [0], [0], [1], [0, 0, 1, 1], [], []>} : vector<2x128xbf16>, vector<128x128xbf16>, vector<2x128xf32> -> vector<2x128xf32>
    %c0_31 = arith.constant 0 : index
    %c0_32 = arith.constant 0 : index
    %27 = vector.load %arg6[%c0_31, %c0_32] : memref<2x128xf32, #tpu.memory_space<vmem>>, vector<2x128xf32>
    %28 = arith.addf %27, %26 : vector<2x128xf32>
    %c0_33 = arith.constant 0 : index
    %c0_34 = arith.constant 0 : index
    %29 = vector.load %arg6[%c0_33, %c0_34] : memref<2x128xf32, #tpu.memory_space<vmem>>, vector<2x128xf32>
    tpu.vector_store %arg6[%c0_33, %c0_34], %28 {strides = array<i32>} : memref<2x128xf32, #tpu.memory_space<vmem>>, vector<2x128xf32>,
    %c0_35 = arith.constant 0 : index
    %c12 = arith.constant 12 : index
    %c0_36 = arith.constant 0 : index
    %30 = vector.load %arg2[%c0_35, %c12, %c0_36] : memref<1x16x128xbf16, #tpu.memory_space<vmem>>, vector<1x2x128xbf16>
    %31 = vector.shape_cast %30 : vector<1x2x128xbf16> to vector<2x128xbf16>
    %c4_37 = arith.constant 4 : index
    %c0_38 = arith.constant 0 : index
    %c0_39 = arith.constant 0 : index
    %32 = vector.load %arg3[%c4_37, %c0_38, %c0_39] : memref<9x128x128xbf16, #tpu.memory_space<vmem>>, vector<1x128x128xbf16>
    %33 = vector.shape_cast %32 : vector<1x128x128xbf16> to vector<128x128xbf16>
    %cst_40 = arith.constant dense<0.000000e+00> : vector<2x128xf32>
    %34 = tpu.matmul %31, %33, %cst_40 {dimension_numbers = #tpu.dot_dimension_numbers<[1], [0], [0], [1], [0, 0, 1, 1], [], []>} : vector<2x128xbf16>, vector<128x128xbf16>, vector<2x128xf32> -> vector<2x128xf32>
    %c0_41 = arith.constant 0 : index
    %c0_42 = arith.constant 0 : index
    %35 = vector.load %arg6[%c0_41, %c0_42] : memref<2x128xf32, #tpu.memory_space<vmem>>, vector<2x128xf32>
    %36 = arith.addf %35, %34 : vector<2x128xf32>
    %c0_43 = arith.constant 0 : index
    %c0_44 = arith.constant 0 : index
    %37 = vector.load %arg6[%c0_43, %c0_44] : memref<2x128xf32, #tpu.memory_space<vmem>>, vector<2x128xf32>
    tpu.vector_store %arg6[%c0_43, %c0_44], %36 {strides = array<i32>} : memref<2x128xf32, #tpu.memory_space<vmem>>, vector<2x128xf32>,
    %c0_45 = arith.constant 0 : index
    %c9 = arith.constant 9 : index
    %c0_46 = arith.constant 0 : index
    %38 = vector.load %arg2[%c0_45, %c9, %c0_46] : memref<1x16x128xbf16, #tpu.memory_space<vmem>>, vector<1x2x128xbf16>
    %39 = vector.shape_cast %38 : vector<1x2x128xbf16> to vector<2x128xbf16>
    %c5 = arith.constant 5 : index
    %c0_47 = arith.constant 0 : index
    %c0_48 = arith.constant 0 : index
    %40 = vector.load %arg3[%c5, %c0_47, %c0_48] : memref<9x128x128xbf16, #tpu.memory_space<vmem>>, vector<1x128x128xbf16>
    %41 = vector.shape_cast %40 : vector<1x128x128xbf16> to vector<128x128xbf16>
    %cst_49 = arith.constant dense<0.000000e+00> : vector<2x128xf32>
    %42 = tpu.matmul %39, %41, %cst_49 {dimension_numbers = #tpu.dot_dimension_numbers<[1], [0], [0], [1], [0, 0, 1, 1], [], []>} : vector<2x128xbf16>, vector<128x128xbf16>, vector<2x128xf32> -> vector<2x128xf32>
    %c0_50 = arith.constant 0 : index
    %c0_51 = arith.constant 0 : index
    %43 = vector.load %arg6[%c0_50, %c0_51] : memref<2x128xf32, #tpu.memory_space<vmem>>, vector<2x128xf32>
    %44 = arith.addf %43, %42 : vector<2x128xf32>
    %c0_52 = arith.constant 0 : index
    %c0_53 = arith.constant 0 : index
    %45 = vector.load %arg6[%c0_52, %c0_53] : memref<2x128xf32, #tpu.memory_space<vmem>>, vector<2x128xf32>
    tpu.vector_store %arg6[%c0_52, %c0_53], %44 {strides = array<i32>} : memref<2x128xf32, #tpu.memory_space<vmem>>, vector<2x128xf32>,
    %c0_54 = arith.constant 0 : index
    %c2_55 = arith.constant 2 : index
    %c0_56 = arith.constant 0 : index
    %46 = vector.load %arg2[%c0_54, %c2_55, %c0_56] : memref<1x16x128xbf16, #tpu.memory_space<vmem>>, vector<1x2x128xbf16>
    %47 = vector.shape_cast %46 : vector<1x2x128xbf16> to vector<2x128xbf16>
    %c6 = arith.constant 6 : index
    %c0_57 = arith.constant 0 : index
    %c0_58 = arith.constant 0 : index
    %48 = vector.load %arg3[%c6, %c0_57, %c0_58] : memref<9x128x128xbf16, #tpu.memory_space<vmem>>, vector<1x128x128xbf16>
    %49 = vector.shape_cast %48 : vector<1x128x128xbf16> to vector<128x128xbf16>
    %cst_59 = arith.constant dense<0.000000e+00> : vector<2x128xf32>
    %50 = tpu.matmul %47, %49, %cst_59 {dimension_numbers = #tpu.dot_dimension_numbers<[1], [0], [0], [1], [0, 0, 1, 1], [], []>} : vector<2x128xbf16>, vector<128x128xbf16>, vector<2x128xf32> -> vector<2x128xf32>
    %c0_60 = arith.constant 0 : index
    %c0_61 = arith.constant 0 : index
    %51 = vector.load %arg6[%c0_60, %c0_61] : memref<2x128xf32, #tpu.memory_space<vmem>>, vector<2x128xf32>
    %52 = arith.addf %51, %50 : vector<2x128xf32>
    %c0_62 = arith.constant 0 : index
    %c0_63 = arith.constant 0 : index
    %53 = vector.load %arg6[%c0_62, %c0_63] : memref<2x128xf32, #tpu.memory_space<vmem>>, vector<2x128xf32>
    tpu.vector_store %arg6[%c0_62, %c0_63], %52 {strides = array<i32>} : memref<2x128xf32, #tpu.memory_space<vmem>>, vector<2x128xf32>,
    %c0_64 = arith.constant 0 : index
    %c6_65 = arith.constant 6 : index
    %c0_66 = arith.constant 0 : index
    %54 = vector.load %arg2[%c0_64, %c6_65, %c0_66] : memref<1x16x128xbf16, #tpu.memory_space<vmem>>, vector<1x2x128xbf16>
    %55 = vector.shape_cast %54 : vector<1x2x128xbf16> to vector<2x128xbf16>
    %c7 = arith.constant 7 : index
    %c0_67 = arith.constant 0 : index
    %c0_68 = arith.constant 0 : index
    %56 = vector.load %arg3[%c7, %c0_67, %c0_68] : memref<9x128x128xbf16, #tpu.memory_space<vmem>>, vector<1x128x128xbf16>
    %57 = vector.shape_cast %56 : vector<1x128x128xbf16> to vector<128x128xbf16>
    %cst_69 = arith.constant dense<0.000000e+00> : vector<2x128xf32>
    %58 = tpu.matmul %55, %57, %cst_69 {dimension_numbers = #tpu.dot_dimension_numbers<[1], [0], [0], [1], [0, 0, 1, 1], [], []>} : vector<2x128xbf16>, vector<128x128xbf16>, vector<2x128xf32> -> vector<2x128xf32>
    %c0_70 = arith.constant 0 : index
    %c0_71 = arith.constant 0 : index
    %59 = vector.load %arg6[%c0_70, %c0_71] : memref<2x128xf32, #tpu.memory_space<vmem>>, vector<2x128xf32>
    %60 = arith.addf %59, %58 : vector<2x128xf32>
    %c0_72 = arith.constant 0 : index
    %c0_73 = arith.constant 0 : index
    %61 = vector.load %arg6[%c0_72, %c0_73] : memref<2x128xf32, #tpu.memory_space<vmem>>, vector<2x128xf32>
    tpu.vector_store %arg6[%c0_72, %c0_73], %60 {strides = array<i32>} : memref<2x128xf32, #tpu.memory_space<vmem>>, vector<2x128xf32>,
    %c0_74 = arith.constant 0 : index
    %c3_75 = arith.constant 3 : index
    %c0_76 = arith.constant 0 : index
    %62 = vector.load %arg2[%c0_74, %c3_75, %c0_76] : memref<1x16x128xbf16, #tpu.memory_space<vmem>>, vector<1x2x128xbf16>
    %63 = vector.shape_cast %62 : vector<1x2x128xbf16> to vector<2x128xbf16>
    %c8_77 = arith.constant 8 : index
    %c0_78 = arith.constant 0 : index
    %c0_79 = arith.constant 0 : index
    %64 = vector.load %arg3[%c8_77, %c0_78, %c0_79] : memref<9x128x128xbf16, #tpu.memory_space<vmem>>, vector<1x128x128xbf16>
    %65 = vector.shape_cast %64 : vector<1x128x128xbf16> to vector<128x128xbf16>
    %cst_80 = arith.constant dense<0.000000e+00> : vector<2x128xf32>
    %66 = tpu.matmul %63, %65, %cst_80 {dimension_numbers = #tpu.dot_dimension_numbers<[1], [0], [0], [1], [0, 0, 1, 1], [], []>} : vector<2x128xbf16>, vector<128x128xbf16>, vector<2x128xf32> -> vector<2x128xf32>
    %c0_81 = arith.constant 0 : index
    %c0_82 = arith.constant 0 : index
    %67 = vector.load %arg6[%c0_81, %c0_82] : memref<2x128xf32, #tpu.memory_space<vmem>>, vector<2x128xf32>
    %68 = arith.addf %67, %66 : vector<2x128xf32>
    %c0_83 = arith.constant 0 : index
    %c0_84 = arith.constant 0 : index
    %69 = vector.load %arg6[%c0_83, %c0_84] : memref<2x128xf32, #tpu.memory_space<vmem>>, vector<2x128xf32>
    tpu.vector_store %arg6[%c0_83, %c0_84], %68 {strides = array<i32>} : memref<2x128xf32, #tpu.memory_space<vmem>>, vector<2x128xf32>,
    %c0_85 = arith.constant 0 : index
    %c0_86 = arith.constant 0 : index
    %70 = vector.load %arg6[%c0_85, %c0_86] : memref<2x128xf32, #tpu.memory_space<vmem>>, vector<2x128xf32>
    %c0_87 = arith.constant 0 : index
    %c0_88 = arith.constant 0 : index
    %71 = vector.load %arg4[%c0_87, %c0_88] : memref<1x128xf32, #tpu.memory_space<vmem>>, vector<1x128xf32>
    %72 = vector.broadcast %71 : vector<1x128xf32> to vector<2x128xf32>
    %73 = arith.addf %70, %72 : vector<2x128xf32>
    %cst_89 = arith.constant 0.000000e+00 : f32
    %74 = vector.broadcast %cst_89 : f32 to vector<2x128xf32>
    %75 = arith.maximumf %73, %74 : vector<2x128xf32>
    %76 = arith.truncf %75 : vector<2x128xf32> to vector<2x128xbf16>
    %c0_90 = arith.constant 0 : index
    %c0_91 = arith.constant 0 : index
    %c0_92 = arith.constant 0 : index
    %77 = vector.load %arg5[%c0_90, %c0_91, %c0_92] : memref<1x2x128xbf16, #tpu.memory_space<vmem>>, vector<1x2x128xbf16>
    %78 = vector.shape_cast %77 : vector<1x2x128xbf16> to vector<2x128xbf16>
    %79 = vector.shape_cast %76 : vector<2x128xbf16> to vector<1x2x128xbf16>
    tpu.vector_store %arg5[%c0_90, %c0_91, %c0_92], %79 {strides = array<i32>} : memref<1x2x128xbf16, #tpu.memory_space<vmem>>, vector<1x2x128xbf16>,
    return
  }
  func.func @transform_0(%arg0: i32, %arg1: i32) -> (i32, i32, i32) {
    %c0_i32 = arith.constant 0 : i32
    %c0_i32_0 = arith.constant 0 : i32
    %c0_i32_1 = arith.constant 0 : i32
    return %arg0, %c0_i32, %c0_i32_0 : i32, i32, i32
  }
  func.func @transform_1(%arg0: i32, %arg1: i32) -> (i32, i32, i32) {
    %c0_i32 = arith.constant 0 : i32
    %c0_i32_0 = arith.constant 0 : i32
    %c0_i32_1 = arith.constant 0 : i32
    %c0_i32_2 = arith.constant 0 : i32
    return %c0_i32, %c0_i32_0, %c0_i32_1 : i32, i32, i32
  }
  func.func @transform_2(%arg0: i32, %arg1: i32) -> (i32, i32) {
    %c0_i32 = arith.constant 0 : i32
    %c0_i32_0 = arith.constant 0 : i32
    %c0_i32_1 = arith.constant 0 : i32
    return %c0_i32, %c0_i32_0 : i32, i32
  }
  func.func @transform_3(%arg0: i32, %arg1: i32) -> (i32, i32, i32) {
    %c0_i32 = arith.constant 0 : i32
    %c0_i32_0 = arith.constant 0 : i32
    return %arg0, %arg1, %c0_i32 : i32, i32, i32
  }
}

module attributes {stable_mosaic.version = 11 : i64} {
  func.func @head_kernel(%arg0: i32, %arg1: memref<2x1x128xbf16, #tpu.memory_space<vmem>>, %arg2: memref<128x128xbf16, #tpu.memory_space<vmem>>, %arg3: memref<1x128xf32, #tpu.memory_space<vmem>>, %arg4: memref<2x128xf32, #tpu.memory_space<vmem>>, %arg5: memref<2x128xf32, #tpu.memory_space<vmem>>) attributes {dimension_semantics = [#tpu.dimension_semantics<arbitrary>], iteration_bounds = array<i64: 1>, scalar_prefetch = 0 : i64, scratch_operands = 1 : i64, tpu.core_type = #tpu.core_type<tc>, window_params = [{transform_indices = @transform_0, window_bounds = array<i64: 2, 1, 128>}, {pipeline_mode = #tpu.pipeline_mode<synchronous>, transform_indices = @transform_1, window_bounds = array<i64: 128, 128>}, {pipeline_mode = #tpu.pipeline_mode<synchronous>, transform_indices = @transform_2, window_bounds = array<i64: 1, 128>}, {pipeline_mode = #tpu.pipeline_mode<synchronous>, transform_indices = @transform_3, window_bounds = array<i64: 2, 128>}]} {
    %c0_i32 = arith.constant 0 : i32
    %0 = arith.cmpi eq, %arg0, %c0_i32 : i32
    %1 = arith.extui %0 : i1 to i32
    %c0_i32_0 = arith.constant 0 : i32
    %2 = arith.cmpi ne, %1, %c0_i32_0 : i32
    scf.if %2 {
      %cst_9 = arith.constant 0.000000e+00 : f32
      %12 = vector.broadcast %cst_9 : f32 to vector<2x128xf32>
      %c0_10 = arith.constant 0 : index
      %c0_11 = arith.constant 0 : index
      %13 = vector.load %arg5[%c0_10, %c0_11] : memref<2x128xf32, #tpu.memory_space<vmem>>, vector<2x128xf32>
      tpu.vector_store %arg5[%c0_10, %c0_11], %12 {strides = array<i32>} : memref<2x128xf32, #tpu.memory_space<vmem>>, vector<2x128xf32>,
    } else {
    }
    %c0 = arith.constant 0 : index
    %c0_1 = arith.constant 0 : index
    %3 = vector.load %arg5[%c0, %c0_1] : memref<2x128xf32, #tpu.memory_space<vmem>>, vector<2x128xf32>
    %c0_2 = arith.constant 0 : index
    %c0_3 = arith.constant 0 : index
    %c0_4 = arith.constant 0 : index
    %4 = vector.load %arg1[%c0_2, %c0_3, %c0_4] : memref<2x1x128xbf16, #tpu.memory_space<vmem>>, vector<2x1x128xbf16>
    %5 = arith.extf %4 : vector<2x1x128xbf16> to vector<2x1x128xf32>
    %cst = arith.constant dense<0.000000e+00> : vector<2x128xf32>
    %6 = vector.multi_reduction <add>, %5, %cst [1] : vector<2x1x128xf32> to vector<2x128xf32>
    %7 = arith.addf %3, %6 : vector<2x128xf32>
    %c0_5 = arith.constant 0 : index
    %c0_6 = arith.constant 0 : index
    %8 = vector.load %arg5[%c0_5, %c0_6] : memref<2x128xf32, #tpu.memory_space<vmem>>, vector<2x128xf32>
    tpu.vector_store %arg5[%c0_5, %c0_6], %7 {strides = array<i32>} : memref<2x128xf32, #tpu.memory_space<vmem>>, vector<2x128xf32>,
    %c0_i32_7 = arith.constant 0 : i32
    %9 = arith.cmpi eq, %arg0, %c0_i32_7 : i32
    %10 = arith.extui %9 : i1 to i32
    %c0_i32_8 = arith.constant 0 : i32
    %11 = arith.cmpi ne, %10, %c0_i32_8 : i32
    scf.if %11 {
      %c0_9 = arith.constant 0 : index
      %c0_10 = arith.constant 0 : index
      %12 = vector.load %arg5[%c0_9, %c0_10] : memref<2x128xf32, #tpu.memory_space<vmem>>, vector<2x128xf32>
      %cst_11 = arith.constant 1.000000e+00 : f32
      %13 = vector.broadcast %cst_11 : f32 to vector<2x128xf32>
      %14 = arith.mulf %12, %13 : vector<2x128xf32>
      %15 = arith.truncf %14 : vector<2x128xf32> to vector<2x128xbf16>
      %c0_12 = arith.constant 0 : index
      %c0_13 = arith.constant 0 : index
      %16 = vector.load %arg2[%c0_12, %c0_13] : memref<128x128xbf16, #tpu.memory_space<vmem>>, vector<128x128xbf16>
      %cst_14 = arith.constant dense<0.000000e+00> : vector<2x128xf32>
      %17 = tpu.matmul %15, %16, %cst_14 {dimension_numbers = #tpu.dot_dimension_numbers<[1], [0], [0], [1], [0, 0, 1, 1], [], []>} : vector<2x128xbf16>, vector<128x128xbf16>, vector<2x128xf32> -> vector<2x128xf32>
      %c0_15 = arith.constant 0 : index
      %c0_16 = arith.constant 0 : index
      %18 = vector.load %arg3[%c0_15, %c0_16] : memref<1x128xf32, #tpu.memory_space<vmem>>, vector<1x128xf32>
      %19 = vector.broadcast %18 : vector<1x128xf32> to vector<2x128xf32>
      %20 = arith.addf %17, %19 : vector<2x128xf32>
      %c0_17 = arith.constant 0 : index
      %c0_18 = arith.constant 0 : index
      %21 = vector.load %arg4[%c0_17, %c0_18] : memref<2x128xf32, #tpu.memory_space<vmem>>, vector<2x128xf32>
      tpu.vector_store %arg4[%c0_17, %c0_18], %20 {strides = array<i32>} : memref<2x128xf32, #tpu.memory_space<vmem>>, vector<2x128xf32>,
    } else {
    }
    return
  }
  func.func @transform_0(%arg0: i32) -> (i32, i32, i32) {
    %c0_i32 = arith.constant 0 : i32
    %c0_i32_0 = arith.constant 0 : i32
    %c0_i32_1 = arith.constant 0 : i32
    return %c0_i32, %arg0, %c0_i32_0 : i32, i32, i32
  }
  func.func @transform_1(%arg0: i32) -> (i32, i32) {
    %c0_i32 = arith.constant 0 : i32
    %c0_i32_0 = arith.constant 0 : i32
    %c0_i32_1 = arith.constant 0 : i32
    return %c0_i32, %c0_i32_0 : i32, i32
  }
  func.func @transform_2(%arg0: i32) -> (i32, i32) {
    %c0_i32 = arith.constant 0 : i32
    %c0_i32_0 = arith.constant 0 : i32
    %c0_i32_1 = arith.constant 0 : i32
    return %c0_i32, %c0_i32_0 : i32, i32
  }
  func.func @transform_3(%arg0: i32) -> (i32, i32) {
    %c0_i32 = arith.constant 0 : i32
    %c0_i32_0 = arith.constant 0 : i32
    %c0_i32_1 = arith.constant 0 : i32
    return %c0_i32, %c0_i32_0 : i32, i32
  }
}

</mosaic_0001>

<bundles_post_ra>
// kernel: fwd.7
= control target key start
LH: loop header
LB: loop body
LE: loop exit
PB: predicated region body
PF: predicated region fallthrough
CT: control target
= control target key end

     0   :  { %s6975_s12 = smov 0   ;;  %s6977_s13 = smov 0   ;;  %s8273_s0 = inlined_call_operand.vmem [shape: bf16[2,1156,16], index: 0, kind: input, shape index: {}]   ;;  %s8274_s1 = inlined_call_operand.vmem [shape: bf16[9,16,128], index: 1, kind: input, shape index: {}]   ;;  %s8275_s2 = inlined_call_operand.vmem [shape: f32[1,128], index: 2, kind: input, shape index: {}]   ;;  %s8276_s3 = inlined_call_operand.vmem [shape: bf16[2,272,128], index: 3, kind: output, shape index: {}]  }
   0x1   :  { %s6979_s14 = smov 0  }
   0x2 LB: > { %s25_s15 = sadd.s32 1, %s6947_s13  ;;  %p5423_p0 = scmp.ge.s32.totalorder %s6951_s14, 1  ;;  %s6951_s14 = sphi %s6979_s14, %s13_s14   ;;  %s6947_s13 = sphi %s6977_s13, %s8278_s13   ;;  %s6943_s12 = sphi %s6975_s12, %s8277_s12  }
   0x3   : > { %p27_p1 = scmp.ge.s32.totalorder %s25_s15, 2  ;;  %p151_p2 = scmp.lt.s32.totalorder %s6951_s14, 3 }
   0x5   : > { %s8280_s15 = smov (%p27_p1, %s25_s15), 0  ;;  %p152_p3 = pnand %p5423_p0, %p151_p2 }
   0x6   : > { %p179_p4 = scmp.lt.s32.totalorder (!%p152_p3), %s6943_s12, 1 }
   0x7   : > { %155 = sbr.rel (%p152_p3) target bundleno = 831 (0x33f), region = 32 }
   0xc   : > { %v6759_v0 = vld [vmem:[%s8274_s1] sm:$0xff]   ;;  %v6953_v1 = vmov 0.0   ;;  %vm6954_vm0 = vmmov 0   ;;  %s8282_s12 = smov (!%p179_p4, %s6943_s12), 1  ;;  %vm322_vm1 = vcmask 130048   ;;  %v6762_v2 = vld [vmem:[%s8274_s1 + $0x10] sm:$0xff]  }
   0xd   : > { %6099 = vmatprep.subr.bf16.mxu0 %v6953_v1  ;;  %6729 = vmatprep.subr.bf16.mxu1 %v6953_v1  ;;  %s6731_s18 = smul.u32 580, %s8282_s12  ;;  %v6763_v3 = vld [vmem:[%s8274_s1 + $0x8] sm:$0xff]   ;;  %vm703_vm2 = vsmask.f32 7424  ;;  %v6781_v34 = vld [vmem:[%s8274_s1 + $0x18] sm:$0xff]   ;;  %v6785_v46 = vld [vmem:[%s8274_s1 + $0x20] sm:$0xff]  }
   0xe   : > { %6100 = vmatpush3.bf16.msra.mxu0 %v6759_v0  ;;  %6730 = vmatpush3.bf16.msra.mxu1 %v6759_v0  ;;  %vm1892_vm3 = vcmask 1046528   ;;  %vm2382_vm4 = vsmask.f32 6400  ;;  %s6732_s17 = smul.u32 136, %s8282_s12 }
   0xf   : > { %6101 = vmatprep.mubr.msk.bf16.mxu0 %vm6954_vm0, %v6953_v1  ;;  %6137 = vmatprep.mubr.msk.bf16.mxu1 %vm6954_vm0, %v6953_v1  ;;  %s7016_s25 = scalar_lea.vmem %s8273_s0, %s6731_s18 }
  0x10   : > { %6239 = vmatprep.subr.bf16.mxu0 %v6953_v1  ;;  %6169 = vmatprep.subr.bf16.mxu1 %v6953_v1  ;;  %v6760_v4 = vld [vmem:[%s7016_s25] sm:$0xff]   ;;  %v6761_v5 = vld [vmem:[%s7016_s25 + $0x48] sm:$0xff]   ;;  %v6765_v7 = vld [vmem:[%s7016_s25 + $0x50] sm:$0xff]   ;;  %s8182_s20 = scalar_lea.vmem %s8276_s3, %s6732_s17 }
  0x11   : > { %6102 = vmatmul.mubr.msk.bf16.vlgmr.msra.gmra.mxu0 %vm322_vm1, %v6760_v4  ;;  %6138 = vmatmul.mubr.msk.bf16.vlgmr.msra.gmra.mxu1 %vm322_vm1, %v6761_v5  ;;  %v6764_v6 = vld [vmem:[%s7016_s25 + $0x8] sm:$0xff]   ;;  %v6766_v8 = vld [vmem:[%s7016_s25 + $0x10] sm:$0xff]   ;;  %v6767_v9 = vld [vmem:[%s7016_s25 + $0x58] sm:$0xff]  }
  0x12   : > { %6240 = vmatpush3.bf16.msra.mxu0 %v6762_v2  ;;  %6170 = vmatpush3.bf16.msra.mxu1 %v6763_v3  ;;  %v6768_v10 = vld [vmem:[%s7016_s25 + $0x18] sm:$0xff]   ;;  %v6769_v11 = vld [vmem:[%s7016_s25 + $0x60] sm:$0xff]   ;;  %v6771_v13 = vld [vmem:[%s7016_s25 + $0x68] sm:$0xff]  }
  0x13   : > { %6105 = vmatprep.mubr.msk.bf16.mxu0 %vm6954_vm0, %v6953_v1  ;;  %6141 = vmatprep.mubr.msk.bf16.mxu1 %vm6954_vm0, %v6953_v1  ;;  %v6770_v12 = vld [vmem:[%s7016_s25 + $0x20] sm:$0xff]   ;;  %v6772_v14 = vld [vmem:[%s7016_s25 + $0x28] sm:$0xff]   ;;  %v6773_v15 = vld [vmem:[%s7016_s25 + $0x70] sm:$0xff]  }
  0x14   : > { %6309 = vmatprep.subr.bf16.mxu1 %v6953_v1  ;;  %6379 = vmatprep.subr.bf16.mxu0 %v6953_v1  ;;  %v6774_v16 = vld [vmem:[%s7016_s25 + $0x30] sm:$0xff]   ;;  %v6775_v17 = vld [vmem:[%s7016_s25 + $0x78] sm:$0xff]   ;;  %v6777_v22 = vld [vmem:[%s7016_s25 + $0x80] sm:$0xff]  }
  0x15   : > { %v6779_v18 = vld [vmem:[%s7016_s25 + $0x90] sm:$0xff]   ;;  %v6780_v19 = vld [vmem:[%s7016_s25 + $0x98] sm:$0xff]   ;;  %v6783_v24 = vld [vmem:[%s7016_s25] sm:$0xff]  }
  0x16   : > { %v707_v20 = vshll.u32 %v6779_v18, 16  ;;  %v6776_v21 = vld [vmem:[%s7016_s25 + $0x38] sm:$0xff]   ;;  %v705_v23 = vshrl.u32 %v6779_v18, 16  ;;  %v712_v26 = vshll.u32 %v6780_v19, 16  ;;  %v6784_v27 = vld [vmem:[%s7016_s25 + $0x8] sm:$0xff]   ;;  %v1301_v28 = vshll.u32 %v6783_v24, 16 }
  0x17   : > { %v6782_v31 = vld [vmem:[%s7016_s25 + $0xa0] sm:$0xff]   ;;  %v1306_v33 = vshll.u32 %v6784_v27, 16  ;;  %v1299_v35 = vshrl.u32 %v6783_v24, 16  ;;  %v716_v38 = vshrl.u32 %v6780_v19, 16  ;;  %v6787_v41 = vld [vmem:[%s7016_s25 + $0x10] sm:$0xff]   ;;  %v6786_v45 = vld [vmem:[%s7016_s25 + $0xa8] sm:$0xff]  }
  0x18   : > { %v709_v25 = vrot.slane %v707_v20, 1  ;;  %v714_v30 = vrot.slane %v712_v26, 1  ;;  %v6778_v32 = vld [vmem:[%s7016_s25 + $0x40] sm:$0xff]   ;;  %v1303_v36 = vrot.slane %v1301_v28, 1  ;;  %v720_v39 = vshll.u32 %v6782_v31, 16  ;;  %v6789_v54 = vld [vmem:[%s7016_s25 + $0x18] sm:$0xff]  }
  0x19   : > { %6106 = vmatmul.mubr.msk.bf16.gmra.mxu0 %vm322_vm1, %v6764_v6  ;;  %6142 = vmatmul.mubr.msk.bf16.gmra.mxu1 %vm322_vm1, %v6765_v7  ;;  %v1308_v40 = vrot.slane %v1306_v33, 1  ;;  %v1310_v47 = vshrl.u32 %v6784_v27, 16  ;;  %v1314_v48 = vshll.u32 %v6787_v41, 16  ;;  %v724_v51 = vshrl.u32 %v6782_v31, 16  ;;  %v6788_v58 = vld [vmem:[%s7016_s25 + $0xb0] sm:$0xff]   ;;  %v6791_v2 = vld [vmem:[%s7016_s25 + $0x20] sm:$0xff]  }
  0x1a   : > { %6109 = vmatprep.mubr.msk.bf16.mxu0 %vm6954_vm0, %v6953_v1  ;;  %6145 = vmatprep.mubr.msk.bf16.mxu1 %vm6954_vm0, %v6953_v1  ;;  %v710_v29 = vor.u32 %v709_v25, %v705_v23  ;;  %v1304_v42 = vor.u32 %v1303_v36, %v1299_v35  ;;  %v718_v43 = vor.u32 %v716_v38, %v714_v30  ;;  %v722_v44 = vrot.slane %v720_v39, 1  ;;  %v6790_v7 = vld [vmem:[%s7016_s25 + $0xb8] sm:$0xff]   ;;  %v6792_v19 = vld [vmem:[%s7016_s25 + $0xc0] sm:$0xff]   ;;  %v6795_v27 = vld [vmem:[%s7016_s25 + $0x30] sm:$0xff]  }
  0x1b   : > { %v728_v52 = vshll.u32 %v6786_v45, 16  ;;  %v1316_v53 = vrot.slane %v1314_v48, 1  ;;  %v1312_v55 = vor.u32 %v1310_v47, %v1308_v40  ;;  %v1318_v59 = vshrl.u32 %v6787_v41, 16  ;;  %v6794_v31 = vld [vmem:[%s7016_s25 + $0xc8] sm:$0xff]   ;;  %v6797_v39 = vld [vmem:[%s7016_s25 + $0x38] sm:$0xff]  }
  0x1c   : > { %v715_v37 = vsel %vm703_vm2, %v710_v29, %v714_v30  ;;  %v1309_v49 = vsel %vm703_vm2, %v1304_v42, %v1308_v40  ;;  %v723_v50 = vsel %vm703_vm2, %v718_v43, %v722_v44  ;;  %v726_v56 = vor.u32 %v724_v51, %v722_v44  ;;  %v6796_v43 = vld [vmem:[%s7016_s25 + $0xd0] sm:$0xff]   ;;  %v6799_v51 = vld [vmem:[%s7016_s25 + $0x40] sm:$0xff]  }
  0x1d   : > { %v730_v57 = vrot.slane %v728_v52, 1  ;;  %v1322_v60 = vshll.u32 %v6789_v54, 16  ;;  %v1317_v61 = vsel %vm703_vm2, %v1312_v55, %v1316_v53  ;;  %v732_v63 = vshrl.u32 %v6786_v45, 16  ;;  %v6798_v55 = vld [vmem:[%s7016_s25 + $0xd8] sm:$0xff]  }
  0x1e   : > { %v736_v0 = vshll.u32 %v6788_v58, 16  ;;  %v1320_v3 = vor.u32 %v1318_v59, %v1316_v53  ;;  %v1334_v20 = vshrl.u32 %v6791_v2, 16  ;;  %v748_v24 = vshrl.u32 %v6790_v7, 16 }
  0x1f   : > { %v731_v62 = vsel %vm703_vm2, %v726_v56, %v730_v57  ;;  %v1324_v4 = vrot.slane %v1322_v60, 1  ;;  %v734_v5 = vor.u32 %v732_v63, %v730_v57  ;;  %v752_v25 = vshll.u32 %v6792_v19, 16  ;;  %v6801_v63 = vld [vmem:[%s7016_s25 + $0x48] sm:$0xff]  }
  0x20   : > { %v738_v6 = vrot.slane %v736_v0, 1  ;;  %v1346_v33 = vshll.u32 %v6795_v27, 16  ;;  %v756_v36 = vshrl.u32 %v6792_v19, 16  ;;  %v1350_v44 = vshrl.u32 %v6795_v27, 16 }
  0x21   : > { %6110 = vmatmul.mubr.msk.bf16.gmra.mxu0 %vm322_vm1, %v6766_v8  ;;  %6146 = vmatmul.mubr.msk.bf16.gmra.mxu1 %vm322_vm1, %v6767_v9  ;;  %v1326_v8 = vshrl.u32 %v6789_v54, 16  ;;  %v1330_v9 = vshll.u32 %v6791_v2, 16  ;;  %v754_v30 = vrot.slane %v752_v25, 1  ;;  %v1354_v45 = vshll.u32 %v6797_v39, 16 }
  0x22   : > { %6113 = vmatprep.mubr.msk.bf16.mxu0 %vm6954_vm0, %v6953_v1  ;;  %6149 = vmatprep.mubr.msk.bf16.mxu1 %vm6954_vm0, %v6953_v1  ;;  %v1348_v38 = vrot.slane %v1346_v33, 1  ;;  %v764_v48 = vshrl.u32 %v6794_v31, 16  ;;  %v1358_v56 = vshrl.u32 %v6797_v39, 16  ;;  %v1362_v57 = vshll.u32 %v6799_v51, 16 }
  0x23   : > { %v758_v41 = vor.u32 %v756_v36, %v754_v30  ;;  %v772_v60 = vshrl.u32 %v6796_v43, 16  ;;  %v6807_v36 = vld [vmem:[%s7016_s25 + $0x60] sm:$0xff]  }
  0x24   : > { %v1352_v52 = vor.u32 %v1350_v44, %v1348_v38 }
  0x29   : > { %6114 = vmatmul.mubr.msk.bf16.gmra.mxu0 %vm322_vm1, %v6768_v10  ;;  %6150 = vmatmul.mubr.msk.bf16.gmra.mxu1 %vm322_vm1, %v6769_v11  ;;  %v1325_v10 = vsel %vm703_vm2, %v1320_v3, %v1324_v4  ;;  %v739_v11 = vsel %vm703_vm2, %v734_v5, %v738_v6  ;;  %v1366_v5 = vshrl.u32 %v6799_v51, 16 }
  0x2a   : > { %6117 = vmatprep.mubr.msk.bf16.mxu0 %vm6954_vm0, %v6953_v1  ;;  %6153 = vmatprep.mubr.msk.bf16.mxu1 %vm6954_vm0, %v6953_v1 }
  0x31   : > { %6118 = vmatmul.mubr.msk.bf16.gmra.mxu0 %vm322_vm1, %v6770_v12  ;;  %6154 = vmatmul.mubr.msk.bf16.gmra.mxu1 %vm322_vm1, %v6771_v13  ;;  %v740_v12 = vshrl.u32 %v6788_v58, 16  ;;  %v744_v13 = vshll.u32 %v6790_v7, 16 }
  0x32   : > { %6121 = vmatprep.mubr.msk.bf16.mxu0 %vm6954_vm0, %v6953_v1  ;;  %6157 = vmatprep.mubr.msk.bf16.mxu1 %vm6954_vm0, %v6953_v1 }
  0x33   : > { %v746_v18 = vrot.slane %v744_v13, 1 }
  0x35   : > { %v750_v29 = vor.u32 %v748_v24, %v746_v18  ;;  %v6805_v24 = vld [vmem:[%s7016_s25 + $0x58] sm:$0xff]  }
  0x37   : > { %v755_v35 = vsel %vm703_vm2, %v750_v29, %v754_v30  ;;  %v1386_v30 = vshll.u32 %v6805_v24, 16 }
  0x39   : > { %6122 = vmatmul.mubr.msk.bf16.gmra.mxu0 %vm322_vm1, %v6772_v14  ;;  %6158 = vmatmul.mubr.msk.bf16.gmra.mxu1 %vm322_vm1, %v6773_v15  ;;  %v1332_v14 = vrot.slane %v1330_v9, 1  ;;  %v6793_v15 = vld [vmem:[%s7016_s25 + $0x28] sm:$0xff]   ;;  %v780_v9 = vshrl.u32 %v6798_v55, 16 }
  0x3a   : > { %6125 = vmatprep.mubr.msk.bf16.mxu0 %vm6954_vm0, %v6953_v1  ;;  %6161 = vmatprep.mubr.msk.bf16.mxu1 %vm6954_vm0, %v6953_v1 }
  0x3b   : > { %v1336_v28 = vor.u32 %v1334_v20, %v1332_v14 }
  0x41   : > { %6126 = vmatmul.mubr.msk.bf16.gmra.mxu0 %vm322_vm1, %v6774_v16  ;;  %6162 = vmatmul.mubr.msk.bf16.gmra.mxu1 %vm322_vm1, %v6775_v17  ;;  %v1328_v16 = vor.u32 %v1326_v8, %v1324_v4  ;;  %v742_v17 = vor.u32 %v740_v12, %v738_v6  ;;  %v6800_v4 = vld [vmem:[%s7016_s25 + $0xe0] sm:$0xff]   ;;  %v1370_v6 = vshll.u32 %v6801_v63, 16  ;;  %v6803_v12 = vld [vmem:[%s7016_s25 + $0x50] sm:$0xff]  }
  0x42   : > { %6129 = vmatprep.mubr.msk.bf16.mxu0 %vm6954_vm0, %v6953_v1  ;;  %6165 = vmatprep.mubr.msk.bf16.mxu1 %vm6954_vm0, %v6953_v1  ;;  %v1382_v29 = vshrl.u32 %v6803_v12, 16 }
  0x43   : > { %v747_v23 = vsel %vm703_vm2, %v742_v17, %v746_v18  ;;  %v1374_v17 = vshrl.u32 %v6801_v63, 16  ;;  %v1378_v18 = vshll.u32 %v6803_v12, 16 }
  0x49   : > { %6130 = vmatmul.mubr.msk.bf16.gmra.mxu0 %vm322_vm1, %v6776_v21  ;;  %6166 = vmatmul.mubr.msk.bf16.gmra.mxu1 %vm322_vm1, %v6777_v22  ;;  %v1338_v21 = vshll.u32 %v6793_v15, 16  ;;  %v1333_v22 = vsel %vm703_vm2, %v1328_v16, %v1332_v14  ;;  %v6802_v16 = vld [vmem:[%s7016_s25 + $0xe8] sm:$0xff]  }
  0x4a   : > { %6133 = vmatprep.mubr.msk.bf16.mxu0 %vm6954_vm0, %v6953_v1  ;;  %6171 = vmatprep.mubr.msk.bf16.mxu1 %vm6954_vm0, %v6953_v1  ;;  %v796_v33 = vshrl.u32 %v6802_v16, 16 }
  0x4b   : > { %v1340_v26 = vrot.slane %v1338_v21, 1  ;;  %v788_v21 = vshrl.u32 %v6800_v4, 16 }
  0x51   : > { %6134 = vmatmul.mubr.msk.bf16.gmra.mxu0 %vm322_vm1, %v6778_v32  ;;  %6172 = vmatmul.mubr.msk.bf16.vlgmr.msra.gmra.mxu1 %vm322_vm1, %v715_v37  ;;  %v1342_v32 = vshrl.u32 %v6793_v15, 16  ;;  %v760_v37 = vshll.u32 %v6794_v31, 16 }
  0x52   : > { %6241 = vmatprep.mubr.msk.bf16.mxu0 %vm6954_vm0, %v6953_v1  ;;  %6310 = vmatpush3.bf16.msra.mxu1 %v6781_v34  ;;  %v1341_v34 = vsel %vm703_vm2, %v1336_v28, %v1340_v26  ;;  %v6804_v28 = vld [vmem:[%s7016_s25 + $0xf0] sm:$0xff]  }
  0x53   : > { %6175 = vmatprep.mubr.msk.bf16.mxu1 %vm6954_vm0, %v6953_v1  ;;  %6449 = vmatprep.subr.bf16.mxu1 %v6953_v1  ;;  %v1344_v40 = vor.u32 %v1342_v32, %v1340_v26  ;;  %v762_v42 = vrot.slane %v760_v37, 1 }
  0x55   : > { %v763_v47 = vsel %vm703_vm2, %v758_v41, %v762_v42  ;;  %v766_v53 = vor.u32 %v764_v48, %v762_v42  ;;  %v1390_v41 = vshrl.u32 %v6805_v24, 16  ;;  %v1394_v42 = vshll.u32 %v6807_v36, 16  ;;  %v6809_v48 = vld [vmem:[%s7016_s25 + $0x68] sm:$0xff]  }
  0x59   : > { %6242 = vmatmul.mubr.msk.bf16.vlgmr.msra.gmra.mxu0 %vm322_vm1, %v1309_v49  ;;  %6176 = vmatmul.mubr.msk.bf16.gmra.mxu1 %vm322_vm1, %v723_v50  ;;  %v768_v49 = vshll.u32 %v6796_v43, 16  ;;  %v1356_v50 = vrot.slane %v1354_v45, 1  ;;  %v804_v45 = vshrl.u32 %v6804_v28, 16 }
  0x5a   : > { %6380 = vmatpush3.bf16.msra.mxu0 %v6785_v46  ;;  %6179 = vmatprep.mubr.msk.bf16.mxu1 %vm6954_vm0, %v6953_v1  ;;  %v1349_v46 = vsel %vm703_vm2, %v1344_v40, %v1348_v38  ;;  %v6806_v40 = vld [vmem:[%s7016_s25 + $0xf8] sm:$0xff]  }
  0x5b   : > { %6245 = vmatprep.mubr.msk.bf16.mxu0 %vm6954_vm0, %v6953_v1  ;;  %6519 = vmatprep.subr.bf16.mxu0 %v6953_v1  ;;  %v770_v54 = vrot.slane %v768_v49, 1  ;;  %v1357_v58 = vsel %vm703_vm2, %v1352_v52, %v1356_v50  ;;  %v1360_v0 = vor.u32 %v1358_v56, %v1356_v50  ;;  %v6808_v52 = vld [vmem:[%s7016_s25 + $0x100] sm:$0xff]  }
  0x5d   : > { %v771_v59 = vsel %vm703_vm2, %v766_v53, %v770_v54  ;;  %v774_v2 = vor.u32 %v772_v60, %v770_v54  ;;  %v1398_v54 = vshrl.u32 %v6807_v36, 16 }
  0x61   : > { %6246 = vmatmul.mubr.msk.bf16.gmra.mxu0 %vm322_vm1, %v1317_v61  ;;  %6180 = vmatmul.mubr.msk.bf16.gmra.mxu1 %vm322_vm1, %v731_v62  ;;  %v776_v61 = vshll.u32 %v6798_v55, 16  ;;  %v1364_v62 = vrot.slane %v1362_v57, 1  ;;  %v1402_v55 = vshll.u32 %v6809_v48, 16  ;;  %v812_v57 = vshrl.u32 %v6806_v40, 16 }
  0x62   : > { %6249 = vmatprep.mubr.msk.bf16.mxu0 %vm6954_vm0, %v6953_v1  ;;  %6183 = vmatprep.mubr.msk.bf16.mxu1 %vm6954_vm0, %v6953_v1 }
  0x63   : > { %v778_v3 = vrot.slane %v776_v61, 1  ;;  %v1365_v7 = vsel %vm703_vm2, %v1360_v0, %v1364_v62  ;;  %v1368_v13 = vor.u32 %v1366_v5, %v1364_v62  ;;  %v1404_v60 = vrot.slane %v1402_v55, 1  ;;  %v6811_v61 = vld [vmem:[%s7016_s25 + $0x70] sm:$0xff]   ;;  %v6810_v0 = vld [vmem:[%s7016_s25 + $0x108] sm:$0xff]  }
  0x65   : > { %v779_v8 = vsel %vm703_vm2, %v774_v2, %v778_v3  ;;  %v782_v14 = vor.u32 %v780_v9, %v778_v3  ;;  %v1406_v3 = vshrl.u32 %v6809_v48, 16 }
  0x69   : > { %6250 = vmatmul.mubr.msk.bf16.gmra.mxu0 %vm322_vm1, %v1325_v10  ;;  %6184 = vmatmul.mubr.msk.bf16.gmra.mxu1 %vm322_vm1, %v739_v11  ;;  %v784_v10 = vshll.u32 %v6800_v4, 16  ;;  %v1372_v11 = vrot.slane %v1370_v6, 1  ;;  %v1410_v4 = vshll.u32 %v6811_v61, 16  ;;  %v820_v6 = vshrl.u32 %v6808_v52, 16 }
  0x6a   : > { %6253 = vmatprep.mubr.msk.bf16.mxu0 %vm6954_vm0, %v6953_v1  ;;  %6187 = vmatprep.mubr.msk.bf16.mxu1 %vm6954_vm0, %v6953_v1 }
  0x6b   : > { %v786_v15 = vrot.slane %v784_v10, 1  ;;  %v1373_v19 = vsel %vm703_vm2, %v1368_v13, %v1372_v11  ;;  %v1376_v25 = vor.u32 %v1374_v17, %v1372_v11  ;;  %v1412_v9 = vrot.slane %v1410_v4, 1  ;;  %v6813_v10 = vld [vmem:[%s7016_s25 + $0x78] sm:$0xff]   ;;  %v6812_v13 = vld [vmem:[%s7016_s25 + $0x110] sm:$0xff]   ;;  %v6819_v4 = vld [vmem:[%s8274_s1 + $0x28] sm:$0xff]  }
  0x6d   : > { %v787_v20 = vsel %vm703_vm2, %v782_v14, %v786_v15  ;;  %v790_v26 = vor.u32 %v788_v21, %v786_v15  ;;  %v1414_v15 = vshrl.u32 %v6811_v61, 16 }
  0x71   : > { %6254 = vmatmul.mubr.msk.bf16.gmra.mxu0 %vm322_vm1, %v1333_v22  ;;  %6188 = vmatmul.mubr.msk.bf16.gmra.mxu1 %vm322_vm1, %v747_v23  ;;  %v792_v22 = vshll.u32 %v6802_v16, 16  ;;  %v1380_v23 = vrot.slane %v1378_v18, 1  ;;  %v1418_v16 = vshll.u32 %v6813_v10, 16  ;;  %v828_v18 = vshrl.u32 %v6810_v0, 16 }
  0x72   : > { %6257 = vmatprep.mubr.msk.bf16.mxu0 %vm6954_vm0, %v6953_v1  ;;  %6191 = vmatprep.mubr.msk.bf16.mxu1 %vm6954_vm0, %v6953_v1 }
  0x73   : > { %v794_v27 = vrot.slane %v792_v22, 1  ;;  %v1381_v31 = vsel %vm703_vm2, %v1376_v25, %v1380_v23  ;;  %v1384_v37 = vor.u32 %v1382_v29, %v1380_v23  ;;  %v1420_v21 = vrot.slane %v1418_v16, 1  ;;  %v6815_v22 = vld [vmem:[%s7016_s25 + $0x80] sm:$0xff]   ;;  %v6814_v25 = vld [vmem:[%s7016_s25 + $0x118] ss:$0 sps:$4 sm:$0x11]  }
  0x75   : > { %v795_v32 = vsel %vm703_vm2, %v790_v26, %v794_v27  ;;  %v798_v38 = vor.u32 %v796_v33, %v794_v27  ;;  %v1422_v27 = vshrl.u32 %v6813_v10, 16 }
  0x77   : > { %v1424_v33 = vor.u32 %v1422_v27, %v1420_v21 }
  0x79   : > { %6258 = vmatmul.mubr.msk.bf16.gmra.mxu0 %vm322_vm1, %v1341_v34  ;;  %6192 = vmatmul.mubr.msk.bf16.gmra.mxu1 %vm322_vm1, %v755_v35  ;;  %v800_v34 = vshll.u32 %v6804_v28, 16  ;;  %v1388_v35 = vrot.slane %v1386_v30, 1  ;;  %v1426_v28 = vshll.u32 %v6815_v22, 16  ;;  %v836_v30 = vshrl.u32 %v6812_v13, 16 }
  0x7a   : > { %6261 = vmatprep.mubr.msk.bf16.mxu0 %vm6954_vm0, %v6953_v1  ;;  %6195 = vmatprep.mubr.msk.bf16.mxu1 %vm6954_vm0, %v6953_v1 }
  0x7b   : > { %v802_v39 = vrot.slane %v800_v34, 1  ;;  %v1389_v43 = vsel %vm703_vm2, %v1384_v37, %v1388_v35  ;;  %v1392_v49 = vor.u32 %v1390_v41, %v1388_v35  ;;  %v1428_v34 = vrot.slane %v1426_v28, 1  ;;  %v6822_v41 = vld [vmem:[%s7016_s25 + $0x1b8] sm:$0xff]  }
  0x7c   : > { %v1430_v37 = vshrl.u32 %v6815_v22, 16  ;;  %v6827_v22 = vld [vmem:[%s7016_s25 + $0x1c8] sm:$0xff]  }
  0x7d   : > { %v803_v44 = vsel %vm703_vm2, %v798_v38, %v802_v39  ;;  %v806_v50 = vor.u32 %v804_v45, %v802_v39  ;;  %v1429_v39 = vsel %vm703_vm2, %v1424_v33, %v1428_v34 }
  0x81   : > { %6262 = vmatmul.mubr.msk.bf16.gmra.mxu0 %vm322_vm1, %v1349_v46  ;;  %6196 = vmatmul.mubr.msk.bf16.gmra.mxu1 %vm322_vm1, %v763_v47  ;;  %v808_v46 = vshll.u32 %v6806_v40, 16  ;;  %v1396_v47 = vrot.slane %v1394_v42, 1  ;;  %v6821_v40 = vld [vmem:[%s7016_s25 + $0x1b0] sm:$0xfe]  }
  0x82   : > { %6265 = vmatprep.mubr.msk.bf16.mxu0 %vm6954_vm0, %v6953_v1  ;;  %6199 = vmatprep.mubr.msk.bf16.mxu1 %vm6954_vm0, %v6953_v1 }
  0x83   : > { %v810_v51 = vrot.slane %v808_v46, 1  ;;  %v1397_v53 = vsel %vm703_vm2, %v1392_v49, %v1396_v47  ;;  %v1432_v46 = vor.u32 %v1430_v37, %v1428_v34  ;;  %v2384_v49 = vshrl.u32 %v6821_v40, 16 }
  0x85   : > { %v811_v56 = vsel %vm703_vm2, %v806_v50, %v810_v51  ;;  %v814_v62 = vor.u32 %v812_v57, %v810_v51  ;;  %v2387_v50 = vshll.u32 %v6821_v40, 16  ;;  %v2392_v51 = vshrl.u32 %v6822_v41, 16  ;;  %v6829_v40 = vld [vmem:[%s7016_s25 + $0x1d0] sm:$0xff]  }
  0x87   : > { %v2389_v61 = vrot.slane %v2387_v50, 2  ;;  %v2419_v50 = vshrl.u32 %v6829_v40, 16 }
  0x89   : > { %6266 = vmatmul.mubr.msk.bf16.gmra.mxu0 %vm322_vm1, %v1357_v58  ;;  %6200 = vmatmul.mubr.msk.bf16.gmra.mxu1 %vm322_vm1, %v771_v59  ;;  %v816_v58 = vshll.u32 %v6808_v52, 16  ;;  %v1400_v59 = vor.u32 %v1398_v54, %v1396_v47  ;;  %v2395_v52 = vshll.u32 %v6822_v41, 16 }
  0x8a   : > { %6269 = vmatprep.mubr.msk.bf16.mxu0 %vm6954_vm0, %v6953_v1  ;;  %6203 = vmatprep.mubr.msk.bf16.mxu1 %vm6954_vm0, %v6953_v1 }
  0x8b   : > { %v818_v63 = vrot.slane %v816_v58, 1  ;;  %v1405_v2 = vsel %vm703_vm2, %v1400_v59, %v1404_v60 }
  0x8d   : > { %v819_v5 = vsel %vm703_vm2, %v814_v62, %v818_v63  ;;  %v822_v11 = vor.u32 %v820_v6, %v818_v63  ;;  %v2394_v62 = vrot.slane %v2392_v51, 1  ;;  %v2397_v63 = vrot.slane %v2395_v52, 2 }
  0x8e   : > { %v2422_v51 = vshll.u32 %v6829_v40, 16 }
  0x8f   : > { %v2398_v10 = vor.u32 %v2397_v63, %v2394_v62  ;;  %v6831_v62 = vld [vmem:[%s7016_s25 + $0x1d8] sm:$0xff]  }
  0x91   : > { %6270 = vmatmul.mubr.msk.bf16.gmra.mxu0 %vm322_vm1, %v1365_v7  ;;  %6204 = vmatmul.mubr.msk.bf16.gmra.mxu1 %vm322_vm1, %v779_v8  ;;  %v824_v7 = vshll.u32 %v6810_v0, 16  ;;  %v1408_v8 = vor.u32 %v1406_v3, %v1404_v60  ;;  %v2386_v60 = vrot.slane %v2384_v49, 1  ;;  %v6825_v0 = vld [vmem:[%s7016_s25 + $0x1c0] sm:$0xff]  }
  0x92   : > { %6273 = vmatprep.mubr.msk.bf16.mxu0 %vm6954_vm0, %v6953_v1  ;;  %6207 = vmatprep.mubr.msk.bf16.mxu1 %vm6954_vm0, %v6953_v1 }
  0x93   : > { %v826_v12 = vrot.slane %v824_v7, 1  ;;  %v1413_v14 = vsel %vm703_vm2, %v1408_v8, %v1412_v9 }
  0x95   : > { %v827_v17 = vsel %vm703_vm2, %v822_v11, %v826_v12  ;;  %v830_v23 = vor.u32 %v828_v18, %v826_v12  ;;  %v2401_v11 = vshrl.u32 %v6825_v0, 16  ;;  %v2404_v12 = vshll.u32 %v6825_v0, 16 }
  0x99   : > { %6274 = vmatmul.mubr.msk.bf16.gmra.mxu0 %vm322_vm1, %v1373_v19  ;;  %6208 = vmatmul.mubr.msk.bf16.gmra.mxu1 %vm322_vm1, %v787_v20  ;;  %v832_v19 = vshll.u32 %v6812_v13, 16  ;;  %v1416_v20 = vor.u32 %v1414_v15, %v1412_v9  ;;  %v2390_v9 = vor.u32 %v2389_v61, %v2386_v60  ;;  %v2421_v60 = vrot.slane %v2419_v50, 1  ;;  %v6832_v50 = vld [vmem:[%s7016_s25 + $0x158] sm:$0xff]  }
  0x9a   : > { %6277 = vmatprep.mubr.msk.bf16.mxu0 %vm6954_vm0, %v6953_v1  ;;  %6211 = vmatprep.mubr.msk.bf16.mxu1 %vm6954_vm0, %v6953_v1  ;;  %v2424_v61 = vrot.slane %v2422_v51, 2 }
  0x9b   : > { %v834_v24 = vrot.slane %v832_v19, 1  ;;  %v1421_v26 = vsel %vm703_vm2, %v1416_v20, %v1420_v21  ;;  %v2399_v18 = vsel %vm2382_vm4, %v2390_v9, %v2398_v10  ;;  %v6823_v19 = vld [vmem:[%s8274_s1 + $0x30] sm:$0xff]   ;;  %v2403_v20 = vrot.slane %v2401_v11, 1 }
  0x9c   : > { %v2406_v21 = vrot.slane %v2404_v12, 2  ;;  %v2428_v9 = vshrl.u32 %v6831_v62, 16 }
  0x9d   : > { %v835_v29 = vsel %vm703_vm2, %v830_v23, %v834_v24  ;;  %v838_v35 = vor.u32 %v836_v30, %v834_v24  ;;  %v2410_v30 = vshrl.u32 %v6827_v22, 16 }
  0xa1   : > { %6278 = vmatmul.mubr.msk.bf16.gmra.mxu0 %vm322_vm1, %v1381_v31  ;;  %6212 = vmatmul.mubr.msk.bf16.gmra.mxu1 %vm322_vm1, %v795_v32  ;;  %v840_v31 = vshll.u32 %v6814_v25, 16  ;;  %v6816_v32 = vld [vmem:[%s7016_s25 + $0x88] ss:$0 sps:$4 sm:$0x11]   ;;  %v6824_v25 = vld [vmem:[%s7016_s25 + $0x138] sm:$0xff]  }
  0xa2   : > { %6281 = vmatprep.mubr.msk.bf16.mxu0 %vm6954_vm0, %v6953_v1  ;;  %6215 = vmatprep.mubr.msk.bf16.mxu1 %vm6954_vm0, %v6953_v1  ;;  %v1434_v38 = vshll.u32 %v6816_v32, 16  ;;  %v1898_v33 = vrot.slane %v6824_v25, 1 }
  0xa3   : > { %v842_v36 = vrot.slane %v840_v31, 1  ;;  %v2413_v31 = vshll.u32 %v6827_v22, 16 }
  0xa4   : > { %v1436_v47 = vrot.slane %v1434_v38, 1  ;;  %v2412_v38 = vrot.slane %v2410_v30, 1 }
  0xa5   : > { %v843_v42 = vsel %vm703_vm2, %v838_v35, %v842_v36 }
  0xa6   : > { %v1437_v58 = vsel %vm703_vm2, %v1432_v46, %v1436_v47 }
  0xa9   : > { %6282 = vmatmul.mubr.msk.bf16.gmra.mxu0 %vm322_vm1, %v1389_v43  ;;  %6216 = vmatmul.mubr.msk.bf16.gmra.mxu1 %vm322_vm1, %v803_v44  ;;  %v6817_v43 = vld [vmem:[%s7016_s25 + $0x120] sm:$0xfe]   ;;  %v6818_v44 = vld [vmem:[%s7016_s25 + $0x128] sm:$0xff]  }
  0xaa   : > { %6285 = vmatprep.mubr.msk.bf16.mxu0 %vm6954_vm0, %v6953_v1  ;;  %6219 = vmatprep.mubr.msk.bf16.mxu1 %vm6954_vm0, %v6953_v1  ;;  %v1893_v54 = vrot.slane %v6817_v43, 1  ;;  %v1894_v55 = vrot.slane %v6818_v44, 1  ;;  %v6826_v43 = vld [vmem:[%s7016_s25 + $0x140] sm:$0xff]  }
  0xac   : > { %v1895_v3 = vsel %vm1892_vm3, %v1893_v54, %v1894_v55 }
  0xb1   : > { %6286 = vmatmul.mubr.msk.bf16.gmra.mxu0 %vm322_vm1, %v1397_v53  ;;  %6220 = vmatmul.mubr.msk.bf16.gmra.mxu1 %vm322_vm1, %v811_v56 }
  0xb2   : > { %6289 = vmatprep.mubr.msk.bf16.mxu0 %vm6954_vm0, %v6953_v1  ;;  %6223 = vmatprep.mubr.msk.bf16.mxu1 %vm6954_vm0, %v6953_v1 }
  0xb9   : > { %6290 = vmatmul.mubr.msk.bf16.gmra.mxu0 %vm322_vm1, %v1405_v2  ;;  %6224 = vmatmul.mubr.msk.bf16.gmra.mxu1 %vm322_vm1, %v819_v5  ;;  %v6820_v5 = vld [vmem:[%s7016_s25 + $0x130] sm:$0xff]  }
  0xba   : > { %6293 = vmatprep.mubr.msk.bf16.mxu0 %vm6954_vm0, %v6953_v1  ;;  %6227 = vmatprep.mubr.msk.bf16.mxu1 %vm6954_vm0, %v6953_v1 }
  0xc1   : > { %6294 = vmatmul.mubr.msk.bf16.gmra.mxu0 %vm322_vm1, %v1413_v14  ;;  %6228 = vmatmul.mubr.msk.bf16.gmra.mxu1 %vm322_vm1, %v827_v17  ;;  %v1896_v14 = vrot.slane %v6820_v5, 1 }
  0xc2   : > { %6297 = vmatprep.mubr.msk.bf16.mxu0 %vm6954_vm0, %v6953_v1  ;;  %6231 = vmatprep.mubr.msk.bf16.mxu1 %vm6954_vm0, %v6953_v1 }
  0xc3   : > { %v1897_v24 = vsel %vm1892_vm3, %v1894_v55, %v1896_v14 }
  0xc9   : > { %6298 = vmatmul.mubr.msk.bf16.gmra.mxu0 %vm322_vm1, %v1421_v26  ;;  %6232 = vmatmul.mubr.msk.bf16.gmra.mxu1 %vm322_vm1, %v835_v29  ;;  %v2407_v29 = vor.u32 %v2406_v21, %v2403_v20  ;;  %v6833_v21 = vld [vmem:[%s7016_s25 + $0x1e0] sm:$0xff]  }
  0xca   : > { %6301 = vmatprep.mubr.msk.bf16.mxu0 %vm6954_vm0, %v6953_v1  ;;  %6235 = vmatprep.mubr.msk.bf16.mxu1 %vm6954_vm0, %v6953_v1 }
  0xcb   : > { %v2408_v37 = vsel %vm2382_vm4, %v2398_v10, %v2407_v29  ;;  %v2431_v10 = vshll.u32 %v6831_v62, 16  ;;  %v1906_v62 = vrot.slane %v6832_v50, 1 }
  0xcd   : > { %v2433_v20 = vrot.slane %v2431_v10, 2  ;;  %v6837_v10 = vld [vmem:[%s7016_s25 + $0x1f0] sm:$0xff]  }
  0xd1   : > { %v7262_v45 = vpop.f32.mrf.mxu0  ;;  %6302 = vmatmul.mubr.msk.bf16.gmra.mxu0 %vm322_vm1, %v1429_v39  ;;  %v7265_v48 = vpop.f32.mrf.mxu1  ;;  %6236 = vmatmul.mubr.msk.bf16.gmra.mxu1 %vm322_vm1, %v843_v42  ;;  %v2415_v39 = vrot.slane %v2413_v31, 2  ;;  %v1899_v42 = vsel %vm1892_vm3, %v1896_v14, %v1898_v33  ;;  %v2437_v31 = vshrl.u32 %v6833_v21, 16 }
  0xd2   : > { %6305 = vmatprep.mubr.msk.bf16.mxu0 %vm6954_vm0, %v6953_v1  ;;  %6311 = vmatprep.mubr.msk.bf16.mxu1 %vm6954_vm0, %v6953_v1 }
  0xd3   : > { %v6103_v53 = vpop.f32.mrf.mxu0  ;;  %v6139_v56 = vpop.f32.mrf.mxu1  ;;  %v2416_v49 = vor.u32 %v2415_v39, %v2412_v38 }
  0xd4   : > { %v1900_v53 = vrot.slane %v6826_v43, 1  ;;  %v6835_v43 = vld [vmem:[%s7016_s25 + $0x1e8] sm:$0xff]  }
  0xd5   : > { %v7272_v57 = vpop.f32.mrf.mxu0  ;;  %v7275_v59 = vpop.f32.mrf.mxu1 }
  0xd6   : > { %v1901_v0 = vsel %vm1892_vm3, %v1898_v33, %v1900_v53 }
  0xd7   : > { %v6104_v2 = vpop.f32.mrf.mxu0  ;;  %v6140_v6 = vpop.f32.mrf.mxu1 }
  0xd8   : > { %v6828_v2 = vld [vmem:[%s7016_s25 + $0x148] sm:$0xff]   ;;  %v2425_v6 = vor.u32 %v2424_v61, %v2421_v60  ;;  %v2449_v60 = vshll.u32 %v6835_v43, 16 }
  0xd9   : > { %v7283_v7 = vpop.f32.mrf.mxu0  ;;  %6306 = vmatmul.mubr.msk.bf16.gmra.mxu0 %vm322_vm1, %v1437_v58  ;;  %v7286_v8 = vpop.f32.mrf.mxu1  ;;  %6312 = vmatmul.mubr.msk.bf16.vlgmr.msra.gmra.mxu1 %vm322_vm1, %v1895_v3  ;;  %v2417_v58 = vsel %vm2382_vm4, %v2407_v29, %v2416_v49  ;;  %v1902_v12 = vrot.slane %v6828_v2, 1 }
  0xda   : > { %6381 = vmatprep.mubr.msk.bf16.mxu0 %vm6954_vm0, %v6953_v1  ;;  %6450 = vmatpush3.bf16.msra.mxu1 %v6819_v4 }
  0xdb   : > { %v6107_v13 = vpop.f32.mrf.mxu0  ;;  %6315 = vmatprep.mubr.msk.bf16.mxu1 %vm6954_vm0, %v6953_v1  ;;  %v6143_v15 = vpop.f32.mrf.mxu1  ;;  %6589 = vmatprep.subr.bf16.mxu1 %v6953_v1 }
  0xdd   : > { %v7294_v16 = vpop.f32.mrf.mxu0  ;;  %v7296_v17 = vpop.f32.mrf.mxu1 }
  0xdf   : > { %v6108_v23 = vpop.f32.mrf.mxu0  ;;  %v6144_v26 = vpop.f32.mrf.mxu1 }
  0xe0   : > { %v1903_v23 = vsel %vm1892_vm3, %v1900_v53, %v1902_v12 }
  0xe1   : > { %v7305_v27 = vpop.f32.mrf.mxu0  ;;  %6382 = vmatmul.mubr.msk.bf16.vlgmr.msra.gmra.mxu0 %vm322_vm1, %v2399_v18  ;;  %v7308_v28 = vpop.f32.mrf.mxu1  ;;  %6316 = vmatmul.mubr.msk.bf16.gmra.mxu1 %vm322_vm1, %v1897_v24  ;;  %v2426_v18 = vsel %vm2382_vm4, %v2416_v49, %v2425_v6  ;;  %v6830_v24 = vld [vmem:[%s7016_s25 + $0x150] sm:$0xff]  }
  0xe2   : > { %6520 = vmatpush3.bf16.msra.mxu0 %v6823_v19  ;;  %6319 = vmatprep.mubr.msk.bf16.mxu1 %vm6954_vm0, %v6953_v1  ;;  %v2430_v19 = vrot.slane %v2428_v9, 1  ;;  %v2451_v9 = vrot.slane %v2449_v60, 2 }
  0xe3   : > { %v6111_v32 = vpop.f32.mrf.mxu0  ;;  %6385 = vmatprep.mubr.msk.bf16.mxu0 %vm6954_vm0, %v6953_v1  ;;  %v6147_v34 = vpop.f32.mrf.mxu1  ;;  %6659 = vmatprep.subr.bf16.mxu0 %v6953_v1 }
  0xe4   : > { %v2434_v30 = vor.u32 %v2433_v20, %v2430_v19  ;;  %v2440_v32 = vshll.u32 %v6833_v21, 16  ;;  %v1904_v34 = vrot.slane %v6830_v24, 1 }
  0xe5   : > { %v7316_v35 = vpop.f32.mrf.mxu0  ;;  %v7318_v36 = vpop.f32.mrf.mxu1 }
  0xe6   : > { %v2435_v40 = vsel %vm2382_vm4, %v2425_v6, %v2434_v30  ;;  %v1905_v49 = vsel %vm1892_vm3, %v1902_v12, %v1904_v34  ;;  %v1907_v12 = vsel %vm1892_vm3, %v1904_v34, %v1906_v62 }
  0xe7   : > { %v6112_v41 = vpop.f32.mrf.mxu0  ;;  %v6148_v44 = vpop.f32.mrf.mxu1 }
  0xe8   : > { %v2439_v41 = vrot.slane %v2437_v31, 1 }
  0xe9   : > { %v7324_v46 = vpop.f32.mrf.mxu0  ;;  %6386 = vmatmul.mubr.msk.bf16.gmra.mxu0 %vm322_vm1, %v2408_v37  ;;  %v7327_v47 = vpop.f32.mrf.mxu1  ;;  %6320 = vmatmul.mubr.msk.bf16.gmra.mxu1 %vm322_vm1, %v1899_v42  ;;  %v2442_v42 = vrot.slane %v2440_v32, 2 }
  0xea   : > { %6389 = vmatprep.mubr.msk.bf16.mxu0 %vm6954_vm0, %v6953_v1  ;;  %6323 = vmatprep.mubr.msk.bf16.mxu1 %vm6954_vm0, %v6953_v1 }
  0xeb   : > { %v6115_v52 = vpop.f32.mrf.mxu0  ;;  %v6151_v54 = vpop.f32.mrf.mxu1 }
  0xec   : > { %v2443_v54 = vor.u32 %v2442_v42, %v2439_v41 }
  0xed   : > { %v7334_v55 = vpop.f32.mrf.mxu0  ;;  %v7336_v56 = vpop.f32.mrf.mxu1 }
  0xef   : > { %v6116_v63 = vpop.f32.mrf.mxu0  ;;  %v6152_v3 = vpop.f32.mrf.mxu1 }
  0xf0   : > { %v2444_v3 = vsel %vm2382_vm4, %v2434_v30, %v2443_v54 }
  0xf1   : > { %v7342_v4 = vpop.f32.mrf.mxu0  ;;  %6390 = vmatmul.mubr.msk.bf16.gmra.mxu0 %vm322_vm1, %v2417_v58  ;;  %v7345_v5 = vpop.f32.mrf.mxu1  ;;  %6324 = vmatmul.mubr.msk.bf16.gmra.mxu1 %vm322_vm1, %v1901_v0  ;;  %v2446_v58 = vshrl.u32 %v6835_v43, 16  ;;  %v6836_v43 = vld [vmem:[%s7016_s25 + $0x168] sm:$0xff]  }
  0xf2   : > { %6393 = vmatprep.mubr.msk.bf16.mxu0 %vm6954_vm0, %v6953_v1  ;;  %6327 = vmatprep.mubr.msk.bf16.mxu1 %vm6954_vm0, %v6953_v1 }
  0xf3   : > { %v6119_v11 = vpop.f32.mrf.mxu0  ;;  %v6155_v13 = vpop.f32.mrf.mxu1  ;;  %v2448_v6 = vrot.slane %v2446_v58, 1 }
  0xf4   : > { %v6834_v13 = vld [vmem:[%s7016_s25 + $0x160] sm:$0xff]  }
  0xf5   : > { %v7352_v14 = vpop.f32.mrf.mxu0  ;;  %v7354_v15 = vpop.f32.mrf.mxu1  ;;  %v2452_v21 = vor.u32 %v2451_v9, %v2448_v6 }
  0xf7   : > { %v6120_v22 = vpop.f32.mrf.mxu0  ;;  %v6156_v25 = vpop.f32.mrf.mxu1 }
  0xf8   : > { %v2455_v22 = vshrl.u32 %v6837_v10, 16  ;;  %v1908_v25 = vrot.slane %v6834_v13, 1 }
  0xf9   : > { %v7360_v26 = vpop.f32.mrf.mxu0  ;;  %6394 = vmatmul.mubr.msk.bf16.gmra.mxu0 %vm322_vm1, %v2426_v18  ;;  %v7363_v29 = vpop.f32.mrf.mxu1  ;;  %6328 = vmatmul.mubr.msk.bf16.gmra.mxu1 %vm322_vm1, %v1903_v23  ;;  %v2458_v23 = vshll.u32 %v6837_v10, 16 }
  0xfa   : > { %6397 = vmatprep.mubr.msk.bf16.mxu0 %vm6954_vm0, %v6953_v1  ;;  %6331 = vmatprep.mubr.msk.bf16.mxu1 %vm6954_vm0, %v6953_v1  ;;  %v2457_v34 = vrot.slane %v2455_v22, 1  ;;  %v1909_v42 = vsel %vm1892_vm3, %v1906_v62, %v1908_v25  ;;  %v1910_v62 = vrot.slane %v6836_v43, 1 }
  0xfb   : > { %v6123_v33 = vpop.f32.mrf.mxu0  ;;  %v6159_v37 = vpop.f32.mrf.mxu1 }
  0xfc   : > { %v2453_v33 = vsel %vm2382_vm4, %v2443_v54, %v2452_v21  ;;  %v2460_v37 = vrot.slane %v2458_v23, 2  ;;  %v1911_v22 = vsel %vm1892_vm3, %v1908_v25, %v1910_v62 }
  0xfd   : > { %v7370_v38 = vpop.f32.mrf.mxu0  ;;  %v7372_v39 = vpop.f32.mrf.mxu1 }
  0xff   : > { %v6124_v44 = vpop.f32.mrf.mxu0  ;;  %v6160_v51 = vpop.f32.mrf.mxu1 }
 0x100   : > { %v2461_v51 = vor.u32 %v2460_v37, %v2457_v34 }
 0x101   : > { %v7378_v52 = vpop.f32.mrf.mxu0  ;;  %6398 = vmatmul.mubr.msk.bf16.gmra.mxu0 %vm322_vm1, %v2435_v40  ;;  %v7381_v53 = vpop.f32.mrf.mxu1  ;;  %6332 = vmatmul.mubr.msk.bf16.gmra.mxu1 %vm322_vm1, %v1905_v49  ;;  %v6839_v40 = vld [vmem:[%s7016_s25 + $0x1f8] sm:$0xff]  }
 0x102   : > { %6401 = vmatprep.mubr.msk.bf16.mxu0 %vm6954_vm0, %v6953_v1  ;;  %6335 = vmatprep.mubr.msk.bf16.mxu1 %vm6954_vm0, %v6953_v1  ;;  %v2464_v54 = vshrl.u32 %v6839_v40, 16  ;;  %v2467_v58 = vshll.u32 %v6839_v40, 16  ;;  %v2462_v9 = vsel %vm2382_vm4, %v2452_v21, %v2461_v51 }
 0x103   : > { %v6127_v61 = vpop.f32.mrf.mxu0  ;;  %v6163_v63 = vpop.f32.mrf.mxu1 }
 0x104   : > { %v2466_v10 = vrot.slane %v2464_v54, 1 }
 0x105   : > { %v7388_v0 = vpop.f32.mrf.mxu0  ;;  %v7390_v2 = vpop.f32.mrf.mxu1 }
 0x107   : > { %v6128_v11 = vpop.f32.mrf.mxu0  ;;  %v6164_v18 = vpop.f32.mrf.mxu1 }
 0x108   : > { %v2469_v11 = vrot.slane %v2467_v58, 2 }
 0x109   : > { %v7396_v19 = vpop.f32.mrf.mxu0  ;;  %6402 = vmatmul.mubr.msk.bf16.gmra.mxu0 %vm322_vm1, %v2444_v3  ;;  %v7399_v20 = vpop.f32.mrf.mxu1  ;;  %6336 = vmatmul.mubr.msk.bf16.gmra.mxu1 %vm322_vm1, %v1907_v12  ;;  %v6841_v12 = vld [vmem:[%s7016_s25 + $0x200] sm:$0xff]  }
 0x10a   : > { %6405 = vmatprep.mubr.msk.bf16.mxu0 %vm6954_vm0, %v6953_v1  ;;  %6339 = vmatprep.mubr.msk.bf16.mxu1 %vm6954_vm0, %v6953_v1  ;;  %v2470_v21 = vor.u32 %v2469_v11, %v2466_v10  ;;  %v2473_v34 = vshrl.u32 %v6841_v12, 16 }
 0x10b   : > { %v6131_v24 = vpop.f32.mrf.mxu0  ;;  %v6167_v30 = vpop.f32.mrf.mxu1 }
 0x10c   : > { %v2475_v54 = vrot.slane %v2473_v34, 1 }
 0x10d   : > { %v7406_v31 = vpop.f32.mrf.mxu0  ;;  %v7408_v32 = vpop.f32.mrf.mxu1 }
 0x10f   : > { %v6132_v41 = vpop.f32.mrf.mxu0  ;;  %v6168_v44 = vpop.f32.mrf.mxu1 }
 0x111   : > { %v7414_v49 = vpop.f32.mrf.mxu0  ;;  %6406 = vmatmul.mubr.msk.bf16.gmra.mxu0 %vm322_vm1, %v2453_v33  ;;  %v935_v50 = vpop.f32.mrf.mxu1  ;;  %6340 = vmatmul.mubr.msk.bf16.gmra.mxu1 %vm322_vm1, %v1909_v42 }
 0x112   : > { %6409 = vmatprep.mubr.msk.bf16.mxu0 %vm6954_vm0, %v6953_v1  ;;  %v1104_v60 = vadd.f32 %v935_v50, %v7262_v45  ;;  %6343 = vmatprep.mubr.msk.bf16.mxu1 %vm6954_vm0, %v6953_v1  ;;  %v6838_v45 = vld [vmem:[%s7016_s25 + $0x170] sm:$0xff]   ;;  %v2471_v50 = vsel %vm2382_vm4, %v2461_v51, %v2470_v21 }
 0x113   : > { %v6135_v61 = vpop.f32.mrf.mxu0  ;;  %v6173_v63 = vpop.f32.mrf.mxu1  ;;  %v1912_v40 = vrot.slane %v6838_v45, 1 }
 0x115   : > { %v7423_v3 = vpop.f32.mrf.mxu0  ;;  %v938_v6 = vpop.f32.mrf.mxu1 }
 0x116   : > { %v1105_v13 = vadd.f32 %v938_v6, %v7272_v57  ;;  %v2476_v57 = vshll.u32 %v6841_v12, 16  ;;  %v6840_v6 = vld [vmem:[%s7016_s25 + $0x178] sm:$0xff]  }
 0x117   : > { %v6136_v18 = vpop.f32.mrf.mxu0  ;;  %v6174_v23 = vpop.f32.mrf.mxu1 }
 0x118   : > { %v2478_v58 = vrot.slane %v2476_v57, 2 }
 0x119   : > { %v1529_v24 = vpop.f32.mrf.mxu0  ;;  %6410 = vmatmul.mubr.msk.bf16.gmra.mxu0 %vm322_vm1, %v2462_v9  ;;  %v943_v30 = vpop.f32.mrf.mxu1  ;;  %6344 = vmatmul.mubr.msk.bf16.gmra.mxu1 %vm322_vm1, %v1911_v22  ;;  %v1914_v22 = vrot.slane %v6840_v6, 1 }
 0x11a   : > { %v7431_v33 = vadd.f32 %v1529_v24, %v1104_v60  ;;  %6413 = vmatprep.mubr.msk.bf16.mxu0 %vm6954_vm0, %v6953_v1  ;;  %v1106_v25 = vadd.f32 %v943_v30, %v7283_v7  ;;  %6347 = vmatprep.mubr.msk.bf16.mxu1 %vm6954_vm0, %v6953_v1  ;;  %v6843_v60 = vld [vmem:[%s7016_s25 + $0x208] sm:$0xff]   ;;  %v1913_v7 = vsel %vm1892_vm3, %v1910_v62, %v1912_v40 }
 0x11b   : > { %v6243_v37 = vpop.f32.mrf.mxu0  ;;  %v6177_v41 = vpop.f32.mrf.mxu1  ;;  %v2479_v51 = vor.u32 %v2478_v58, %v2475_v54 }
 0x11c   : > { %v6845_v37 = vld [vmem:[%s7016_s25 + $0x210] sm:$0xff]  }
 0x11d   : > { %v1532_v42 = vpop.f32.mrf.mxu0  ;;  %v946_v43 = vpop.f32.mrf.mxu1  ;;  %v2480_v34 = vsel %vm2382_vm4, %v2470_v21, %v2479_v51 }
 0x11e   : > { %v7439_v44 = vadd.f32 %v1532_v42, %v1105_v13  ;;  %v1107_v61 = vadd.f32 %v946_v43, %v7294_v16  ;;  %v2482_v13 = vshrl.u32 %v6843_v60, 16  ;;  %v2485_v16 = vshll.u32 %v6843_v60, 16  ;;  %v6842_v43 = vld [vmem:[%s7016_s25 + $0x180] sm:$0xff]  }
 0x11f   : > { %v6244_v63 = vpop.f32.mrf.mxu0  ;;  %v6178_v9 = vpop.f32.mrf.mxu1 }
 0x120   : > { %v2484_v57 = vrot.slane %v2482_v13, 1 }
 0x121   : > { %v1537_v10 = vpop.f32.mrf.mxu0  ;;  %6414 = vmatmul.mubr.msk.bf16.gmra.mxu0 %vm322_vm1, %v2471_v50  ;;  %v951_v11 = vpop.f32.mrf.mxu1  ;;  %6348 = vmatmul.mubr.msk.bf16.gmra.mxu1 %vm322_vm1, %v1913_v7  ;;  %v1916_v7 = vrot.slane %v6842_v43, 1 }
 0x122   : > { %v7447_v12 = vadd.f32 %v1537_v10, %v1106_v25  ;;  %6417 = vmatprep.mubr.msk.bf16.mxu0 %vm6954_vm0, %v6953_v1  ;;  %v1108_v62 = vadd.f32 %v951_v11, %v7305_v27  ;;  %6351 = vmatprep.mubr.msk.bf16.mxu1 %vm6954_vm0, %v6953_v1  ;;  %v2487_v25 = vrot.slane %v2485_v16, 2  ;;  %v1915_v27 = vsel %vm1892_vm3, %v1912_v40, %v1914_v22 }
 0x123   : > { %v6247_v18 = vpop.f32.mrf.mxu0  ;;  %v6181_v45 = vpop.f32.mrf.mxu1 }
 0x124   : > { %v2488_v21 = vor.u32 %v2487_v25, %v2484_v57  ;;  %v6847_v18 = vld [vmem:[%s7016_s25 + $0x218] sm:$0xff]  }
 0x125   : > { %v1540_v23 = vpop.f32.mrf.mxu0  ;;  %v954_v24 = vpop.f32.mrf.mxu1 }
 0x126   : > { %v7455_v30 = vadd.f32 %v1540_v23, %v1107_v61  ;;  %v1109_v41 = vadd.f32 %v954_v24, %v7316_v35  ;;  %v2491_v61 = vshrl.u32 %v6845_v37, 16  ;;  %v2494_v35 = vshll.u32 %v6845_v37, 16  ;;  %v6844_v24 = vld [vmem:[%s7016_s25 + $0x188] sm:$0xff]  }
 0x127   : > { %v6248_v42 = vpop.f32.mrf.mxu0  ;;  %v6182_v50 = vpop.f32.mrf.mxu1  ;;  %v2489_v13 = vsel %vm2382_vm4, %v2479_v51, %v2488_v21 }
 0x128   : > { %v2493_v16 = vrot.slane %v2491_v61, 1 }
 0x129   : > { %v1545_v54 = vpop.f32.mrf.mxu0  ;;  %6418 = vmatmul.mubr.msk.bf16.gmra.mxu0 %vm322_vm1, %v2480_v34  ;;  %v959_v58 = vpop.f32.mrf.mxu1  ;;  %6352 = vmatmul.mubr.msk.bf16.gmra.mxu1 %vm322_vm1, %v1915_v27  ;;  %v1918_v27 = vrot.slane %v6844_v24, 1 }
 0x12a   : > { %v7463_v60 = vadd.f32 %v1545_v54, %v1108_v62  ;;  %6421 = vmatprep.mubr.msk.bf16.mxu0 %vm6954_vm0, %v6953_v1  ;;  %v1110_v40 = vadd.f32 %v959_v58, %v7324_v46  ;;  %6355 = vmatprep.mubr.msk.bf16.mxu1 %vm6954_vm0, %v6953_v1  ;;  %v2496_v62 = vrot.slane %v2494_v35, 2  ;;  %v1917_v46 = vsel %vm1892_vm3, %v1914_v22, %v1916_v7 }
 0x12b   : > { %v6251_v63 = vpop.f32.mrf.mxu0  ;;  %v6185_v6 = vpop.f32.mrf.mxu1 }
 0x12c   : > { %v2497_v51 = vor.u32 %v2496_v62, %v2493_v16  ;;  %v6849_v63 = vld [vmem:[%s7016_s25 + $0x220] sm:$0xff]  }
 0x12d   : > { %v1548_v9 = vpop.f32.mrf.mxu0  ;;  %v962_v10 = vpop.f32.mrf.mxu1 }
 0x12e   : > { %v7471_v11 = vadd.f32 %v1548_v9, %v1109_v41  ;;  %v1111_v45 = vadd.f32 %v962_v10, %v7334_v55  ;;  %v2500_v41 = vshrl.u32 %v6847_v18, 16  ;;  %v2503_v55 = vshll.u32 %v6847_v18, 16  ;;  %v6846_v10 = vld [vmem:[%s7016_s25 + $0x190] sm:$0xff]  }
 0x12f   : > { %v6252_v23 = vpop.f32.mrf.mxu0  ;;  %v6186_v34 = vpop.f32.mrf.mxu1  ;;  %v2498_v61 = vsel %vm2382_vm4, %v2488_v21, %v2497_v51 }
 0x130   : > { %v2502_v35 = vrot.slane %v2500_v41, 1 }
 0x131   : > { %v1553_v57 = vpop.f32.mrf.mxu0  ;;  %6422 = vmatmul.mubr.msk.bf16.gmra.mxu0 %vm322_vm1, %v2489_v13  ;;  %v967_v25 = vpop.f32.mrf.mxu1  ;;  %6356 = vmatmul.mubr.msk.bf16.gmra.mxu1 %vm322_vm1, %v1917_v46  ;;  %v1920_v46 = vrot.slane %v6846_v10, 1 }
 0x132   : > { %v7479_v37 = vadd.f32 %v1553_v57, %v1110_v40  ;;  %6425 = vmatprep.mubr.msk.bf16.mxu0 %vm6954_vm0, %v6953_v1  ;;  %v1112_v22 = vadd.f32 %v967_v25, %v7342_v4  ;;  %6359 = vmatprep.mubr.msk.bf16.mxu1 %vm6954_vm0, %v6953_v1  ;;  %v2505_v40 = vrot.slane %v2503_v55, 2  ;;  %v1919_v4 = vsel %vm1892_vm3, %v1916_v7, %v1918_v27 }
 0x133   : > { %v6255_v42 = vpop.f32.mrf.mxu0  ;;  %v6189_v43 = vpop.f32.mrf.mxu1 }
 0x134   : > { %v2506_v21 = vor.u32 %v2505_v40, %v2502_v35  ;;  %v6851_v42 = vld [vmem:[%s7016_s25 + $0x228] sm:$0xff]  }
 0x135   : > { %v1556_v50 = vpop.f32.mrf.mxu0  ;;  %v970_v54 = vpop.f32.mrf.mxu1 }
 0x136   : > { %v7487_v58 = vadd.f32 %v1556_v50, %v1111_v45  ;;  %v1113_v6 = vadd.f32 %v970_v54, %v7352_v14  ;;  %v2509_v45 = vshrl.u32 %v6849_v63, 16  ;;  %v2512_v14 = vshll.u32 %v6849_v63, 16  ;;  %v6848_v54 = vld [vmem:[%s7016_s25 + $0x198] sm:$0xff]  }
 0x137   : > { %v6256_v9 = vpop.f32.mrf.mxu0  ;;  %v6190_v13 = vpop.f32.mrf.mxu1  ;;  %v2507_v41 = vsel %vm2382_vm4, %v2497_v51, %v2506_v21 }
 0x138   : > { %v2511_v55 = vrot.slane %v2509_v45, 1 }
 0x139   : > { %v1561_v16 = vpop.f32.mrf.mxu0  ;;  %6426 = vmatmul.mubr.msk.bf16.gmra.mxu0 %vm322_vm1, %v2498_v61  ;;  %v975_v62 = vpop.f32.mrf.mxu1  ;;  %6360 = vmatmul.mubr.msk.bf16.gmra.mxu1 %vm322_vm1, %v1919_v4  ;;  %v1922_v4 = vrot.slane %v6848_v54, 1 }
 0x13a   : > { %v7495_v18 = vadd.f32 %v1561_v16, %v1112_v22  ;;  %6429 = vmatprep.mubr.msk.bf16.mxu0 %vm6954_vm0, %v6953_v1  ;;  %v1114_v7 = vadd.f32 %v975_v62, %v7360_v26  ;;  %6363 = vmatprep.mubr.msk.bf16.mxu1 %vm6954_vm0, %v6953_v1  ;;  %v2514_v22 = vrot.slane %v2512_v14, 2  ;;  %v1921_v26 = vsel %vm1892_vm3, %v1918_v27, %v1920_v46 }
 0x13b   : > { %v6259_v23 = vpop.f32.mrf.mxu0  ;;  %v6193_v24 = vpop.f32.mrf.mxu1 }
 0x13c   : > { %v2515_v51 = vor.u32 %v2514_v22, %v2511_v55  ;;  %v6853_v23 = vld [vmem:[%s7016_s25 + $0x230] sm:$0xff]  }
 0x13d   : > { %v1564_v34 = vpop.f32.mrf.mxu0  ;;  %v978_v57 = vpop.f32.mrf.mxu1 }
 0x13e   : > { %v7503_v25 = vadd.f32 %v1564_v34, %v1113_v6  ;;  %v1115_v43 = vadd.f32 %v978_v57, %v7370_v38  ;;  %v2518_v6 = vshrl.u32 %v6851_v42, 16  ;;  %v2521_v38 = vshll.u32 %v6851_v42, 16  ;;  %v6850_v57 = vld [vmem:[%s7016_s25 + $0x1a0] sm:$0xff]  }
 0x13f   : > { %v6260_v50 = vpop.f32.mrf.mxu0  ;;  %v6194_v61 = vpop.f32.mrf.mxu1  ;;  %v2516_v45 = vsel %vm2382_vm4, %v2506_v21, %v2515_v51 }
 0x140   : > { %v2520_v14 = vrot.slane %v2518_v6, 1 }
 0x141   : > { %v1569_v35 = vpop.f32.mrf.mxu0  ;;  %6430 = vmatmul.mubr.msk.bf16.gmra.mxu0 %vm322_vm1, %v2507_v41  ;;  %v983_v40 = vpop.f32.mrf.mxu1  ;;  %6364 = vmatmul.mubr.msk.bf16.gmra.mxu1 %vm322_vm1, %v1921_v26  ;;  %v1924_v26 = vrot.slane %v6850_v57, 1 }
 0x142   : > { %v7511_v63 = vadd.f32 %v1569_v35, %v1114_v7  ;;  %6433 = vmatprep.mubr.msk.bf16.mxu0 %vm6954_vm0, %v6953_v1  ;;  %v1116_v27 = vadd.f32 %v983_v40, %v7378_v52  ;;  %6367 = vmatprep.mubr.msk.bf16.mxu1 %vm6954_vm0, %v6953_v1  ;;  %v2523_v7 = vrot.slane %v2521_v38, 2  ;;  %v1923_v52 = vsel %vm1892_vm3, %v1920_v46, %v1922_v4  ;;  %v6852_v35 = vld [vmem:[%s7016_s25 + $0x1a8] ss:$0 sps:$4 sm:$0x11]  }
 0x143   : > { %v6263_v9 = vpop.f32.mrf.mxu0  ;;  %v6197_v10 = vpop.f32.mrf.mxu1  ;;  %v6854_v40 = vld [vmem:[%s7016_s25 + $0x238] ss:$0 sps:$4 sm:$0x33]  }
 0x144   : > { %v2524_v21 = vor.u32 %v2523_v7, %v2520_v14  ;;  %v6856_v14 = vld [vmem:[%s7016_s25 + $0x128] sm:$0xff]  }
 0x145   : > { %v1572_v13 = vpop.f32.mrf.mxu0  ;;  %v986_v16 = vpop.f32.mrf.mxu1 }
 0x146   : > { %v7519_v62 = vadd.f32 %v1572_v13, %v1115_v43  ;;  %v1117_v24 = vadd.f32 %v986_v16, %v7388_v0  ;;  %v2527_v0 = vshrl.u32 %v6853_v23, 16  ;;  %v2530_v43 = vshll.u32 %v6853_v23, 16  ;;  %v6855_v13 = vld [vmem:[%s7016_s25 + $0x120] sm:$0xfe]  }
 0x147   : > { %v6264_v34 = vpop.f32.mrf.mxu0  ;;  %v6198_v41 = vpop.f32.mrf.mxu1 }
 0x148   : > { %v2529_v9 = vrot.slane %v2527_v0, 1  ;;  %v2532_v10 = vrot.slane %v2530_v43, 2  ;;  %v2536_v34 = vshrl.u32 %v6854_v40, 16  ;;  %v2999_v41 = vshrl.u32 %v6855_v13, 16 }
 0x149   : > { %v1577_v55 = vpop.f32.mrf.mxu0  ;;  %6434 = vmatmul.mubr.msk.bf16.gmra.mxu0 %vm322_vm1, %v2516_v45  ;;  %v991_v22 = vpop.f32.mrf.mxu1  ;;  %6368 = vmatmul.mubr.msk.bf16.gmra.mxu1 %vm322_vm1, %v1923_v52  ;;  %v1925_v45 = vsel %vm1892_vm3, %v1922_v4, %v1924_v26  ;;  %v2539_v52 = vshll.u32 %v6854_v40, 16  ;;  %v3007_v0 = vshrl.u32 %v6856_v14, 16  ;;  %v3010_v43 = vshll.u32 %v6856_v14, 16 }
 0x14a   : > { %v7527_v42 = vadd.f32 %v1577_v55, %v1116_v27  ;;  %6437 = vmatprep.mubr.msk.bf16.mxu0 %vm6954_vm0, %v6953_v1  ;;  %v1118_v46 = vadd.f32 %v991_v22, %v7396_v19  ;;  %6371 = vmatprep.mubr.msk.bf16.mxu1 %vm6954_vm0, %v6953_v1  ;;  %v2525_v27 = vsel %vm2382_vm4, %v2515_v51, %v2524_v21  ;;  %v1926_v51 = vrot.slane %v6852_v35, 1 }
 0x14b   : > { %v6267_v50 = vpop.f32.mrf.mxu0  ;;  %v6201_v54 = vpop.f32.mrf.mxu1  ;;  %v3002_v22 = vshll.u32 %v6855_v13, 16  ;;  %v3012_v14 = vrot.slane %v3010_v43, 2 }
 0x14c   : > { %v2538_v54 = vrot.slane %v2536_v34, 1  ;;  %v1927_v35 = vsel %vm1892_vm3, %v1924_v26, %v1926_v51 }
 0x14d   : > { %v1580_v61 = vpop.f32.mrf.mxu0  ;;  %v994_v6 = vpop.f32.mrf.mxu1 }
 0x14e   : > { %v7537_v38 = vadd.f32 %v1580_v61, %v1117_v24  ;;  %v1119_v19 = vadd.f32 %v994_v6, %v7406_v31  ;;  %v2533_v31 = vor.u32 %v2532_v10, %v2529_v9  ;;  %v2541_v61 = vrot.slane %v2539_v52, 2  ;;  %v6859_v9 = vld [vmem:[%s7016_s25 + $0x8] sm:$0xff]  }
 0x14f   : > { %v6268_v16 = vpop.f32.mrf.mxu0  ;;  %v6202_v7 = vpop.f32.mrf.mxu1 }
 0x150   : > { %v3004_v16 = vrot.slane %v3002_v22, 2  ;;  %v6858_v7 = vld [vmem:[%s7016_s25 + $0x130] sm:$0xff]  }
 0x151   : > { %v1585_v23 = vpop.f32.mrf.mxu0  ;;  %6438 = vmatmul.mubr.msk.bf16.gmra.mxu0 %vm322_vm1, %v2525_v27  ;;  %v999_v57 = vpop.f32.mrf.mxu1  ;;  %6372 = vmatmul.mubr.msk.bf16.gmra.mxu1 %vm322_vm1, %v1925_v45  ;;  %v2534_v27 = vsel %vm2382_vm4, %v2524_v21, %v2533_v31  ;;  %v3009_v45 = vrot.slane %v3007_v0, 1  ;;  %v6860_v21 = vld [vmem:[%s7016_s25 + $0x10] sm:$0xff]   ;;  %v3019_v22 = vshll.u32 %v6858_v7, 16 }
 0x152   : > { %v7545_v24 = vadd.f32 %v1585_v23, %v1118_v46  ;;  %6441 = vmatprep.mubr.msk.bf16.mxu0 %vm6954_vm0, %v6953_v1  ;;  %v1120_v4 = vadd.f32 %v999_v57, %v7414_v49  ;;  %6375 = vmatprep.mubr.msk.bf16.mxu1 %vm6954_vm0, %v6953_v1  ;;  %v3001_v49 = vrot.slane %v2999_v41, 1 }
 0x153   : > { %v6271_v55 = vpop.f32.mrf.mxu0  ;;  %v6205_v46 = vpop.f32.mrf.mxu1  ;;  %v3013_v41 = vor.u32 %v3012_v14, %v3009_v45  ;;  %v6862_v45 = vld [vmem:[%s7016_s25 + $0x138] sm:$0xff]  }
 0x154   : > { %v3005_v51 = vor.u32 %v3004_v16, %v3001_v49  ;;  %v3016_v55 = vshrl.u32 %v6858_v7, 16  ;;  %v6857_v49 = vld [vmem:[%s8274_s1 + $0x38] sm:$0xff]   ;;  %v3021_v16 = vrot.slane %v3019_v22, 2 }
 0x155   : > { %v1588_v50 = vpop.f32.mrf.mxu0  ;;  %v1002_v40 = vpop.f32.mrf.mxu1 }
 0x156   : > { %v7553_v6 = vadd.f32 %v1588_v50, %v1119_v19  ;;  %v1121_v10 = vadd.f32 %v1002_v40, %v7423_v3  ;;  %v2542_v19 = vor.u32 %v2541_v61, %v2538_v54  ;;  %v3616_v3 = vshll.u32 %v6859_v9, 16 }
 0x157   : > { %v6272_v13 = vpop.f32.mrf.mxu0  ;;  %v6206_v23 = vpop.f32.mrf.mxu1  ;;  %v3614_v54 = vshrl.u32 %v6859_v9, 16  ;;  %v3621_v40 = vshll.u32 %v6860_v21, 16 }
 0x158   : > { %v3618_v61 = vrot.slane %v3616_v3, 1  ;;  %v3018_v13 = vrot.slane %v3016_v55, 1 }
 0x159   : > { %v1593_v34 = vpop.f32.mrf.mxu0  ;;  %6442 = vmatmul.mubr.msk.bf16.gmra.mxu0 %vm322_vm1, %v2534_v27  ;;  %v1007_v52 = vpop.f32.mrf.mxu1  ;;  %6376 = vmatmul.mubr.msk.bf16.gmra.mxu1 %vm322_vm1, %v1927_v35  ;;  %v3014_v27 = vsel %vm2382_vm4, %v3005_v51, %v3013_v41 }
 0x15a   : > { %v7561_v57 = vadd.f32 %v1593_v34, %v1120_v4  ;;  %6445 = vmatprep.mubr.msk.bf16.mxu0 %vm6954_vm0, %v6953_v1  ;;  %6451 = vmatprep.mubr.msk.bf16.mxu1 %vm6954_vm0, %v6953_v1  ;;  %v2543_v4 = vsel %vm2382_vm4, %v2533_v31, %v2542_v19  ;;  %v1122_v14 = vadd.f32 %v1007_v52, %v7265_v48  ;;  %v3623_v34 = vrot.slane %v3621_v40, 1  ;;  %v6863_v19 = vld [vmem:[%s7016_s25 + $0x18] sm:$0xff]  }
 0x15b   : > { %v6275_v26 = vpop.f32.mrf.mxu0  ;;  %v6209_v0 = vpop.f32.mrf.mxu1  ;;  %v3619_v23 = vor.u32 %v3618_v61, %v3614_v54  ;;  %v3022_v48 = vor.u32 %v3021_v16, %v3018_v13  ;;  %v3025_v52 = vshrl.u32 %v6862_v45, 16  ;;  %v6861_v54 = vld [vmem:[%s8274_s1 + $0x40] sm:$0xff]   ;;  %v3625_v61 = vshrl.u32 %v6860_v21, 16 }
 0x15c   : > { %v3028_v26 = vshll.u32 %v6862_v45, 16  ;;  %v3629_v40 = vshll.u32 %v6863_v19, 16 }
 0x15d   : > { %v1596_v43 = vpop.f32.mrf.mxu0  ;;  %v1010_v46 = vpop.f32.mrf.mxu1  ;;  %v3627_v21 = vor.u32 %v3625_v61, %v3623_v34 }
 0x15e   : > { %v7570_v50 = vadd.f32 %v1596_v43, %v1121_v10  ;;  %v1123_v51 = vadd.f32 %v1010_v46, %v7275_v59  ;;  %v3030_v13 = vrot.slane %v3028_v26, 2  ;;  %v6864_v59 = vld [vmem:[%s7016_s25 + $0x140] sm:$0xff]  }
 0x15f   : > { %v6276_v35 = vpop.f32.mrf.mxu0  ;;  %v6210_v31 = vpop.f32.mrf.mxu1 }
 0x161   : > { %v1601_v7 = vpop.f32.mrf.mxu0  ;;  %6446 = vmatmul.mubr.msk.bf16.gmra.mxu0 %vm322_vm1, %v2543_v4  ;;  %v1015_v9 = vpop.f32.mrf.mxu1  ;;  %6452 = vmatmul.mubr.msk.bf16.vlgmr.msra.gmra.mxu1 %vm322_vm1, %v3014_v27  ;;  %v3624_v4 = vsel %vm703_vm2, %v3619_v23, %v3623_v34  ;;  %v3023_v27 = vsel %vm2382_vm4, %v3013_v41, %v3022_v48  ;;  %v6865_v23 = vld [vmem:[%s7016_s25 + $0x20] sm:$0xff]   ;;  %v3034_v41 = vshrl.u32 %v6864_v59, 16 }
 0x162   : > { %v7579_v10 = vadd.f32 %v1601_v7, %v1122_v14  ;;  %6521 = vmatprep.mubr.msk.bf16.mxu0 %vm6954_vm0, %v6953_v1  ;;  %6590 = vmatpush3.bf16.msra.mxu1 %v6857_v49  ;;  %v3027_v49 = vrot.slane %v3025_v52, 1  ;;  %v1124_v46 = vadd.f32 %v1015_v9, %v7286_v8  ;;  %v3631_v7 = vrot.slane %v3629_v40, 1 }
 0x163   : > { %v6279_v3 = vpop.f32.mrf.mxu0  ;;  %6455 = vmatprep.mubr.msk.bf16.mxu1 %vm6954_vm0, %v6953_v1  ;;  %v6213_v55 = vpop.f32.mrf.mxu1  ;;  %v3037_v9 = vshll.u32 %v6864_v59, 16 }
 0x164   : > { %v3031_v8 = vor.u32 %v3030_v13, %v3027_v49  ;;  %v3632_v34 = vsel %vm703_vm2, %v3627_v21, %v3631_v7  ;;  %v6866_v49 = vld [vmem:[%s7016_s25 + $0x148] sm:$0xff]  }
 0x165   : > { %v1604_v22 = vpop.f32.mrf.mxu0  ;;  %v1018_v0 = vpop.f32.mrf.mxu1  ;;  %v3046_v21 = vshll.u32 %v6866_v49, 16 }
 0x166   : > { %v7588_v43 = vadd.f32 %v1604_v22, %v1123_v51  ;;  %v1125_v52 = vadd.f32 %v1018_v0, %v7296_v17  ;;  %v3032_v40 = vsel %vm2382_vm4, %v3022_v48, %v3031_v8  ;;  %v6867_v48 = vld [vmem:[%s7016_s25 + $0x28] sm:$0xff]  }
 0x167   : > { %v6280_v35 = vpop.f32.mrf.mxu0  ;;  %v6214_v16 = vpop.f32.mrf.mxu1 }
 0x168   : > { %v3036_v35 = vrot.slane %v3034_v41, 1 }
 0x169   : > { %v1609_v45 = vpop.f32.mrf.mxu0  ;;  %6522 = vmatmul.mubr.msk.bf16.vlgmr.msra.gmra.mxu0 %vm322_vm1, %v3624_v4  ;;  %v1023_v14 = vpop.f32.mrf.mxu1  ;;  %6456 = vmatmul.mubr.msk.bf16.gmra.mxu1 %vm322_vm1, %v3023_v27  ;;  %v3633_v4 = vshrl.u32 %v6863_v19, 16  ;;  %v3039_v27 = vrot.slane %v3037_v9, 2 }
 0x16a   : > { %v7598_v31 = vadd.f32 %v1609_v45, %v1124_v46  ;;  %6660 = vmatpush3.bf16.msra.mxu0 %v6861_v54  ;;  %6459 = vmatprep.mubr.msk.bf16.mxu1 %vm6954_vm0, %v6953_v1  ;;  %v3637_v54 = vshll.u32 %v6865_v23, 16  ;;  %v1126_v13 = vadd.f32 %v1023_v14, %v7308_v28  ;;  %v3043_v14 = vshrl.u32 %v6866_v49, 16 }
 0x16b   : > { %v6283_v3 = vpop.f32.mrf.mxu0  ;;  %6525 = vmatprep.mubr.msk.bf16.mxu0 %vm6954_vm0, %v6953_v1  ;;  %v6217_v26 = vpop.f32.mrf.mxu1  ;;  %v3635_v19 = vor.u32 %v3633_v4, %v3631_v7  ;;  %v3040_v28 = vor.u32 %v3039_v27, %v3036_v35  ;;  %v3641_v7 = vshrl.u32 %v6865_v23, 16  ;;  %v6868_v35 = vld [vmem:[%s7016_s25 + $0x150] sm:$0xff]  }
 0x16c   : > { %v3639_v16 = vrot.slane %v3637_v54, 1 }
 0x16d   : > { %v1612_v51 = vpop.f32.mrf.mxu0  ;;  %v1026_v55 = vpop.f32.mrf.mxu1  ;;  %v3041_v54 = vsel %vm2382_vm4, %v3031_v8, %v3040_v28  ;;  %v6869_v8 = vld [vmem:[%s7016_s25 + $0x30] sm:$0xff]  }
 0x16e   : > { %v7607_v22 = vadd.f32 %v1612_v51, %v1125_v52  ;;  %v1127_v3 = vadd.f32 %v1026_v55, %v7318_v36  ;;  %v3640_v51 = vsel %vm703_vm2, %v3635_v19, %v3639_v16  ;;  %v3643_v23 = vor.u32 %v3641_v7, %v3639_v16 }
 0x16f   : > { %v6284_v61 = vpop.f32.mrf.mxu0  ;;  %v6218_v59 = vpop.f32.mrf.mxu1  ;;  %v3055_v19 = vshll.u32 %v6868_v35, 16  ;;  %v3649_v16 = vshrl.u32 %v6867_v48, 16 }
 0x170   : > { %v3045_v61 = vrot.slane %v3043_v14, 1 }
 0x171   : > { %v1617_v17 = vpop.f32.mrf.mxu0  ;;  %6526 = vmatmul.mubr.msk.bf16.gmra.mxu0 %vm322_vm1, %v3632_v34  ;;  %v1031_v0 = vpop.f32.mrf.mxu1  ;;  %6460 = vmatmul.mubr.msk.bf16.gmra.mxu1 %vm322_vm1, %v3032_v40  ;;  %v3645_v34 = vshll.u32 %v6867_v48, 16  ;;  %v3048_v40 = vrot.slane %v3046_v21, 2 }
 0x172   : > { %v7614_v46 = vadd.f32 %v1617_v17, %v1126_v13  ;;  %6529 = vmatprep.mubr.msk.bf16.mxu0 %vm6954_vm0, %v6953_v1  ;;  %6463 = vmatprep.mubr.msk.bf16.mxu1 %vm6954_vm0, %v6953_v1  ;;  %v1128_v27 = vadd.f32 %v1031_v0, %v7327_v47  ;;  %v3052_v0 = vshrl.u32 %v6868_v35, 16 }
 0x173   : > { %v6287_v45 = vpop.f32.mrf.mxu0  ;;  %v6221_v41 = vpop.f32.mrf.mxu1  ;;  %v3647_v59 = vrot.slane %v3645_v34, 1  ;;  %v3049_v47 = vor.u32 %v3048_v40, %v3045_v61  ;;  %v6870_v61 = vld [vmem:[%s7016_s25 + $0x158] sm:$0xff]  }
 0x175   : > { %v1620_v9 = vpop.f32.mrf.mxu0  ;;  %v1034_v52 = vpop.f32.mrf.mxu1  ;;  %v3050_v34 = vsel %vm2382_vm4, %v3040_v28, %v3049_v47  ;;  %v3651_v48 = vor.u32 %v3649_v16, %v3647_v59  ;;  %v6871_v28 = vld [vmem:[%s7016_s25 + $0x38] sm:$0xff]  }
 0x176   : > { %v7623_v26 = vadd.f32 %v1620_v9, %v1127_v3  ;;  %v1129_v45 = vadd.f32 %v1034_v52, %v7336_v56  ;;  %v3648_v9 = vsel %vm703_vm2, %v3643_v23, %v3647_v59  ;;  %v3064_v23 = vshll.u32 %v6870_v61, 16 }
 0x177   : > { %v6288_v4 = vpop.f32.mrf.mxu0  ;;  %v6222_v49 = vpop.f32.mrf.mxu1  ;;  %v3657_v59 = vshrl.u32 %v6869_v8, 16 }
 0x178   : > { %v3054_v4 = vrot.slane %v3052_v0, 1 }
 0x179   : > { %v1625_v36 = vpop.f32.mrf.mxu0  ;;  %6530 = vmatmul.mubr.msk.bf16.gmra.mxu0 %vm322_vm1, %v3640_v51  ;;  %v1039_v55 = vpop.f32.mrf.mxu1  ;;  %6464 = vmatmul.mubr.msk.bf16.gmra.mxu1 %vm322_vm1, %v3041_v54  ;;  %v3653_v51 = vshll.u32 %v6869_v8, 16  ;;  %v3057_v54 = vrot.slane %v3055_v19, 2 }
 0x17a   : > { %v7630_v13 = vadd.f32 %v1625_v36, %v1128_v27  ;;  %6533 = vmatprep.mubr.msk.bf16.mxu0 %vm6954_vm0, %v6953_v1  ;;  %6467 = vmatprep.mubr.msk.bf16.mxu1 %vm6954_vm0, %v6953_v1  ;;  %v1130_v40 = vadd.f32 %v1039_v55, %v7345_v5  ;;  %v3061_v55 = vshrl.u32 %v6870_v61, 16 }
 0x17b   : > { %v6291_v17 = vpop.f32.mrf.mxu0  ;;  %v6225_v14 = vpop.f32.mrf.mxu1  ;;  %v3655_v49 = vrot.slane %v3653_v51, 1  ;;  %v3058_v5 = vor.u32 %v3057_v54, %v3054_v4  ;;  %v6872_v4 = vld [vmem:[%s7016_s25 + $0x160] sm:$0xff]  }
 0x17d   : > { %v1628_v21 = vpop.f32.mrf.mxu0  ;;  %v1042_v3 = vpop.f32.mrf.mxu1  ;;  %v3059_v51 = vsel %vm2382_vm4, %v3049_v47, %v3058_v5  ;;  %v3659_v8 = vor.u32 %v3657_v59, %v3655_v49  ;;  %v6873_v47 = vld [vmem:[%s7016_s25 + $0x40] sm:$0xff]  }
 0x17e   : > { %v7639_v41 = vadd.f32 %v1628_v21, %v1129_v45  ;;  %v1131_v17 = vadd.f32 %v1042_v3, %v7354_v15  ;;  %v3656_v21 = vsel %vm703_vm2, %v3651_v48, %v3655_v49  ;;  %v3073_v48 = vshll.u32 %v6872_v4, 16 }
 0x17f   : > { %v6292_v7 = vpop.f32.mrf.mxu0  ;;  %v6226_v35 = vpop.f32.mrf.mxu1  ;;  %v3665_v49 = vshrl.u32 %v6871_v28, 16 }
 0x180   : > { %v3063_v7 = vrot.slane %v3061_v55, 1 }
 0x181   : > { %v1633_v56 = vpop.f32.mrf.mxu0  ;;  %6534 = vmatmul.mubr.msk.bf16.gmra.mxu0 %vm322_vm1, %v3648_v9  ;;  %v1047_v52 = vpop.f32.mrf.mxu1  ;;  %6468 = vmatmul.mubr.msk.bf16.gmra.mxu1 %vm322_vm1, %v3050_v34  ;;  %v3661_v9 = vshll.u32 %v6871_v28, 16  ;;  %v3066_v34 = vrot.slane %v3064_v23, 2 }
 0x182   : > { %v7646_v27 = vadd.f32 %v1633_v56, %v1130_v40  ;;  %6537 = vmatprep.mubr.msk.bf16.mxu0 %vm6954_vm0, %v6953_v1  ;;  %6471 = vmatprep.mubr.msk.bf16.mxu1 %vm6954_vm0, %v6953_v1  ;;  %v1132_v54 = vadd.f32 %v1047_v52, %v7363_v29  ;;  %v3070_v52 = vshrl.u32 %v6872_v4, 16 }
 0x183   : > { %v6295_v36 = vpop.f32.mrf.mxu0  ;;  %v6229_v0 = vpop.f32.mrf.mxu1  ;;  %v3663_v35 = vrot.slane %v3661_v9, 1  ;;  %v3067_v29 = vor.u32 %v3066_v34, %v3063_v7  ;;  %v6874_v7 = vld [vmem:[%s7016_s25 + $0x168] sm:$0xff]  }
 0x185   : > { %v1636_v19 = vpop.f32.mrf.mxu0  ;;  %v1050_v45 = vpop.f32.mrf.mxu1  ;;  %v3068_v9 = vsel %vm2382_vm4, %v3058_v5, %v3067_v29  ;;  %v3667_v28 = vor.u32 %v3665_v49, %v3663_v35  ;;  %v6875_v5 = vld [vmem:[%s7016_s25 + $0x48] sm:$0xff]  }
 0x186   : > { %v7655_v14 = vadd.f32 %v1636_v19, %v1131_v17  ;;  %v1133_v36 = vadd.f32 %v1050_v45, %v7372_v39  ;;  %v3664_v19 = vsel %vm703_vm2, %v3659_v8, %v3663_v35  ;;  %v3082_v8 = vshll.u32 %v6874_v7, 16 }
 0x187   : > { %v6296_v16 = vpop.f32.mrf.mxu0  ;;  %v6230_v61 = vpop.f32.mrf.mxu1  ;;  %v3673_v35 = vshrl.u32 %v6873_v47, 16 }
 0x188   : > { %v3072_v16 = vrot.slane %v3070_v52, 1 }
 0x189   : > { %v1641_v15 = vpop.f32.mrf.mxu0  ;;  %6538 = vmatmul.mubr.msk.bf16.gmra.mxu0 %vm322_vm1, %v3656_v21  ;;  %v1055_v3 = vpop.f32.mrf.mxu1  ;;  %6472 = vmatmul.mubr.msk.bf16.gmra.mxu1 %vm322_vm1, %v3059_v51  ;;  %v3669_v21 = vshll.u32 %v6873_v47, 16  ;;  %v3075_v51 = vrot.slane %v3073_v48, 2 }
 0x18a   : > { %v7662_v40 = vadd.f32 %v1641_v15, %v1132_v54  ;;  %6541 = vmatprep.mubr.msk.bf16.mxu0 %vm6954_vm0, %v6953_v1  ;;  %6475 = vmatprep.mubr.msk.bf16.mxu1 %vm6954_vm0, %v6953_v1  ;;  %v1134_v34 = vadd.f32 %v1055_v3, %v7381_v53  ;;  %v3079_v3 = vshrl.u32 %v6874_v7, 16 }
 0x18b   : > { %v6299_v56 = vpop.f32.mrf.mxu0  ;;  %v6233_v55 = vpop.f32.mrf.mxu1  ;;  %v3671_v61 = vrot.slane %v3669_v21, 1  ;;  %v3076_v53 = vor.u32 %v3075_v51, %v3072_v16  ;;  %v6876_v16 = vld [vmem:[%s7016_s25 + $0x170] sm:$0xff]  }
 0x18d   : > { %v1644_v23 = vpop.f32.mrf.mxu0  ;;  %v1058_v17 = vpop.f32.mrf.mxu1  ;;  %v3077_v21 = vsel %vm2382_vm4, %v3067_v29, %v3076_v53  ;;  %v3675_v47 = vor.u32 %v3673_v35, %v3671_v61  ;;  %v6877_v29 = vld [vmem:[%s7016_s25 + $0x50] sm:$0xff]  }
 0x18e   : > { %v7671_v0 = vadd.f32 %v1644_v23, %v1133_v36  ;;  %v1135_v56 = vadd.f32 %v1058_v17, %v7390_v2  ;;  %v3672_v23 = vsel %vm703_vm2, %v3667_v28, %v3671_v61  ;;  %v3685_v35 = vshll.u32 %v6877_v29, 16 }
 0x18f   : > { %v6300_v59 = vpop.f32.mrf.mxu0  ;;  %v6234_v4 = vpop.f32.mrf.mxu1 }
 0x190   : > { %v3081_v59 = vrot.slane %v3079_v3, 1 }
 0x191   : > { %v1649_v39 = vpop.f32.mrf.mxu0  ;;  %6542 = vmatmul.mubr.msk.bf16.gmra.mxu0 %vm322_vm1, %v3664_v19  ;;  %v1063_v45 = vpop.f32.mrf.mxu1  ;;  %6476 = vmatmul.mubr.msk.bf16.gmra.mxu1 %vm322_vm1, %v3068_v9  ;;  %v3677_v19 = vshll.u32 %v6875_v5, 16  ;;  %v3084_v9 = vrot.slane %v3082_v8, 2 }
 0x192   : > { %v7678_v54 = vadd.f32 %v1649_v39, %v1134_v34  ;;  %6545 = vmatprep.mubr.msk.bf16.mxu0 %vm6954_vm0, %v6953_v1  ;;  %6479 = vmatprep.mubr.msk.bf16.mxu1 %vm6954_vm0, %v6953_v1  ;;  %v1136_v51 = vadd.f32 %v1063_v45, %v7399_v20  ;;  %v3088_v45 = vshrl.u32 %v6876_v16, 16 }
 0x193   : > { %v6303_v15 = vpop.f32.mrf.mxu0  ;;  %v6237_v52 = vpop.f32.mrf.mxu1  ;;  %v3679_v4 = vrot.slane %v3677_v19, 1  ;;  %v3085_v20 = vor.u32 %v3084_v9, %v3081_v59  ;;  %v6878_v9 = vld [vmem:[%s7016_s25 + $0x178] sm:$0xff]  }
 0x194   : > { %v3091_v15 = vshll.u32 %v6876_v16, 16 }
 0x195   : > { %v1652_v48 = vpop.f32.mrf.mxu0  ;;  %v1066_v36 = vpop.f32.mrf.mxu1  ;;  %v3680_v61 = vsel %vm703_vm2, %v3675_v47, %v3679_v4  ;;  %v3097_v47 = vshrl.u32 %v6878_v9, 16 }
 0x196   : > { %v7687_v55 = vadd.f32 %v1652_v48, %v1135_v56  ;;  %v1137_v3 = vadd.f32 %v1066_v36, %v7408_v32  ;;  %v3093_v59 = vrot.slane %v3091_v15, 2 }
 0x197   : > { %v6304_v49 = vpop.f32.mrf.mxu0  ;;  %v6238_v7 = vpop.f32.mrf.mxu1 }
 0x198   : > { %v3086_v49 = vsel %vm2382_vm4, %v3076_v53, %v3085_v20  ;;  %v6879_v7 = vld [vmem:[%s7016_s25 + $0x58] sm:$0xff]  }
 0x199   : > { %v1657_v2 = vpop.f32.mrf.mxu0  ;;  %6546 = vmatmul.mubr.msk.bf16.gmra.mxu0 %vm322_vm1, %v3672_v23  ;;  %v2019_v34 = vpop.f32.mrf.mxu1  ;;  %6480 = vmatmul.mubr.msk.bf16.gmra.mxu1 %vm322_vm1, %v3077_v21  ;;  %v3681_v23 = vshrl.u32 %v6875_v5, 16  ;;  %v3090_v21 = vrot.slane %v3088_v45, 1 }
 0x19a   : > { %v7694_v17 = vadd.f32 %v1657_v2, %v1136_v51  ;;  %6549 = vmatprep.mubr.msk.bf16.mxu0 %vm6954_vm0, %v6953_v1  ;;  %v2188_v39 = vadd.f32 %v2019_v34, %v7431_v33  ;;  %6483 = vmatprep.mubr.msk.bf16.mxu1 %vm6954_vm0, %v6953_v1 }
 0x19b   : > { %v6307_v28 = vpop.f32.mrf.mxu0  ;;  %v6313_v8 = vpop.f32.mrf.mxu1  ;;  %v3683_v5 = vor.u32 %v3681_v23, %v3679_v4  ;;  %v3094_v34 = vor.u32 %v3093_v59, %v3090_v21  ;;  %v3689_v4 = vshrl.u32 %v6877_v29, 16  ;;  %v3099_v23 = vrot.slane %v3097_v47, 1 }
 0x19c   : > { %v3100_v28 = vshll.u32 %v6878_v9, 16  ;;  %v6881_v9 = vld [vmem:[%s7016_s25 + $0x60] sm:$0xff]  }
 0x19d   : > { %v1660_v56 = vpop.f32.mrf.mxu0  ;;  %v2022_v48 = vpop.f32.mrf.mxu1 }
 0x19e   : > { %v7704_v52 = vadd.f32 %v1660_v56, %v1137_v3  ;;  %v2189_v33 = vadd.f32 %v2022_v48, %v7439_v44  ;;  %v3687_v44 = vrot.slane %v3685_v35, 1  ;;  %v3693_v56 = vshll.u32 %v6879_v7, 16 }
 0x19f   : > { %v6308_v19 = vpop.f32.mrf.mxu0  ;;  %v6314_v16 = vpop.f32.mrf.mxu1  ;;  %v3102_v35 = vrot.slane %v3100_v28, 2 }
 0x1a0   : > { %v3688_v8 = vsel %vm703_vm2, %v3683_v5, %v3687_v44  ;;  %v6880_v19 = vld [vmem:[%s7016_s25 + $0x180] sm:$0xff]   ;;  %v3691_v29 = vor.u32 %v3689_v4, %v3687_v44  ;;  %v3697_v44 = vshrl.u32 %v6879_v7, 16 }
 0x1a1   : > { %v2635_v32 = vpop.f32.mrf.mxu0  ;;  %6550 = vmatmul.mubr.msk.bf16.gmra.mxu0 %vm322_vm1, %v3680_v61  ;;  %v2027_v36 = vpop.f32.mrf.mxu1  ;;  %6484 = vmatmul.mubr.msk.bf16.gmra.mxu1 %vm322_vm1, %v3086_v49  ;;  %v3095_v61 = vsel %vm2382_vm4, %v3085_v20, %v3094_v34  ;;  %v3109_v5 = vshll.u32 %v6880_v19, 16 }
 0x1a2   : > { %v7711_v51 = vadd.f32 %v2635_v32, %v2188_v39  ;;  %6553 = vmatprep.mubr.msk.bf16.mxu0 %vm6954_vm0, %v6953_v1  ;;  %v2190_v53 = vadd.f32 %v2027_v36, %v7447_v12  ;;  %6487 = vmatprep.mubr.msk.bf16.mxu1 %vm6954_vm0, %v6953_v1  ;;  %v3103_v32 = vor.u32 %v3102_v35, %v3099_v23  ;;  %v3106_v36 = vshrl.u32 %v6880_v19, 16  ;;  %v6883_v19 = vld [vmem:[%s7016_s25 + $0x68] sm:$0xff]  }
 0x1a3   : > { %v6383_v2 = vpop.f32.mrf.mxu0  ;;  %v6317_v39 = vpop.f32.mrf.mxu1 }
 0x1a4   : > { %v3108_v4 = vrot.slane %v3106_v36, 1 }
 0x1a5   : > { %v2638_v45 = vpop.f32.mrf.mxu0  ;;  %v2030_v15 = vpop.f32.mrf.mxu1 }
 0x1a6   : > { %v7720_v3 = vadd.f32 %v2638_v45, %v2189_v33  ;;  %v2191_v12 = vadd.f32 %v2030_v15, %v7455_v30  ;;  %v3695_v30 = vrot.slane %v3693_v56, 1  ;;  %v3701_v45 = vshll.u32 %v6881_v9, 16 }
 0x1a7   : > { %v6384_v48 = vpop.f32.mrf.mxu0  ;;  %v6318_v49 = vpop.f32.mrf.mxu1  ;;  %v3111_v56 = vrot.slane %v3109_v5, 2 }
 0x1a8   : > { %v3696_v39 = vsel %vm703_vm2, %v3691_v29, %v3695_v30  ;;  %v6882_v48 = vld [vmem:[%s7016_s25 + $0x188] sm:$0xff]   ;;  %v3699_v7 = vor.u32 %v3697_v44, %v3695_v30  ;;  %v3705_v30 = vshrl.u32 %v6881_v9, 16 }
 0x1a9   : > { %v2643_v21 = vpop.f32.mrf.mxu0  ;;  %6554 = vmatmul.mubr.msk.bf16.gmra.mxu0 %vm322_vm1, %v3688_v8  ;;  %v2035_v59 = vpop.f32.mrf.mxu1  ;;  %6488 = vmatmul.mubr.msk.bf16.gmra.mxu1 %vm322_vm1, %v3095_v61  ;;  %v3104_v8 = vsel %vm2382_vm4, %v3094_v34, %v3103_v32  ;;  %v3118_v29 = vshll.u32 %v6882_v48, 16 }
 0x1aa   : > { %v7727_v33 = vadd.f32 %v2643_v21, %v2190_v53  ;;  %6557 = vmatprep.mubr.msk.bf16.mxu0 %vm6954_vm0, %v6953_v1  ;;  %v2192_v20 = vadd.f32 %v2035_v59, %v7463_v60  ;;  %6491 = vmatprep.mubr.msk.bf16.mxu1 %vm6954_vm0, %v6953_v1  ;;  %v3112_v21 = vor.u32 %v3111_v56, %v3108_v4  ;;  %v3115_v59 = vshrl.u32 %v6882_v48, 16  ;;  %v6885_v48 = vld [vmem:[%s7016_s25 + $0x70] sm:$0xff]  }
 0x1ab   : > { %v6387_v16 = vpop.f32.mrf.mxu0  ;;  %v6321_v53 = vpop.f32.mrf.mxu1 }
 0x1ac   : > { %v3117_v44 = vrot.slane %v3115_v59, 1 }
 0x1ad   : > { %v2646_v2 = vpop.f32.mrf.mxu0  ;;  %v2038_v47 = vpop.f32.mrf.mxu1 }
 0x1ae   : > { %v7736_v28 = vadd.f32 %v2646_v2, %v2191_v12  ;;  %v2193_v60 = vadd.f32 %v2038_v47, %v7471_v11  ;;  %v3703_v11 = vrot.slane %v3701_v45, 1  ;;  %v3709_v2 = vshll.u32 %v6883_v19, 16 }
 0x1af   : > { %v6388_v15 = vpop.f32.mrf.mxu0  ;;  %v6322_v61 = vpop.f32.mrf.mxu1  ;;  %v3120_v45 = vrot.slane %v3118_v29, 2 }
 0x1b0   : > { %v3704_v53 = vsel %vm703_vm2, %v3699_v7, %v3703_v11  ;;  %v6884_v15 = vld [vmem:[%s7016_s25 + $0x190] sm:$0xff]   ;;  %v3707_v9 = vor.u32 %v3705_v30, %v3703_v11  ;;  %v3713_v11 = vshrl.u32 %v6883_v19, 16 }
 0x1b1   : > { %v2651_v23 = vpop.f32.mrf.mxu0  ;;  %6558 = vmatmul.mubr.msk.bf16.gmra.mxu0 %vm322_vm1, %v3696_v39  ;;  %v2043_v35 = vpop.f32.mrf.mxu1  ;;  %6492 = vmatmul.mubr.msk.bf16.gmra.mxu1 %vm322_vm1, %v3104_v8  ;;  %v3113_v39 = vsel %vm2382_vm4, %v3103_v32, %v3112_v21  ;;  %v3127_v7 = vshll.u32 %v6884_v15, 16 }
 0x1b2   : > { %v7743_v12 = vadd.f32 %v2651_v23, %v2192_v20  ;;  %6561 = vmatprep.mubr.msk.bf16.mxu0 %vm6954_vm0, %v6953_v1  ;;  %v2194_v34 = vadd.f32 %v2043_v35, %v7479_v37  ;;  %6495 = vmatprep.mubr.msk.bf16.mxu1 %vm6954_vm0, %v6953_v1  ;;  %v3121_v23 = vor.u32 %v3120_v45, %v3117_v44  ;;  %v3124_v35 = vshrl.u32 %v6884_v15, 16  ;;  %v6887_v15 = vld [vmem:[%s7016_s25 + $0x78] sm:$0xff]  }
 0x1b3   : > { %v6391_v49 = vpop.f32.mrf.mxu0  ;;  %v6325_v20 = vpop.f32.mrf.mxu1 }
 0x1b4   : > { %v3126_v30 = vrot.slane %v3124_v35, 1 }
 0x1b5   : > { %v2654_v16 = vpop.f32.mrf.mxu0  ;;  %v2046_v36 = vpop.f32.mrf.mxu1 }
 0x1b6   : > { %v7752_v5 = vadd.f32 %v2654_v16, %v2193_v60  ;;  %v2195_v37 = vadd.f32 %v2046_v36, %v7487_v58  ;;  %v3711_v58 = vrot.slane %v3709_v2, 1  ;;  %v3717_v16 = vshll.u32 %v6885_v48, 16 }
 0x1b7   : > { %v6392_v47 = vpop.f32.mrf.mxu0  ;;  %v6326_v8 = vpop.f32.mrf.mxu1  ;;  %v3129_v2 = vrot.slane %v3127_v7, 2 }
 0x1b8   : > { %v3712_v20 = vsel %vm703_vm2, %v3707_v9, %v3711_v58  ;;  %v6886_v47 = vld [vmem:[%s7016_s25 + $0x198] sm:$0xff]   ;;  %v3715_v19 = vor.u32 %v3713_v11, %v3711_v58  ;;  %v3721_v58 = vshrl.u32 %v6885_v48, 16 }
 0x1b9   : > { %v2659_v4 = vpop.f32.mrf.mxu0  ;;  %6562 = vmatmul.mubr.msk.bf16.gmra.mxu0 %vm322_vm1, %v3704_v53  ;;  %v2051_v56 = vpop.f32.mrf.mxu1  ;;  %6496 = vmatmul.mubr.msk.bf16.gmra.mxu1 %vm322_vm1, %v3113_v39  ;;  %v3122_v53 = vsel %vm2382_vm4, %v3112_v21, %v3121_v23  ;;  %v3136_v9 = vshll.u32 %v6886_v47, 16 }
 0x1ba   : > { %v7759_v60 = vadd.f32 %v2659_v4, %v2194_v34  ;;  %6565 = vmatprep.mubr.msk.bf16.mxu0 %vm6954_vm0, %v6953_v1  ;;  %v2196_v32 = vadd.f32 %v2051_v56, %v7495_v18  ;;  %6499 = vmatprep.mubr.msk.bf16.mxu1 %vm6954_vm0, %v6953_v1  ;;  %v3130_v4 = vor.u32 %v3129_v2, %v3126_v30  ;;  %v3133_v56 = vshrl.u32 %v6886_v47, 16  ;;  %v6889_v47 = vld [vmem:[%s7016_s25 + $0x80] sm:$0xff]  }
 0x1bb   : > { %v6395_v61 = vpop.f32.mrf.mxu0  ;;  %v6329_v34 = vpop.f32.mrf.mxu1 }
 0x1bc   : > { %v3135_v11 = vrot.slane %v3133_v56, 1 }
 0x1bd   : > { %v2662_v49 = vpop.f32.mrf.mxu0  ;;  %v2054_v59 = vpop.f32.mrf.mxu1 }
 0x1be   : > { %v7768_v29 = vadd.f32 %v2662_v49, %v2195_v37  ;;  %v2197_v18 = vadd.f32 %v2054_v59, %v7503_v25  ;;  %v3719_v25 = vrot.slane %v3717_v16, 1  ;;  %v3725_v49 = vshll.u32 %v6887_v15, 16 }
 0x1bf   : > { %v6396_v36 = vpop.f32.mrf.mxu0  ;;  %v6330_v39 = vpop.f32.mrf.mxu1  ;;  %v3138_v16 = vrot.slane %v3136_v9, 2 }
 0x1c0   : > { %v3720_v34 = vsel %vm703_vm2, %v3715_v19, %v3719_v25  ;;  %v6888_v36 = vld [vmem:[%s7016_s25 + $0x1a0] sm:$0xff]   ;;  %v3723_v48 = vor.u32 %v3721_v58, %v3719_v25  ;;  %v3729_v25 = vshrl.u32 %v6887_v15, 16 }
 0x1c1   : > { %v2667_v44 = vpop.f32.mrf.mxu0  ;;  %6566 = vmatmul.mubr.msk.bf16.gmra.mxu0 %vm322_vm1, %v3712_v20  ;;  %v2059_v45 = vpop.f32.mrf.mxu1  ;;  %6500 = vmatmul.mubr.msk.bf16.gmra.mxu1 %vm322_vm1, %v3122_v53  ;;  %v3131_v20 = vsel %vm2382_vm4, %v3121_v23, %v3130_v4  ;;  %v3145_v19 = vshll.u32 %v6888_v36, 16 }
 0x1c2   : > { %v7775_v37 = vadd.f32 %v2667_v44, %v2196_v32  ;;  %6569 = vmatprep.mubr.msk.bf16.mxu0 %vm6954_vm0, %v6953_v1  ;;  %v2198_v21 = vadd.f32 %v2059_v45, %v7511_v63  ;;  %6503 = vmatprep.mubr.msk.bf16.mxu1 %vm6954_vm0, %v6953_v1  ;;  %v3139_v44 = vor.u32 %v3138_v16, %v3135_v11  ;;  %v3142_v45 = vshrl.u32 %v6888_v36, 16  ;;  %v6891_v36 = vld [vmem:[%s7016_s25 + $0x88] sm:$0xff]  }
 0x1c3   : > { %v6399_v8 = vpop.f32.mrf.mxu0  ;;  %v6333_v32 = vpop.f32.mrf.mxu1 }
 0x1c4   : > { %v3144_v58 = vrot.slane %v3142_v45, 1 }
 0x1c5   : > { %v2670_v61 = vpop.f32.mrf.mxu0  ;;  %v2062_v35 = vpop.f32.mrf.mxu1 }
 0x1c6   : > { %v7784_v7 = vadd.f32 %v2670_v61, %v2197_v18  ;;  %v2199_v63 = vadd.f32 %v2062_v35, %v7519_v62  ;;  %v3727_v62 = vrot.slane %v3725_v49, 1  ;;  %v3733_v61 = vshll.u32 %v6889_v47, 16 }
 0x1c7   : > { %v6400_v59 = vpop.f32.mrf.mxu0  ;;  %v6334_v53 = vpop.f32.mrf.mxu1  ;;  %v3147_v49 = vrot.slane %v3145_v19, 2 }
 0x1c8   : > { %v3728_v32 = vsel %vm703_vm2, %v3723_v48, %v3727_v62  ;;  %v6890_v59 = vld [vmem:[%s7016_s25 + $0x1a8] ss:$0 sps:$4 sm:$0x33]   ;;  %v3731_v15 = vor.u32 %v3729_v25, %v3727_v62  ;;  %v3741_v62 = vshll.u32 %v6891_v36, 16 }
 0x1c9   : > { %v2675_v30 = vpop.f32.mrf.mxu0  ;;  %6570 = vmatmul.mubr.msk.bf16.gmra.mxu0 %vm322_vm1, %v3720_v34  ;;  %v2067_v2 = vpop.f32.mrf.mxu1  ;;  %6504 = vmatmul.mubr.msk.bf16.gmra.mxu1 %vm322_vm1, %v3131_v20  ;;  %v3140_v34 = vsel %vm2382_vm4, %v3130_v4, %v3139_v44  ;;  %v3154_v48 = vshll.u32 %v6890_v59, 16 }
 0x1ca   : > { %v7791_v18 = vadd.f32 %v2675_v30, %v2198_v21  ;;  %6573 = vmatprep.mubr.msk.bf16.mxu0 %vm6954_vm0, %v6953_v1  ;;  %v2200_v23 = vadd.f32 %v2067_v2, %v7527_v42  ;;  %6507 = vmatprep.mubr.msk.bf16.mxu1 %vm6954_vm0, %v6953_v1  ;;  %v3148_v30 = vor.u32 %v3147_v49, %v3144_v58  ;;  %v3151_v2 = vshrl.u32 %v6890_v59, 16 }
 0x1cb   : > { %v6403_v39 = vpop.f32.mrf.mxu0  ;;  %v6337_v21 = vpop.f32.mrf.mxu1 }
 0x1cc   : > { %v3153_v25 = vrot.slane %v3151_v2, 1  ;;  %v3745_v2 = vshrl.u32 %v6891_v36, 16 }
 0x1cd   : > { %v2678_v8 = vpop.f32.mrf.mxu0  ;;  %v2070_v56 = vpop.f32.mrf.mxu1 }
 0x1ce   : > { %v7800_v9 = vadd.f32 %v2678_v8, %v2199_v63  ;;  %v2201_v42 = vadd.f32 %v2070_v56, %v7537_v38  ;;  %v3735_v38 = vrot.slane %v3733_v61, 1  ;;  %v3737_v8 = vshrl.u32 %v6889_v47, 16 }
 0x1cf   : > { %v6404_v35 = vpop.f32.mrf.mxu0  ;;  %v6338_v20 = vpop.f32.mrf.mxu1  ;;  %v3156_v61 = vrot.slane %v3154_v48, 2 }
 0x1d0   : > { %v3736_v21 = vsel %vm703_vm2, %v3731_v15, %v3735_v38  ;;  %v3739_v47 = vor.u32 %v3737_v8, %v3735_v38 }
 0x1d1   : > { %v2683_v11 = vpop.f32.mrf.mxu0  ;;  %6574 = vmatmul.mubr.msk.bf16.gmra.mxu0 %vm322_vm1, %v3728_v32  ;;  %v2075_v16 = vpop.f32.mrf.mxu1  ;;  %6508 = vmatmul.mubr.msk.bf16.gmra.mxu1 %vm322_vm1, %v3140_v34  ;;  %v3149_v32 = vsel %vm2382_vm4, %v3139_v44, %v3148_v30  ;;  %v3157_v20 = vor.u32 %v3156_v61, %v3153_v25 }
 0x1d2   : > { %v7807_v63 = vadd.f32 %v2683_v11, %v2200_v23  ;;  %6577 = vmatprep.mubr.msk.bf16.mxu0 %vm6954_vm0, %v6953_v1  ;;  %v2202_v4 = vadd.f32 %v2075_v16, %v7545_v24  ;;  %6511 = vmatprep.mubr.msk.bf16.mxu1 %vm6954_vm0, %v6953_v1 }
 0x1d3   : > { %v6407_v53 = vpop.f32.mrf.mxu0  ;;  %v6341_v39 = vpop.f32.mrf.mxu1 }
 0x1d5   : > { %v2686_v23 = vpop.f32.mrf.mxu0  ;;  %v2078_v45 = vpop.f32.mrf.mxu1 }
 0x1d6   : > { %v7816_v19 = vadd.f32 %v2686_v23, %v2201_v42  ;;  %v2203_v56 = vadd.f32 %v2078_v45, %v7553_v6  ;;  %v3743_v42 = vrot.slane %v3741_v62, 1  ;;  %v6892_v6 = vld [vmem:[%s7016_s25 + $0x90] ss:$0 sps:$4 sm:$0x11]   ;;  %v3158_v23 = vsel %vm2382_vm4, %v3148_v30, %v3157_v20  ;;  %v6894_v45 = vld [vmem:[%s7016_s25 + $0xa0] sm:$0xff]   ;;  %v6895_v20 = vld [vmem:[%s7016_s25 + $0xa8] sm:$0xff]  }
 0x1d7   : > { %v6408_v24 = vpop.f32.mrf.mxu0  ;;  %v6342_v35 = vpop.f32.mrf.mxu1  ;;  %v3749_v38 = vshll.u32 %v6892_v6, 16  ;;  %v4208_v25 = vrot.slane %v6894_v45, 1  ;;  %v6896_v6 = vld [vmem:[%s7016_s25 + $0x8] sm:$0xfe]  }
 0x1d8   : > { %v3744_v53 = vsel %vm703_vm2, %v3739_v47, %v3743_v42 }
 0x1d9   : > { %v2691_v34 = vpop.f32.mrf.mxu0  ;;  %6578 = vmatmul.mubr.msk.bf16.gmra.mxu0 %vm322_vm1, %v3736_v21  ;;  %v2083_v58 = vpop.f32.mrf.mxu1  ;;  %6512 = vmatmul.mubr.msk.bf16.gmra.mxu1 %vm322_vm1, %v3149_v32  ;;  %v3751_v36 = vrot.slane %v3749_v38, 1 }
 0x1da   : > { %v7822_v49 = vadd.f32 %v2691_v34, %v2202_v4  ;;  %6581 = vmatprep.mubr.msk.bf16.mxu0 %vm6954_vm0, %v6953_v1  ;;  %v2204_v44 = vadd.f32 %v2083_v58, %v7561_v57  ;;  %6515 = vmatprep.mubr.msk.bf16.mxu1 %vm6954_vm0, %v6953_v1  ;;  %v6893_v57 = vld [vmem:[%s7016_s25 + $0x98] sm:$0xfe]  }
 0x1db   : > { %v6411_v59 = vpop.f32.mrf.mxu0  ;;  %v6345_v11 = vpop.f32.mrf.mxu1  ;;  %v4207_v32 = vrot.slane %v6893_v57, 1 }
 0x1dd   : > { %v2694_v16 = vpop.f32.mrf.mxu0  ;;  %v2086_v15 = vpop.f32.mrf.mxu1 }
 0x1de   : > { %v7831_v4 = vadd.f32 %v2694_v16, %v2203_v56  ;;  %v2205_v48 = vadd.f32 %v2086_v15, %v7570_v50  ;;  %v3747_v50 = vor.u32 %v3745_v2, %v3743_v42  ;;  %v4696_v2 = vrot.slane %v6896_v6, 1 }
 0x1df   : > { %v6412_v39 = vpop.f32.mrf.mxu0  ;;  %v6346_v21 = vpop.f32.mrf.mxu1 }
 0x1e0   : > { %v3752_v47 = vsel %vm703_vm2, %v3747_v50, %v3751_v36  ;;  %v4210_v39 = vrot.slane %v6895_v20, 1  ;;  %v6901_v20 = vld [vmem:[%s7016_s25 + $0x20] sm:$0xff]  }
 0x1e1   : > { %v2699_v8 = vpop.f32.mrf.mxu0  ;;  %6582 = vmatmul.mubr.msk.bf16.gmra.mxu0 %vm322_vm1, %v3744_v53  ;;  %v2091_v62 = vpop.f32.mrf.mxu1  ;;  %6516 = vmatmul.mubr.msk.bf16.gmra.mxu1 %vm322_vm1, %v3158_v23 }
 0x1e2   : > { %v7839_v24 = vadd.f32 %v2699_v8, %v2204_v44  ;;  %6585 = vmatprep.mubr.msk.bf16.mxu0 %vm6954_vm0, %v6953_v1  ;;  %v2206_v30 = vadd.f32 %v2091_v62, %v7579_v10  ;;  %6591 = vmatprep.mubr.msk.bf16.mxu1 %vm6954_vm0, %v6953_v1  ;;  %v6897_v44 = vld [vmem:[%s7016_s25 + $0x10] sm:$0xff]   ;;  %v4209_v10 = vsel %vm1892_vm3, %v4207_v32, %v4208_v25  ;;  %v6899_v62 = vld [vmem:[%s7016_s25 + $0x18] sm:$0xff]  }
 0x1e3   : > { %v6415_v56 = vpop.f32.mrf.mxu0  ;;  %v6349_v61 = vpop.f32.mrf.mxu1 }
 0x1e4   : > { %v6898_v56 = vld [vmem:[%s7016_s25 + $0xb0] sm:$0xff]  }
 0x1e5   : > { %v2702_v35 = vpop.f32.mrf.mxu0  ;;  %v2094_v34 = vpop.f32.mrf.mxu1 }
 0x1e6   : > { %v7847_v58 = vadd.f32 %v2702_v35, %v2205_v48  ;;  %v2207_v42 = vadd.f32 %v2094_v34, %v7588_v43  ;;  %v4697_v43 = vrot.slane %v6897_v44, 1  ;;  %v4699_v34 = vrot.slane %v6899_v62, 1 }
 0x1e7   : > { %v6416_v59 = vpop.f32.mrf.mxu0  ;;  %v6350_v11 = vpop.f32.mrf.mxu1 }
 0x1e8   : > { %v4698_v8 = vsel %vm1892_vm3, %v4696_v2, %v4697_v43  ;;  %v6900_v2 = vld [vmem:[%s7016_s25 + $0xb8] sm:$0xff]  }
 0x1e9   : > { %v2707_v16 = vpop.f32.mrf.mxu0  ;;  %6586 = vmatmul.mubr.msk.bf16.gmra.mxu0 %vm322_vm1, %v3752_v47  ;;  %v2099_v15 = vpop.f32.mrf.mxu1  ;;  %6592 = vmatmul.mubr.msk.bf16.vlgmr.msra.gmra.mxu1 %vm322_vm1, %v4209_v10  ;;  %v4700_v10 = vsel %vm1892_vm3, %v4697_v43, %v4699_v34  ;;  %v4701_v43 = vrot.slane %v6901_v20, 1 }
 0x1ea   : > { %v7856_v53 = vadd.f32 %v2707_v16, %v2206_v30  ;;  %6661 = vmatprep.mubr.msk.bf16.mxu0 %vm6954_vm0, %v6953_v1  ;;  %v2208_v38 = vadd.f32 %v2099_v15, %v7598_v31  ;;  %6595 = vmatprep.mubr.msk.bf16.mxu1 %vm6954_vm0, %v6953_v1  ;;  %v4211_v30 = vsel %vm1892_vm3, %v4208_v25, %v4210_v39  ;;  %v4212_v25 = vrot.slane %v6898_v56, 1 }
 0x1eb   : > { %v6419_v48 = vpop.f32.mrf.mxu0  ;;  %v6353_v23 = vpop.f32.mrf.mxu1 }
 0x1ec   : > { %v4213_v15 = vsel %vm1892_vm3, %v4210_v39, %v4212_v25  ;;  %v4214_v39 = vrot.slane %v6900_v2, 1 }
 0x1ed   : > { %v2710_v57 = vpop.f32.mrf.mxu0  ;;  %v2102_v45 = vpop.f32.mrf.mxu1 }
 0x1ee   : > { %v7864_v21 = vadd.f32 %v2710_v57, %v2207_v42  ;;  %v2209_v50 = vadd.f32 %v2102_v45, %v7607_v22 }
 0x1ef   : > { %v6420_v36 = vpop.f32.mrf.mxu0  ;;  %v6354_v31 = vpop.f32.mrf.mxu1 }
 0x1f0   : > { %v4702_v36 = vsel %vm1892_vm3, %v4699_v34, %v4701_v43 }
 0x1f1   : > { %v2715_v32 = vpop.f32.mrf.mxu0  ;;  %6662 = vmatmul.mubr.msk.bf16.vlgmr.msra.gmra.mxu0 %vm322_vm1, %v4698_v8  ;;  %v2107_v61 = vpop.f32.mrf.mxu1  ;;  %6596 = vmatmul.mubr.msk.bf16.gmra.mxu1 %vm322_vm1, %v4211_v30  ;;  %v6903_v30 = vld [vmem:[%s7016_s25 + $0x28] sm:$0xff]  }
 0x1f2   : > { %v7872_v35 = vadd.f32 %v2715_v32, %v2208_v38  ;;  %6665 = vmatprep.mubr.msk.bf16.mxu0 %vm6954_vm0, %v6953_v1  ;;  %v2210_v22 = vadd.f32 %v2107_v61, %v7614_v46  ;;  %6599 = vmatprep.mubr.msk.bf16.mxu1 %vm6954_vm0, %v6953_v1  ;;  %v4215_v32 = vsel %vm1892_vm3, %v4212_v25, %v4214_v39  ;;  %v6902_v61 = vld [vmem:[%s7016_s25 + $0xc0] sm:$0xff]   ;;  %v4703_v34 = vrot.slane %v6903_v30, 1 }
 0x1f3   : > { %v6423_v47 = vpop.f32.mrf.mxu0  ;;  %v6357_v6 = vpop.f32.mrf.mxu1  ;;  %v4216_v25 = vrot.slane %v6902_v61, 1 }
 0x1f5   : > { %v2718_v44 = vpop.f32.mrf.mxu0  ;;  %v2110_v42 = vpop.f32.mrf.mxu1 }
 0x1f6   : > { %v7880_v59 = vadd.f32 %v2718_v44, %v2209_v50  ;;  %v2211_v11 = vadd.f32 %v2110_v42, %v7623_v26 }
 0x1f7   : > { %v6424_v16 = vpop.f32.mrf.mxu0  ;;  %v6358_v46 = vpop.f32.mrf.mxu1 }
 0x1f8   : > { %v4704_v16 = vsel %vm1892_vm3, %v4701_v43, %v4703_v34 }
 0x1f9   : > { %v2723_v38 = vpop.f32.mrf.mxu0  ;;  %6666 = vmatmul.mubr.msk.bf16.gmra.mxu0 %vm322_vm1, %v4700_v10  ;;  %v2115_v48 = vpop.f32.mrf.mxu1  ;;  %6600 = vmatmul.mubr.msk.bf16.gmra.mxu1 %vm322_vm1, %v4213_v15  ;;  %v6905_v15 = vld [vmem:[%s7016_s25 + $0x30] sm:$0xff]  }
 0x1fa   : > { %v7888_v23 = vadd.f32 %v2723_v38, %v2210_v22  ;;  %6669 = vmatprep.mubr.msk.bf16.mxu0 %vm6954_vm0, %v6953_v1  ;;  %v2212_v26 = vadd.f32 %v2115_v48, %v7630_v13  ;;  %6603 = vmatprep.mubr.msk.bf16.mxu1 %vm6954_vm0, %v6953_v1  ;;  %v4217_v38 = vsel %vm1892_vm3, %v4214_v39, %v4216_v25  ;;  %v6904_v48 = vld [vmem:[%s7016_s25 + $0xc8] sm:$0xff]   ;;  %v4705_v43 = vrot.slane %v6905_v15, 1 }
 0x1fb   : > { %v6427_v57 = vpop.f32.mrf.mxu0  ;;  %v6361_v45 = vpop.f32.mrf.mxu1  ;;  %v4218_v39 = vrot.slane %v6904_v48, 1 }
 0x1fd   : > { %v2726_v8 = vpop.f32.mrf.mxu0  ;;  %v2118_v62 = vpop.f32.mrf.mxu1 }
 0x1fe   : > { %v7896_v50 = vadd.f32 %v2726_v8, %v2211_v11  ;;  %v2213_v56 = vadd.f32 %v2118_v62, %v7639_v41 }
 0x1ff   : > { %v6428_v31 = vpop.f32.mrf.mxu0  ;;  %v6362_v13 = vpop.f32.mrf.mxu1 }
 0x200   : > { %v4706_v31 = vsel %vm1892_vm3, %v4703_v34, %v4705_v43 }
 0x201   : > { %v2731_v22 = vpop.f32.mrf.mxu0  ;;  %6670 = vmatmul.mubr.msk.bf16.gmra.mxu0 %vm322_vm1, %v4702_v36  ;;  %v2123_v47 = vpop.f32.mrf.mxu1  ;;  %6604 = vmatmul.mubr.msk.bf16.gmra.mxu1 %vm322_vm1, %v4215_v32  ;;  %v6907_v32 = vld [vmem:[%s7016_s25 + $0x38] sm:$0xff]  }
 0x202   : > { %v7904_v6 = vadd.f32 %v2731_v22, %v2212_v26  ;;  %6673 = vmatprep.mubr.msk.bf16.mxu0 %vm6954_vm0, %v6953_v1  ;;  %v2214_v41 = vadd.f32 %v2123_v47, %v7646_v27  ;;  %6607 = vmatprep.mubr.msk.bf16.mxu1 %vm6954_vm0, %v6953_v1  ;;  %v4219_v22 = vsel %vm1892_vm3, %v4216_v25, %v4218_v39  ;;  %v6906_v47 = vld [vmem:[%s7016_s25 + $0xd0] sm:$0xff]   ;;  %v4707_v34 = vrot.slane %v6907_v32, 1 }
 0x203   : > { %v6431_v44 = vpop.f32.mrf.mxu0  ;;  %v6365_v42 = vpop.f32.mrf.mxu1  ;;  %v4220_v25 = vrot.slane %v6906_v47, 1 }
 0x205   : > { %v2734_v10 = vpop.f32.mrf.mxu0  ;;  %v2126_v20 = vpop.f32.mrf.mxu1 }
 0x206   : > { %v7912_v11 = vadd.f32 %v2734_v10, %v2213_v56  ;;  %v2215_v2 = vadd.f32 %v2126_v20, %v7655_v14 }
 0x207   : > { %v6432_v46 = vpop.f32.mrf.mxu0  ;;  %v6366_v27 = vpop.f32.mrf.mxu1 }
 0x208   : > { %v4708_v46 = vsel %vm1892_vm3, %v4705_v43, %v4707_v34 }
 0x209   : > { %v2739_v26 = vpop.f32.mrf.mxu0  ;;  %6674 = vmatmul.mubr.msk.bf16.gmra.mxu0 %vm322_vm1, %v4704_v16  ;;  %v2131_v57 = vpop.f32.mrf.mxu1  ;;  %6608 = vmatmul.mubr.msk.bf16.gmra.mxu1 %vm322_vm1, %v4217_v38  ;;  %v6909_v38 = vld [vmem:[%s7016_s25 + $0x40] sm:$0xff]  }
 0x20a   : > { %v7920_v45 = vadd.f32 %v2739_v26, %v2214_v41  ;;  %6677 = vmatprep.mubr.msk.bf16.mxu0 %vm6954_vm0, %v6953_v1  ;;  %v2216_v14 = vadd.f32 %v2131_v57, %v7662_v40  ;;  %6611 = vmatprep.mubr.msk.bf16.mxu1 %vm6954_vm0, %v6953_v1  ;;  %v4221_v26 = vsel %vm1892_vm3, %v4218_v39, %v4220_v25  ;;  %v6908_v57 = vld [vmem:[%s7016_s25 + $0xd8] sm:$0xff]   ;;  %v4709_v43 = vrot.slane %v6909_v38, 1 }
 0x20b   : > { %v6435_v8 = vpop.f32.mrf.mxu0  ;;  %v6369_v62 = vpop.f32.mrf.mxu1  ;;  %v4222_v39 = vrot.slane %v6908_v57, 1 }
 0x20d   : > { %v2742_v36 = vpop.f32.mrf.mxu0  ;;  %v2134_v30 = vpop.f32.mrf.mxu1 }
 0x20e   : > { %v7928_v56 = vadd.f32 %v2742_v36, %v2215_v2  ;;  %v2217_v61 = vadd.f32 %v2134_v30, %v7671_v0 }
 0x20f   : > { %v6436_v13 = vpop.f32.mrf.mxu0  ;;  %v6370_v40 = vpop.f32.mrf.mxu1 }
 0x210   : > { %v4710_v13 = vsel %vm1892_vm3, %v4707_v34, %v4709_v43 }
 0x211   : > { %v2747_v41 = vpop.f32.mrf.mxu0  ;;  %6678 = vmatmul.mubr.msk.bf16.gmra.mxu0 %vm322_vm1, %v4706_v31  ;;  %v2139_v44 = vpop.f32.mrf.mxu1  ;;  %6612 = vmatmul.mubr.msk.bf16.gmra.mxu1 %vm322_vm1, %v4219_v22  ;;  %v6911_v22 = vld [vmem:[%s7016_s25 + $0x48] sm:$0xff]  }
 0x212   : > { %v7936_v42 = vadd.f32 %v2747_v41, %v2216_v14  ;;  %6681 = vmatprep.mubr.msk.bf16.mxu0 %vm6954_vm0, %v6953_v1  ;;  %v2218_v0 = vadd.f32 %v2139_v44, %v7678_v54  ;;  %6615 = vmatprep.mubr.msk.bf16.mxu1 %vm6954_vm0, %v6953_v1  ;;  %v4223_v41 = vsel %vm1892_vm3, %v4220_v25, %v4222_v39  ;;  %v6910_v44 = vld [vmem:[%s7016_s25 + $0xe0] sm:$0xff]   ;;  %v4711_v34 = vrot.slane %v6911_v22, 1 }
 0x213   : > { %v6439_v10 = vpop.f32.mrf.mxu0  ;;  %v6373_v20 = vpop.f32.mrf.mxu1  ;;  %v4224_v25 = vrot.slane %v6910_v44, 1 }
 0x215   : > { %v2750_v16 = vpop.f32.mrf.mxu0  ;;  %v2142_v15 = vpop.f32.mrf.mxu1 }
 0x216   : > { %v7944_v2 = vadd.f32 %v2750_v16, %v2217_v61  ;;  %v2219_v48 = vadd.f32 %v2142_v15, %v7687_v55 }
 0x217   : > { %v6440_v27 = vpop.f32.mrf.mxu0  ;;  %v6374_v54 = vpop.f32.mrf.mxu1 }
 0x218   : > { %v4712_v27 = vsel %vm1892_vm3, %v4709_v43, %v4711_v34 }
 0x219   : > { %v2755_v14 = vpop.f32.mrf.mxu0  ;;  %6682 = vmatmul.mubr.msk.bf16.gmra.mxu0 %vm322_vm1, %v4708_v46  ;;  %v2147_v8 = vpop.f32.mrf.mxu1  ;;  %6616 = vmatmul.mubr.msk.bf16.gmra.mxu1 %vm322_vm1, %v4221_v26  ;;  %v6913_v26 = vld [vmem:[%s7016_s25 + $0x50] sm:$0xff]  }
 0x21a   : > { %v7952_v62 = vadd.f32 %v2755_v14, %v2218_v0  ;;  %6685 = vmatprep.mubr.msk.bf16.mxu0 %vm6954_vm0, %v6953_v1  ;;  %v2220_v55 = vadd.f32 %v2147_v8, %v7694_v17  ;;  %6619 = vmatprep.mubr.msk.bf16.mxu1 %vm6954_vm0, %v6953_v1  ;;  %v4225_v14 = vsel %vm1892_vm3, %v4222_v39, %v4224_v25  ;;  %v6912_v8 = vld [vmem:[%s7016_s25 + $0xe8] sm:$0xff]   ;;  %v4713_v43 = vrot.slane %v6913_v26, 1 }
 0x21b   : > { %v6443_v36 = vpop.f32.mrf.mxu0  ;;  %v6377_v30 = vpop.f32.mrf.mxu1  ;;  %v4226_v39 = vrot.slane %v6912_v8, 1 }
 0x21d   : > { %v2758_v31 = vpop.f32.mrf.mxu0  ;;  %v2150_v32 = vpop.f32.mrf.mxu1 }
 0x21e   : > { %v7960_v61 = vadd.f32 %v2758_v31, %v2219_v48  ;;  %v2221_v47 = vadd.f32 %v2150_v32, %v7704_v52 }
 0x21f   : > { %v6444_v40 = vpop.f32.mrf.mxu0  ;;  %v6378_v17 = vpop.f32.mrf.mxu1 }
 0x220   : > { %v4714_v40 = vsel %vm1892_vm3, %v4711_v34, %v4713_v43 }
 0x221   : > { %v2763_v0 = vpop.f32.mrf.mxu0  ;;  %6686 = vmatmul.mubr.msk.bf16.gmra.mxu0 %vm322_vm1, %v4710_v13  ;;  %v3250_v20 = vpop.f32.mrf.mxu1  ;;  %6620 = vmatmul.mubr.msk.bf16.gmra.mxu1 %vm322_vm1, %v4223_v41  ;;  %v6915_v41 = vld [vmem:[%s7016_s25 + $0x58] sm:$0xff]  }
 0x222   : > { %v7968_v10 = vadd.f32 %v2763_v0, %v2220_v55  ;;  %6689 = vmatprep.mubr.msk.bf16.mxu0 %vm6954_vm0, %v6953_v1  ;;  %v3419_v52 = vadd.f32 %v3250_v20, %v7711_v51  ;;  %6623 = vmatprep.mubr.msk.bf16.mxu1 %vm6954_vm0, %v6953_v1  ;;  %v4227_v0 = vsel %vm1892_vm3, %v4224_v25, %v4226_v39  ;;  %v6914_v20 = vld [vmem:[%s7016_s25 + $0xf0] sm:$0xff]   ;;  %v4715_v34 = vrot.slane %v6915_v41, 1 }
 0x223   : > { %v6447_v16 = vpop.f32.mrf.mxu0  ;;  %v6453_v15 = vpop.f32.mrf.mxu1  ;;  %v4228_v25 = vrot.slane %v6914_v20, 1 }
 0x225   : > { %v2766_v46 = vpop.f32.mrf.mxu0  ;;  %v3253_v48 = vpop.f32.mrf.mxu1 }
 0x226   : > { %v7976_v38 = vadd.f32 %v2766_v46, %v2221_v47  ;;  %v3420_v57 = vadd.f32 %v3253_v48, %v7720_v3 }
 0x227   : > { %v6448_v54 = vpop.f32.mrf.mxu0  ;;  %v6454_v51 = vpop.f32.mrf.mxu1 }
 0x228   : > { %v4716_v54 = vsel %vm1892_vm3, %v4713_v43, %v4715_v34 }
 0x229   : > { %v3844_v55 = vpop.f32.mrf.mxu0  ;;  %6690 = vmatmul.mubr.msk.bf16.gmra.mxu0 %vm322_vm1, %v4712_v27  ;;  %v3258_v36 = vpop.f32.mrf.mxu1  ;;  %6624 = vmatmul.mubr.msk.bf16.gmra.mxu1 %vm322_vm1, %v4225_v14  ;;  %v6917_v14 = vld [vmem:[%s7016_s25 + $0x60] sm:$0xff]  }
 0x22a   : > { %v7984_v30 = vadd.f32 %v3844_v55, %v3419_v52  ;;  %6693 = vmatprep.mubr.msk.bf16.mxu0 %vm6954_vm0, %v6953_v1  ;;  %v3421_v3 = vadd.f32 %v3258_v36, %v7727_v33  ;;  %6627 = vmatprep.mubr.msk.bf16.mxu1 %vm6954_vm0, %v6953_v1  ;;  %v4229_v55 = vsel %vm1892_vm3, %v4226_v39, %v4228_v25  ;;  %v6916_v36 = vld [vmem:[%s7016_s25 + $0xf8] sm:$0xff]   ;;  %v4717_v43 = vrot.slane %v6917_v14, 1 }
 0x22b   : > { %v6523_v31 = vpop.f32.mrf.mxu0  ;;  %v6457_v32 = vpop.f32.mrf.mxu1  ;;  %v4230_v39 = vrot.slane %v6916_v36, 1 }
 0x22d   : > { %v3847_v13 = vpop.f32.mrf.mxu0  ;;  %v3261_v22 = vpop.f32.mrf.mxu1 }
 0x22e   : > { %v7992_v47 = vadd.f32 %v3847_v13, %v3420_v57  ;;  %v3422_v44 = vadd.f32 %v3261_v22, %v7736_v28 }
 0x22f   : > { %v6524_v17 = vpop.f32.mrf.mxu0  ;;  %v6458_v33 = vpop.f32.mrf.mxu1 }
 0x230   : > { %v4718_v17 = vsel %vm1892_vm3, %v4715_v34, %v4717_v43 }
 0x231   : > { %v3852_v52 = vpop.f32.mrf.mxu0  ;;  %6694 = vmatmul.mubr.msk.bf16.gmra.mxu0 %vm322_vm1, %v4714_v40  ;;  %v3266_v16 = vpop.f32.mrf.mxu1  ;;  %6628 = vmatmul.mubr.msk.bf16.gmra.mxu1 %vm322_vm1, %v4227_v0  ;;  %v6919_v0 = vld [vmem:[%s7016_s25 + $0x68] sm:$0xff]  }
 0x232   : > { %v8000_v15 = vadd.f32 %v3852_v52, %v3421_v3  ;;  %6697 = vmatprep.mubr.msk.bf16.mxu0 %vm6954_vm0, %v6953_v1  ;;  %v3423_v28 = vadd.f32 %v3266_v16, %v7743_v12  ;;  %6631 = vmatprep.mubr.msk.bf16.mxu1 %vm6954_vm0, %v6953_v1  ;;  %v4231_v52 = vsel %vm1892_vm3, %v4228_v25, %v4230_v39  ;;  %v6918_v16 = vld [vmem:[%s7016_s25 + $0x100] sm:$0xff]   ;;  %v4719_v34 = vrot.slane %v6919_v0, 1 }
 0x233   : > { %v6527_v46 = vpop.f32.mrf.mxu0  ;;  %v6461_v48 = vpop.f32.mrf.mxu1  ;;  %v4232_v25 = vrot.slane %v6918_v16, 1 }
 0x235   : > { %v3855_v27 = vpop.f32.mrf.mxu0  ;;  %v3269_v26 = vpop.f32.mrf.mxu1 }
 0x236   : > { %v8008_v57 = vadd.f32 %v3855_v27, %v3422_v44  ;;  %v3424_v8 = vadd.f32 %v3269_v26, %v7752_v5 }
 0x237   : > { %v6528_v51 = vpop.f32.mrf.mxu0  ;;  %v6462_v12 = vpop.f32.mrf.mxu1 }
 0x238   : > { %v4720_v51 = vsel %vm1892_vm3, %v4717_v43, %v4719_v34 }
 0x239   : > { %v3860_v3 = vpop.f32.mrf.mxu0  ;;  %6698 = vmatmul.mubr.msk.bf16.gmra.mxu0 %vm322_vm1, %v4716_v54  ;;  %v3274_v31 = vpop.f32.mrf.mxu1  ;;  %6632 = vmatmul.mubr.msk.bf16.gmra.mxu1 %vm322_vm1, %v4229_v55  ;;  %v6921_v55 = vld [vmem:[%s7016_s25 + $0x70] sm:$0xff]  }
 0x23a   : > { %v8016_v32 = vadd.f32 %v3860_v3, %v3423_v28  ;;  %6701 = vmatprep.mubr.msk.bf16.mxu0 %vm6954_vm0, %v6953_v1  ;;  %v3425_v5 = vadd.f32 %v3274_v31, %v7759_v60  ;;  %6635 = vmatprep.mubr.msk.bf16.mxu1 %vm6954_vm0, %v6953_v1  ;;  %v4233_v3 = vsel %vm1892_vm3, %v4230_v39, %v4232_v25  ;;  %v6920_v31 = vld [vmem:[%s7016_s25 + $0x108] sm:$0xff]   ;;  %v4721_v43 = vrot.slane %v6921_v55, 1 }
 0x23b   : > { %v6531_v13 = vpop.f32.mrf.mxu0  ;;  %v6465_v22 = vpop.f32.mrf.mxu1  ;;  %v4234_v39 = vrot.slane %v6920_v31, 1 }
 0x23d   : > { %v3863_v40 = vpop.f32.mrf.mxu0  ;;  %v3277_v41 = vpop.f32.mrf.mxu1 }
 0x23e   : > { %v8024_v44 = vadd.f32 %v3863_v40, %v3424_v8  ;;  %v3426_v20 = vadd.f32 %v3277_v41, %v7768_v29 }
 0x23f   : > { %v6532_v33 = vpop.f32.mrf.mxu0  ;;  %v6466_v60 = vpop.f32.mrf.mxu1 }
 0x240   : > { %v4722_v33 = vsel %vm1892_vm3, %v4719_v34, %v4721_v43 }
 0x241   : > { %v3868_v28 = vpop.f32.mrf.mxu0  ;;  %6702 = vmatmul.mubr.msk.bf16.gmra.mxu0 %vm322_vm1, %v4718_v17  ;;  %v3282_v46 = vpop.f32.mrf.mxu1  ;;  %6636 = vmatmul.mubr.msk.bf16.gmra.mxu1 %vm322_vm1, %v4231_v52  ;;  %v6923_v52 = vld [vmem:[%s7016_s25 + $0x78] sm:$0xff]  }
 0x242   : > { %v8032_v48 = vadd.f32 %v3868_v28, %v3425_v5  ;;  %6705 = vmatprep.mubr.msk.bf16.mxu0 %vm6954_vm0, %v6953_v1  ;;  %v3427_v29 = vadd.f32 %v3282_v46, %v7775_v37  ;;  %6639 = vmatprep.mubr.msk.bf16.mxu1 %vm6954_vm0, %v6953_v1  ;;  %v4235_v28 = vsel %vm1892_vm3, %v4232_v25, %v4234_v39  ;;  %v6922_v46 = vld [vmem:[%s7016_s25 + $0x110] sm:$0xff]   ;;  %v4723_v34 = vrot.slane %v6923_v52, 1 }
 0x243   : > { %v6535_v27 = vpop.f32.mrf.mxu0  ;;  %v6469_v26 = vpop.f32.mrf.mxu1  ;;  %v4236_v25 = vrot.slane %v6922_v46, 1 }
 0x245   : > { %v3871_v54 = vpop.f32.mrf.mxu0  ;;  %v3285_v14 = vpop.f32.mrf.mxu1 }
 0x246   : > { %v8040_v8 = vadd.f32 %v3871_v54, %v3426_v20  ;;  %v3428_v36 = vadd.f32 %v3285_v14, %v7784_v7 }
 0x247   : > { %v6536_v12 = vpop.f32.mrf.mxu0  ;;  %v6470_v37 = vpop.f32.mrf.mxu1 }
 0x248   : > { %v4724_v12 = vsel %vm1892_vm3, %v4721_v43, %v4723_v34 }
 0x249   : > { %v3876_v5 = vpop.f32.mrf.mxu0  ;;  %6706 = vmatmul.mubr.msk.bf16.gmra.mxu0 %vm322_vm1, %v4720_v51  ;;  %v3290_v13 = vpop.f32.mrf.mxu1  ;;  %6640 = vmatmul.mubr.msk.bf16.gmra.mxu1 %vm322_vm1, %v4233_v3  ;;  %v6925_v3 = vld [vmem:[%s7016_s25 + $0x80] sm:$0xff]  }
 0x24a   : > { %v8048_v22 = vadd.f32 %v3876_v5, %v3427_v29  ;;  %6709 = vmatprep.mubr.msk.bf16.mxu0 %vm6954_vm0, %v6953_v1  ;;  %v3429_v7 = vadd.f32 %v3290_v13, %v7791_v18  ;;  %6643 = vmatprep.mubr.msk.bf16.mxu1 %vm6954_vm0, %v6953_v1  ;;  %v4237_v5 = vsel %vm1892_vm3, %v4234_v39, %v4236_v25  ;;  %v6924_v13 = vld [vmem:[%s7016_s25 + $0x118] sm:$0xff]   ;;  %v4725_v43 = vrot.slane %v6925_v3, 1 }
 0x24b   : > { %v6539_v40 = vpop.f32.mrf.mxu0  ;;  %v6473_v41 = vpop.f32.mrf.mxu1  ;;  %v4238_v39 = vrot.slane %v6924_v13, 1 }
 0x24d   : > { %v3879_v17 = vpop.f32.mrf.mxu0  ;;  %v3293_v0 = vpop.f32.mrf.mxu1 }
 0x24e   : > { %v8056_v20 = vadd.f32 %v3879_v17, %v3428_v36  ;;  %v3430_v16 = vadd.f32 %v3293_v0, %v7800_v9 }
 0x24f   : > { %v6540_v60 = vpop.f32.mrf.mxu0  ;;  %v6474_v18 = vpop.f32.mrf.mxu1 }
 0x250   : > { %v4726_v60 = vsel %vm1892_vm3, %v4723_v34, %v4725_v43 }
 0x251   : > { %v3884_v29 = vpop.f32.mrf.mxu0  ;;  %6710 = vmatmul.mubr.msk.bf16.gmra.mxu0 %vm322_vm1, %v4722_v33  ;;  %v3298_v27 = vpop.f32.mrf.mxu1  ;;  %6644 = vmatmul.mubr.msk.bf16.gmra.mxu1 %vm322_vm1, %v4235_v28  ;;  %v6927_v28 = vld [vmem:[%s7016_s25 + $0x88] sm:$0xff]  }
 0x252   : > { %v8064_v26 = vadd.f32 %v3884_v29, %v3429_v7  ;;  %6713 = vmatprep.mubr.msk.bf16.mxu0 %vm6954_vm0, %v6953_v1  ;;  %v3431_v9 = vadd.f32 %v3298_v27, %v7807_v63  ;;  %6647 = vmatprep.mubr.msk.bf16.mxu1 %vm6954_vm0, %v6953_v1  ;;  %v4239_v29 = vsel %vm1892_vm3, %v4236_v25, %v4238_v39  ;;  %v6926_v27 = vld [vmem:[%s7016_s25 + $0x120] ss:$0 sps:$4 sm:$0x11]   ;;  %v4727_v34 = vrot.slane %v6927_v28, 1 }
 0x253   : > { %v6543_v54 = vpop.f32.mrf.mxu0  ;;  %v6477_v14 = vpop.f32.mrf.mxu1  ;;  %v4240_v25 = vrot.slane %v6926_v27, 1 }
 0x255   : > { %v3887_v51 = vpop.f32.mrf.mxu0  ;;  %v3301_v55 = vpop.f32.mrf.mxu1 }
 0x256   : > { %v8072_v36 = vadd.f32 %v3887_v51, %v3430_v16  ;;  %v3432_v31 = vadd.f32 %v3301_v55, %v7816_v19 }
 0x257   : > { %v6544_v37 = vpop.f32.mrf.mxu0  ;;  %v6478_v63 = vpop.f32.mrf.mxu1 }
 0x258   : > { %v4728_v37 = vsel %vm1892_vm3, %v4725_v43, %v4727_v34 }
 0x259   : > { %v3892_v7 = vpop.f32.mrf.mxu0  ;;  %6714 = vmatmul.mubr.msk.bf16.gmra.mxu0 %vm322_vm1, %v4724_v12  ;;  %v3306_v40 = vpop.f32.mrf.mxu1  ;;  %6648 = vmatmul.mubr.msk.bf16.gmra.mxu1 %vm322_vm1, %v4237_v5  ;;  %v6928_v5 = vld [vmem:[%s7016_s25 + $0x90] ss:$0 sps:$4 sm:$0x11]  }
 0x25a   : > { %v8080_v41 = vadd.f32 %v3892_v7, %v3431_v9  ;;  %6717 = vmatprep.mubr.msk.bf16.mxu0 %vm6954_vm0, %v6953_v1  ;;  %v3433_v19 = vadd.f32 %v3306_v40, %v7822_v49  ;;  %6651 = vmatprep.mubr.msk.bf16.mxu1 %vm6954_vm0, %v6953_v1  ;;  %v4241_v7 = vsel %vm1892_vm3, %v4238_v39, %v4240_v25 }
 0x25b   : > { %v6547_v17 = vpop.f32.mrf.mxu0  ;;  %v6481_v0 = vpop.f32.mrf.mxu1 }
 0x25c   : > { %v4729_v0 = vrot.slane %v6928_v5, 1 }
 0x25d   : > { %v3895_v33 = vpop.f32.mrf.mxu0  ;;  %v3309_v52 = vpop.f32.mrf.mxu1 }
 0x25e   : > { %v8088_v16 = vadd.f32 %v3895_v33, %v3432_v31  ;;  %v3434_v46 = vadd.f32 %v3309_v52, %v7831_v4  ;;  %v4730_v28 = vsel %vm1892_vm3, %v4727_v34, %v4729_v0 }
 0x25f   : > { %v6548_v18 = vpop.f32.mrf.mxu0  ;;  %v6482_v49 = vpop.f32.mrf.mxu1 }
 0x261   : > { %v3900_v9 = vpop.f32.mrf.mxu0  ;;  %6718 = vmatmul.mubr.msk.bf16.gmra.mxu0 %vm322_vm1, %v4726_v60  ;;  %v3314_v54 = vpop.f32.mrf.mxu1  ;;  %6652 = vmatmul.mubr.msk.bf16.gmra.mxu1 %vm322_vm1, %v4239_v29 }
 0x262   : > { %v8096_v14 = vadd.f32 %v3900_v9, %v3433_v19  ;;  %6721 = vmatprep.mubr.msk.bf16.mxu0 %vm6954_vm0, %v6953_v1  ;;  %v3435_v4 = vadd.f32 %v3314_v54, %v7839_v24  ;;  %6655 = vmatprep.mubr.msk.bf16.mxu1 %vm6954_vm0, %v6953_v1 }
 0x263   : > { %v6551_v51 = vpop.f32.mrf.mxu0  ;;  %v6485_v55 = vpop.f32.mrf.mxu1 }
 0x265   : > { %v3903_v12 = vpop.f32.mrf.mxu0  ;;  %v3317_v3 = vpop.f32.mrf.mxu1 }
 0x266   : > { %v8104_v31 = vadd.f32 %v3903_v12, %v3434_v46  ;;  %v3436_v13 = vadd.f32 %v3317_v3, %v7847_v58 }
 0x267   : > { %v6552_v63 = vpop.f32.mrf.mxu0  ;;  %v6486_v40 = vpop.f32.mrf.mxu1 }
 0x269   : > { %v3908_v24 = vpop.f32.mrf.mxu0  ;;  %6722 = vmatmul.mubr.msk.bf16.gmra.mxu0 %vm322_vm1, %v4728_v37  ;;  %v3322_v19 = vpop.f32.mrf.mxu1  ;;  %6656 = vmatmul.mubr.msk.bf16.gmra.mxu1 %vm322_vm1, %v4241_v7 }
 0x26a   : > { %v8111_v17 = vadd.f32 %v3908_v24, %v3435_v4  ;;  %6725 = vmatprep.mubr.msk.bf16.mxu0 %vm6954_vm0, %v6953_v1  ;;  %v3437_v43 = vadd.f32 %v3322_v19, %v7856_v53 }
 0x26b   : > { %v6555_v33 = vpop.f32.mrf.mxu0  ;;  %v6489_v58 = vpop.f32.mrf.mxu1 }
 0x26d   : > { %v3911_v52 = vpop.f32.mrf.mxu0  ;;  %v3325_v60 = vpop.f32.mrf.mxu1 }
 0x26e   : > { %v8117_v39 = vadd.f32 %v3911_v52, %v3436_v13  ;;  %v3438_v46 = vadd.f32 %v3325_v60, %v7864_v21 }
 0x26f   : > { %v6556_v18 = vpop.f32.mrf.mxu0  ;;  %v6490_v29 = vpop.f32.mrf.mxu1 }
 0x271   : > { %v3916_v27 = vpop.f32.mrf.mxu0  ;;  %6726 = vmatmul.mubr.msk.bf16.gmra.mxu0 %vm322_vm1, %v4730_v28  ;;  %v3330_v49 = vpop.f32.mrf.mxu1 }
 0x272   : > { %v8122_v1 = vadd.f32 %v3916_v27, %v3437_v43  ;;  %v3439_v53 = vadd.f32 %v3330_v49, %v7872_v35 }
 0x273   : > { %v6559_v9 = vpop.f32.mrf.mxu0  ;;  %v6493_v54 = vpop.f32.mrf.mxu1 }
 0x275   : > { %v3919_v4 = vpop.f32.mrf.mxu0  ;;  %v3333_v51 = vpop.f32.mrf.mxu1 }
 0x276   : > { %v8125_v25 = vadd.f32 %v3919_v4, %v3438_v46  ;;  %v3440_v34 = vadd.f32 %v3333_v51, %v7880_v59 }
 0x277   : > { %v6560_v55 = vpop.f32.mrf.mxu0  ;;  %v6494_v21 = vpop.f32.mrf.mxu1 }
 0x279   : > { %v3924_v12 = vpop.f32.mrf.mxu0  ;;  %v3338_v3 = vpop.f32.mrf.mxu1 }
 0x27a   : > { %v8128_v37 = vadd.f32 %v3924_v12, %v3439_v53  ;;  %v3441_v5 = vadd.f32 %v3338_v3, %v7888_v23 }
 0x27b   : > { %v6563_v13 = vpop.f32.mrf.mxu0  ;;  %v6497_v63 = vpop.f32.mrf.mxu1 }
 0x27d   : > { %v3927_v7 = vpop.f32.mrf.mxu0  ;;  %v3341_v35 = vpop.f32.mrf.mxu1 }
 0x27e   : > { %v8131_v40 = vadd.f32 %v3927_v7, %v3440_v34  ;;  %v3442_v24 = vadd.f32 %v3341_v35, %v7896_v50 }
 0x27f   : > { %v6564_v19 = vpop.f32.mrf.mxu0  ;;  %v6498_v0 = vpop.f32.mrf.mxu1 }
 0x281   : > { %v3932_v43 = vpop.f32.mrf.mxu0  ;;  %v3346_v59 = vpop.f32.mrf.mxu1 }
 0x282   : > { %v8134_v33 = vadd.f32 %v3932_v43, %v3441_v5  ;;  %v3443_v58 = vadd.f32 %v3346_v59, %v7904_v6 }
 0x283   : > { %v6567_v52 = vpop.f32.mrf.mxu0  ;;  %v6501_v60 = vpop.f32.mrf.mxu1 }
 0x285   : > { %v3935_v28 = vpop.f32.mrf.mxu0  ;;  %v3349_v23 = vpop.f32.mrf.mxu1 }
 0x286   : > { %v8137_v46 = vadd.f32 %v3935_v28, %v3442_v24  ;;  %v3444_v18 = vadd.f32 %v3349_v23, %v7912_v11 }
 0x287   : > { %v6568_v29 = vpop.f32.mrf.mxu0  ;;  %v6502_v27 = vpop.f32.mrf.mxu1 }
 0x289   : > { %v3940_v49 = vpop.f32.mrf.mxu0  ;;  %v3354_v50 = vpop.f32.mrf.mxu1 }
 0x28a   : > { %v8140_v53 = vadd.f32 %v3940_v49, %v3443_v58  ;;  %v3445_v9 = vadd.f32 %v3354_v50, %v7920_v45 }
 0x28b   : > { %v6571_v54 = vpop.f32.mrf.mxu0  ;;  %v6505_v4 = vpop.f32.mrf.mxu1 }
 0x28d   : > { %v3943_v51 = vpop.f32.mrf.mxu0  ;;  %v3357_v6 = vpop.f32.mrf.mxu1 }
 0x28e   : > { %v8143_v34 = vadd.f32 %v3943_v51, %v3444_v18  ;;  %v3446_v55 = vadd.f32 %v3357_v6, %v7928_v56 }
 0x28f   : > { %v6572_v21 = vpop.f32.mrf.mxu0  ;;  %v6506_v12 = vpop.f32.mrf.mxu1 }
 0x291   : > { %v3948_v3 = vpop.f32.mrf.mxu0  ;;  %v3362_v11 = vpop.f32.mrf.mxu1 }
 0x292   : > { %v8146_v5 = vadd.f32 %v3948_v3, %v3445_v9  ;;  %v3447_v13 = vadd.f32 %v3362_v11, %v7936_v42 }
 0x293   : > { %v6575_v63 = vpop.f32.mrf.mxu0  ;;  %v6509_v7 = vpop.f32.mrf.mxu1 }
 0x295   : > { %v3951_v35 = vpop.f32.mrf.mxu0  ;;  %v3365_v45 = vpop.f32.mrf.mxu1 }
 0x296   : > { %v8149_v24 = vadd.f32 %v3951_v35, %v3446_v55  ;;  %v3448_v19 = vadd.f32 %v3365_v45, %v7944_v2 }
 0x297   : > { %v6576_v0 = vpop.f32.mrf.mxu0  ;;  %v6510_v43 = vpop.f32.mrf.mxu1 }
 0x299   : > { %v3956_v59 = vpop.f32.mrf.mxu0  ;;  %v3370_v56 = vpop.f32.mrf.mxu1 }
 0x29a   : > { %v8152_v58 = vadd.f32 %v3956_v59, %v3447_v13  ;;  %v3449_v52 = vadd.f32 %v3370_v56, %v7952_v62 }
 0x29b   : > { %v6579_v60 = vpop.f32.mrf.mxu0  ;;  %v6513_v28 = vpop.f32.mrf.mxu1 }
 0x29d   : > { %v3959_v23 = vpop.f32.mrf.mxu0  ;;  %v3373_v42 = vpop.f32.mrf.mxu1 }
 0x29e   : > { %v8155_v18 = vadd.f32 %v3959_v23, %v3448_v19  ;;  %v3450_v29 = vadd.f32 %v3373_v42, %v7960_v61 }
 0x29f   : > { %v6580_v27 = vpop.f32.mrf.mxu0  ;;  %v6514_v49 = vpop.f32.mrf.mxu1 }
 0x2a1   : > { %v3964_v50 = vpop.f32.mrf.mxu0  ;;  %v3378_v2 = vpop.f32.mrf.mxu1 }
 0x2a2   : > { %v8158_v9 = vadd.f32 %v3964_v50, %v3449_v52  ;;  %v3451_v54 = vadd.f32 %v3378_v2, %v7968_v10  ;;  %v8172_v52 = vld [vmem:[%s8275_s2] ss:$0 sm:$0xff] }
 0x2a3   : > { %v6583_v4 = vpop.f32.mrf.mxu0  ;;  %v6517_v51 = vpop.f32.mrf.mxu1 }
 0x2a5   : > { %v3967_v6 = vpop.f32.mrf.mxu0  ;;  %v3381_v62 = vpop.f32.mrf.mxu1 }
 0x2a6   : > { %v8161_v55 = vadd.f32 %v3967_v6, %v3450_v29  ;;  %v3452_v21 = vadd.f32 %v3381_v62, %v7976_v38 }
 0x2a7   : > { %v6584_v12 = vpop.f32.mrf.mxu0  ;;  %v6518_v3 = vpop.f32.mrf.mxu1 }
 0x2a9   : > { %v3972_v11 = vpop.f32.mrf.mxu0  ;;  %v4333_v13 = vpop.f32.mrf.mxu1 }
 0x2aa   : > { %v8164_v61 = vadd.f32 %v3972_v11, %v3451_v54  ;;  %v4502_v0 = vadd.f32 %v4333_v13, %v7984_v30 }
 0x2ab   : > { %v6587_v63 = vpop.f32.mrf.mxu0  ;;  %v6593_v7 = vpop.f32.mrf.mxu1 }
 0x2ad   : > { %v3975_v35 = vpop.f32.mrf.mxu0  ;;  %v4336_v10 = vpop.f32.mrf.mxu1 }
 0x2ae   : > { %v8166_v45 = vadd.f32 %v3975_v35, %v3452_v21  ;;  %v4503_v28 = vadd.f32 %v4336_v10, %v7992_v47 }
 0x2af   : > { %v6588_v19 = vpop.f32.mrf.mxu0  ;;  %v6594_v43 = vpop.f32.mrf.mxu1 }
 0x2b1   : > { %v4822_v59 = vpop.f32.mrf.mxu0  ;;  %v4341_v56 = vpop.f32.mrf.mxu1 }
 0x2b2   : > { %v4991_v38 = vadd.f32 %v4822_v59, %v4502_v0  ;;  %v4504_v50 = vadd.f32 %v4341_v56, %v8000_v15 }
 0x2b3   : > { %v6663_v60 = vpop.f32.mrf.mxu0  ;;  %v6597_v23 = vpop.f32.mrf.mxu1 }
 0x2b4   : > { %v5100_v29 = vadd.f32 %v8172_v52, %v4991_v38 }
 0x2b5   : > { %v4825_v42 = vpop.f32.mrf.mxu0  ;;  %v4344_v27 = vpop.f32.mrf.mxu1 }
 0x2b6   : > { %v4992_v49 = vadd.f32 %v4825_v42, %v4503_v28  ;;  %v5134_v51 = vmax.f32 %v5100_v29, 0.0  ;;  %v4505_v12 = vadd.f32 %v4344_v27, %v8008_v57 }
 0x2b7   : > { %v6664_v30 = vpop.f32.mrf.mxu0  ;;  %v6598_v54 = vpop.f32.mrf.mxu1 }
 0x2b8   : > { %v5101_v2 = vadd.f32 %v8172_v52, %v4992_v49 }
 0x2b9   : > { %v4830_v4 = vpop.f32.mrf.mxu0  ;;  %v4349_v62 = vpop.f32.mrf.mxu1 }
 0x2ba   : > { %v5135_v6 = vmax.f32 %v5101_v2, 0.0  ;;  %v4993_v21 = vadd.f32 %v4830_v4, %v4504_v50  ;;  %v4506_v10 = vadd.f32 %v4349_v62, %v8016_v32 }
 0x2bb   : > { %v6667_v47 = vpop.f32.mrf.mxu0  ;;  %v6601_v11 = vpop.f32.mrf.mxu1 }
 0x2bc   : > { %v5839_v3 = vpack.c.bf16 %v5135_v6, %v5134_v51  ;;  %v5102_v13 = vadd.f32 %v8172_v52, %v4993_v21 }
 0x2bd   : > { %v4833_v15 = vpop.f32.mrf.mxu0  ;;  %v4352_v63 = vpop.f32.mrf.mxu1 }
 0x2be   : > { %5840 = vst [vmem:[%s8182_s20] sm:$0xff] %v5839_v3   ;;  %v4994_v7 = vadd.f32 %v4833_v15, %v4505_v12  ;;  %v5136_v59 = vmax.f32 %v5102_v13, 0.0  ;;  %v4507_v28 = vadd.f32 %v4352_v63, %v8024_v44 }
 0x2bf   : > { %v6668_v35 = vpop.f32.mrf.mxu0  ;;  %v6602_v0 = vpop.f32.mrf.mxu1 }
 0x2c0   : > { %v5103_v19 = vadd.f32 %v8172_v52, %v4994_v7 }
 0x2c1   : > { %v4838_v43 = vpop.f32.mrf.mxu0  ;;  %v4357_v38 = vpop.f32.mrf.mxu1 }
 0x2c2   : > { %v5137_v56 = vmax.f32 %v5103_v19, 0.0  ;;  %v4995_v57 = vadd.f32 %v4838_v43, %v4506_v10  ;;  %v4508_v50 = vadd.f32 %v4357_v38, %v8032_v48 }
 0x2c3   : > { %v6671_v60 = vpop.f32.mrf.mxu0  ;;  %v6605_v42 = vpop.f32.mrf.mxu1 }
 0x2c4   : > { %v5844_v23 = vpack.c.bf16 %v5137_v56, %v5136_v59  ;;  %v5104_v27 = vadd.f32 %v8172_v52, %v4995_v57 }
 0x2c5   : > { %v4841_v29 = vpop.f32.mrf.mxu0  ;;  %v4360_v49 = vpop.f32.mrf.mxu1 }
 0x2c6   : > { %5921 = vst [vmem:[%s8182_s20 + $0x8] sm:$0xff] %v5844_v23   ;;  %v4996_v32 = vadd.f32 %v4841_v29, %v4507_v28  ;;  %v5138_v51 = vmax.f32 %v5104_v27, 0.0  ;;  %v4509_v47 = vadd.f32 %v4360_v49, %v8040_v8 }
 0x2c7   : > { %v6672_v30 = vpop.f32.mrf.mxu0  ;;  %v6606_v54 = vpop.f32.mrf.mxu1 }
 0x2c8   : > { %v5105_v2 = vadd.f32 %v8172_v52, %v4996_v32 }
 0x2c9   : > { %v4846_v4 = vpop.f32.mrf.mxu0  ;;  %v4365_v62 = vpop.f32.mrf.mxu1 }
 0x2ca   : > { %v5139_v6 = vmax.f32 %v5105_v2, 0.0  ;;  %v4997_v44 = vadd.f32 %v4846_v4, %v4508_v50  ;;  %v4510_v7 = vadd.f32 %v4365_v62, %v8048_v22 }
 0x2cb   : > { %v6675_v21 = vpop.f32.mrf.mxu0  ;;  %v6609_v3 = vpop.f32.mrf.mxu1 }
 0x2cc   : > { %v5849_v12 = vpack.c.bf16 %v5139_v6, %v5138_v51  ;;  %v5106_v15 = vadd.f32 %v8172_v52, %v4997_v44 }
 0x2cd   : > { %v4849_v11 = vpop.f32.mrf.mxu0  ;;  %v4368_v13 = vpop.f32.mrf.mxu1 }
 0x2ce   : > { %5922 = vst [vmem:[%s8182_s20 + $0x10] sm:$0xff] %v5849_v12   ;;  %v4998_v48 = vadd.f32 %v4849_v11, %v4509_v47  ;;  %v5140_v0 = vmax.f32 %v5106_v15, 0.0  ;;  %v4511_v38 = vadd.f32 %v4368_v13, %v8056_v20 }
 0x2cf   : > { %v6676_v63 = vpop.f32.mrf.mxu0  ;;  %v6610_v10 = vpop.f32.mrf.mxu1 }
 0x2d0   : > { %v5107_v35 = vadd.f32 %v8172_v52, %v4998_v48 }
 0x2d1   : > { %v4854_v19 = vpop.f32.mrf.mxu0  ;;  %v4373_v59 = vpop.f32.mrf.mxu1 }
 0x2d2   : > { %v5141_v43 = vmax.f32 %v5107_v35, 0.0  ;;  %v4999_v8 = vadd.f32 %v4854_v19, %v4510_v7  ;;  %v4512_v27 = vadd.f32 %v4373_v59, %v8064_v26 }
 0x2d3   : > { %v6679_v56 = vpop.f32.mrf.mxu0  ;;  %v6613_v60 = vpop.f32.mrf.mxu1 }
 0x2d4   : > { %v5854_v57 = vpack.c.bf16 %v5141_v43, %v5140_v0  ;;  %v5108_v23 = vadd.f32 %v8172_v52, %v4999_v8 }
 0x2d5   : > { %v4857_v28 = vpop.f32.mrf.mxu0  ;;  %v4376_v42 = vpop.f32.mrf.mxu1 }
 0x2d6   : > { %5923 = vst [vmem:[%s8182_s20 + $0x18] sm:$0xff] %v5854_v57   ;;  %v5000_v22 = vadd.f32 %v4857_v28, %v4511_v38  ;;  %v5142_v50 = vmax.f32 %v5108_v23, 0.0  ;;  %v4513_v51 = vadd.f32 %v4376_v42, %v8072_v36 }
 0x2d7   : > { %v6680_v29 = vpop.f32.mrf.mxu0  ;;  %v6614_v32 = vpop.f32.mrf.mxu1 }
 0x2d8   : > { %v5109_v49 = vadd.f32 %v8172_v52, %v5000_v22 }
 0x2d9   : > { %v4862_v30 = vpop.f32.mrf.mxu0  ;;  %v4381_v54 = vpop.f32.mrf.mxu1 }
 0x2da   : > { %v5143_v2 = vmax.f32 %v5109_v49, 0.0  ;;  %v5001_v20 = vadd.f32 %v4862_v30, %v4512_v27  ;;  %v4514_v3 = vadd.f32 %v4381_v54, %v8080_v41 }
 0x2db   : > { %v6683_v4 = vpop.f32.mrf.mxu0  ;;  %v6617_v62 = vpop.f32.mrf.mxu1 }
 0x2dc   : > { %v5859_v6 = vpack.c.bf16 %v5143_v2, %v5142_v50  ;;  %v5110_v21 = vadd.f32 %v8172_v52, %v5001_v20 }
 0x2dd   : > { %v4865_v44 = vpop.f32.mrf.mxu0  ;;  %v4384_v47 = vpop.f32.mrf.mxu1 }
 0x2de   : > { %5924 = vst [vmem:[%s8182_s20 + $0x20] sm:$0xff] %v5859_v6   ;;  %v5002_v26 = vadd.f32 %v4865_v44, %v4513_v51  ;;  %v5144_v48 = vmax.f32 %v5110_v21, 0.0  ;;  %v4515_v10 = vadd.f32 %v4384_v47, %v8088_v16 }
 0x2df   : > { %v6684_v12 = vpop.f32.mrf.mxu0  ;;  %v6618_v15 = vpop.f32.mrf.mxu1 }
 0x2e0   : > { %v5111_v11 = vadd.f32 %v8172_v52, %v5002_v26 }
 0x2e1   : > { %v4870_v13 = vpop.f32.mrf.mxu0  ;;  %v4389_v7 = vpop.f32.mrf.mxu1 }
 0x2e2   : > { %v5145_v63 = vmax.f32 %v5111_v11, 0.0  ;;  %v5003_v36 = vadd.f32 %v4870_v13, %v4514_v3  ;;  %v4516_v38 = vadd.f32 %v4389_v7, %v8096_v14 }
 0x2e3   : > { %v6687_v35 = vpop.f32.mrf.mxu0  ;;  %v6621_v0 = vpop.f32.mrf.mxu1 }
 0x2e4   : > { %v5864_v19 = vpack.c.bf16 %v5145_v63, %v5144_v48  ;;  %v5112_v59 = vadd.f32 %v8172_v52, %v5003_v36 }
 0x2e5   : > { %v4873_v43 = vpop.f32.mrf.mxu0  ;;  %v4392_v8 = vpop.f32.mrf.mxu1 }
 0x2e6   : > { %5925 = vst [vmem:[%s8182_s20 + $0x28] sm:$0xff] %v5864_v19   ;;  %v5004_v41 = vadd.f32 %v4873_v43, %v4515_v10  ;;  %v5146_v23 = vmax.f32 %v5112_v59, 0.0  ;;  %v4517_v27 = vadd.f32 %v4392_v8, %v8104_v31 }
 0x2e7   : > { %v6688_v56 = vpop.f32.mrf.mxu0  ;;  %v6622_v60 = vpop.f32.mrf.mxu1 }
 0x2e8   : > { %v5113_v57 = vadd.f32 %v8172_v52, %v5004_v41 }
 0x2e9   : > { %v4878_v28 = vpop.f32.mrf.mxu0  ;;  %v4397_v22 = vpop.f32.mrf.mxu1 }
 0x2ea   : > { %v5147_v42 = vmax.f32 %v5113_v57, 0.0  ;;  %v5005_v16 = vadd.f32 %v4878_v28, %v4516_v38  ;;  %v4518_v20 = vadd.f32 %v4397_v22, %v8111_v17 }
 0x2eb   : > { %v6691_v29 = vpop.f32.mrf.mxu0  ;;  %v6625_v32 = vpop.f32.mrf.mxu1 }
 0x2ec   : > { %v5869_v49 = vpack.c.bf16 %v5147_v42, %v5146_v23  ;;  %v5114_v50 = vadd.f32 %v8172_v52, %v5005_v16 }
 0x2ed   : > { %v4881_v30 = vpop.f32.mrf.mxu0  ;;  %v4400_v2 = vpop.f32.mrf.mxu1 }
 0x2ee   : > { %5926 = vst [vmem:[%s8182_s20 + $0x30] sm:$0xff] %v5869_v49   ;;  %v5006_v14 = vadd.f32 %v4881_v30, %v4517_v27  ;;  %v5148_v62 = vmax.f32 %v5114_v50, 0.0  ;;  %v4519_v26 = vadd.f32 %v4400_v2, %v8117_v39 }
 0x2ef   : > { %v6692_v54 = vpop.f32.mrf.mxu0  ;;  %v6626_v51 = vpop.f32.mrf.mxu1 }
 0x2f0   : > { %v5115_v4 = vadd.f32 %v8172_v52, %v5006_v14 }
 0x2f1   : > { %v4886_v6 = vpop.f32.mrf.mxu0  ;;  %v4405_v21 = vpop.f32.mrf.mxu1 }
 0x2f2   : > { %v5149_v44 = vmax.f32 %v5115_v4, 0.0  ;;  %v5007_v31 = vadd.f32 %v4886_v6, %v4518_v20  ;;  %v4520_v63 = vadd.f32 %v4405_v21, %v8122_v1 }
 0x2f3   : > { %v6695_v47 = vpop.f32.mrf.mxu0  ;;  %v6629_v3 = vpop.f32.mrf.mxu1 }
 0x2f4   : > { %v5874_v12 = vpack.c.bf16 %v5149_v44, %v5148_v62  ;;  %v5116_v15 = vadd.f32 %v8172_v52, %v5007_v31 }
 0x2f5   : > { %v4889_v11 = vpop.f32.mrf.mxu0  ;;  %v4408_v13 = vpop.f32.mrf.mxu1 }
 0x2f6   : > { %5927 = vst [vmem:[%s8182_s20 + $0x38] sm:$0xff] %v5874_v12   ;;  %v5008_v17 = vadd.f32 %v4889_v11, %v4519_v26  ;;  %v5150_v10 = vmax.f32 %v5116_v15, 0.0  ;;  %v4521_v59 = vadd.f32 %v4408_v13, %v8125_v25 }
 0x2f7   : > { %v6696_v48 = vpop.f32.mrf.mxu0  ;;  %v6630_v36 = vpop.f32.mrf.mxu1 }
 0x2f8   : > { %v5117_v7 = vadd.f32 %v8172_v52, %v5008_v17 }
 0x2f9   : > { %v4894_v35 = vpop.f32.mrf.mxu0  ;;  %v4413_v0 = vpop.f32.mrf.mxu1 }
 0x2fa   : > { %v5151_v19 = vmax.f32 %v5117_v7, 0.0  ;;  %v5009_v39 = vadd.f32 %v4894_v35, %v4520_v63  ;;  %v4522_v28 = vadd.f32 %v4413_v0, %v8128_v37 }
 0x2fb   : > { %v6699_v43 = vpop.f32.mrf.mxu0  ;;  %v6633_v41 = vpop.f32.mrf.mxu1 }
 0x2fc   : > { %v5879_v8 = vpack.c.bf16 %v5151_v19, %v5150_v10  ;;  %v5118_v38 = vadd.f32 %v8172_v52, %v5009_v39 }
 0x2fd   : > { %v4897_v56 = vpop.f32.mrf.mxu0  ;;  %v4416_v57 = vpop.f32.mrf.mxu1 }
 0x2fe   : > { %5928 = vst [vmem:[%s8182_s20 + $0x40] sm:$0xff] %v5879_v8   ;;  %v5010_v1 = vadd.f32 %v4897_v56, %v4521_v59  ;;  %v5152_v16 = vmax.f32 %v5118_v38, 0.0  ;;  %v4523_v32 = vadd.f32 %v4416_v57, %v8131_v40 }
 0x2ff   : > { %v6700_v60 = vpop.f32.mrf.mxu0  ;;  %v6634_v42 = vpop.f32.mrf.mxu1 }
 0x300   : > { %v5119_v23 = vadd.f32 %v8172_v52, %v5010_v1 }
 0x301   : > { %v4902_v22 = vpop.f32.mrf.mxu0  ;;  %v4421_v27 = vpop.f32.mrf.mxu1 }
 0x302   : > { %v5153_v29 = vmax.f32 %v5119_v23, 0.0  ;;  %v5011_v25 = vadd.f32 %v4902_v22, %v4522_v28  ;;  %v4524_v4 = vadd.f32 %v4421_v27, %v8134_v33 }
 0x303   : > { %v6703_v49 = vpop.f32.mrf.mxu0  ;;  %v6637_v50 = vpop.f32.mrf.mxu1 }
 0x304   : > { %v5884_v30 = vpack.c.bf16 %v5153_v29, %v5152_v16  ;;  %v5120_v14 = vadd.f32 %v8172_v52, %v5011_v25 }
 0x305   : > { %v4905_v2 = vpop.f32.mrf.mxu0  ;;  %v4424_v54 = vpop.f32.mrf.mxu1 }
 0x306   : > { %5929 = vst [vmem:[%s8182_s20 + $0x48] sm:$0xff] %v5884_v30   ;;  %v5012_v37 = vadd.f32 %v4905_v2, %v4523_v32  ;;  %v5154_v44 = vmax.f32 %v5120_v14, 0.0  ;;  %v4525_v26 = vadd.f32 %v4424_v54, %v8137_v46 }
 0x307   : > { %v6704_v20 = vpop.f32.mrf.mxu0  ;;  %v6638_v6 = vpop.f32.mrf.mxu1 }
 0x308   : > { %v5121_v51 = vadd.f32 %v8172_v52, %v5012_v37 }
 0x309   : > { %v4910_v62 = vpop.f32.mrf.mxu0  ;;  %v4429_v31 = vpop.f32.mrf.mxu1 }
 0x30a   : > { %v5155_v21 = vmax.f32 %v5121_v51, 0.0  ;;  %v5013_v40 = vadd.f32 %v4910_v62, %v4524_v4  ;;  %v4526_v48 = vadd.f32 %v4429_v31, %v8140_v53 }
 0x30b   : > { %v6707_v47 = vpop.f32.mrf.mxu0  ;;  %v6641_v3 = vpop.f32.mrf.mxu1 }
 0x30c   : > { %v5889_v12 = vpack.c.bf16 %v5155_v21, %v5154_v44  ;;  %v5122_v15 = vadd.f32 %v8172_v52, %v5013_v40 }
 0x30d   : > { %v4913_v11 = vpop.f32.mrf.mxu0  ;;  %v4432_v13 = vpop.f32.mrf.mxu1 }
 0x30e   : > { %5930 = vst [vmem:[%s8182_s20 + $0x50] sm:$0xff] %v5889_v12   ;;  %v5014_v33 = vadd.f32 %v4913_v11, %v4525_v26  ;;  %v5156_v35 = vmax.f32 %v5122_v15, 0.0  ;;  %v4527_v39 = vadd.f32 %v4432_v13, %v8143_v34 }
 0x30f   : > { %v6708_v17 = vpop.f32.mrf.mxu0  ;;  %v6642_v7 = vpop.f32.mrf.mxu1 }
 0x310   : > { %v5123_v63 = vadd.f32 %v8172_v52, %v5014_v33 }
 0x311   : > { %v4918_v36 = vpop.f32.mrf.mxu0  ;;  %v4437_v19 = vpop.f32.mrf.mxu1 }
 0x312   : > { %v5157_v10 = vmax.f32 %v5123_v63, 0.0  ;;  %v5015_v46 = vadd.f32 %v4918_v36, %v4526_v48  ;;  %v4528_v57 = vadd.f32 %v4437_v19, %v8146_v5 }
 0x313   : > { %v6711_v0 = vpop.f32.mrf.mxu0  ;;  %v6645_v59 = vpop.f32.mrf.mxu1 }
 0x314   : > { %v5894_v43 = vpack.c.bf16 %v5157_v10, %v5156_v35  ;;  %v5124_v41 = vadd.f32 %v8172_v52, %v5015_v46 }
 0x315   : > { %v4921_v8 = vpop.f32.mrf.mxu0  ;;  %v4440_v56 = vpop.f32.mrf.mxu1 }
 0x316   : > { %5931 = vst [vmem:[%s8182_s20 + $0x58] sm:$0xff] %v5894_v43   ;;  %v5016_v53 = vadd.f32 %v4921_v8, %v4527_v39  ;;  %v5158_v23 = vmax.f32 %v5124_v41, 0.0  ;;  %v4529_v29 = vadd.f32 %v4440_v56, %v8149_v24 }
 0x317   : > { %v6712_v38 = vpop.f32.mrf.mxu0  ;;  %v6646_v60 = vpop.f32.mrf.mxu1 }
 0x318   : > { %v5125_v1 = vadd.f32 %v8172_v52, %v5016_v53 }
 0x319   : > { %v4926_v28 = vpop.f32.mrf.mxu0  ;;  %v4445_v22 = vpop.f32.mrf.mxu1 }
 0x31a   : > { %v5159_v42 = vmax.f32 %v5125_v1, 0.0  ;;  %v5017_v34 = vadd.f32 %v4926_v28, %v4528_v57  ;;  %v4530_v2 = vadd.f32 %v4445_v22, %v8152_v58 }
 0x31b   : > { %v6715_v16 = vpop.f32.mrf.mxu0  ;;  %v6649_v25 = vpop.f32.mrf.mxu1 }
 0x31c   : > { %v5899_v27 = vpack.c.bf16 %v5159_v42, %v5158_v23  ;;  %v5126_v32 = vadd.f32 %v8172_v52, %v5017_v34 }
 0x31d   : > { %v4929_v49 = vpop.f32.mrf.mxu0  ;;  %v4448_v30 = vpop.f32.mrf.mxu1 }
 0x31e   : > { %5932 = vst [vmem:[%s8182_s20 + $0x60] sm:$0xff] %v5899_v27   ;;  %v5018_v5 = vadd.f32 %v4929_v49, %v4529_v29  ;;  %v5160_v20 = vmax.f32 %v5126_v32, 0.0  ;;  %v4531_v62 = vadd.f32 %v4448_v30, %v8155_v18 }
 0x31f   : > { %v6716_v50 = vpop.f32.mrf.mxu0  ;;  %v6650_v54 = vpop.f32.mrf.mxu1 }
 0x320   : > { %v5127_v14 = vadd.f32 %v8172_v52, %v5018_v5 }
 0x321   : > { %v4934_v37 = vpop.f32.mrf.mxu0  ;;  %v4453_v51 = vpop.f32.mrf.mxu1 }
 0x322   : > { %v5161_v4 = vmax.f32 %v5127_v14, 0.0  ;;  %v5019_v24 = vadd.f32 %v4934_v37, %v4530_v2  ;;  %v4532_v12 = vadd.f32 %v4453_v51, %v8158_v9 }
 0x323   : > { %v6719_v6 = vpop.f32.mrf.mxu0  ;;  %v6653_v21 = vpop.f32.mrf.mxu1 }
 0x324   : > { %v5904_v44 = vpack.c.bf16 %v5161_v4, %v5160_v20  ;;  %v5128_v40 = vadd.f32 %v8172_v52, %v5019_v24 }
 0x325   : > { %v4937_v31 = vpop.f32.mrf.mxu0  ;;  %v4456_v47 = vpop.f32.mrf.mxu1 }
 0x326   : > { %5933 = vst [vmem:[%s8182_s20 + $0x68] sm:$0xff] %v5904_v44   ;;  %v5020_v58 = vadd.f32 %v4937_v31, %v4531_v62  ;;  %v5162_v13 = vmax.f32 %v5128_v40, 0.0  ;;  %v4533_v63 = vadd.f32 %v4456_v47, %v8161_v55 }
 0x327   : > { %v6720_v26 = vpop.f32.mrf.mxu0  ;;  %v6654_v11 = vpop.f32.mrf.mxu1 }
 0x328   : > { %v5129_v3 = vadd.f32 %v8172_v52, %v5020_v58 }
 0x329   : > { %v4942_v15 = vpop.f32.mrf.mxu0  ;;  %v4461_v17 = vpop.f32.mrf.mxu1 }
 0x32a   : > { %v5163_v33 = vmax.f32 %v5129_v3, 0.0  ;;  %v5021_v18 = vadd.f32 %v4942_v15, %v4532_v12  ;;  %v4534_v0 = vadd.f32 %v4461_v17, %v8164_v61 }
 0x32b   : > { %v6723_v48 = vpop.f32.mrf.mxu0  ;;  %v6657_v36 = vpop.f32.mrf.mxu1 }
 0x32c   : > { %v5909_v7 = vpack.c.bf16 %v5163_v33, %v5162_v13  ;;  %v5130_v10 = vadd.f32 %v8172_v52, %v5021_v18 }
 0x32d   : > { %v4945_v35 = vpop.f32.mrf.mxu0  ;;  %v4464_v19 = vpop.f32.mrf.mxu1 }
 0x32e   : > { %5934 = vst [vmem:[%s8182_s20 + $0x70] sm:$0xff] %v5909_v7   ;;  %v5022_v9 = vadd.f32 %v4945_v35, %v4533_v63  ;;  %v5164_v8 = vmax.f32 %v5130_v10, 0.0  ;;  %v4535_v53 = vadd.f32 %v4464_v19, %v8166_v45 }
 0x32f   : > { %v6724_v46 = vpop.f32.mrf.mxu0  ;;  %v6658_v43 = vpop.f32.mrf.mxu1 }
 0x330   : > { %v5131_v39 = vadd.f32 %v8172_v52, %v5022_v9 }
 0x331   : > { %v4950_v59 = vpop.f32.mrf.mxu0 }
 0x332   : > { %v5165_v41 = vmax.f32 %v5131_v39, 0.0  ;;  %v5023_v55 = vadd.f32 %v4950_v59, %v4534_v0 }
 0x333   : > { %v6727_v56 = vpop.f32.mrf.mxu0 }
 0x334   : > { %v5914_v38 = vpack.c.bf16 %v5165_v41, %v5164_v8  ;;  %v5132_v1 = vadd.f32 %v8172_v52, %v5023_v55 }
 0x335   : > { %v4953_v57 = vpop.f32.mrf.mxu0 }
 0x336   : > { %5935 = vst [vmem:[%s8182_s20 + $0x78] sm:$0xff] %v5914_v38   ;;  %v5024_v60 = vadd.f32 %v4953_v57, %v4535_v53  ;;  %v5166_v23 = vmax.f32 %v5132_v1, 0.0 }
 0x337   : > { %v6728_v28 = vpop.f32.mrf.mxu0 }
 0x338   : > { %v5133_v61 = vadd.f32 %v8172_v52, %v5024_v60 }
 0x33a   : > { %v5167_v42 = vmax.f32 %v5133_v61, 0.0 }
 0x33c   : > { %v5919_v22 = vpack.c.bf16 %v5167_v42, %v5166_v23 }
 0x33e   : > { %5936 = vst [vmem:[%s8182_s20 + $0x80] sm:$0xff] %v5919_v22  }
 0x33f PF: > { %s13_s14 = sadd.s32 1, %s6951_s14   ;;  %s8277_s12 = smov %s6947_s13 }
 0x340   : > { %p10_p5 = scmp.ge.s32.totalorder %s13_s14, 4   ;;  %s8278_s13 = smov %s8280_s15 }
 0x342   :  { %12 = sbr.rel (!%p10_p5) target bundleno = 2 (0x2), region = 70 }

// kernel: fwd.8
= control target key start
LH: loop header
LB: loop body
LE: loop exit
PB: predicated region body
PF: predicated region fallthrough
CT: control target
= control target key end

     0   :  { %s3349_s12 = smov 0   ;;  %s3351_s13 = smov 0   ;;  %s3925_s0 = inlined_call_operand.vmem [shape: bf16[2,324,128], index: 0, kind: input, shape index: {}]   ;;  %s3926_s1 = inlined_call_operand.vmem [shape: bf16[9,128,128], index: 1, kind: input, shape index: {}]   ;;  %s3927_s2 = inlined_call_operand.vmem [shape: f32[1,128], index: 2, kind: input, shape index: {}]   ;;  %s3928_s3 = inlined_call_operand.vmem [shape: bf16[2,72,128], index: 3, kind: output, shape index: {}]  }
   0x1   :  { %s3353_s14 = smov 0  }
   0x2 LB: > { %s25_s15 = sadd.s32 1, %s3321_s13  ;;  %p2409_p0 = scmp.ge.s32.totalorder %s3325_s14, 1  ;;  %s3325_s14 = sphi %s3353_s14, %s13_s14   ;;  %s3321_s13 = sphi %s3351_s13, %s3930_s13   ;;  %s3317_s12 = sphi %s3349_s12, %s3929_s12  }
   0x3   : > { %p27_p1 = scmp.ge.s32.totalorder %s25_s15, 2  ;;  %p151_p2 = scmp.lt.s32.totalorder %s3325_s14, 3 }
   0x5   : > { %s3932_s15 = smov (%p27_p1, %s25_s15), 0  ;;  %p152_p3 = pnand %p2409_p0, %p151_p2 }
   0x6   : > { %p179_p4 = scmp.lt.s32.totalorder (!%p152_p3), %s3317_s12, 1 }
   0x7   : > { %155 = sbr.rel (%p152_p3) target bundleno = 427 (0x1ab), region = 32 }
   0xc   : > { %v3186_v0 = vld [vmem:[%s3926_s1 + $0x38] sm:$0xff]   ;;  %v3327_v1 = vmov 0.0   ;;  %v3188_v3 = vld [vmem:[%s3926_s1 + $0x30] sm:$0xff]   ;;  %vm3328_vm0 = vmmov 0   ;;  %v3190_v5 = vld [vmem:[%s3926_s1 + $0x28] sm:$0xff]   ;;  %s3934_s12 = smov (!%p179_p4, %s3317_s12), 1 }
   0xd   : > { %2818 = vmatprep.subr.bf16.mxu0 %v3327_v1  ;;  %2854 = vmatprep.subr.bf16.mxu1 %v3327_v1  ;;  %v3187_v2 = vld [vmem:[%s3926_s1 + $0x78] sm:$0xff]   ;;  %v3189_v4 = vld [vmem:[%s3926_s1 + $0x70] sm:$0xff]   ;;  %v3191_v6 = vld [vmem:[%s3926_s1 + $0x68] sm:$0xff]   ;;  %s3158_s5 = smul.u32 164, %s3934_s12  ;;  %vm429_vm1 = vsmask.f32 7424 }
   0xe   : > { %2819 = vmatpush3.bf16.msra.mxu0 %v3186_v0  ;;  %2834 = vmatprep.mubr.msk.bf16.mxu0 %vm3328_vm0, %v3327_v1  ;;  %v3192_v7 = vld [vmem:[%s3926_s1 + $0x20] sm:$0xff]   ;;  %v3194_v9 = vld [vmem:[%s3926_s1 + $0x18] sm:$0xff]   ;;  %v3196_v11 = vld [vmem:[%s3926_s1 + $0x10] sm:$0xff]   ;;  %vm916_vm2 = vcmask 1046528   ;;  %vm1130_vm3 = vsmask.f32 6400 }
   0xf   : > { %2855 = vmatpush3.bf16.msra.mxu1 %v3187_v2  ;;  %2820 = vmatprep.subr.bf16.mxu0 %v3327_v1  ;;  %v3193_v8 = vld [vmem:[%s3926_s1 + $0x60] sm:$0xff]   ;;  %v3195_v10 = vld [vmem:[%s3926_s1 + $0x58] sm:$0xff]   ;;  %s3420_s16 = scalar_lea.vmem %s3925_s0, %s3158_s5  ;;  %v3197_v12 = vld [vmem:[%s3926_s1 + $0x50] sm:$0xff]   ;;  %s3159_s5 = smul.u32 36, %s3934_s12 }
  0x10   : > { %2856 = vmatprep.subr.bf16.mxu1 %v3327_v1  ;;  %2870 = vmatprep.mubr.msk.bf16.mxu1 %vm3328_vm0, %v3327_v1  ;;  %v3203_v13 = vld [vmem:[%s3420_s16 + $0x28] sm:$0xff]   ;;  %v3204_v14 = vld [vmem:[%s3420_s16 + $0x30] sm:$0xff]   ;;  %v3200_v21 = vld [vmem:[%s3926_s1] sm:$0xff]  }
  0x11   : > { %v433_v15 = vshll.u32 %v3203_v13, 16  ;;  %v3198_v16 = vld [vmem:[%s3926_s1 + $0x8] sm:$0xff]   ;;  %v431_v18 = vshrl.u32 %v3203_v13, 16  ;;  %v438_v20 = vshll.u32 %v3204_v14, 16  ;;  %v3201_v22 = vld [vmem:[%s3926_s1 + $0x40] sm:$0xff]   ;;  %v3208_v25 = vld [vmem:[%s3420_s16 + $0x38] sm:$0xff]   ;;  %s3897_s12 = scalar_lea.vmem %s3928_s3, %s3159_s5 }
  0x12   : > { %2821 = vmatpush3.bf16.msra.mxu0 %v3188_v3  ;;  %v3199_v17 = vld [vmem:[%s3926_s1 + $0x48] sm:$0xff]   ;;  %v3202_v26 = vld [vmem:[%s3420_s16] sm:$0xff]   ;;  %v3205_v27 = vld [vmem:[%s3926_s1 + $0xb8] sm:$0xff]   ;;  %v442_v29 = vshrl.u32 %v3204_v14, 16  ;;  %v446_v30 = vshll.u32 %v3208_v25, 16  ;;  %v450_v40 = vshrl.u32 %v3208_v25, 16 }
  0x13   : > { %2857 = vmatpush3.bf16.msra.mxu1 %v3189_v4  ;;  %2822 = vmatprep.subr.bf16.mxu0 %v3327_v1  ;;  %v435_v19 = vrot.slane %v433_v15, 1  ;;  %v440_v24 = vrot.slane %v438_v20, 1  ;;  %v3209_v31 = vld [vmem:[%s3926_s1 + $0xf8] sm:$0xff]   ;;  %v3206_v32 = vld [vmem:[%s3926_s1 + $0xb0] sm:$0xff]   ;;  %v3213_v35 = vld [vmem:[%s3420_s16 + $0x40] sm:$0xff]  }
  0x14   : > { %2858 = vmatprep.subr.bf16.mxu1 %v3327_v1  ;;  %v448_v34 = vrot.slane %v446_v30, 1  ;;  %v3211_v36 = vld [vmem:[%s3926_s1 + $0xf0] sm:$0xff]   ;;  %v3207_v37 = vld [vmem:[%s3420_s16 + $0x8] sm:$0xff]   ;;  %v454_v41 = vshll.u32 %v3213_v35, 16  ;;  %v3214_v43 = vld [vmem:[%s3926_s1 + $0xa0] sm:$0xff]   ;;  %v458_v51 = vshrl.u32 %v3213_v35, 16 }
  0x15   : > { %v436_v23 = vor.u32 %v435_v19, %v431_v18  ;;  %v444_v33 = vor.u32 %v442_v29, %v440_v24  ;;  %v3210_v38 = vld [vmem:[%s3926_s1 + $0xa8] sm:$0xff]   ;;  %v3217_v46 = vld [vmem:[%s3926_s1 + $0xe0] sm:$0xff]   ;;  %v3212_v48 = vld [vmem:[%s3420_s16 + $0x10] sm:$0xff]  }
  0x16   : > { %2823 = vmatpush3.bf16.msra.mxu0 %v3190_v5  ;;  %v3215_v42 = vld [vmem:[%s3926_s1 + $0xe8] sm:$0xff]   ;;  %v452_v44 = vor.u32 %v450_v40, %v448_v34  ;;  %v456_v45 = vrot.slane %v454_v41, 1  ;;  %v3216_v49 = vld [vmem:[%s3926_s1 + $0x98] sm:$0xff]   ;;  %v3221_v54 = vld [vmem:[%s3926_s1 + $0x90] sm:$0xff]  }
  0x17   : > { %2859 = vmatpush3.bf16.msra.mxu1 %v3191_v6  ;;  %2824 = vmatprep.subr.bf16.mxu0 %v3327_v1  ;;  %v441_v28 = vsel %vm429_vm1, %v436_v23, %v440_v24  ;;  %v449_v39 = vsel %vm429_vm1, %v444_v33, %v448_v34  ;;  %v3219_v47 = vld [vmem:[%s3420_s16 + $0x48] sm:$0x1f]   ;;  %v3220_v53 = vld [vmem:[%s3926_s1 + $0xd8] sm:$0xff]   ;;  %v3222_v57 = vld [vmem:[%s3926_s1 + $0xd0] sm:$0xff]  }
  0x18   : > { %2860 = vmatprep.subr.bf16.mxu1 %v3327_v1  ;;  %v457_v50 = vsel %vm429_vm1, %v452_v44, %v456_v45  ;;  %v462_v52 = vshll.u32 %v3219_v47, 16  ;;  %v460_v55 = vor.u32 %v458_v51, %v456_v45  ;;  %v3218_v58 = vld [vmem:[%s3420_s16 + $0x18] sm:$0xff]   ;;  %v3228_v59 = vld [vmem:[%s3420_s16] sm:$0xff]   ;;  %v3223_v61 = vld [vmem:[%s3926_s1 + $0x88] sm:$0xff]   ;;  %v466_v0 = vshrl.u32 %v3219_v47, 16 }
  0x19   : > { %v3225_v62 = vld [vmem:[%s3926_s1 + $0xc8] sm:$0xff]   ;;  %v676_v2 = vshll.u32 %v3228_v59, 16  ;;  %v3224_v3 = vld [vmem:[%s3420_s16 + $0x20] ss:$0 sps:$4 sm:$0xff]   ;;  %v674_v6 = vshrl.u32 %v3228_v59, 16  ;;  %v3234_v14 = vld [vmem:[%s3420_s16 + $0x10] sm:$0xff]  }
  0x1a   : > { %2825 = vmatpush3.bf16.msra.mxu0 %v3192_v7  ;;  %v464_v56 = vrot.slane %v462_v52, 1  ;;  %v3229_v63 = vld [vmem:[%s3420_s16 + $0x8] sm:$0xff]   ;;  %v3226_v4 = vld [vmem:[%s3926_s1 + $0x80] sm:$0xff]   ;;  %v3232_v18 = vld [vmem:[%s3926_s1 + $0x138] sm:$0xff]   ;;  %v689_v20 = vshll.u32 %v3234_v14, 16 }
  0x1b   : > { %2861 = vmatpush3.bf16.msra.mxu1 %v3193_v8  ;;  %2826 = vmatprep.subr.bf16.mxu0 %v3327_v1  ;;  %v3227_v5 = vld [vmem:[%s3926_s1 + $0xc0] sm:$0xff]   ;;  %v681_v7 = vshll.u32 %v3229_v63, 16  ;;  %v685_v19 = vshrl.u32 %v3229_v63, 16  ;;  %v3236_v23 = vld [vmem:[%s3926_s1 + $0x178] sm:$0xff]   ;;  %v3233_v25 = vld [vmem:[%s3926_s1 + $0x130] sm:$0xff]  }
  0x1c   : > { %2862 = vmatprep.subr.bf16.mxu1 %v3327_v1  ;;  %v465_v60 = vsel %vm429_vm1, %v460_v55, %v464_v56  ;;  %v468_v8 = vor.u32 %v466_v0, %v464_v56  ;;  %v3239_v24 = vld [vmem:[%s3420_s16 + $0x18] sm:$0xff]   ;;  %v3238_v29 = vld [vmem:[%s3926_s1 + $0x170] sm:$0xff]   ;;  %v3237_v30 = vld [vmem:[%s3926_s1 + $0x128] sm:$0xff]  }
  0x1d   : > { %v683_v13 = vrot.slane %v681_v7, 1  ;;  %v3240_v33 = vld [vmem:[%s3420_s16 + $0x68] sm:$0xff]   ;;  %v3589_v41 = vld [vmem:[%s3420_s16 + $0x20] sm:$0x1f]   ;;  %v3243_v45 = vld [vmem:[%s3926_s1 + $0x118] sm:$0xff]  }
  0x1e   : > { %2827 = vmatpush3.bf16.msra.mxu0 %v3194_v9  ;;  %v678_v9 = vrot.slane %v676_v2, 1  ;;  %v922_v40 = vrot.slane %v3240_v33, 1  ;;  %v705_v47 = vshll.u32 %v3589_v41, 16  ;;  %v3248_v51 = vld [vmem:[%s3926_s1 + $0x110] sm:$0xff]   ;;  %v3254_v55 = vld [vmem:[%s3420_s16 + $0x78] sm:$0xfe]  }
  0x1f   : > { %2863 = vmatpush3.bf16.msra.mxu1 %v3195_v10  ;;  %2828 = vmatprep.subr.bf16.mxu0 %v3327_v1  ;;  %v3231_v10 = vld [vmem:[%s3420_s16 + $0x58] sm:$0xff]   ;;  %v3255_v56 = vld [vmem:[%s3420_s16 + $0x80] sm:$0xff]   ;;  %v1132_v0 = vshrl.u32 %v3254_v55, 16  ;;  %v1135_v2 = vshll.u32 %v3254_v55, 16 }
  0x20   : > { %2864 = vmatprep.subr.bf16.mxu1 %v3327_v1 }
  0x22   : > { %2829 = vmatpush3.bf16.msra.mxu0 %v3196_v11  ;;  %v3230_v11 = vld [vmem:[%s3420_s16 + $0x50] sm:$0xfe]  }
  0x23   : > { %2865 = vmatpush3.bf16.msra.mxu1 %v3197_v12  ;;  %2830 = vmatprep.subr.bf16.mxu0 %v3327_v1  ;;  %v679_v12 = vor.u32 %v678_v9, %v674_v6  ;;  %v917_v15 = vrot.slane %v3230_v11, 1  ;;  %v1134_v11 = vrot.slane %v1132_v0, 1 }
  0x24   : > { %2866 = vmatprep.subr.bf16.mxu1 %v3327_v1 }
  0x26   : > { %2831 = vmatpush3.bf16.msra.mxu0 %v3198_v16  ;;  %v918_v16 = vrot.slane %v3231_v10, 1  ;;  %v3253_v10 = vld [vmem:[%s3926_s1 + $0x140] sm:$0xff]  }
  0x27   : > { %2867 = vmatpush3.bf16.msra.mxu1 %v3199_v17  ;;  %2832 = vmatprep.subr.bf16.mxu0 %v3327_v1  ;;  %v684_v17 = vsel %vm429_vm1, %v679_v12, %v683_v13  ;;  %v1137_v12 = vrot.slane %v1135_v2, 2  ;;  %v3270_v2 = vld [vmem:[%s3926_s1 + $0x1e0] sm:$0xff]  }
  0x28   : > { %2868 = vmatprep.subr.bf16.mxu1 %v3327_v1 }
  0x2a   : > { %2833 = vmatpush3.bf16.msra.mxu0 %v3200_v21  ;;  %v3235_v21 = vld [vmem:[%s3420_s16 + $0x60] sm:$0xff]  }
  0x2b   : > { %2869 = vmatpush3.bf16.msra.mxu1 %v3201_v22  ;;  %2890 = vmatprep.subr.bf16.mxu0 %v3327_v1  ;;  %v919_v22 = vsel %vm916_vm2, %v917_v15, %v918_v16 }
  0x2c   : > { %2926 = vmatprep.subr.bf16.mxu1 %v3327_v1 }
  0x2d   : > { %2835 = vmatmul.mubr.bf16.vlgmr.msra.gmra.mxu0 %v3202_v26  ;;  %v687_v26 = vor.u32 %v685_v19, %v683_v13  ;;  %v3260_v19 = vld [vmem:[%s3420_s16 + $0x88] sm:$0xff]  }
  0x2e   : > { %2871 = vmatmul.mubr.bf16.vlgmr.msra.gmra.mxu1 %v441_v28  ;;  %2891 = vmatpush3.bf16.msra.mxu0 %v3205_v27  ;;  %v691_v27 = vrot.slane %v689_v20, 1  ;;  %v920_v28 = vrot.slane %v3235_v21, 1  ;;  %v3261_v21 = vld [vmem:[%s3420_s16 + $0x60] sm:$0xff]  }
  0x2f   : > { %2892 = vmatprep.subr.bf16.mxu0 %v3327_v1  ;;  %2838 = vmatprep.mubr.msk.bf16.mxu0 %vm3328_vm0, %v3327_v1 }
  0x30   : > { %2874 = vmatprep.mubr.msk.bf16.mxu1 %vm3328_vm0, %v3327_v1  ;;  %2927 = vmatpush3.bf16.msra.mxu1 %v3209_v31  ;;  %v693_v31 = vshrl.u32 %v3234_v14, 16  ;;  %v692_v34 = vsel %vm429_vm1, %v687_v26, %v691_v27  ;;  %v921_v35 = vsel %vm916_vm2, %v918_v16, %v920_v28 }
  0x31   : > { %2928 = vmatprep.subr.bf16.mxu1 %v3327_v1 }
  0x32   : > { %2893 = vmatpush3.bf16.msra.mxu0 %v3206_v32  ;;  %v697_v32 = vshll.u32 %v3239_v24, 16 }
  0x33   : > { %2894 = vmatprep.subr.bf16.mxu0 %v3327_v1 }
  0x34   : > { %2929 = vmatpush3.bf16.msra.mxu1 %v3211_v36  ;;  %v3242_v36 = vld [vmem:[%s3926_s1 + $0x168] sm:$0xff]  }
  0x35   : > { %2839 = vmatmul.mubr.bf16.gmra.mxu0 %v3207_v37  ;;  %2930 = vmatprep.subr.bf16.mxu1 %v3327_v1  ;;  %v3241_v37 = vld [vmem:[%s3926_s1 + $0x120] sm:$0xff]  }
  0x36   : > { %2875 = vmatmul.mubr.bf16.gmra.mxu1 %v449_v39  ;;  %2895 = vmatpush3.bf16.msra.mxu0 %v3210_v38  ;;  %v695_v38 = vor.u32 %v693_v31, %v691_v27  ;;  %v699_v39 = vrot.slane %v697_v32, 1  ;;  %v3258_v31 = vld [vmem:[%s3926_s1 + $0x1b8] sm:$0xff]   ;;  %v3266_v32 = vld [vmem:[%s3420_s16 + $0x68] sm:$0xff]  }
  0x37   : > { %2842 = vmatprep.mubr.msk.bf16.mxu0 %vm3328_vm0, %v3327_v1  ;;  %2878 = vmatprep.mubr.msk.bf16.mxu1 %vm3328_vm0, %v3327_v1 }
  0x38   : > { %2896 = vmatprep.subr.bf16.mxu0 %v3327_v1  ;;  %2931 = vmatpush3.bf16.msra.mxu1 %v3215_v42  ;;  %v3244_v42 = vld [vmem:[%s3926_s1 + $0x160] sm:$0xff]   ;;  %v700_v44 = vsel %vm429_vm1, %v695_v38, %v699_v39 }
  0x39   : > { %2932 = vmatprep.subr.bf16.mxu1 %v3327_v1 }
  0x3a   : > { %2897 = vmatpush3.bf16.msra.mxu0 %v3214_v43  ;;  %v3600_v43 = vld [vmem:[%s3420_s16 + $0x70] sm:$0x1f]  }
  0x3b   : > { %2898 = vmatprep.subr.bf16.mxu0 %v3327_v1 }
  0x3c   : > { %2933 = vmatpush3.bf16.msra.mxu1 %v3217_v46  ;;  %v701_v46 = vshrl.u32 %v3239_v24, 16  ;;  %v1149_v24 = vshrl.u32 %v3260_v19, 16 }
  0x3d   : > { %2843 = vmatmul.mubr.bf16.gmra.mxu0 %v3212_v48  ;;  %2934 = vmatprep.subr.bf16.mxu1 %v3327_v1  ;;  %v923_v48 = vsel %vm916_vm2, %v920_v28, %v922_v40  ;;  %v1397_v28 = vshrl.u32 %v3261_v21, 16 }
  0x3e   : > { %2879 = vmatmul.mubr.bf16.gmra.mxu1 %v457_v50  ;;  %2899 = vmatpush3.bf16.msra.mxu0 %v3216_v49  ;;  %v3247_v49 = vld [vmem:[%s3926_s1 + $0x158] sm:$0xff]   ;;  %v924_v50 = vrot.slane %v3600_v43, 1  ;;  %v703_v52 = vor.u32 %v701_v46, %v699_v39  ;;  %v1409_v43 = vshll.u32 %v3266_v32, 16 }
  0x3f   : > { %2846 = vmatprep.mubr.msk.bf16.mxu0 %vm3328_vm0, %v3327_v1  ;;  %2882 = vmatprep.mubr.msk.bf16.mxu1 %vm3328_vm0, %v3327_v1  ;;  %v1399_v38 = vrot.slane %v1397_v28, 1  ;;  %v3283_v28 = vld [vmem:[%s3420_s16 + $0x34] sm:$0xff]  }
  0x40   : > { %2900 = vmatprep.subr.bf16.mxu0 %v3327_v1  ;;  %2935 = vmatpush3.bf16.msra.mxu1 %v3220_v53  ;;  %v707_v53 = vrot.slane %v705_v47, 1  ;;  %v925_v63 = vsel %vm916_vm2, %v922_v40, %v924_v50  ;;  %v3264_v47 = vld [vmem:[%s3926_s1 + $0x1f0] sm:$0xff]  }
  0x41   : > { %2936 = vmatprep.subr.bf16.mxu1 %v3327_v1 }
  0x42   : > { %2901 = vmatpush3.bf16.msra.mxu0 %v3221_v54  ;;  %v3249_v54 = vld [vmem:[%s3926_s1 + $0x150] sm:$0xff]   ;;  %v708_v59 = vsel %vm429_vm1, %v703_v52, %v707_v53  ;;  %v1411_v52 = vrot.slane %v1409_v43, 2  ;;  %v3289_v43 = vld [vmem:[%s3420_s16 + $0x1c] sm:$0xff]  }
  0x43   : > { %2902 = vmatprep.subr.bf16.mxu0 %v3327_v1 }
  0x44   : > { %2937 = vmatpush3.bf16.msra.mxu1 %v3222_v57  ;;  %v3250_v57 = vld [vmem:[%s3926_s1 + $0x108] sm:$0xff]  }
  0x45   : > { %2847 = vmatmul.mubr.bf16.gmra.mxu0 %v3218_v58  ;;  %2938 = vmatprep.subr.bf16.mxu1 %v3327_v1  ;;  %v3256_v58 = vld [vmem:[%s3420_s16 + $0x50] sm:$0xfe]  }
  0x46   : > { %2883 = vmatmul.mubr.bf16.gmra.mxu1 %v465_v60  ;;  %2850 = vmatprep.mubr.msk.bf16.mxu0 %vm3328_vm0, %v3327_v1  ;;  %v709_v60 = vshrl.u32 %v3589_v41, 16  ;;  %v1380_v6 = vshrl.u32 %v3256_v58, 16  ;;  %v1383_v7 = vshll.u32 %v3256_v58, 16 }
  0x47   : > { %2886 = vmatprep.mubr.msk.bf16.mxu1 %vm3328_vm0, %v3327_v1  ;;  %2903 = vmatpush3.bf16.msra.mxu0 %v3223_v61  ;;  %v3251_v61 = vld [vmem:[%s3926_s1 + $0x148] sm:$0xff]  }
  0x48   : > { %2939 = vmatpush3.bf16.msra.mxu1 %v3225_v62  ;;  %2904 = vmatprep.subr.bf16.mxu0 %v3327_v1  ;;  %v3257_v62 = vld [vmem:[%s3420_s16 + $0x58] sm:$0xff]   ;;  %v711_v14 = vor.u32 %v709_v60, %v707_v53  ;;  %v1382_v16 = vrot.slane %v1380_v6, 1 }
  0x49   : > { %2940 = vmatprep.subr.bf16.mxu1 %v3327_v1  ;;  %v1391_v9 = vshll.u32 %v3257_v62, 16 }
  0x4b   : > { %2905 = vmatpush3.bf16.msra.mxu0 %v3226_v4  ;;  %v1143_v4 = vshll.u32 %v3255_v56, 16  ;;  %v1393_v20 = vrot.slane %v1391_v9, 2 }
  0x4c   : > { %2941 = vmatpush3.bf16.msra.mxu1 %v3227_v5  ;;  %2962 = vmatprep.subr.bf16.mxu0 %v3327_v1  ;;  %v3252_v5 = vld [vmem:[%s3926_s1 + $0x100] sm:$0xff]  }
  0x4d   : > { %2851 = vmatmul.mubr.bf16.gmra.mxu0 %v3224_v3  ;;  %2998 = vmatprep.subr.bf16.mxu1 %v3327_v1  ;;  %v1140_v3 = vshrl.u32 %v3255_v56, 16  ;;  %v1145_v15 = vrot.slane %v1143_v4, 2  ;;  %v3272_v56 = vld [vmem:[%s3420_s16 + $0x70] sm:$0x3f]   ;;  %v3269_v4 = vld [vmem:[%s3926_s1 + $0x198] sm:$0xff]  }
  0x4e   : > { %2887 = vmatmul.mubr.bf16.gmra.mxu1 %v468_v8  ;;  %2906 = vmatprep.mubr.msk.bf16.mxu0 %vm3328_vm0, %v3327_v1  ;;  %v1388_v8 = vshrl.u32 %v3257_v62, 16  ;;  %v1418_v0 = vshll.u32 %v3272_v56, 16 }
  0x4f   : > { %2942 = vmatprep.mubr.msk.bf16.mxu1 %vm3328_vm0, %v3327_v1  ;;  %v1142_v13 = vrot.slane %v1140_v3, 1 }
  0x50   : > { %v1420_v9 = vrot.slane %v1418_v0, 2  ;;  %v3295_v0 = vld [vmem:[%s3926_s1 + $0x210] sm:$0xff]  }
  0x55   : > { %2907 = vmatmul.mubr.bf16.vlgmr.msra.gmra.mxu0 %v684_v17  ;;  %v1385_v17 = vrot.slane %v1383_v7, 2 }
  0x56   : > { %2943 = vmatmul.mubr.bf16.vlgmr.msra.gmra.mxu1 %v919_v22  ;;  %2963 = vmatpush3.bf16.msra.mxu0 %v3232_v18  ;;  %v1390_v18 = vrot.slane %v1388_v8, 1  ;;  %v1138_v22 = vor.u32 %v1137_v12, %v1134_v11  ;;  %v3274_v12 = vld [vmem:[%s3926_s1 + $0x190] sm:$0xff]  }
  0x57   : > { %2964 = vmatprep.subr.bf16.mxu0 %v3327_v1  ;;  %2910 = vmatprep.mubr.msk.bf16.mxu0 %vm3328_vm0, %v3327_v1  ;;  %v1386_v26 = vor.u32 %v1385_v17, %v1382_v16  ;;  %v3280_v16 = vld [vmem:[%s3420_s16 + $0x4] sm:$0xff]  }
  0x58   : > { %2946 = vmatprep.mubr.msk.bf16.mxu1 %vm3328_vm0, %v3327_v1  ;;  %2999 = vmatpush3.bf16.msra.mxu1 %v3236_v23  ;;  %v1146_v23 = vor.u32 %v1145_v15, %v1142_v13  ;;  %v1394_v27 = vor.u32 %v1393_v20, %v1390_v18  ;;  %v3276_v18 = vld [vmem:[%s3926_s1 + $0x188] sm:$0xff]  }
  0x59   : > { %3000 = vmatprep.subr.bf16.mxu1 %v3327_v1  ;;  %v3281_v20 = vld [vmem:[%s3420_s16 + $0xc] sm:$0xff]  }
  0x5a   : > { %2965 = vmatpush3.bf16.msra.mxu0 %v3233_v25  ;;  %v1152_v25 = vshll.u32 %v3260_v19, 16  ;;  %v1147_v33 = vsel %vm1130_vm3, %v1138_v22, %v1146_v23  ;;  %v3277_v19 = vld [vmem:[%s3926_s1 + $0x1c8] sm:$0xff]   ;;  %v3278_v22 = vld [vmem:[%s3926_s1 + $0x180] sm:$0xff]  }
  0x5b   : > { %2966 = vmatprep.subr.bf16.mxu0 %v3327_v1 }
  0x5c   : > { %3001 = vmatpush3.bf16.msra.mxu1 %v3238_v29  ;;  %v1400_v29 = vshll.u32 %v3261_v21, 16  ;;  %v1630_v21 = vshll.u32 %v3280_v16, 16 }
  0x5d   : > { %2911 = vmatmul.mubr.bf16.gmra.mxu0 %v692_v34  ;;  %3002 = vmatprep.subr.bf16.mxu1 %v3327_v1  ;;  %v1151_v34 = vrot.slane %v1149_v24, 1  ;;  %v1628_v24 = vshrl.u32 %v3280_v16, 16 }
  0x5e   : > { %2947 = vmatmul.mubr.bf16.gmra.mxu1 %v921_v35  ;;  %2967 = vmatpush3.bf16.msra.mxu0 %v3237_v30  ;;  %v3265_v30 = vld [vmem:[%s3420_s16 + $0x90] sm:$0xff]   ;;  %v1154_v35 = vrot.slane %v1152_v25, 2  ;;  %v1402_v39 = vrot.slane %v1400_v29, 2  ;;  %v1632_v25 = vrot.slane %v1630_v21, 1 }
  0x5f   : > { %2914 = vmatprep.mubr.msk.bf16.mxu0 %vm3328_vm0, %v3327_v1  ;;  %2950 = vmatprep.mubr.msk.bf16.mxu1 %vm3328_vm0, %v3327_v1  ;;  %v1158_v40 = vshrl.u32 %v3265_v30, 16  ;;  %v1161_v41 = vshll.u32 %v3265_v30, 16 }
  0x60   : > { %2968 = vmatprep.subr.bf16.mxu0 %v3327_v1  ;;  %3003 = vmatpush3.bf16.msra.mxu1 %v3242_v36  ;;  %v3262_v36 = vld [vmem:[%s3926_s1 + $0x1f8] sm:$0xff]   ;;  %v1403_v46 = vor.u32 %v1402_v39, %v1399_v38  ;;  %v1633_v29 = vor.u32 %v1632_v25, %v1628_v24 }
  0x61   : > { %3004 = vmatprep.subr.bf16.mxu1 %v3327_v1  ;;  %v3287_v39 = vld [vmem:[%s3420_s16 + $0x3c] sm:$0xff]  }
  0x62   : > { %2969 = vmatpush3.bf16.msra.mxu0 %v3241_v37  ;;  %v1395_v37 = vsel %vm1130_vm3, %v1386_v26, %v1394_v27  ;;  %v1404_v55 = vsel %vm1130_vm3, %v1394_v27, %v1403_v46  ;;  %v1635_v26 = vshll.u32 %v3281_v20, 16  ;;  %v3282_v27 = vld [vmem:[%s3420_s16 + $0x2c] sm:$0xfe]  }
  0x63   : > { %2970 = vmatprep.subr.bf16.mxu0 %v3327_v1 }
  0x64   : > { %3005 = vmatpush3.bf16.msra.mxu1 %v3244_v42  ;;  %v1406_v42 = vshrl.u32 %v3266_v32, 16  ;;  %v1637_v30 = vrot.slane %v1635_v26, 1  ;;  %v1870_v32 = vrot.slane %v3282_v27, 1 }
  0x65   : > { %2915 = vmatmul.mubr.bf16.gmra.mxu0 %v700_v44  ;;  %3006 = vmatprep.subr.bf16.mxu1 %v3327_v1  ;;  %v3259_v44 = vld [vmem:[%s3926_s1 + $0x1b0] sm:$0xff]  }
  0x66   : > { %2951 = vmatmul.mubr.bf16.gmra.mxu1 %v923_v48  ;;  %2971 = vmatpush3.bf16.msra.mxu0 %v3243_v45  ;;  %v1155_v45 = vor.u32 %v1154_v35, %v1151_v34  ;;  %v3263_v48 = vld [vmem:[%s3926_s1 + $0x1a8] sm:$0xff]   ;;  %v1638_v34 = vsel %vm429_vm1, %v1633_v29, %v1637_v30  ;;  %v3284_v35 = vld [vmem:[%s3926_s1 + $0x238] sm:$0xff]  }
  0x67   : > { %2918 = vmatprep.mubr.msk.bf16.mxu0 %vm3328_vm0, %v3327_v1  ;;  %2954 = vmatprep.mubr.msk.bf16.mxu1 %vm3328_vm0, %v3327_v1 }
  0x68   : > { %2972 = vmatprep.subr.bf16.mxu0 %v3327_v1  ;;  %3007 = vmatpush3.bf16.msra.mxu1 %v3247_v49  ;;  %v1160_v49 = vrot.slane %v1158_v40, 1  ;;  %v1156_v53 = vsel %vm1130_vm3, %v1146_v23, %v1155_v45  ;;  %v3279_v23 = vld [vmem:[%s3926_s1 + $0x1c0] sm:$0xff]   ;;  %v3285_v40 = vld [vmem:[%s3926_s1 + $0x230] sm:$0xff]  }
  0x69   : > { %3008 = vmatprep.subr.bf16.mxu1 %v3327_v1 }
  0x6a   : > { %2973 = vmatpush3.bf16.msra.mxu0 %v3248_v51  ;;  %v1408_v51 = vrot.slane %v1406_v42, 1 }
  0x6b   : > { %2974 = vmatprep.subr.bf16.mxu0 %v3327_v1 }
  0x6c   : > { %3009 = vmatpush3.bf16.msra.mxu1 %v3249_v54  ;;  %v3271_v54 = vld [vmem:[%s3420_s16 + $0x98] sm:$0x3f]   ;;  %v1412_v62 = vor.u32 %v1411_v52, %v1408_v51 }
  0x6d   : > { %2919 = vmatmul.mubr.bf16.gmra.mxu0 %v708_v59  ;;  %3010 = vmatprep.subr.bf16.mxu1 %v3327_v1  ;;  %v3267_v59 = vld [vmem:[%s3926_s1 + $0x1a0] sm:$0xff]   ;;  %v1167_v60 = vshrl.u32 %v3271_v54, 16 }
  0x6e   : > { %2955 = vmatmul.mubr.bf16.gmra.mxu1 %v925_v63  ;;  %2922 = vmatprep.mubr.msk.bf16.mxu0 %vm3328_vm0, %v3327_v1  ;;  %v1415_v63 = vshrl.u32 %v3272_v56, 16  ;;  %v1413_v7 = vsel %vm1130_vm3, %v1403_v46, %v1412_v62  ;;  %v3288_v46 = vld [vmem:[%s3926_s1 + $0x228] sm:$0xff]  }
  0x6f   : > { %2958 = vmatprep.mubr.msk.bf16.mxu1 %vm3328_vm0, %v3327_v1  ;;  %2975 = vmatpush3.bf16.msra.mxu0 %v3250_v57  ;;  %v3268_v57 = vld [vmem:[%s3926_s1 + $0x1e8] sm:$0xff]  }
  0x70   : > { %3011 = vmatpush3.bf16.msra.mxu1 %v3251_v61  ;;  %2976 = vmatprep.subr.bf16.mxu0 %v3327_v1  ;;  %v1170_v61 = vshll.u32 %v3271_v54, 16  ;;  %v1417_v8 = vrot.slane %v1415_v63, 1  ;;  %v3293_v54 = vld [vmem:[%s3420_s16 + $0x24] sm:$0x1f]  }
  0x71   : > { %3012 = vmatprep.subr.bf16.mxu1 %v3327_v1 }
  0x72   : > { %v1172_v6 = vrot.slane %v1170_v61, 2  ;;  %v1421_v13 = vor.u32 %v1420_v9, %v1417_v8  ;;  %v3294_v61 = vld [vmem:[%s3420_s16 + $0x4c] sm:$0x1f]   ;;  %v3298_v9 = vld [vmem:[%s3420_s16 + $0x4] sm:$0xfe]  }
  0x73   : > { %2977 = vmatpush3.bf16.msra.mxu0 %v3252_v5  ;;  %v1169_v5 = vrot.slane %v1167_v60, 1 }
  0x74   : > { %3013 = vmatpush3.bf16.msra.mxu1 %v3253_v10  ;;  %3034 = vmatprep.subr.bf16.mxu0 %v3327_v1  ;;  %v3273_v10 = vld [vmem:[%s3926_s1 + $0x1d8] sm:$0xff]   ;;  %v1422_v17 = vsel %vm1130_vm3, %v1412_v62, %v1421_v13 }
  0x75   : > { %2923 = vmatmul.mubr.bf16.gmra.mxu0 %v711_v14  ;;  %3070 = vmatprep.subr.bf16.mxu1 %v3327_v1  ;;  %v1173_v11 = vor.u32 %v1172_v6, %v1169_v5  ;;  %v3275_v14 = vld [vmem:[%s3926_s1 + $0x1d0] sm:$0xff]   ;;  %v3296_v5 = vld [vmem:[%s3926_s1 + $0x208] sm:$0xff]   ;;  %v1663_v6 = vshrl.u32 %v3293_v54, 16 }
  0x76   : > { %2959 = vmatmul.mubr.bf16.gmra.mxu1 %v924_v50  ;;  %2978 = vmatprep.mubr.msk.bf16.mxu0 %vm3328_vm0, %v3327_v1  ;;  %v1163_v50 = vrot.slane %v1161_v41, 2 }
  0x77   : > { %3014 = vmatprep.mubr.msk.bf16.mxu1 %vm3328_vm0, %v3327_v1 }
  0x78   : > { %v1164_v58 = vor.u32 %v1163_v50, %v1160_v49  ;;  %v3290_v50 = vld [vmem:[%s3420_s16 + $0x44] sm:$0xff]  }
  0x7a   : > { %v1165_v3 = vsel %vm1130_vm3, %v1155_v45, %v1164_v58  ;;  %v1174_v15 = vsel %vm1130_vm3, %v1164_v58, %v1173_v11  ;;  %v1655_v58 = vshrl.u32 %v3289_v43, 16 }
  0x7d   : > { %2979 = vmatmul.mubr.bf16.vlgmr.msra.gmra.mxu0 %v1147_v33  ;;  %v1871_v33 = vrot.slane %v3283_v28, 1 }
  0x7e   : > { %3015 = vmatmul.mubr.bf16.vlgmr.msra.gmra.mxu1 %v1395_v37  ;;  %3035 = vmatpush3.bf16.msra.mxu0 %v3258_v31  ;;  %v3286_v31 = vld [vmem:[%s3420_s16 + $0x14] sm:$0xff]  }
  0x7f   : > { %3036 = vmatprep.subr.bf16.mxu0 %v3327_v1  ;;  %2982 = vmatprep.mubr.msk.bf16.mxu0 %vm3328_vm0, %v3327_v1  ;;  %v1643_v37 = vshll.u32 %v3286_v31, 16  ;;  %v1872_v38 = vsel %vm916_vm2, %v1870_v32, %v1871_v33 }
  0x80   : > { %3018 = vmatprep.mubr.msk.bf16.mxu1 %vm3328_vm0, %v3327_v1  ;;  %3071 = vmatpush3.bf16.msra.mxu1 %v3262_v36  ;;  %v1639_v36 = vshrl.u32 %v3281_v20, 16 }
  0x81   : > { %3072 = vmatprep.subr.bf16.mxu1 %v3327_v1  ;;  %v1645_v42 = vrot.slane %v1643_v37, 1 }
  0x82   : > { %3037 = vmatpush3.bf16.msra.mxu0 %v3259_v44  ;;  %v1641_v41 = vor.u32 %v1639_v36, %v1637_v30  ;;  %v1873_v44 = vrot.slane %v3287_v39, 1 }
  0x83   : > { %3038 = vmatprep.subr.bf16.mxu0 %v3327_v1 }
  0x84   : > { %3073 = vmatpush3.bf16.msra.mxu1 %v3264_v47  ;;  %v1646_v45 = vsel %vm429_vm1, %v1641_v41, %v1645_v42  ;;  %v1647_v47 = vshrl.u32 %v3286_v31, 16  ;;  %v1874_v49 = vsel %vm916_vm2, %v1871_v33, %v1873_v44 }
  0x85   : > { %2983 = vmatmul.mubr.bf16.gmra.mxu0 %v1156_v53  ;;  %3074 = vmatprep.subr.bf16.mxu1 %v3327_v1  ;;  %v3291_v53 = vld [vmem:[%s3926_s1 + $0x220] sm:$0xff]  }
  0x86   : > { %3019 = vmatmul.mubr.bf16.gmra.mxu1 %v1404_v55  ;;  %3039 = vmatpush3.bf16.msra.mxu0 %v3263_v48  ;;  %v1651_v48 = vshll.u32 %v3289_v43, 16  ;;  %v1649_v51 = vor.u32 %v1647_v47, %v1645_v42  ;;  %v1875_v55 = vrot.slane %v3290_v50, 1 }
  0x87   : > { %2986 = vmatprep.mubr.msk.bf16.mxu0 %vm3328_vm0, %v3327_v1  ;;  %3022 = vmatprep.mubr.msk.bf16.mxu1 %vm3328_vm0, %v3327_v1 }
  0x88   : > { %3040 = vmatprep.subr.bf16.mxu0 %v3327_v1  ;;  %3075 = vmatpush3.bf16.msra.mxu1 %v3268_v57  ;;  %v1653_v52 = vrot.slane %v1651_v48, 1  ;;  %v3292_v57 = vld [vmem:[%s3926_s1 + $0x218] sm:$0xff]   ;;  %v1876_v60 = vsel %vm916_vm2, %v1873_v44, %v1875_v55 }
  0x89   : > { %3076 = vmatprep.subr.bf16.mxu1 %v3327_v1 }
  0x8a   : > { %3041 = vmatpush3.bf16.msra.mxu0 %v3267_v59  ;;  %v1654_v56 = vsel %vm429_vm1, %v1649_v51, %v1653_v52  ;;  %v1659_v59 = vshll.u32 %v3293_v54, 16  ;;  %v1657_v62 = vor.u32 %v1655_v58, %v1653_v52 }
  0x8b   : > { %3042 = vmatprep.subr.bf16.mxu0 %v3327_v1 }
  0x8c   : > { %3077 = vmatpush3.bf16.msra.mxu1 %v3270_v2  ;;  %v1661_v63 = vrot.slane %v1659_v59, 1  ;;  %v1877_v2 = vrot.slane %v3294_v61, 1 }
  0x8d   : > { %2987 = vmatmul.mubr.bf16.gmra.mxu0 %v1165_v3  ;;  %3078 = vmatprep.subr.bf16.mxu1 %v3327_v1 }
  0x8e   : > { %3023 = vmatmul.mubr.bf16.gmra.mxu1 %v1413_v7  ;;  %3043 = vmatpush3.bf16.msra.mxu0 %v3269_v4  ;;  %v1662_v3 = vsel %vm429_vm1, %v1657_v62, %v1661_v63  ;;  %v1878_v4 = vsel %vm916_vm2, %v1875_v55, %v1877_v2  ;;  %v3297_v7 = vld [vmem:[%s3926_s1 + $0x200] sm:$0xff]   ;;  %v1665_v8 = vor.u32 %v1663_v6, %v1661_v63 }
  0x8f   : > { %2990 = vmatprep.mubr.msk.bf16.mxu0 %vm3328_vm0, %v3327_v1  ;;  %3026 = vmatprep.mubr.msk.bf16.mxu1 %vm3328_vm0, %v3327_v1 }
  0x90   : > { %3044 = vmatprep.subr.bf16.mxu0 %v3327_v1  ;;  %3079 = vmatpush3.bf16.msra.mxu1 %v3273_v10  ;;  %v3299_v10 = vld [vmem:[%s3420_s16 + $0xc] sm:$0xff]  }
  0x91   : > { %3080 = vmatprep.subr.bf16.mxu1 %v3327_v1 }
  0x92   : > { %3045 = vmatpush3.bf16.msra.mxu0 %v3274_v12  ;;  %v3301_v12 = vld [vmem:[%s3420_s16 + $0x24] sm:$0x1f]  }
  0x93   : > { %3046 = vmatprep.subr.bf16.mxu0 %v3327_v1  ;;  %v2090_v16 = vrot.slane %v3301_v12, 1 }
  0x94   : > { %3081 = vmatpush3.bf16.msra.mxu1 %v3275_v14  ;;  %v2084_v14 = vrot.slane %v3299_v10, 1 }
  0x95   : > { %2991 = vmatmul.mubr.bf16.gmra.mxu0 %v1174_v15  ;;  %3082 = vmatprep.subr.bf16.mxu1 %v3327_v1 }
  0x96   : > { %3027 = vmatmul.mubr.bf16.gmra.mxu1 %v1422_v17  ;;  %2994 = vmatprep.mubr.msk.bf16.mxu0 %vm3328_vm0, %v3327_v1 }
  0x97   : > { %3030 = vmatprep.mubr.msk.bf16.mxu1 %vm3328_vm0, %v3327_v1  ;;  %3047 = vmatpush3.bf16.msra.mxu0 %v3276_v18  ;;  %v3302_v18 = vld [vmem:[%s3420_s16 + $0x14] sm:$0xff]  }
  0x98   : > { %3083 = vmatpush3.bf16.msra.mxu1 %v3277_v19  ;;  %3048 = vmatprep.subr.bf16.mxu0 %v3327_v1  ;;  %v2086_v20 = vrot.slane %v3302_v18, 1 }
  0x99   : > { %3084 = vmatprep.subr.bf16.mxu1 %v3327_v1 }
  0x9a   : > { %v2087_v21 = vsel %vm916_vm2, %v2084_v14, %v2086_v20 }
  0x9b   : > { %3049 = vmatpush3.bf16.msra.mxu0 %v3278_v22 }
  0x9c   : > { %3085 = vmatpush3.bf16.msra.mxu1 %v3279_v23  ;;  %3106 = vmatprep.subr.bf16.mxu0 %v3327_v1 }
  0x9d   : > { %2995 = vmatmul.mubr.bf16.gmra.mxu0 %v1173_v11  ;;  %3142 = vmatprep.subr.bf16.mxu1 %v3327_v1  ;;  %v3300_v11 = vld [vmem:[%s3420_s16 + $0x1c] sm:$0xff]  }
  0x9e   : > { %3031 = vmatmul.mubr.bf16.gmra.mxu1 %v1421_v13  ;;  %3050 = vmatprep.mubr.msk.bf16.mxu0 %vm3328_vm0, %v3327_v1  ;;  %v2083_v13 = vrot.slane %v3298_v9, 1  ;;  %v2088_v15 = vrot.slane %v3300_v11, 1 }
  0x9f   : > { %3086 = vmatprep.mubr.msk.bf16.mxu1 %vm3328_vm0, %v3327_v1 }
  0xa0   : > { %v2085_v17 = vsel %vm916_vm2, %v2083_v13, %v2084_v14  ;;  %v2091_v19 = vsel %vm916_vm2, %v2088_v15, %v2090_v16  ;;  %v2089_v22 = vsel %vm916_vm2, %v2086_v20, %v2088_v15 }
  0xa5   : > { %3051 = vmatmul.mubr.bf16.vlgmr.msra.gmra.mxu0 %v1638_v34 }
  0xa6   : > { %3087 = vmatmul.mubr.bf16.vlgmr.msra.gmra.mxu1 %v1872_v38  ;;  %3107 = vmatpush3.bf16.msra.mxu0 %v3284_v35 }
  0xa7   : > { %3108 = vmatprep.subr.bf16.mxu0 %v3327_v1  ;;  %3054 = vmatprep.mubr.msk.bf16.mxu0 %vm3328_vm0, %v3327_v1 }
  0xa8   : > { %3090 = vmatprep.mubr.msk.bf16.mxu1 %vm3328_vm0, %v3327_v1  ;;  %3150 = vmatpush3.bf16.msra.mxu1 %v3284_v35 }
  0xa9   : > { %3143 = vmatprep.subr.bf16.mxu1 %v3327_v1 }
  0xaa   : > { %3109 = vmatpush3.bf16.msra.mxu0 %v3285_v40 }
  0xab   : > { %3110 = vmatprep.subr.bf16.mxu0 %v3327_v1 }
  0xac   : > { %3151 = vmatpush3.bf16.msra.mxu1 %v3285_v40 }
  0xad   : > { %3055 = vmatmul.mubr.bf16.gmra.mxu0 %v1646_v45  ;;  %3144 = vmatprep.subr.bf16.mxu1 %v3327_v1 }
  0xae   : > { %3091 = vmatmul.mubr.bf16.gmra.mxu1 %v1874_v49  ;;  %3111 = vmatpush3.bf16.msra.mxu0 %v3288_v46 }
  0xaf   : > { %3058 = vmatprep.mubr.msk.bf16.mxu0 %vm3328_vm0, %v3327_v1  ;;  %3094 = vmatprep.mubr.msk.bf16.mxu1 %vm3328_vm0, %v3327_v1 }
  0xb0   : > { %3112 = vmatprep.subr.bf16.mxu0 %v3327_v1  ;;  %3152 = vmatpush3.bf16.msra.mxu1 %v3288_v46 }
  0xb1   : > { %3145 = vmatprep.subr.bf16.mxu1 %v3327_v1 }
  0xb2   : > { %3113 = vmatpush3.bf16.msra.mxu0 %v3291_v53 }
  0xb3   : > { %3114 = vmatprep.subr.bf16.mxu0 %v3327_v1 }
  0xb4   : > { %3153 = vmatpush3.bf16.msra.mxu1 %v3291_v53 }
  0xb5   : > { %3059 = vmatmul.mubr.bf16.gmra.mxu0 %v1654_v56  ;;  %3146 = vmatprep.subr.bf16.mxu1 %v3327_v1 }
  0xb6   : > { %3095 = vmatmul.mubr.bf16.gmra.mxu1 %v1876_v60  ;;  %3115 = vmatpush3.bf16.msra.mxu0 %v3292_v57 }
  0xb7   : > { %3062 = vmatprep.mubr.msk.bf16.mxu0 %vm3328_vm0, %v3327_v1  ;;  %3098 = vmatprep.mubr.msk.bf16.mxu1 %vm3328_vm0, %v3327_v1 }
  0xb8   : > { %3154 = vmatpush3.bf16.msra.mxu1 %v3292_v57  ;;  %3116 = vmatprep.subr.bf16.mxu0 %v3327_v1 }
  0xb9   : > { %3147 = vmatprep.subr.bf16.mxu1 %v3327_v1 }
  0xba   : > { %3117 = vmatpush3.bf16.msra.mxu0 %v3295_v0 }
  0xbb   : > { %3118 = vmatprep.subr.bf16.mxu0 %v3327_v1 }
  0xbc   : > { %3155 = vmatpush3.bf16.msra.mxu1 %v3295_v0 }
  0xbd   : > { %3063 = vmatmul.mubr.bf16.gmra.mxu0 %v1662_v3  ;;  %3148 = vmatprep.subr.bf16.mxu1 %v3327_v1 }
  0xbe   : > { %3099 = vmatmul.mubr.bf16.gmra.mxu1 %v1878_v4  ;;  %3066 = vmatprep.mubr.msk.bf16.mxu0 %vm3328_vm0, %v3327_v1 }
  0xbf   : > { %3102 = vmatprep.mubr.msk.bf16.mxu1 %vm3328_vm0, %v3327_v1  ;;  %3119 = vmatpush3.bf16.msra.mxu0 %v3296_v5 }
  0xc0   : > { %3156 = vmatpush3.bf16.msra.mxu1 %v3296_v5  ;;  %3120 = vmatprep.subr.bf16.mxu0 %v3327_v1 }
  0xc1   : > { %3149 = vmatprep.subr.bf16.mxu1 %v3327_v1 }
  0xc3   : > { %3121 = vmatpush3.bf16.msra.mxu0 %v3297_v7 }
  0xc4   : > { %3157 = vmatpush3.bf16.msra.mxu1 %v3297_v7 }
  0xc5   : > { %3067 = vmatmul.mubr.bf16.gmra.mxu0 %v1665_v8 }
  0xc6   : > { %3103 = vmatmul.mubr.bf16.gmra.mxu1 %v1877_v2  ;;  %3122 = vmatprep.mubr.msk.bf16.mxu0 %vm3328_vm0, %v3327_v1 }
  0xc7   : > { %3134 = vmatprep.mubr.msk.bf16.mxu1 %vm3328_vm0, %v3327_v1 }
  0xcd   : > { %3123 = vmatmul.mubr.bf16.vlgmr.msra.gmra.mxu0 %v2085_v17 }
  0xce   : > { %3135 = vmatmul.mubr.bf16.vlgmr.msra.gmra.mxu1 %v2091_v19  ;;  %3126 = vmatprep.mubr.msk.bf16.mxu0 %vm3328_vm0, %v3327_v1 }
  0xcf   : > { %3138 = vmatprep.mubr.msk.bf16.mxu1 %vm3328_vm0, %v3327_v1 }
  0xd5   : > { %3127 = vmatmul.mubr.bf16.gmra.mxu0 %v2087_v21 }
  0xd6   : > { %3139 = vmatmul.mubr.bf16.gmra.mxu1 %v2090_v16  ;;  %3130 = vmatprep.mubr.msk.bf16.mxu0 %vm3328_vm0, %v3327_v1 }
  0xdd   : > { %3131 = vmatmul.mubr.bf16.gmra.mxu0 %v2089_v22 }
  0xed   : > { %v330_v23 = vpop.f32.mrf.mxu0 }
  0xee   : > { %v556_v24 = vpop.f32.mrf.mxu1 }
  0xef   : > { %v603_v25 = vadd.f32 %v556_v24, %v330_v23  ;;  %v2836_v26 = vpop.f32.mrf.mxu0 }
  0xf0   : > { %v2872_v27 = vpop.f32.mrf.mxu1 }
  0xf1   : > { %v333_v28 = vpop.f32.mrf.mxu0 }
  0xf2   : > { %v559_v29 = vpop.f32.mrf.mxu1 }
  0xf3   : > { %v604_v30 = vadd.f32 %v559_v29, %v333_v28  ;;  %v2837_v31 = vpop.f32.mrf.mxu0 }
  0xf4   : > { %v2873_v32 = vpop.f32.mrf.mxu1 }
  0xf5   : > { %v338_v33 = vpop.f32.mrf.mxu0 }
  0xf6   : > { %v564_v34 = vpop.f32.mrf.mxu1 }
  0xf7   : > { %v605_v35 = vadd.f32 %v564_v34, %v338_v33  ;;  %v2840_v36 = vpop.f32.mrf.mxu0 }
  0xf8   : > { %v2876_v37 = vpop.f32.mrf.mxu1 }
  0xf9   : > { %v341_v38 = vpop.f32.mrf.mxu0 }
  0xfa   : > { %v567_v1 = vpop.f32.mrf.mxu1 }
  0xfb   : > { %v606_v39 = vadd.f32 %v567_v1, %v341_v38  ;;  %v2841_v40 = vpop.f32.mrf.mxu0 }
  0xfc   : > { %v2877_v41 = vpop.f32.mrf.mxu1 }
  0xfd   : > { %v346_v42 = vpop.f32.mrf.mxu0 }
  0xfe   : > { %v572_v43 = vpop.f32.mrf.mxu1 }
  0xff   : > { %v607_v44 = vadd.f32 %v572_v43, %v346_v42  ;;  %v2844_v45 = vpop.f32.mrf.mxu0 }
 0x100   : > { %v2880_v46 = vpop.f32.mrf.mxu1 }
 0x101   : > { %v349_v47 = vpop.f32.mrf.mxu0 }
 0x102   : > { %v575_v48 = vpop.f32.mrf.mxu1 }
 0x103   : > { %v608_v49 = vadd.f32 %v575_v48, %v349_v47  ;;  %v2845_v50 = vpop.f32.mrf.mxu0 }
 0x104   : > { %v2881_v51 = vpop.f32.mrf.mxu1 }
 0x105   : > { %v354_v52 = vpop.f32.mrf.mxu0 }
 0x106   : > { %v580_v53 = vpop.f32.mrf.mxu1 }
 0x107   : > { %v609_v54 = vadd.f32 %v580_v53, %v354_v52  ;;  %v2848_v55 = vpop.f32.mrf.mxu0 }
 0x108   : > { %v2884_v56 = vpop.f32.mrf.mxu1 }
 0x109   : > { %v357_v57 = vpop.f32.mrf.mxu0 }
 0x10a   : > { %v583_v58 = vpop.f32.mrf.mxu1 }
 0x10b   : > { %v610_v59 = vadd.f32 %v583_v58, %v357_v57  ;;  %v2849_v60 = vpop.f32.mrf.mxu0 }
 0x10c   : > { %v2885_v61 = vpop.f32.mrf.mxu1 }
 0x10d   : > { %v362_v62 = vpop.f32.mrf.mxu0 }
 0x10e   : > { %v588_v63 = vpop.f32.mrf.mxu1 }
 0x10f   : > { %v611_v0 = vadd.f32 %v588_v63, %v362_v62  ;;  %v2852_v2 = vpop.f32.mrf.mxu0 }
 0x110   : > { %v2888_v3 = vpop.f32.mrf.mxu1 }
 0x111   : > { %v365_v4 = vpop.f32.mrf.mxu0 }
 0x112   : > { %v591_v5 = vpop.f32.mrf.mxu1 }
 0x113   : > { %v2853_v6 = vpop.f32.mrf.mxu0 }
 0x114   : > { %v2889_v7 = vpop.f32.mrf.mxu1 }
 0x115   : > { %v799_v8 = vpop.f32.mrf.mxu0 }
 0x116   : > { %v846_v9 = vadd.f32 %v799_v8, %v603_v25  ;;  %v1013_v10 = vpop.f32.mrf.mxu1 }
 0x117   : > { %v2908_v11 = vpop.f32.mrf.mxu0 }
 0x118   : > { %v1060_v12 = vadd.f32 %v1013_v10, %v846_v9  ;;  %v2944_v13 = vpop.f32.mrf.mxu1 }
 0x119   : > { %v802_v14 = vpop.f32.mrf.mxu0 }
 0x11a   : > { %v847_v15 = vadd.f32 %v802_v14, %v604_v30  ;;  %v1016_v16 = vpop.f32.mrf.mxu1 }
 0x11b   : > { %v2909_v17 = vpop.f32.mrf.mxu0 }
 0x11c   : > { %v1061_v18 = vadd.f32 %v1016_v16, %v847_v15  ;;  %v2945_v19 = vpop.f32.mrf.mxu1 }
 0x11d   : > { %v807_v20 = vpop.f32.mrf.mxu0 }
 0x11e   : > { %v848_v21 = vadd.f32 %v807_v20, %v605_v35  ;;  %v1021_v22 = vpop.f32.mrf.mxu1 }
 0x11f   : > { %v2912_v23 = vpop.f32.mrf.mxu0 }
 0x120   : > { %v1062_v24 = vadd.f32 %v1021_v22, %v848_v21  ;;  %v2948_v26 = vpop.f32.mrf.mxu1 }
 0x121   : > { %v810_v27 = vpop.f32.mrf.mxu0 }
 0x122   : > { %v849_v28 = vadd.f32 %v810_v27, %v606_v39  ;;  %v1024_v29 = vpop.f32.mrf.mxu1 }
 0x123   : > { %v2913_v25 = vpop.f32.mrf.mxu0 }
 0x124   : > { %v1063_v31 = vadd.f32 %v1024_v29, %v849_v28  ;;  %v2949_v32 = vpop.f32.mrf.mxu1 }
 0x125   : > { %v815_v33 = vpop.f32.mrf.mxu0 }
 0x126   : > { %v850_v34 = vadd.f32 %v815_v33, %v607_v44  ;;  %v1029_v36 = vpop.f32.mrf.mxu1 }
 0x127   : > { %v2916_v30 = vpop.f32.mrf.mxu0 }
 0x128   : > { %v1064_v37 = vadd.f32 %v1029_v36, %v850_v34  ;;  %v2952_v38 = vpop.f32.mrf.mxu1 }
 0x129   : > { %v818_v1 = vpop.f32.mrf.mxu0 }
 0x12a   : > { %v851_v40 = vadd.f32 %v818_v1, %v608_v49  ;;  %v1032_v41 = vpop.f32.mrf.mxu1 }
 0x12b   : > { %v2917_v35 = vpop.f32.mrf.mxu0 }
 0x12c   : > { %v1065_v42 = vadd.f32 %v1032_v41, %v851_v40  ;;  %v2953_v43 = vpop.f32.mrf.mxu1 }
 0x12d   : > { %v823_v45 = vpop.f32.mrf.mxu0 }
 0x12e   : > { %v852_v46 = vadd.f32 %v823_v45, %v609_v54  ;;  %v1037_v47 = vpop.f32.mrf.mxu1 }
 0x12f   : > { %v2920_v39 = vpop.f32.mrf.mxu0 }
 0x130   : > { %v3849_v48 = vadd.f32 %v1037_v47, %v852_v46  ;;  %v2956_v50 = vpop.f32.mrf.mxu1 }
 0x131   : > { %v826_v51 = vpop.f32.mrf.mxu0 }
 0x132   : > { %v853_v52 = vadd.f32 %v826_v51, %v610_v59  ;;  %v1040_v44 = vpop.f32.mrf.mxu1 }
 0x133   : > { %v2921_v53 = vpop.f32.mrf.mxu0 }
 0x134   : > { %v3851_v55 = vadd.f32 %v1040_v44, %v853_v52  ;;  %v2957_v56 = vpop.f32.mrf.mxu1 }
 0x135   : > { %v831_v57 = vpop.f32.mrf.mxu0 }
 0x136   : > { %v854_v49 = vadd.f32 %v831_v57, %v611_v0  ;;  %v1045_v58 = vpop.f32.mrf.mxu1 }
 0x137   : > { %v2924_v60 = vpop.f32.mrf.mxu0 }
 0x138   : > { %v3853_v61 = vadd.f32 %v1045_v58, %v854_v49  ;;  %v2960_v62 = vpop.f32.mrf.mxu1 }
 0x139   : > { %v834_v54 = vpop.f32.mrf.mxu0 }
 0x13a   : > { %v1048_v63 = vpop.f32.mrf.mxu1 }
 0x13b   : > { %v2925_v2 = vpop.f32.mrf.mxu0 }
 0x13c   : > { %v2961_v3 = vpop.f32.mrf.mxu1 }
 0x13d   : > { %v1262_v4 = vpop.f32.mrf.mxu0 }
 0x13e   : > { %v1309_v5 = vadd.f32 %v1262_v4, %v1060_v12  ;;  %v1510_v6 = vpop.f32.mrf.mxu1 }
 0x13f   : > { %v2980_v59 = vpop.f32.mrf.mxu0 }
 0x140   : > { %v3855_v7 = vadd.f32 %v1510_v6, %v1309_v5  ;;  %v3016_v8 = vpop.f32.mrf.mxu1 }
 0x141   : > { %v1265_v9 = vpop.f32.mrf.mxu0 }
 0x142   : > { %v1310_v10 = vadd.f32 %v1265_v9, %v1061_v18  ;;  %v1513_v11 = vpop.f32.mrf.mxu1 }
 0x143   : > { %v2981_v0 = vpop.f32.mrf.mxu0 }
 0x144   : > { %v3857_v13 = vadd.f32 %v1513_v11, %v1310_v10  ;;  %v3017_v14 = vpop.f32.mrf.mxu1 }
 0x145   : > { %v1270_v15 = vpop.f32.mrf.mxu0 }
 0x146   : > { %v1311_v16 = vadd.f32 %v1270_v15, %v1062_v24  ;;  %v1518_v17 = vpop.f32.mrf.mxu1 }
 0x147   : > { %v2984_v19 = vpop.f32.mrf.mxu0 }
 0x148   : > { %v3859_v20 = vadd.f32 %v1518_v17, %v1311_v16  ;;  %v3020_v21 = vpop.f32.mrf.mxu1 }
 0x149   : > { %v1273_v12 = vpop.f32.mrf.mxu0 }
 0x14a   : > { %v1312_v22 = vadd.f32 %v1273_v12, %v1063_v31  ;;  %v1521_v23 = vpop.f32.mrf.mxu1 }
 0x14b   : > { %v2985_v26 = vpop.f32.mrf.mxu0 }
 0x14c   : > { %v3861_v27 = vadd.f32 %v1521_v23, %v1312_v22  ;;  %v3021_v28 = vpop.f32.mrf.mxu1 }
 0x14d   : > { %v1278_v18 = vpop.f32.mrf.mxu0 }
 0x14e   : > { %v1313_v29 = vadd.f32 %v1278_v18, %v1064_v37  ;;  %v1526_v25 = vpop.f32.mrf.mxu1 }
 0x14f   : > { %v2988_v32 = vpop.f32.mrf.mxu0 }
 0x150   : > { %v3863_v33 = vadd.f32 %v1526_v25, %v1313_v29  ;;  %v3024_v34 = vpop.f32.mrf.mxu1 }
 0x151   : > { %v1281_v24 = vpop.f32.mrf.mxu0 }
 0x152   : > { %v1314_v36 = vadd.f32 %v1281_v24, %v1065_v42  ;;  %v1529_v30 = vpop.f32.mrf.mxu1 }
 0x153   : > { %v2989_v38 = vpop.f32.mrf.mxu0 }
 0x154   : > { %v3865_v1 = vadd.f32 %v1529_v30, %v1314_v36  ;;  %v3025_v40 = vpop.f32.mrf.mxu1 }
 0x155   : > { %v1286_v31 = vpop.f32.mrf.mxu0 }
 0x156   : > { %v1534_v41 = vpop.f32.mrf.mxu1  ;;  %v1315_v29 = vadd.f32 %v1286_v31, %v3849_v48 }
 0x157   : > { %v2992_v35 = vpop.f32.mrf.mxu0 }
 0x158   : > { %v3028_v43 = vpop.f32.mrf.mxu1  ;;  %v1563_v36 = vadd.f32 %v1534_v41, %v1315_v29 }
 0x159   : > { %v1289_v45 = vpop.f32.mrf.mxu0 }
 0x15a   : > { %v1537_v46 = vpop.f32.mrf.mxu1  ;;  %v1316_v30 = vadd.f32 %v1289_v45, %v3851_v55 }
 0x15b   : > { %v2993_v47 = vpop.f32.mrf.mxu0 }
 0x15c   : > { %v3029_v37 = vpop.f32.mrf.mxu1 }
 0x15d   : > { %v1294_v39 = vpop.f32.mrf.mxu0 }
 0x15e   : > { %v1542_v50 = vpop.f32.mrf.mxu1 }
 0x15f   : > { %v2996_v51 = vpop.f32.mrf.mxu0 }
 0x160   : > { %v3032_v52 = vpop.f32.mrf.mxu1  ;;  %v1564_v51 = vadd.f32 %v1537_v46, %v1316_v30 }
 0x161   : > { %v1297_v44 = vpop.f32.mrf.mxu0  ;;  %v1317_v52 = vadd.f32 %v1294_v39, %v3853_v61 }
 0x162   : > { %v1545_v53 = vpop.f32.mrf.mxu1 }
 0x163   : > { %v2997_v42 = vpop.f32.mrf.mxu0  ;;  %v1565_v45 = vadd.f32 %v1542_v50, %v1317_v52 }
 0x164   : > { %v3033_v56 = vpop.f32.mrf.mxu1 }
 0x165   : > { %v1753_v57 = vpop.f32.mrf.mxu0 }
 0x166   : > { %v1966_v49 = vpop.f32.mrf.mxu1  ;;  %v1800_v40 = vadd.f32 %v1753_v57, %v3855_v7  ;;  %v3885_v7 = vld [vmem:[%s3927_s2] ss:$0 sm:$0xff] }
 0x167   : > { %v3052_v58 = vpop.f32.mrf.mxu0 }
 0x168   : > { %v3088_v60 = vpop.f32.mrf.mxu1  ;;  %v2013_v53 = vadd.f32 %v1966_v49, %v1800_v40 }
 0x169   : > { %v1756_v62 = vpop.f32.mrf.mxu0 }
 0x16a   : > { %v1969_v54 = vpop.f32.mrf.mxu1  ;;  %v1801_v48 = vadd.f32 %v1756_v62, %v3857_v13 }
 0x16b   : > { %v3053_v63 = vpop.f32.mrf.mxu0 }
 0x16c   : > { %v3089_v2 = vpop.f32.mrf.mxu1  ;;  %v2014_v61 = vadd.f32 %v1969_v54, %v1801_v48 }
 0x16d   : > { %v1761_v3 = vpop.f32.mrf.mxu0 }
 0x16e   : > { %v1974_v4 = vpop.f32.mrf.mxu1  ;;  %v1802_v39 = vadd.f32 %v1761_v3, %v3859_v20 }
 0x16f   : > { %v3056_v5 = vpop.f32.mrf.mxu0 }
 0x170   : > { %v3092_v6 = vpop.f32.mrf.mxu1 }
 0x171   : > { %v1764_v59 = vpop.f32.mrf.mxu0 }
 0x172   : > { %v3867_v8 = vpop.f32.mrf.mxu1 }
 0x173   : > { %v3057_v9 = vpop.f32.mrf.mxu0 }
 0x174   : > { %v3093_v10 = vpop.f32.mrf.mxu1 }
 0x175   : > { %v3869_v11 = vpop.f32.mrf.mxu0  ;;  %v2015_v10 = vadd.f32 %v1974_v4, %v1802_v39 }
 0x176   : > { %v3871_v0 = vpop.f32.mrf.mxu1 }
 0x177   : > { %v3060_v14 = vpop.f32.mrf.mxu0 }
 0x178   : > { %v3096_v15 = vpop.f32.mrf.mxu1  ;;  %v1803_v14 = vadd.f32 %v1764_v59, %v3861_v27 }
 0x179   : > { %v3873_v16 = vpop.f32.mrf.mxu0 }
 0x17a   : > { %v3875_v17 = vpop.f32.mrf.mxu1 }
 0x17b   : > { %v3061_v19 = vpop.f32.mrf.mxu0 }
 0x17c   : > { %v3097_v21 = vpop.f32.mrf.mxu1 }
 0x17d   : > { %v1777_v12 = vpop.f32.mrf.mxu0 }
 0x17e   : > { %v1990_v22 = vpop.f32.mrf.mxu1  ;;  %v1806_v43 = vadd.f32 %v1777_v12, %v1563_v36 }
 0x17f   : > { %v3064_v23 = vpop.f32.mrf.mxu0 }
 0x180   : > { %v3100_v26 = vpop.f32.mrf.mxu1  ;;  %v2019_v42 = vadd.f32 %v1990_v22, %v1806_v43 }
 0x181   : > { %v1780_v28 = vpop.f32.mrf.mxu0 }
 0x182   : > { %v1993_v18 = vpop.f32.mrf.mxu1  ;;  %v1807_v56 = vadd.f32 %v1780_v28, %v1564_v51  ;;  %v2016_v28 = vadd.f32 %v3867_v8, %v1803_v14 }
 0x183   : > { %v3065_v25 = vpop.f32.mrf.mxu0 }
 0x184   : > { %v3101_v32 = vpop.f32.mrf.mxu1  ;;  %v2020_v13 = vadd.f32 %v1993_v18, %v1807_v56  ;;  %v1804_v18 = vadd.f32 %v3869_v11, %v3863_v33  ;;  %v1805_v33 = vadd.f32 %v3873_v16, %v3865_v1 }
 0x185   : > { %v1785_v34 = vpop.f32.mrf.mxu0 }
 0x186   : > { %v1998_v24 = vpop.f32.mrf.mxu1  ;;  %v1808_v60 = vadd.f32 %v1785_v34, %v1565_v45  ;;  %v2017_v8 = vadd.f32 %v3871_v0, %v1804_v18  ;;  %v2018_v48 = vadd.f32 %v3875_v17, %v1805_v33 }
 0x187   : > { %v3068_v38 = vpop.f32.mrf.mxu0 }
 0x188   : > { %v3104_v35 = vpop.f32.mrf.mxu1  ;;  %v2021_v20 = vadd.f32 %v1998_v24, %v1808_v60 }
 0x189   : > { %v1788_v47 = vpop.f32.mrf.mxu0 }
 0x18a   : > { %v2001_v37 = vpop.f32.mrf.mxu1 }
 0x18b   : > { %v3069_v44 = vpop.f32.mrf.mxu0 }
 0x18c   : > { %v3105_v31 = vpop.f32.mrf.mxu1 }
 0x18d   : > { %v2179_v41 = vpop.f32.mrf.mxu0 }
 0x18e   : > { %v2226_v58 = vadd.f32 %v2179_v41, %v2013_v53  ;;  %v2203_v55 = vpop.f32.mrf.mxu1 }
 0x18f   : > { %v2232_v46 = vadd.f32 %v2203_v55, %v2019_v42  ;;  %v3124_v57 = vpop.f32.mrf.mxu0 }
 0x190   : > { %v3136_v49 = vpop.f32.mrf.mxu1  ;;  %v2260_v63 = vadd.f32 %v3885_v7, %v2226_v58 }
 0x191   : > { %v2182_v62 = vpop.f32.mrf.mxu0  ;;  %v2266_v50 = vadd.f32 %v3885_v7, %v2232_v46 }
 0x192   : > { %v2227_v2 = vadd.f32 %v2182_v62, %v2014_v61  ;;  %v2206_v5 = vpop.f32.mrf.mxu1  ;;  %v2269_v21 = vmax.f32 %v2260_v63, 0.0 }
 0x193   : > { %v2233_v6 = vadd.f32 %v2206_v5, %v2020_v13  ;;  %v3125_v9 = vpop.f32.mrf.mxu0  ;;  %v2275_v26 = vmax.f32 %v2266_v50, 0.0 }
 0x194   : > { %v2261_v54 = vadd.f32 %v3885_v7, %v2227_v2  ;;  %v3137_v15 = vpop.f32.mrf.mxu1 }
 0x195   : > { %v2267_v3 = vadd.f32 %v3885_v7, %v2233_v6  ;;  %v2187_v19 = vpop.f32.mrf.mxu0 }
 0x196   : > { %v2270_v12 = vmax.f32 %v2261_v54, 0.0  ;;  %v2228_v22 = vadd.f32 %v2187_v19, %v2015_v10  ;;  %v2211_v23 = vpop.f32.mrf.mxu1 }
 0x197   : > { %v2276_v27 = vmax.f32 %v2267_v3, 0.0  ;;  %v2234_v4 = vadd.f32 %v2211_v23, %v2021_v20  ;;  %v3128_v59 = vpop.f32.mrf.mxu0 }
 0x198   : > { %v2681_v29 = vpack.c.bf16 %v2270_v12, %v2269_v21  ;;  %v3140_v25 = vpop.f32.mrf.mxu1  ;;  %v2262_v36 = vadd.f32 %v3885_v7, %v2228_v22 }
 0x199   : > { %v2696_v32 = vpack.c.bf16 %v2276_v27, %v2275_v26  ;;  %v2268_v34 = vadd.f32 %v3885_v7, %v2234_v4  ;;  %v2190_v24 = vpop.f32.mrf.mxu0 }
 0x19a   : > { %2682 = vst [vmem:[%s3897_s12] sm:$0xff] %v2681_v29   ;;  %v2229_v30 = vadd.f32 %v2190_v24, %v2016_v28  ;;  %v2214_v38 = vpop.f32.mrf.mxu1  ;;  %v2271_v51 = vmax.f32 %v2262_v36, 0.0 }
 0x19b   : > { %2700 = vst [vmem:[%s3897_s12 + $0x18] sm:$0xff] %v2696_v32   ;;  %v2277_v40 = vmax.f32 %v2268_v34, 0.0  ;;  %v3129_v35 = vpop.f32.mrf.mxu0 }
 0x19c   : > { %v2263_v11 = vadd.f32 %v3885_v7, %v2229_v30  ;;  %v3141_v43 = vpop.f32.mrf.mxu1 }
 0x19d   : > { %v2677_v47 = vpack.c.bf16 %v2277_v40, %v2277_v40  ;;  %v2195_v37 = vpop.f32.mrf.mxu0 }
 0x19e   : > { %v2272_v52 = vmax.f32 %v2263_v11, 0.0  ;;  %v2230_v44 = vadd.f32 %v2195_v37, %v2017_v8 }
 0x19f   : > { %2323 = vst [vmem:[%s3897_s12 + $0x20] sm:$0xf] %v2677_v47  ;;  %v3132_v53 = vpop.f32.mrf.mxu0 }
 0x1a0   : > { %v2686_v31 = vpack.c.bf16 %v2272_v52, %v2271_v51  ;;  %v2264_v0 = vadd.f32 %v3885_v7, %v2230_v44 }
 0x1a1   : > { %v2198_v42 = vpop.f32.mrf.mxu0 }
 0x1a2   : > { %2698 = vst [vmem:[%s3897_s12 + $0x8] sm:$0xff] %v2686_v31   ;;  %v2231_v56 = vadd.f32 %v2198_v42, %v2018_v48  ;;  %v2273_v41 = vmax.f32 %v2264_v0, 0.0 }
 0x1a3   : > { %v3133_v1 = vpop.f32.mrf.mxu0 }
 0x1a4   : > { %v2265_v16 = vadd.f32 %v3885_v7, %v2231_v56 }
 0x1a6   : > { %v2274_v58 = vmax.f32 %v2265_v16, 0.0 }
 0x1a8   : > { %v2691_v55 = vpack.c.bf16 %v2274_v58, %v2273_v41 }
 0x1aa   : > { %2699 = vst [vmem:[%s3897_s12 + $0x10] sm:$0xff] %v2691_v55  }
 0x1ab PF: > { %s13_s14 = sadd.s32 1, %s3325_s14   ;;  %s3929_s12 = smov %s3321_s13 }
 0x1ac   : > { %p10_p5 = scmp.ge.s32.totalorder %s13_s14, 4   ;;  %s3930_s13 = smov %s3932_s15 }
 0x1ae   :  { %12 = sbr.rel (!%p10_p5) target bundleno = 2 (0x2), region = 70 }

// kernel: fwd.9
= control target key start
LH: loop header
LB: loop body
LE: loop exit
PB: predicated region body
PF: predicated region fallthrough
CT: control target
= control target key end

     0   :  { %s3425_s12 = smov 0   ;;  %s3427_s13 = smov 0   ;;  %s4020_s0 = inlined_call_operand.vmem [shape: bf16[2,102,128], index: 0, kind: input, shape index: {}]   ;;  %s4021_s1 = inlined_call_operand.vmem [shape: bf16[9,128,128], index: 1, kind: input, shape index: {}]   ;;  %s4022_s2 = inlined_call_operand.vmem [shape: f32[1,128], index: 2, kind: input, shape index: {}]   ;;  %s4023_s3 = inlined_call_operand.vmem [shape: bf16[2,80,128], index: 3, kind: output, shape index: {}]  }
   0x1   :  { %s3429_s14 = smov 0  }
   0x2 LB: > { %s25_s15 = sadd.s32 1, %s3397_s13  ;;  %p2461_p0 = scmp.ge.s32.totalorder %s3401_s14, 1  ;;  %s3401_s14 = sphi %s3429_s14, %s13_s14   ;;  %s3397_s13 = sphi %s3427_s13, %s4025_s13   ;;  %s3393_s12 = sphi %s3425_s12, %s4024_s12  }
   0x3   : > { %p27_p1 = scmp.ge.s32.totalorder %s25_s15, 2  ;;  %p151_p2 = scmp.lt.s32.totalorder %s3401_s14, 3 }
   0x5   : > { %s4027_s15 = smov (%p27_p1, %s25_s15), 0  ;;  %p152_p3 = pnand %p2461_p0, %p151_p2 }
   0x6   : > { %p179_p4 = scmp.lt.s32.totalorder (!%p152_p3), %s3393_s12, 1 }
   0x7   : > { %155 = sbr.rel (%p152_p3) target bundleno = 427 (0x1ab), region = 32 }
   0xc   : > { %v3254_v0 = vld [vmem:[%s4021_s1 + $0x38] sm:$0xff]   ;;  %v3403_v1 = vmov 0.0   ;;  %v3256_v3 = vld [vmem:[%s4021_s1 + $0x30] sm:$0xff]   ;;  %vm3404_vm0 = vmmov 0   ;;  %v3258_v5 = vld [vmem:[%s4021_s1 + $0x28] sm:$0xff]   ;;  %s4029_s12 = smov (!%p179_p4, %s3393_s12), 1 }
   0xd   : > { %2886 = vmatprep.subr.bf16.mxu0 %v3403_v1  ;;  %2922 = vmatprep.subr.bf16.mxu1 %v3403_v1  ;;  %v3255_v2 = vld [vmem:[%s4021_s1 + $0x78] sm:$0xff]   ;;  %v3257_v4 = vld [vmem:[%s4021_s1 + $0x70] sm:$0xff]   ;;  %v3259_v6 = vld [vmem:[%s4021_s1 + $0x68] sm:$0xff]   ;;  %s3226_s5 = smul.u32 52, %s4029_s12  ;;  %vm438_vm1 = vsmask.f32 7424 }
   0xe   : > { %2887 = vmatpush3.bf16.msra.mxu0 %v3254_v0  ;;  %2902 = vmatprep.mubr.msk.bf16.mxu0 %vm3404_vm0, %v3403_v1  ;;  %v3260_v7 = vld [vmem:[%s4021_s1 + $0x20] sm:$0xff]   ;;  %v3262_v9 = vld [vmem:[%s4021_s1 + $0x18] sm:$0xff]   ;;  %v3264_v11 = vld [vmem:[%s4021_s1 + $0x10] sm:$0xff]   ;;  %vm695_vm2 = vcmask 1046528   ;;  %vm1142_vm3 = vsmask.f32 6400 }
   0xf   : > { %2923 = vmatpush3.bf16.msra.mxu1 %v3255_v2  ;;  %2888 = vmatprep.subr.bf16.mxu0 %v3403_v1  ;;  %v3261_v8 = vld [vmem:[%s4021_s1 + $0x60] sm:$0xff]   ;;  %v3263_v10 = vld [vmem:[%s4021_s1 + $0x58] sm:$0xff]   ;;  %s3496_s16 = scalar_lea.vmem %s4020_s0, %s3226_s5  ;;  %v3265_v12 = vld [vmem:[%s4021_s1 + $0x50] sm:$0xff]   ;;  %vm1408_vm4 = vcmask 1045504   ;;  %vm1855_vm5 = vsmask.f32 5376 }
  0x10   : > { %2924 = vmatprep.subr.bf16.mxu1 %v3403_v1  ;;  %2938 = vmatprep.mubr.msk.bf16.mxu1 %vm3404_vm0, %v3403_v1  ;;  %v3271_v13 = vld [vmem:[%s3496_s16] sm:$0xff]   ;;  %v3272_v14 = vld [vmem:[%s3496_s16 + $0x8] sm:$0xff]   ;;  %v3276_v25 = vld [vmem:[%s3496_s16 + $0x10] sm:$0xff]   ;;  %vm2121_vm6 = vcmask 1044480   ;;  %s3227_s5 = smul.u32 40, %s4029_s12 }
  0x11   : > { %v442_v15 = vshll.u32 %v3271_v13, 16  ;;  %v3266_v16 = vld [vmem:[%s4021_s1 + $0x8] sm:$0xff]   ;;  %v440_v18 = vshrl.u32 %v3271_v13, 16  ;;  %v447_v20 = vshll.u32 %v3272_v14, 16  ;;  %v3268_v21 = vld [vmem:[%s4021_s1] sm:$0xff]   ;;  %v3273_v27 = vld [vmem:[%s4021_s1 + $0xb8] sm:$0xff]  }
  0x12   : > { %2889 = vmatpush3.bf16.msra.mxu0 %v3256_v3  ;;  %v3267_v17 = vld [vmem:[%s4021_s1 + $0x48] sm:$0xff]   ;;  %v3269_v22 = vld [vmem:[%s4021_s1 + $0x40] sm:$0xff]   ;;  %v451_v29 = vshrl.u32 %v3272_v14, 16  ;;  %v455_v30 = vshll.u32 %v3276_v25, 16  ;;  %v3277_v31 = vld [vmem:[%s4021_s1 + $0xf8] sm:$0xff]   ;;  %v459_v40 = vshrl.u32 %v3276_v25, 16  ;;  %s3991_s7 = scalar_lea.vmem %s4023_s3, %s3227_s5 }
  0x13   : > { %2925 = vmatpush3.bf16.msra.mxu1 %v3257_v4  ;;  %2890 = vmatprep.subr.bf16.mxu0 %v3403_v1  ;;  %v444_v19 = vrot.slane %v442_v15, 1  ;;  %v449_v24 = vrot.slane %v447_v20, 1  ;;  %v3270_v26 = vld [vmem:[%s3496_s16] sm:$0xff]   ;;  %v3274_v32 = vld [vmem:[%s4021_s1 + $0xb0] sm:$0xff]   ;;  %v3281_v35 = vld [vmem:[%s3496_s16 + $0x18] sm:$0xff]  }
  0x14   : > { %2926 = vmatprep.subr.bf16.mxu1 %v3403_v1  ;;  %v457_v34 = vrot.slane %v455_v30, 1  ;;  %v3279_v36 = vld [vmem:[%s4021_s1 + $0xf0] sm:$0xff]   ;;  %v3275_v37 = vld [vmem:[%s3496_s16 + $0x8] sm:$0xff]   ;;  %v463_v41 = vshll.u32 %v3281_v35, 16  ;;  %v3282_v43 = vld [vmem:[%s4021_s1 + $0xa0] sm:$0xff]   ;;  %v467_v51 = vshrl.u32 %v3281_v35, 16 }
  0x15   : > { %v445_v23 = vor.u32 %v444_v19, %v440_v18  ;;  %v453_v33 = vor.u32 %v451_v29, %v449_v24  ;;  %v3278_v38 = vld [vmem:[%s4021_s1 + $0xa8] sm:$0xff]   ;;  %v3287_v46 = vld [vmem:[%s3496_s16 + $0x20] sm:$0xff]   ;;  %v3280_v48 = vld [vmem:[%s3496_s16 + $0x10] sm:$0xff]  }
  0x16   : > { %2891 = vmatpush3.bf16.msra.mxu0 %v3258_v5  ;;  %v3283_v42 = vld [vmem:[%s4021_s1 + $0xe8] sm:$0xff]   ;;  %v461_v44 = vor.u32 %v459_v40, %v457_v34  ;;  %v465_v45 = vrot.slane %v463_v41, 1  ;;  %v3285_v47 = vld [vmem:[%s4021_s1 + $0xe0] sm:$0xff]   ;;  %v3284_v49 = vld [vmem:[%s4021_s1 + $0x98] sm:$0xff]   ;;  %v471_v52 = vshll.u32 %v3287_v46, 16  ;;  %v475_v60 = vshrl.u32 %v3287_v46, 16 }
  0x17   : > { %2927 = vmatpush3.bf16.msra.mxu1 %v3259_v6  ;;  %2892 = vmatprep.subr.bf16.mxu0 %v3403_v1  ;;  %v450_v28 = vsel %vm438_vm1, %v445_v23, %v449_v24  ;;  %v458_v39 = vsel %vm438_vm1, %v453_v33, %v457_v34  ;;  %v3288_v53 = vld [vmem:[%s4021_s1 + $0xd8] sm:$0xff]   ;;  %v3293_v54 = vld [vmem:[%s3496_s16 + $0x28] ss:$0 sps:$4 sm:$0x11]   ;;  %v3289_v55 = vld [vmem:[%s4021_s1 + $0x90] sm:$0xff]  }
  0x18   : > { %2928 = vmatprep.subr.bf16.mxu1 %v3403_v1  ;;  %v466_v50 = vsel %vm438_vm1, %v461_v44, %v465_v45  ;;  %v469_v56 = vor.u32 %v467_v51, %v465_v45  ;;  %v473_v57 = vrot.slane %v471_v52, 1  ;;  %v3290_v58 = vld [vmem:[%s4021_s1 + $0xd0] sm:$0xff]   ;;  %v3286_v59 = vld [vmem:[%s3496_s16 + $0x18] sm:$0xff]   ;;  %v3291_v62 = vld [vmem:[%s4021_s1 + $0x88] sm:$0xff]   ;;  %v479_v63 = vshll.u32 %v3293_v54, 16 }
  0x19   : > { %v3294_v0 = vld [vmem:[%s4021_s1 + $0xc8] sm:$0xff]   ;;  %v3295_v2 = vld [vmem:[%s4021_s1 + $0x80] sm:$0xff]   ;;  %v3304_v18 = vld [vmem:[%s3496_s16 + $0x14] sm:$0xff]  }
  0x1a   : > { %2893 = vmatpush3.bf16.msra.mxu0 %v3260_v7  ;;  %v474_v61 = vsel %vm438_vm1, %v469_v56, %v473_v57  ;;  %v3292_v3 = vld [vmem:[%s3496_s16 + $0x20] sm:$0xff]   ;;  %v477_v4 = vor.u32 %v475_v60, %v473_v57  ;;  %v481_v5 = vrot.slane %v479_v63, 1  ;;  %v3298_v7 = vld [vmem:[%s3496_s16 + $0x8] sm:$0xff]   ;;  %v922_v24 = vrot.slane %v3304_v18, 1  ;;  %v3316_v41 = vld [vmem:[%s4021_s1 + $0x158] sm:$0xff]  }
  0x1b   : > { %2929 = vmatpush3.bf16.msra.mxu1 %v3261_v8  ;;  %2894 = vmatprep.subr.bf16.mxu0 %v3403_v1  ;;  %v3296_v6 = vld [vmem:[%s4021_s1 + $0xc0] sm:$0xff]   ;;  %v697_v13 = vrot.slane %v3298_v7, 1  ;;  %v3306_v25 = vld [vmem:[%s4021_s1 + $0x128] sm:$0xff]   ;;  %v3318_v45 = vld [vmem:[%s4021_s1 + $0x150] sm:$0xff]  }
  0x1c   : > { %2930 = vmatprep.subr.bf16.mxu1 %v3403_v1  ;;  %v3297_v8 = vld [vmem:[%s3496_s16] sm:$0xfe]   ;;  %v3320_v46 = vld [vmem:[%s3496_s16 + $0x28] ss:$0 sps:$4 sm:$0x11]   ;;  %v3331_v63 = vld [vmem:[%s3496_s16 + $0x14] sm:$0xff]  }
  0x1d   : > { %v3309_v29 = vld [vmem:[%s3496_s16 + $0x1c] sm:$0xff]   ;;  %v3315_v40 = vld [vmem:[%s3496_s16 + $0x24] sm:$0xff]  }
  0x1e   : > { %2895 = vmatpush3.bf16.msra.mxu0 %v3262_v9  ;;  %v3300_v9 = vld [vmem:[%s3496_s16 + $0xc] sm:$0xff]   ;;  %v924_v33 = vrot.slane %v3309_v29, 1  ;;  %v3310_v34 = vld [vmem:[%s4021_s1 + $0x120] sm:$0xff]   ;;  %v926_v44 = vrot.slane %v3315_v40, 1 }
  0x1f   : > { %2931 = vmatpush3.bf16.msra.mxu1 %v3263_v10  ;;  %2896 = vmatprep.subr.bf16.mxu0 %v3403_v1  ;;  %v482_v10 = vsel %vm438_vm1, %v477_v4, %v481_v5  ;;  %v920_v15 = vrot.slane %v3300_v9, 1  ;;  %v3313_v35 = vld [vmem:[%s4021_s1 + $0x160] sm:$0xff]   ;;  %v3319_v52 = vld [vmem:[%s4021_s1 + $0x108] sm:$0xff]   ;;  %v1164_v9 = vshll.u32 %v3331_v63, 16 }
  0x20   : > { %2932 = vmatprep.subr.bf16.mxu1 %v3403_v1  ;;  %v927_v51 = vsel %vm695_vm2, %v924_v33, %v926_v44  ;;  %v3323_v56 = vld [vmem:[%s4021_s1 + $0x100] sm:$0xff]  }
  0x21   : > { %v923_v30 = vsel %vm695_vm2, %v920_v15, %v922_v24 }
  0x22   : > { %2897 = vmatpush3.bf16.msra.mxu0 %v3264_v11  ;;  %v3299_v11 = vld [vmem:[%s3496_s16 + $0x4] sm:$0xfe]  }
  0x23   : > { %2933 = vmatpush3.bf16.msra.mxu1 %v3265_v12  ;;  %2898 = vmatprep.subr.bf16.mxu0 %v3403_v1  ;;  %v696_v12 = vrot.slane %v3297_v8, 1  ;;  %v919_v14 = vrot.slane %v3299_v11, 1  ;;  %v1161_v8 = vshrl.u32 %v3331_v63, 16  ;;  %v3356_v63 = vld [vmem:[%s3496_s16 + $0x10] sm:$0xff]  }
  0x24   : > { %2934 = vmatprep.subr.bf16.mxu1 %v3403_v1 }
  0x25   : > { %v698_v19 = vsel %vm695_vm2, %v696_v12, %v697_v13  ;;  %v921_v20 = vsel %vm695_vm2, %v919_v14, %v920_v15  ;;  %v3329_v14 = vld [vmem:[%s4021_s1 + $0x1b8] sm:$0xff]   ;;  %v1163_v15 = vrot.slane %v1161_v8, 1  ;;  %v1868_v8 = vshll.u32 %v3356_v63, 16 }
  0x26   : > { %2899 = vmatpush3.bf16.msra.mxu0 %v3266_v16  ;;  %v3301_v16 = vld [vmem:[%s4021_s1 + $0x138] sm:$0xff]  }
  0x27   : > { %2935 = vmatpush3.bf16.msra.mxu1 %v3267_v17  ;;  %2900 = vmatprep.subr.bf16.mxu0 %v3403_v1  ;;  %v3303_v17 = vld [vmem:[%s3496_s16 + $0x10] sm:$0xff]  }
  0x28   : > { %2936 = vmatprep.subr.bf16.mxu1 %v3403_v1  ;;  %v699_v23 = vrot.slane %v3303_v17, 1  ;;  %v3336_v17 = vld [vmem:[%s3496_s16 + $0x1c] sm:$0xff]  }
  0x2a   : > { %2901 = vmatpush3.bf16.msra.mxu0 %v3268_v21  ;;  %v3305_v21 = vld [vmem:[%s4021_s1 + $0x178] sm:$0xff]  }
  0x2b   : > { %2937 = vmatpush3.bf16.msra.mxu1 %v3269_v22  ;;  %2958 = vmatprep.subr.bf16.mxu0 %v3403_v1  ;;  %v3302_v22 = vld [vmem:[%s4021_s1 + $0x130] sm:$0xff]  }
  0x2c   : > { %2994 = vmatprep.subr.bf16.mxu1 %v3403_v1 }
  0x2d   : > { %2903 = vmatmul.mubr.bf16.vlgmr.msra.gmra.mxu0 %v3270_v26  ;;  %v3307_v26 = vld [vmem:[%s4021_s1 + $0x170] sm:$0xff]  }
  0x2e   : > { %2939 = vmatmul.mubr.bf16.vlgmr.msra.gmra.mxu1 %v450_v28  ;;  %2959 = vmatpush3.bf16.msra.mxu0 %v3273_v27  ;;  %v3308_v27 = vld [vmem:[%s3496_s16 + $0x18] sm:$0xff]   ;;  %v700_v28 = vsel %vm695_vm2, %v697_v13, %v699_v23 }
  0x2f   : > { %2960 = vmatprep.subr.bf16.mxu0 %v3403_v1  ;;  %2906 = vmatprep.mubr.msk.bf16.mxu0 %vm3404_vm0, %v3403_v1 }
  0x30   : > { %2942 = vmatprep.mubr.msk.bf16.mxu1 %vm3404_vm0, %v3403_v1  ;;  %2995 = vmatpush3.bf16.msra.mxu1 %v3277_v31  ;;  %v3311_v31 = vld [vmem:[%s4021_s1 + $0x168] sm:$0xff]  }
  0x31   : > { %2996 = vmatprep.subr.bf16.mxu1 %v3403_v1 }
  0x32   : > { %2961 = vmatpush3.bf16.msra.mxu0 %v3274_v32  ;;  %v701_v32 = vrot.slane %v3308_v27, 1  ;;  %v3335_v27 = vld [vmem:[%s4021_s1 + $0x1f0] sm:$0xff]  }
  0x33   : > { %2962 = vmatprep.subr.bf16.mxu0 %v3403_v1 }
  0x34   : > { %2997 = vmatpush3.bf16.msra.mxu1 %v3279_v36  ;;  %v702_v36 = vsel %vm695_vm2, %v699_v23, %v701_v32  ;;  %v3330_v23 = vld [vmem:[%s4021_s1 + $0x1b0] sm:$0xff]  }
  0x35   : > { %2907 = vmatmul.mubr.bf16.gmra.mxu0 %v3275_v37  ;;  %2998 = vmatprep.subr.bf16.mxu1 %v3403_v1  ;;  %v3312_v37 = vld [vmem:[%s4021_s1 + $0x118] sm:$0xff]  }
  0x36   : > { %2943 = vmatmul.mubr.bf16.gmra.mxu1 %v458_v39  ;;  %2963 = vmatpush3.bf16.msra.mxu0 %v3278_v38  ;;  %v3314_v38 = vld [vmem:[%s3496_s16 + $0x20] sm:$0xff]   ;;  %v925_v39 = vsel %vm695_vm2, %v922_v24, %v924_v33 }
  0x37   : > { %2910 = vmatprep.mubr.msk.bf16.mxu0 %vm3404_vm0, %v3403_v1  ;;  %2946 = vmatprep.mubr.msk.bf16.mxu1 %vm3404_vm0, %v3403_v1 }
  0x38   : > { %2964 = vmatprep.subr.bf16.mxu0 %v3403_v1  ;;  %2999 = vmatpush3.bf16.msra.mxu1 %v3283_v42  ;;  %v703_v42 = vrot.slane %v3314_v38, 1 }
  0x39   : > { %3000 = vmatprep.subr.bf16.mxu1 %v3403_v1 }
  0x3a   : > { %2965 = vmatpush3.bf16.msra.mxu0 %v3282_v43  ;;  %v3317_v43 = vld [vmem:[%s4021_s1 + $0x110] sm:$0xff]  }
  0x3b   : > { %2966 = vmatprep.subr.bf16.mxu0 %v3403_v1 }
  0x3c   : > { %3001 = vmatpush3.bf16.msra.mxu1 %v3285_v47  ;;  %v3326_v47 = vld [vmem:[%s3496_s16 + $0xc] sm:$0xff]  }
  0x3d   : > { %2911 = vmatmul.mubr.bf16.gmra.mxu0 %v3280_v48  ;;  %3002 = vmatprep.subr.bf16.mxu1 %v3403_v1  ;;  %v3321_v48 = vld [vmem:[%s3496_s16 + $0x2c] ss:$0 sps:$4 sm:$0x11]   ;;  %v1152_v54 = vshrl.u32 %v3326_v47, 16  ;;  %v1155_v57 = vshll.u32 %v3326_v47, 16 }
  0x3e   : > { %2947 = vmatmul.mubr.bf16.gmra.mxu1 %v466_v50  ;;  %2967 = vmatpush3.bf16.msra.mxu0 %v3284_v49  ;;  %v704_v49 = vsel %vm695_vm2, %v701_v32, %v703_v42  ;;  %v3325_v50 = vld [vmem:[%s3496_s16 + $0x4] sm:$0xfe]   ;;  %v928_v60 = vrot.slane %v3321_v48, 1 }
  0x3f   : > { %2914 = vmatprep.mubr.msk.bf16.mxu0 %vm3404_vm0, %v3403_v1  ;;  %2950 = vmatprep.mubr.msk.bf16.mxu1 %vm3404_vm0, %v3403_v1  ;;  %v1157_v5 = vrot.slane %v1155_v57, 2  ;;  %v3342_v32 = vld [vmem:[%s3496_s16 + $0x24] sm:$0xff]  }
  0x40   : > { %2968 = vmatprep.subr.bf16.mxu0 %v3403_v1  ;;  %3003 = vmatpush3.bf16.msra.mxu1 %v3288_v53  ;;  %v3322_v53 = vld [vmem:[%s4021_s1 + $0x148] sm:$0xff]   ;;  %v929_v7 = vsel %vm695_vm2, %v926_v44, %v928_v60  ;;  %v1179_v38 = vshrl.u32 %v3342_v32, 16 }
  0x41   : > { %3004 = vmatprep.subr.bf16.mxu1 %v3403_v1  ;;  %v3343_v48 = vld [vmem:[%s3496_s16 + $0x24] sm:$0xff]  }
  0x42   : > { %2969 = vmatpush3.bf16.msra.mxu0 %v3289_v55  ;;  %v705_v55 = vrot.slane %v3320_v46, 1 }
  0x43   : > { %2970 = vmatprep.subr.bf16.mxu0 %v3403_v1 }
  0x44   : > { %3005 = vmatpush3.bf16.msra.mxu1 %v3290_v58  ;;  %v1144_v58 = vshrl.u32 %v3325_v50, 16 }
  0x45   : > { %2915 = vmatmul.mubr.bf16.gmra.mxu0 %v3286_v59  ;;  %3006 = vmatprep.subr.bf16.mxu1 %v3403_v1  ;;  %v1147_v59 = vshll.u32 %v3325_v50, 16 }
  0x46   : > { %2951 = vmatmul.mubr.bf16.gmra.mxu1 %v474_v61  ;;  %2918 = vmatprep.mubr.msk.bf16.mxu0 %vm3404_vm0, %v3403_v1  ;;  %v3324_v61 = vld [vmem:[%s4021_s1 + $0x140] sm:$0xff]  }
  0x47   : > { %2954 = vmatprep.mubr.msk.bf16.mxu1 %vm3404_vm0, %v3403_v1  ;;  %2971 = vmatpush3.bf16.msra.mxu0 %v3291_v62  ;;  %v1154_v62 = vrot.slane %v1152_v54, 1  ;;  %v1149_v4 = vrot.slane %v1147_v59, 2  ;;  %v1416_v54 = vrot.slane %v3343_v48, 2  ;;  %v3349_v59 = vld [vmem:[%s3496_s16 + $0x2c] ss:$0 sps:$4 sm:$0x33]  }
  0x48   : > { %3007 = vmatpush3.bf16.msra.mxu1 %v3294_v0  ;;  %2972 = vmatprep.subr.bf16.mxu0 %v3403_v1  ;;  %v3327_v0 = vld [vmem:[%s3496_s16 + $0x4] sm:$0xfc]  }
  0x49   : > { %3008 = vmatprep.subr.bf16.mxu1 %v3403_v1  ;;  %v1158_v11 = vor.u32 %v1157_v5, %v1154_v62  ;;  %v1409_v12 = vrot.slane %v3327_v0, 2  ;;  %v3355_v62 = vld [vmem:[%s3496_s16 + $0x8] sm:$0xfc]  }
  0x4a   : > { %v3350_v0 = vld [vmem:[%s4021_s1 + $0x1c8] sm:$0xff]   ;;  %v1857_v5 = vshrl.u32 %v3355_v62, 16 }
  0x4b   : > { %2973 = vmatpush3.bf16.msra.mxu0 %v3295_v2  ;;  %v706_v2 = vsel %vm695_vm2, %v703_v42, %v705_v55  ;;  %v3340_v42 = vld [vmem:[%s4021_s1 + $0x198] sm:$0xff]   ;;  %v3346_v55 = vld [vmem:[%s4021_s1 + $0x1d0] sm:$0xff]  }
  0x4c   : > { %3009 = vmatpush3.bf16.msra.mxu1 %v3296_v6  ;;  %3030 = vmatprep.subr.bf16.mxu0 %v3403_v1  ;;  %v3328_v6 = vld [vmem:[%s3496_s16 + $0xc] sm:$0xff]  }
  0x4d   : > { %2919 = vmatmul.mubr.bf16.gmra.mxu0 %v3292_v3  ;;  %3066 = vmatprep.subr.bf16.mxu1 %v3403_v1  ;;  %v1146_v3 = vrot.slane %v1144_v58, 1  ;;  %v1410_v13 = vrot.slane %v3328_v6, 2  ;;  %v1860_v6 = vshll.u32 %v3355_v62, 16  ;;  %v3370_v62 = vld [vmem:[%s3496_s16 + $0x30] ss:$0 sps:$4 sm:$0x33]  }
  0x4e   : > { %2955 = vmatmul.mubr.bf16.gmra.mxu1 %v482_v10  ;;  %2974 = vmatprep.mubr.msk.bf16.mxu0 %vm3404_vm0, %v3403_v1 }
  0x4f   : > { %3010 = vmatprep.mubr.msk.bf16.mxu1 %vm3404_vm0, %v3403_v1  ;;  %v1150_v10 = vor.u32 %v1149_v4, %v1146_v3  ;;  %v1418_v3 = vrot.slane %v3349_v59, 2  ;;  %v3351_v4 = vld [vmem:[%s4021_s1 + $0x180] sm:$0xff]  }
  0x51   : > { %v1159_v18 = vsel %vm1142_vm3, %v1150_v10, %v1158_v11 }
  0x55   : > { %2975 = vmatmul.mubr.bf16.vlgmr.msra.gmra.mxu0 %v698_v19  ;;  %v1411_v19 = vsel %vm1408_vm4, %v1409_v12, %v1410_v13  ;;  %v3353_v12 = vld [vmem:[%s3496_s16 + $0x8] sm:$0xfc]  }
  0x56   : > { %3011 = vmatmul.mubr.bf16.vlgmr.msra.gmra.mxu1 %v921_v20  ;;  %3031 = vmatpush3.bf16.msra.mxu0 %v3301_v16  ;;  %v1166_v16 = vrot.slane %v1164_v9, 2  ;;  %v3332_v20 = vld [vmem:[%s3496_s16 + $0x14] sm:$0xff]   ;;  %v3352_v9 = vld [vmem:[%s4021_s1 + $0x1c0] sm:$0xff]  }
  0x57   : > { %3032 = vmatprep.subr.bf16.mxu0 %v3403_v1  ;;  %2978 = vmatprep.mubr.msk.bf16.mxu0 %vm3404_vm0, %v3403_v1 }
  0x58   : > { %3014 = vmatprep.mubr.msk.bf16.mxu1 %vm3404_vm0, %v3403_v1  ;;  %3067 = vmatpush3.bf16.msra.mxu1 %v3305_v21  ;;  %v3333_v21 = vld [vmem:[%s4021_s1 + $0x1f8] sm:$0xff]   ;;  %v1167_v24 = vor.u32 %v1166_v16, %v1163_v15  ;;  %v1862_v15 = vrot.slane %v1860_v6, 3  ;;  %v3372_v6 = vld [vmem:[%s4021_s1 + $0x200] sm:$0xff]  }
  0x59   : > { %3068 = vmatprep.subr.bf16.mxu1 %v3403_v1 }
  0x5a   : > { %3033 = vmatpush3.bf16.msra.mxu0 %v3302_v22  ;;  %v1170_v22 = vshrl.u32 %v3336_v17, 16 }
  0x5b   : > { %3034 = vmatprep.subr.bf16.mxu0 %v3403_v1 }
  0x5c   : > { %3069 = vmatpush3.bf16.msra.mxu1 %v3307_v26  ;;  %v1412_v26 = vrot.slane %v3332_v20, 2  ;;  %v1172_v29 = vrot.slane %v1170_v22, 1 }
  0x5d   : > { %2979 = vmatmul.mubr.bf16.gmra.mxu0 %v700_v28  ;;  %3070 = vmatprep.subr.bf16.mxu1 %v3403_v1  ;;  %v3334_v28 = vld [vmem:[%s4021_s1 + $0x1a8] sm:$0xff]  }
  0x5e   : > { %3015 = vmatmul.mubr.bf16.gmra.mxu1 %v923_v30  ;;  %3035 = vmatpush3.bf16.msra.mxu0 %v3306_v25  ;;  %v1173_v25 = vshll.u32 %v3336_v17, 16  ;;  %v1168_v30 = vsel %vm1142_vm3, %v1158_v11, %v1167_v24  ;;  %v1413_v33 = vsel %vm1408_vm4, %v1410_v13, %v1412_v26  ;;  %v1419_v11 = vsel %vm1408_vm4, %v1416_v54, %v1418_v3  ;;  %v3354_v13 = vld [vmem:[%s3496_s16 + $0x10] sm:$0xff]  }
  0x5f   : > { %2982 = vmatprep.mubr.msk.bf16.mxu0 %vm3404_vm0, %v3403_v1  ;;  %3018 = vmatprep.mubr.msk.bf16.mxu1 %vm3404_vm0, %v3403_v1  ;;  %v1870_v17 = vrot.slane %v1868_v8, 3  ;;  %v1633_v20 = vrot.slane %v3354_v13, 2  ;;  %v3373_v8 = vld [vmem:[%s3496_s16 + $0x8] sm:$0xf8]  }
  0x60   : > { %3036 = vmatprep.subr.bf16.mxu0 %v3403_v1  ;;  %3071 = vmatpush3.bf16.msra.mxu1 %v3311_v31  ;;  %v1175_v31 = vrot.slane %v1173_v25, 2  ;;  %v2122_v13 = vrot.slane %v3373_v8, 3 }
  0x61   : > { %3072 = vmatprep.subr.bf16.mxu1 %v3403_v1 }
  0x62   : > { %3037 = vmatpush3.bf16.msra.mxu0 %v3310_v34  ;;  %v3337_v34 = vld [vmem:[%s3496_s16 + $0x1c] sm:$0xff]  }
  0x63   : > { %3038 = vmatprep.subr.bf16.mxu0 %v3403_v1  ;;  %v1414_v40 = vrot.slane %v3337_v34, 2 }
  0x64   : > { %3073 = vmatpush3.bf16.msra.mxu1 %v3313_v35  ;;  %v3339_v35 = vld [vmem:[%s4021_s1 + $0x1e8] sm:$0xff]  }
  0x65   : > { %2983 = vmatmul.mubr.bf16.gmra.mxu0 %v702_v36  ;;  %3074 = vmatprep.subr.bf16.mxu1 %v3403_v1  ;;  %v1176_v36 = vor.u32 %v1175_v31, %v1172_v29  ;;  %v1415_v47 = vsel %vm1408_vm4, %v1412_v26, %v1414_v40  ;;  %v1417_v60 = vsel %vm1408_vm4, %v1414_v40, %v1416_v54  ;;  %v3357_v26 = vld [vmem:[%s4021_s1 + $0x238] sm:$0xff]   ;;  %v3363_v31 = vld [vmem:[%s3496_s16 + $0x20] sm:$0xff]  }
  0x66   : > { %3019 = vmatmul.mubr.bf16.gmra.mxu1 %v925_v39  ;;  %3039 = vmatpush3.bf16.msra.mxu0 %v3312_v37  ;;  %v3338_v37 = vld [vmem:[%s4021_s1 + $0x1a0] sm:$0xff]   ;;  %v1182_v39 = vshll.u32 %v3342_v32, 16  ;;  %v3358_v32 = vld [vmem:[%s4021_s1 + $0x230] sm:$0xff]  }
  0x67   : > { %2986 = vmatprep.mubr.msk.bf16.mxu0 %vm3404_vm0, %v3403_v1  ;;  %3022 = vmatprep.mubr.msk.bf16.mxu1 %vm3404_vm0, %v3403_v1  ;;  %v1177_v44 = vsel %vm1142_vm3, %v1167_v24, %v1176_v36 }
  0x68   : > { %3040 = vmatprep.subr.bf16.mxu0 %v3403_v1  ;;  %3075 = vmatpush3.bf16.msra.mxu1 %v3316_v41  ;;  %v3341_v41 = vld [vmem:[%s4021_s1 + $0x1e0] sm:$0xff]   ;;  %v1184_v46 = vrot.slane %v1182_v39, 2 }
  0x69   : > { %3076 = vmatprep.subr.bf16.mxu1 %v3403_v1  ;;  %v3362_v39 = vld [vmem:[%s3496_s16 + $0x20] sm:$0xff]  }
  0x6a   : > { %3041 = vmatpush3.bf16.msra.mxu0 %v3317_v43  ;;  %v3348_v43 = vld [vmem:[%s3496_s16 + $0x2c] ss:$0 sps:$4 sm:$0x33]  }
  0x6b   : > { %3042 = vmatprep.subr.bf16.mxu0 %v3403_v1 }
  0x6c   : > { %3077 = vmatpush3.bf16.msra.mxu1 %v3318_v45  ;;  %v1181_v45 = vrot.slane %v1179_v38, 1  ;;  %v3361_v38 = vld [vmem:[%s4021_s1 + $0x228] sm:$0xff]  }
  0x6d   : > { %2987 = vmatmul.mubr.bf16.gmra.mxu0 %v704_v49  ;;  %3078 = vmatprep.subr.bf16.mxu1 %v3403_v1  ;;  %v3344_v49 = vld [vmem:[%s4021_s1 + $0x1d8] sm:$0xff]  }
  0x6e   : > { %3023 = vmatmul.mubr.bf16.gmra.mxu1 %v927_v51  ;;  %2990 = vmatprep.mubr.msk.bf16.mxu0 %vm3404_vm0, %v3403_v1  ;;  %v1185_v50 = vor.u32 %v1184_v46, %v1181_v45  ;;  %v3345_v51 = vld [vmem:[%s4021_s1 + $0x190] sm:$0xff]   ;;  %v3364_v45 = vld [vmem:[%s4021_s1 + $0x220] sm:$0xff]  }
  0x6f   : > { %3026 = vmatprep.mubr.msk.bf16.mxu1 %vm3404_vm0, %v3403_v1  ;;  %3043 = vmatpush3.bf16.msra.mxu0 %v3319_v52  ;;  %v1188_v52 = vshrl.u32 %v3348_v43, 16 }
  0x70   : > { %3079 = vmatpush3.bf16.msra.mxu1 %v3322_v53  ;;  %3044 = vmatprep.subr.bf16.mxu0 %v3403_v1  ;;  %v1191_v53 = vshll.u32 %v3348_v43, 16  ;;  %v3367_v43 = vld [vmem:[%s3496_s16 + $0x28] sm:$0xff]  }
  0x71   : > { %3080 = vmatprep.subr.bf16.mxu1 %v3403_v1  ;;  %v1190_v57 = vrot.slane %v1188_v52, 1  ;;  %v1895_v48 = vshll.u32 %v3367_v43, 16 }
  0x72   : > { %v1193_v58 = vrot.slane %v1191_v53, 2 }
  0x73   : > { %3045 = vmatpush3.bf16.msra.mxu0 %v3323_v56  ;;  %v1186_v56 = vsel %vm1142_vm3, %v1176_v36, %v1185_v50  ;;  %v1886_v36 = vshll.u32 %v3363_v31, 16  ;;  %v1897_v54 = vrot.slane %v1895_v48, 3 }
  0x74   : > { %3081 = vmatpush3.bf16.msra.mxu1 %v3324_v61  ;;  %3102 = vmatprep.subr.bf16.mxu0 %v3403_v1  ;;  %v3347_v61 = vld [vmem:[%s4021_s1 + $0x188] sm:$0xff]  }
  0x75   : > { %2991 = vmatmul.mubr.bf16.gmra.mxu0 %v706_v2  ;;  %3138 = vmatprep.subr.bf16.mxu1 %v3403_v1  ;;  %v1194_v2 = vor.u32 %v1193_v58, %v1190_v57  ;;  %v3368_v57 = vld [vmem:[%s4021_s1 + $0x210] sm:$0xff]  }
  0x76   : > { %3027 = vmatmul.mubr.bf16.gmra.mxu1 %v929_v7  ;;  %3046 = vmatprep.mubr.msk.bf16.mxu0 %vm3404_vm0, %v3403_v1  ;;  %v1865_v7 = vshrl.u32 %v3356_v63, 16 }
  0x77   : > { %3082 = vmatprep.mubr.msk.bf16.mxu1 %vm3404_vm0, %v3403_v1  ;;  %v1195_v10 = vsel %vm1142_vm3, %v1185_v50, %v1194_v2  ;;  %v3365_v50 = vld [vmem:[%s4021_s1 + $0x218] sm:$0xff]  }
  0x78   : > { %v1867_v16 = vrot.slane %v1865_v7, 2 }
  0x7a   : > { %v1871_v22 = vor.u32 %v1870_v17, %v1867_v16 }
  0x7d   : > { %3047 = vmatmul.mubr.bf16.vlgmr.msra.gmra.mxu0 %v1159_v18  ;;  %v3360_v18 = vld [vmem:[%s3496_s16 + $0x18] sm:$0xff]  }
  0x7e   : > { %3083 = vmatmul.mubr.bf16.vlgmr.msra.gmra.mxu1 %v1411_v19  ;;  %3103 = vmatpush3.bf16.msra.mxu0 %v3329_v14  ;;  %v1859_v14 = vrot.slane %v1857_v5, 2  ;;  %v1632_v19 = vrot.slane %v3353_v12, 2  ;;  %v1877_v24 = vshll.u32 %v3360_v18, 16  ;;  %v3376_v12 = vld [vmem:[%s3496_s16 + $0x28] sm:$0xff]  }
  0x7f   : > { %3104 = vmatprep.subr.bf16.mxu0 %v3403_v1  ;;  %3050 = vmatprep.mubr.msk.bf16.mxu0 %vm3404_vm0, %v3403_v1  ;;  %v2129_v16 = vrot.slane %v3376_v12, 3 }
  0x80   : > { %3086 = vmatprep.mubr.msk.bf16.mxu1 %vm3404_vm0, %v3403_v1  ;;  %3139 = vmatpush3.bf16.msra.mxu1 %v3333_v21  ;;  %v1863_v21 = vor.u32 %v1862_v15, %v1859_v14  ;;  %v1634_v25 = vsel %vm1408_vm4, %v1632_v19, %v1633_v20 }
  0x81   : > { %3140 = vmatprep.subr.bf16.mxu1 %v3403_v1 }
  0x82   : > { %3105 = vmatpush3.bf16.msra.mxu0 %v3330_v23  ;;  %v1874_v23 = vshrl.u32 %v3360_v18, 16  ;;  %v3377_v18 = vld [vmem:[%s3496_s16 + $0x18] sm:$0xff]  }
  0x83   : > { %3106 = vmatprep.subr.bf16.mxu0 %v3403_v1 }
  0x84   : > { %3141 = vmatpush3.bf16.msra.mxu1 %v3335_v27  ;;  %v3359_v27 = vld [vmem:[%s3496_s16 + $0x18] sm:$0xff]   ;;  %v1876_v29 = vrot.slane %v1874_v23, 2 }
  0x85   : > { %3051 = vmatmul.mubr.bf16.gmra.mxu0 %v1168_v30  ;;  %3142 = vmatprep.subr.bf16.mxu1 %v3403_v1  ;;  %v1879_v30 = vrot.slane %v1877_v24, 3 }
  0x86   : > { %3087 = vmatmul.mubr.bf16.gmra.mxu1 %v1413_v33  ;;  %3107 = vmatpush3.bf16.msra.mxu0 %v3334_v28  ;;  %v1872_v28 = vsel %vm1855_vm5, %v1863_v21, %v1871_v22  ;;  %v1635_v33 = vrot.slane %v3359_v27, 2  ;;  %v2125_v21 = vrot.slane %v3377_v18, 3 }
  0x87   : > { %3054 = vmatprep.mubr.msk.bf16.mxu0 %vm3404_vm0, %v3403_v1  ;;  %3090 = vmatprep.mubr.msk.bf16.mxu1 %vm3404_vm0, %v3403_v1  ;;  %v1880_v34 = vor.u32 %v1879_v30, %v1876_v29 }
  0x88   : > { %3108 = vmatprep.subr.bf16.mxu0 %v3403_v1  ;;  %3143 = vmatpush3.bf16.msra.mxu1 %v3339_v35  ;;  %v1883_v35 = vshrl.u32 %v3363_v31, 16 }
  0x89   : > { %3144 = vmatprep.subr.bf16.mxu1 %v3403_v1  ;;  %v1881_v40 = vsel %vm1855_vm5, %v1871_v22, %v1880_v34 }
  0x8a   : > { %3109 = vmatpush3.bf16.msra.mxu0 %v3338_v37  ;;  %v1636_v37 = vsel %vm1408_vm4, %v1633_v20, %v1635_v33  ;;  %v3378_v20 = vld [vmem:[%s3496_s16 + $0x30] ss:$0 sps:$4 sm:$0x77]  }
  0x8b   : > { %3110 = vmatprep.subr.bf16.mxu0 %v3403_v1  ;;  %v2131_v22 = vrot.slane %v3378_v20, 3 }
  0x8c   : > { %3145 = vmatpush3.bf16.msra.mxu1 %v3341_v41  ;;  %v1885_v41 = vrot.slane %v1883_v35, 2 }
  0x8d   : > { %3055 = vmatmul.mubr.bf16.gmra.mxu0 %v1177_v44  ;;  %3146 = vmatprep.subr.bf16.mxu1 %v3403_v1  ;;  %v1637_v44 = vrot.slane %v3362_v39, 2  ;;  %v2132_v24 = vsel %vm2121_vm6, %v2129_v16, %v2131_v22 }
  0x8e   : > { %3091 = vmatmul.mubr.bf16.gmra.mxu1 %v1415_v47  ;;  %3111 = vmatpush3.bf16.msra.mxu0 %v3340_v42  ;;  %v1888_v42 = vrot.slane %v1886_v36, 3  ;;  %v1892_v47 = vshrl.u32 %v3367_v43, 16 }
  0x8f   : > { %3058 = vmatprep.mubr.msk.bf16.mxu0 %vm3404_vm0, %v3403_v1  ;;  %3094 = vmatprep.mubr.msk.bf16.mxu1 %vm3404_vm0, %v3403_v1 }
  0x90   : > { %3112 = vmatprep.subr.bf16.mxu0 %v3403_v1  ;;  %3147 = vmatpush3.bf16.msra.mxu1 %v3344_v49  ;;  %v1889_v46 = vor.u32 %v1888_v42, %v1885_v41  ;;  %v1638_v49 = vsel %vm1408_vm4, %v1635_v33, %v1637_v44  ;;  %v1894_v53 = vrot.slane %v1892_v47, 2 }
  0x91   : > { %3148 = vmatprep.subr.bf16.mxu1 %v3403_v1 }
  0x92   : > { %3113 = vmatpush3.bf16.msra.mxu0 %v3345_v51  ;;  %v3366_v51 = vld [vmem:[%s3496_s16 + $0x28] sm:$0xff]   ;;  %v1890_v52 = vsel %vm1855_vm5, %v1880_v34, %v1889_v46  ;;  %v1898_v58 = vor.u32 %v1897_v54, %v1894_v53 }
  0x93   : > { %3114 = vmatprep.subr.bf16.mxu0 %v3403_v1 }
  0x94   : > { %3149 = vmatpush3.bf16.msra.mxu1 %v3346_v55  ;;  %v3371_v55 = vld [vmem:[%s3496_s16 + $0x30] ss:$0 sps:$4 sm:$0x77]   ;;  %v1899_v63 = vsel %vm1855_vm5, %v1889_v46, %v1898_v58 }
  0x95   : > { %3059 = vmatmul.mubr.bf16.gmra.mxu0 %v1186_v56  ;;  %3150 = vmatprep.subr.bf16.mxu1 %v3403_v1  ;;  %v1639_v56 = vrot.slane %v3366_v51, 2  ;;  %v1901_v59 = vshrl.u32 %v3371_v55, 16 }
  0x96   : > { %3095 = vmatmul.mubr.bf16.gmra.mxu1 %v1417_v60  ;;  %3062 = vmatprep.mubr.msk.bf16.mxu0 %vm3404_vm0, %v3403_v1  ;;  %v1904_v60 = vshll.u32 %v3371_v55, 16 }
  0x97   : > { %3098 = vmatprep.mubr.msk.bf16.mxu1 %vm3404_vm0, %v3403_v1  ;;  %3115 = vmatpush3.bf16.msra.mxu0 %v3347_v61  ;;  %v1640_v61 = vsel %vm1408_vm4, %v1637_v44, %v1639_v56  ;;  %v1903_v2 = vrot.slane %v1901_v59, 2 }
  0x98   : > { %3151 = vmatpush3.bf16.msra.mxu1 %v3350_v0  ;;  %3116 = vmatprep.subr.bf16.mxu0 %v3403_v1  ;;  %v3369_v0 = vld [vmem:[%s4021_s1 + $0x208] sm:$0xff]   ;;  %v1906_v3 = vrot.slane %v1904_v60, 3 }
  0x99   : > { %3152 = vmatprep.subr.bf16.mxu1 %v3403_v1 }
  0x9a   : > { %v1907_v5 = vor.u32 %v1906_v3, %v1903_v2 }
  0x9b   : > { %3117 = vmatpush3.bf16.msra.mxu0 %v3351_v4  ;;  %v1641_v4 = vrot.slane %v3370_v62, 2 }
  0x9c   : > { %3153 = vmatpush3.bf16.msra.mxu1 %v3352_v9  ;;  %3174 = vmatprep.subr.bf16.mxu0 %v3403_v1  ;;  %v3374_v9 = vld [vmem:[%s3496_s16 + $0x10] sm:$0xff]  }
  0x9d   : > { %3063 = vmatmul.mubr.bf16.gmra.mxu0 %v1195_v10  ;;  %3210 = vmatprep.subr.bf16.mxu1 %v3403_v1  ;;  %v1642_v7 = vsel %vm1408_vm4, %v1639_v56, %v1641_v4  ;;  %v1908_v10 = vsel %vm1855_vm5, %v1898_v58, %v1907_v5  ;;  %v2123_v14 = vrot.slane %v3374_v9, 3 }
  0x9e   : > { %3099 = vmatmul.mubr.bf16.gmra.mxu1 %v1419_v11  ;;  %3118 = vmatprep.mubr.msk.bf16.mxu0 %vm3404_vm0, %v3403_v1  ;;  %v3375_v11 = vld [vmem:[%s3496_s16 + $0x20] sm:$0xff]  }
  0x9f   : > { %3154 = vmatprep.mubr.msk.bf16.mxu1 %vm3404_vm0, %v3403_v1  ;;  %v2127_v15 = vrot.slane %v3375_v11, 3  ;;  %v2124_v17 = vsel %vm2121_vm6, %v2122_v13, %v2123_v14  ;;  %v2126_v23 = vsel %vm2121_vm6, %v2123_v14, %v2125_v21 }
  0xa1   : > { %v2130_v19 = vsel %vm2121_vm6, %v2127_v15, %v2129_v16 }
  0xa5   : > { %3119 = vmatmul.mubr.bf16.vlgmr.msra.gmra.mxu0 %v1634_v25  ;;  %v2128_v25 = vsel %vm2121_vm6, %v2125_v21, %v2127_v15 }
  0xa6   : > { %3155 = vmatmul.mubr.bf16.vlgmr.msra.gmra.mxu1 %v1872_v28  ;;  %3175 = vmatpush3.bf16.msra.mxu0 %v3357_v26 }
  0xa7   : > { %3176 = vmatprep.subr.bf16.mxu0 %v3403_v1  ;;  %3122 = vmatprep.mubr.msk.bf16.mxu0 %vm3404_vm0, %v3403_v1 }
  0xa8   : > { %3158 = vmatprep.mubr.msk.bf16.mxu1 %vm3404_vm0, %v3403_v1  ;;  %3218 = vmatpush3.bf16.msra.mxu1 %v3357_v26 }
  0xa9   : > { %3211 = vmatprep.subr.bf16.mxu1 %v3403_v1 }
  0xaa   : > { %3177 = vmatpush3.bf16.msra.mxu0 %v3358_v32 }
  0xab   : > { %3178 = vmatprep.subr.bf16.mxu0 %v3403_v1 }
  0xac   : > { %3219 = vmatpush3.bf16.msra.mxu1 %v3358_v32 }
  0xad   : > { %3123 = vmatmul.mubr.bf16.gmra.mxu0 %v1636_v37  ;;  %3212 = vmatprep.subr.bf16.mxu1 %v3403_v1 }
  0xae   : > { %3159 = vmatmul.mubr.bf16.gmra.mxu1 %v1881_v40  ;;  %3179 = vmatpush3.bf16.msra.mxu0 %v3361_v38 }
  0xaf   : > { %3126 = vmatprep.mubr.msk.bf16.mxu0 %vm3404_vm0, %v3403_v1  ;;  %3162 = vmatprep.mubr.msk.bf16.mxu1 %vm3404_vm0, %v3403_v1 }
  0xb0   : > { %3180 = vmatprep.subr.bf16.mxu0 %v3403_v1  ;;  %3220 = vmatpush3.bf16.msra.mxu1 %v3361_v38 }
  0xb1   : > { %3213 = vmatprep.subr.bf16.mxu1 %v3403_v1 }
  0xb2   : > { %3181 = vmatpush3.bf16.msra.mxu0 %v3364_v45 }
  0xb3   : > { %3182 = vmatprep.subr.bf16.mxu0 %v3403_v1 }
  0xb4   : > { %3221 = vmatpush3.bf16.msra.mxu1 %v3364_v45 }
  0xb5   : > { %3127 = vmatmul.mubr.bf16.gmra.mxu0 %v1638_v49  ;;  %3214 = vmatprep.subr.bf16.mxu1 %v3403_v1 }
  0xb6   : > { %3163 = vmatmul.mubr.bf16.gmra.mxu1 %v1890_v52  ;;  %3183 = vmatpush3.bf16.msra.mxu0 %v3365_v50 }
  0xb7   : > { %3130 = vmatprep.mubr.msk.bf16.mxu0 %vm3404_vm0, %v3403_v1  ;;  %3166 = vmatprep.mubr.msk.bf16.mxu1 %vm3404_vm0, %v3403_v1 }
  0xb8   : > { %3222 = vmatpush3.bf16.msra.mxu1 %v3365_v50  ;;  %3184 = vmatprep.subr.bf16.mxu0 %v3403_v1 }
  0xb9   : > { %3215 = vmatprep.subr.bf16.mxu1 %v3403_v1 }
  0xba   : > { %3185 = vmatpush3.bf16.msra.mxu0 %v3368_v57 }
  0xbb   : > { %3186 = vmatprep.subr.bf16.mxu0 %v3403_v1 }
  0xbc   : > { %3223 = vmatpush3.bf16.msra.mxu1 %v3368_v57 }
  0xbd   : > { %3131 = vmatmul.mubr.bf16.gmra.mxu0 %v1640_v61  ;;  %3216 = vmatprep.subr.bf16.mxu1 %v3403_v1 }
  0xbe   : > { %3167 = vmatmul.mubr.bf16.gmra.mxu1 %v1899_v63  ;;  %3134 = vmatprep.mubr.msk.bf16.mxu0 %vm3404_vm0, %v3403_v1 }
  0xbf   : > { %3170 = vmatprep.mubr.msk.bf16.mxu1 %vm3404_vm0, %v3403_v1  ;;  %3187 = vmatpush3.bf16.msra.mxu0 %v3369_v0 }
  0xc0   : > { %3224 = vmatpush3.bf16.msra.mxu1 %v3369_v0  ;;  %3188 = vmatprep.subr.bf16.mxu0 %v3403_v1 }
  0xc1   : > { %3217 = vmatprep.subr.bf16.mxu1 %v3403_v1 }
  0xc3   : > { %3189 = vmatpush3.bf16.msra.mxu0 %v3372_v6 }
  0xc4   : > { %3225 = vmatpush3.bf16.msra.mxu1 %v3372_v6 }
  0xc5   : > { %3135 = vmatmul.mubr.bf16.gmra.mxu0 %v1642_v7 }
  0xc6   : > { %3171 = vmatmul.mubr.bf16.gmra.mxu1 %v1908_v10  ;;  %3190 = vmatprep.mubr.msk.bf16.mxu0 %vm3404_vm0, %v3403_v1 }
  0xc7   : > { %3202 = vmatprep.mubr.msk.bf16.mxu1 %vm3404_vm0, %v3403_v1 }
  0xcd   : > { %3191 = vmatmul.mubr.bf16.vlgmr.msra.gmra.mxu0 %v2124_v17 }
  0xce   : > { %3203 = vmatmul.mubr.bf16.vlgmr.msra.gmra.mxu1 %v2130_v19  ;;  %3194 = vmatprep.mubr.msk.bf16.mxu0 %vm3404_vm0, %v3403_v1 }
  0xcf   : > { %3206 = vmatprep.mubr.msk.bf16.mxu1 %vm3404_vm0, %v3403_v1 }
  0xd5   : > { %3195 = vmatmul.mubr.bf16.gmra.mxu0 %v2126_v23 }
  0xd6   : > { %3207 = vmatmul.mubr.bf16.gmra.mxu1 %v2132_v24  ;;  %3198 = vmatprep.mubr.msk.bf16.mxu0 %vm3404_vm0, %v3403_v1 }
  0xdd   : > { %3199 = vmatmul.mubr.bf16.gmra.mxu0 %v2128_v25 }
  0xed   : > { %v333_v26 = vpop.f32.mrf.mxu0 }
  0xee   : > { %v570_v27 = vpop.f32.mrf.mxu1 }
  0xef   : > { %v619_v28 = vadd.f32 %v570_v27, %v333_v26  ;;  %v2904_v29 = vpop.f32.mrf.mxu0 }
  0xf0   : > { %v2940_v30 = vpop.f32.mrf.mxu1 }
  0xf1   : > { %v336_v31 = vpop.f32.mrf.mxu0 }
  0xf2   : > { %v573_v32 = vpop.f32.mrf.mxu1 }
  0xf3   : > { %v620_v33 = vadd.f32 %v573_v32, %v336_v31  ;;  %v2905_v34 = vpop.f32.mrf.mxu0 }
  0xf4   : > { %v2941_v35 = vpop.f32.mrf.mxu1 }
  0xf5   : > { %v341_v36 = vpop.f32.mrf.mxu0 }
  0xf6   : > { %v578_v37 = vpop.f32.mrf.mxu1 }
  0xf7   : > { %v621_v38 = vadd.f32 %v578_v37, %v341_v36  ;;  %v2908_v39 = vpop.f32.mrf.mxu0 }
  0xf8   : > { %v2944_v40 = vpop.f32.mrf.mxu1 }
  0xf9   : > { %v344_v41 = vpop.f32.mrf.mxu0 }
  0xfa   : > { %v581_v1 = vpop.f32.mrf.mxu1 }
  0xfb   : > { %v622_v42 = vadd.f32 %v581_v1, %v344_v41  ;;  %v2909_v43 = vpop.f32.mrf.mxu0 }
  0xfc   : > { %v2945_v44 = vpop.f32.mrf.mxu1 }
  0xfd   : > { %v349_v45 = vpop.f32.mrf.mxu0 }
  0xfe   : > { %v586_v46 = vpop.f32.mrf.mxu1 }
  0xff   : > { %v623_v47 = vadd.f32 %v586_v46, %v349_v45  ;;  %v2912_v48 = vpop.f32.mrf.mxu0 }
 0x100   : > { %v2948_v49 = vpop.f32.mrf.mxu1 }
 0x101   : > { %v352_v50 = vpop.f32.mrf.mxu0 }
 0x102   : > { %v589_v51 = vpop.f32.mrf.mxu1 }
 0x103   : > { %v624_v52 = vadd.f32 %v589_v51, %v352_v50  ;;  %v2913_v53 = vpop.f32.mrf.mxu0 }
 0x104   : > { %v2949_v54 = vpop.f32.mrf.mxu1 }
 0x105   : > { %v357_v55 = vpop.f32.mrf.mxu0 }
 0x106   : > { %v594_v56 = vpop.f32.mrf.mxu1 }
 0x107   : > { %v625_v57 = vadd.f32 %v594_v56, %v357_v55  ;;  %v2916_v58 = vpop.f32.mrf.mxu0 }
 0x108   : > { %v2952_v59 = vpop.f32.mrf.mxu1 }
 0x109   : > { %v360_v60 = vpop.f32.mrf.mxu0 }
 0x10a   : > { %v597_v61 = vpop.f32.mrf.mxu1 }
 0x10b   : > { %v626_v62 = vadd.f32 %v597_v61, %v360_v60  ;;  %v2917_v63 = vpop.f32.mrf.mxu0 }
 0x10c   : > { %v2953_v0 = vpop.f32.mrf.mxu1 }
 0x10d   : > { %v365_v2 = vpop.f32.mrf.mxu0 }
 0x10e   : > { %v602_v3 = vpop.f32.mrf.mxu1 }
 0x10f   : > { %v627_v4 = vadd.f32 %v602_v3, %v365_v2  ;;  %v2920_v5 = vpop.f32.mrf.mxu0 }
 0x110   : > { %v2956_v6 = vpop.f32.mrf.mxu1 }
 0x111   : > { %v368_v7 = vpop.f32.mrf.mxu0 }
 0x112   : > { %v605_v8 = vpop.f32.mrf.mxu1 }
 0x113   : > { %v628_v9 = vadd.f32 %v605_v8, %v368_v7  ;;  %v2921_v10 = vpop.f32.mrf.mxu0 }
 0x114   : > { %v2957_v11 = vpop.f32.mrf.mxu1 }
 0x115   : > { %v794_v12 = vpop.f32.mrf.mxu0 }
 0x116   : > { %v843_v13 = vadd.f32 %v794_v12, %v619_v28  ;;  %v1017_v14 = vpop.f32.mrf.mxu1 }
 0x117   : > { %v2976_v15 = vpop.f32.mrf.mxu0 }
 0x118   : > { %v1066_v16 = vadd.f32 %v1017_v14, %v843_v13  ;;  %v3012_v17 = vpop.f32.mrf.mxu1 }
 0x119   : > { %v797_v18 = vpop.f32.mrf.mxu0 }
 0x11a   : > { %v844_v19 = vadd.f32 %v797_v18, %v620_v33  ;;  %v1020_v20 = vpop.f32.mrf.mxu1 }
 0x11b   : > { %v2977_v21 = vpop.f32.mrf.mxu0 }
 0x11c   : > { %v1067_v22 = vadd.f32 %v1020_v20, %v844_v19  ;;  %v3013_v23 = vpop.f32.mrf.mxu1 }
 0x11d   : > { %v802_v24 = vpop.f32.mrf.mxu0 }
 0x11e   : > { %v845_v25 = vadd.f32 %v802_v24, %v621_v38  ;;  %v1025_v26 = vpop.f32.mrf.mxu1 }
 0x11f   : > { %v2980_v27 = vpop.f32.mrf.mxu0 }
 0x120   : > { %v1068_v29 = vadd.f32 %v1025_v26, %v845_v25  ;;  %v3016_v30 = vpop.f32.mrf.mxu1 }
 0x121   : > { %v805_v31 = vpop.f32.mrf.mxu0 }
 0x122   : > { %v846_v32 = vadd.f32 %v805_v31, %v622_v42  ;;  %v1028_v34 = vpop.f32.mrf.mxu1 }
 0x123   : > { %v2981_v28 = vpop.f32.mrf.mxu0 }
 0x124   : > { %v1069_v35 = vadd.f32 %v1028_v34, %v846_v32  ;;  %v3017_v36 = vpop.f32.mrf.mxu1 }
 0x125   : > { %v810_v37 = vpop.f32.mrf.mxu0 }
 0x126   : > { %v847_v39 = vadd.f32 %v810_v37, %v623_v47  ;;  %v1033_v40 = vpop.f32.mrf.mxu1 }
 0x127   : > { %v2984_v33 = vpop.f32.mrf.mxu0 }
 0x128   : > { %v1070_v41 = vadd.f32 %v1033_v40, %v847_v39  ;;  %v3020_v1 = vpop.f32.mrf.mxu1 }
 0x129   : > { %v813_v43 = vpop.f32.mrf.mxu0 }
 0x12a   : > { %v848_v44 = vadd.f32 %v813_v43, %v624_v52  ;;  %v1036_v45 = vpop.f32.mrf.mxu1 }
 0x12b   : > { %v2985_v38 = vpop.f32.mrf.mxu0 }
 0x12c   : > { %v1071_v46 = vadd.f32 %v1036_v45, %v848_v44  ;;  %v3021_v48 = vpop.f32.mrf.mxu1 }
 0x12d   : > { %v818_v49 = vpop.f32.mrf.mxu0 }
 0x12e   : > { %v849_v50 = vadd.f32 %v818_v49, %v625_v57  ;;  %v1041_v51 = vpop.f32.mrf.mxu1 }
 0x12f   : > { %v2988_v42 = vpop.f32.mrf.mxu0 }
 0x130   : > { %v3934_v53 = vadd.f32 %v1041_v51, %v849_v50  ;;  %v3024_v54 = vpop.f32.mrf.mxu1 }
 0x131   : > { %v821_v55 = vpop.f32.mrf.mxu0 }
 0x132   : > { %v850_v56 = vadd.f32 %v821_v55, %v626_v62  ;;  %v1044_v47 = vpop.f32.mrf.mxu1 }
 0x133   : > { %v2989_v58 = vpop.f32.mrf.mxu0 }
 0x134   : > { %v3936_v59 = vadd.f32 %v1044_v47, %v850_v56  ;;  %v3025_v60 = vpop.f32.mrf.mxu1 }
 0x135   : > { %v826_v61 = vpop.f32.mrf.mxu0 }
 0x136   : > { %v851_v52 = vadd.f32 %v826_v61, %v627_v4  ;;  %v1049_v63 = vpop.f32.mrf.mxu1 }
 0x137   : > { %v2992_v0 = vpop.f32.mrf.mxu0 }
 0x138   : > { %v3938_v2 = vadd.f32 %v1049_v63, %v851_v52  ;;  %v3028_v3 = vpop.f32.mrf.mxu1 }
 0x139   : > { %v829_v57 = vpop.f32.mrf.mxu0 }
 0x13a   : > { %v852_v5 = vadd.f32 %v829_v57, %v628_v9  ;;  %v1052_v6 = vpop.f32.mrf.mxu1 }
 0x13b   : > { %v2993_v7 = vpop.f32.mrf.mxu0 }
 0x13c   : > { %v3940_v8 = vadd.f32 %v1052_v6, %v852_v5  ;;  %v3029_v10 = vpop.f32.mrf.mxu1 }
 0x13d   : > { %v1283_v62 = vpop.f32.mrf.mxu0 }
 0x13e   : > { %v1332_v11 = vadd.f32 %v1283_v62, %v1066_v16  ;;  %v1507_v12 = vpop.f32.mrf.mxu1 }
 0x13f   : > { %v3048_v13 = vpop.f32.mrf.mxu0 }
 0x140   : > { %v3942_v14 = vadd.f32 %v1507_v12, %v1332_v11  ;;  %v3084_v15 = vpop.f32.mrf.mxu1 }
 0x141   : > { %v1286_v4 = vpop.f32.mrf.mxu0 }
 0x142   : > { %v1333_v17 = vadd.f32 %v1286_v4, %v1067_v22  ;;  %v1510_v18 = vpop.f32.mrf.mxu1 }
 0x143   : > { %v3049_v19 = vpop.f32.mrf.mxu0 }
 0x144   : > { %v3944_v20 = vadd.f32 %v1510_v18, %v1333_v17  ;;  %v3085_v21 = vpop.f32.mrf.mxu1 }
 0x145   : > { %v1291_v9 = vpop.f32.mrf.mxu0 }
 0x146   : > { %v1334_v23 = vadd.f32 %v1291_v9, %v1068_v29  ;;  %v1515_v24 = vpop.f32.mrf.mxu1 }
 0x147   : > { %v3052_v25 = vpop.f32.mrf.mxu0 }
 0x148   : > { %v3946_v26 = vadd.f32 %v1515_v24, %v1334_v23  ;;  %v3088_v27 = vpop.f32.mrf.mxu1 }
 0x149   : > { %v1294_v16 = vpop.f32.mrf.mxu0 }
 0x14a   : > { %v1335_v30 = vadd.f32 %v1294_v16, %v1069_v35  ;;  %v1518_v31 = vpop.f32.mrf.mxu1 }
 0x14b   : > { %v3053_v32 = vpop.f32.mrf.mxu0 }
 0x14c   : > { %v3948_v34 = vadd.f32 %v1518_v31, %v1335_v30  ;;  %v3089_v28 = vpop.f32.mrf.mxu1 }
 0x14d   : > { %v1299_v22 = vpop.f32.mrf.mxu0 }
 0x14e   : > { %v1336_v36 = vadd.f32 %v1299_v22, %v1070_v41  ;;  %v1523_v37 = vpop.f32.mrf.mxu1 }
 0x14f   : > { %v3056_v39 = vpop.f32.mrf.mxu0 }
 0x150   : > { %v3950_v40 = vadd.f32 %v1523_v37, %v1336_v36  ;;  %v3092_v33 = vpop.f32.mrf.mxu1 }
 0x151   : > { %v1302_v29 = vpop.f32.mrf.mxu0 }
 0x152   : > { %v1337_v1 = vadd.f32 %v1302_v29, %v1071_v46  ;;  %v1526_v43 = vpop.f32.mrf.mxu1 }
 0x153   : > { %v3057_v44 = vpop.f32.mrf.mxu0 }
 0x154   : > { %v3952_v45 = vadd.f32 %v1526_v43, %v1337_v1  ;;  %v3093_v38 = vpop.f32.mrf.mxu1 }
 0x155   : > { %v1307_v35 = vpop.f32.mrf.mxu0 }
 0x156   : > { %v1531_v48 = vpop.f32.mrf.mxu1  ;;  %v1338_v37 = vadd.f32 %v1307_v35, %v3934_v53 }
 0x157   : > { %v3060_v49 = vpop.f32.mrf.mxu0 }
 0x158   : > { %v3096_v50 = vpop.f32.mrf.mxu1  ;;  %v1562_v43 = vadd.f32 %v1531_v48, %v1338_v37 }
 0x159   : > { %v1310_v51 = vpop.f32.mrf.mxu0 }
 0x15a   : > { %v1534_v42 = vpop.f32.mrf.mxu1  ;;  %v1339_v44 = vadd.f32 %v1310_v51, %v3936_v59 }
 0x15b   : > { %v3061_v54 = vpop.f32.mrf.mxu0 }
 0x15c   : > { %v3097_v41 = vpop.f32.mrf.mxu1 }
 0x15d   : > { %v1315_v55 = vpop.f32.mrf.mxu0 }
 0x15e   : > { %v1539_v56 = vpop.f32.mrf.mxu1 }
 0x15f   : > { %v3064_v47 = vpop.f32.mrf.mxu0 }
 0x160   : > { %v3100_v58 = vpop.f32.mrf.mxu1 }
 0x161   : > { %v1318_v60 = vpop.f32.mrf.mxu0  ;;  %v1563_v58 = vadd.f32 %v1534_v42, %v1339_v44  ;;  %v3977_v42 = vld [vmem:[%s4022_s2] ss:$0 sm:$0xff] }
 0x162   : > { %v3954_v61 = vpop.f32.mrf.mxu1 }
 0x163   : > { %v3065_v46 = vpop.f32.mrf.mxu0 }
 0x164   : > { %v3101_v52 = vpop.f32.mrf.mxu1  ;;  %v1340_v46 = vadd.f32 %v1315_v55, %v3938_v2 }
 0x165   : > { %v1730_v63 = vpop.f32.mrf.mxu0 }
 0x166   : > { %v1996_v0 = vpop.f32.mrf.mxu1  ;;  %v1779_v49 = vadd.f32 %v1730_v63, %v3942_v14  ;;  %v1564_v51 = vadd.f32 %v1539_v56, %v1340_v46  ;;  %v1341_v14 = vadd.f32 %v1318_v60, %v3940_v8 }
 0x167   : > { %v3120_v3 = vpop.f32.mrf.mxu0 }
 0x168   : > { %v3156_v57 = vpop.f32.mrf.mxu1  ;;  %v2045_v3 = vadd.f32 %v1996_v0, %v1779_v49  ;;  %v1565_v8 = vadd.f32 %v3954_v61, %v1341_v14 }
 0x169   : > { %v1733_v5 = vpop.f32.mrf.mxu0 }
 0x16a   : > { %v1999_v6 = vpop.f32.mrf.mxu1  ;;  %v1780_v53 = vadd.f32 %v1733_v5, %v3944_v20 }
 0x16b   : > { %v3121_v7 = vpop.f32.mrf.mxu0 }
 0x16c   : > { %v3157_v10 = vpop.f32.mrf.mxu1  ;;  %v2046_v63 = vadd.f32 %v1999_v6, %v1780_v53 }
 0x16d   : > { %v1738_v62 = vpop.f32.mrf.mxu0 }
 0x16e   : > { %v3956_v11 = vpop.f32.mrf.mxu1  ;;  %v1781_v20 = vadd.f32 %v1738_v62, %v3946_v26 }
 0x16f   : > { %v3124_v12 = vpop.f32.mrf.mxu0 }
 0x170   : > { %v3160_v13 = vpop.f32.mrf.mxu1 }
 0x171   : > { %v1741_v15 = vpop.f32.mrf.mxu0 }
 0x172   : > { %v3958_v4 = vpop.f32.mrf.mxu1  ;;  %v1782_v6 = vadd.f32 %v1741_v15, %v3948_v34 }
 0x173   : > { %v3125_v17 = vpop.f32.mrf.mxu0 }
 0x174   : > { %v3161_v18 = vpop.f32.mrf.mxu1 }
 0x175   : > { %v3960_v19 = vpop.f32.mrf.mxu0 }
 0x176   : > { %v3962_v21 = vpop.f32.mrf.mxu1 }
 0x177   : > { %v3128_v9 = vpop.f32.mrf.mxu0 }
 0x178   : > { %v3164_v23 = vpop.f32.mrf.mxu1 }
 0x179   : > { %v3964_v24 = vpop.f32.mrf.mxu0 }
 0x17a   : > { %v3966_v25 = vpop.f32.mrf.mxu1 }
 0x17b   : > { %v3129_v27 = vpop.f32.mrf.mxu0 }
 0x17c   : > { %v3165_v16 = vpop.f32.mrf.mxu1  ;;  %v2047_v27 = vadd.f32 %v3956_v11, %v1781_v20 }
 0x17d   : > { %v1754_v30 = vpop.f32.mrf.mxu0 }
 0x17e   : > { %v2020_v31 = vpop.f32.mrf.mxu1  ;;  %v1785_v54 = vadd.f32 %v1754_v30, %v1562_v43 }
 0x17f   : > { %v3132_v32 = vpop.f32.mrf.mxu0 }
 0x180   : > { %v3168_v28 = vpop.f32.mrf.mxu1  ;;  %v2051_v57 = vadd.f32 %v2020_v31, %v1785_v54 }
 0x181   : > { %v1757_v22 = vpop.f32.mrf.mxu0 }
 0x182   : > { %v2023_v36 = vpop.f32.mrf.mxu1  ;;  %v1786_v7 = vadd.f32 %v1757_v22, %v1563_v58 }
 0x183   : > { %v3133_v39 = vpop.f32.mrf.mxu0 }
 0x184   : > { %v3169_v33 = vpop.f32.mrf.mxu1  ;;  %v2052_v5 = vadd.f32 %v2023_v36, %v1786_v7  ;;  %v2048_v39 = vadd.f32 %v3958_v4, %v1782_v6 }
 0x185   : > { %v1762_v29 = vpop.f32.mrf.mxu0  ;;  %v1783_v33 = vadd.f32 %v3960_v19, %v3950_v40  ;;  %v1784_v40 = vadd.f32 %v3964_v24, %v3952_v45 }
 0x186   : > { %v2028_v1 = vpop.f32.mrf.mxu1  ;;  %v1787_v12 = vadd.f32 %v1762_v29, %v1564_v51 }
 0x187   : > { %v3136_v38 = vpop.f32.mrf.mxu0  ;;  %v2049_v4 = vadd.f32 %v3962_v21, %v1783_v33  ;;  %v2050_v21 = vadd.f32 %v3966_v25, %v1784_v40 }
 0x188   : > { %v3172_v50 = vpop.f32.mrf.mxu1  ;;  %v2053_v16 = vadd.f32 %v2028_v1, %v1787_v12 }
 0x189   : > { %v1765_v41 = vpop.f32.mrf.mxu0 }
 0x18a   : > { %v2031_v47 = vpop.f32.mrf.mxu1  ;;  %v1788_v30 = vadd.f32 %v1765_v41, %v1565_v8 }
 0x18b   : > { %v3137_v52 = vpop.f32.mrf.mxu0 }
 0x18c   : > { %v3173_v35 = vpop.f32.mrf.mxu1  ;;  %v2054_v43 = vadd.f32 %v2031_v47, %v1788_v30 }
 0x18d   : > { %v2220_v48 = vpop.f32.mrf.mxu0 }
 0x18e   : > { %v2269_v10 = vadd.f32 %v2220_v48, %v2045_v3  ;;  %v2244_v59 = vpop.f32.mrf.mxu1 }
 0x18f   : > { %v2275_v2 = vadd.f32 %v2244_v59, %v2051_v57  ;;  %v3192_v55 = vpop.f32.mrf.mxu0 }
 0x190   : > { %v3204_v0 = vpop.f32.mrf.mxu1  ;;  %v2306_v17 = vadd.f32 %v3977_v42, %v2269_v10 }
 0x191   : > { %v2223_v13 = vpop.f32.mrf.mxu0  ;;  %v2312_v60 = vadd.f32 %v3977_v42, %v2275_v2 }
 0x192   : > { %v2270_v56 = vadd.f32 %v2223_v13, %v2046_v63  ;;  %v2247_v18 = vpop.f32.mrf.mxu1  ;;  %v2316_v28 = vmax.f32 %v2306_v17, 0.0 }
 0x193   : > { %v2276_v9 = vadd.f32 %v2247_v18, %v2052_v5  ;;  %v3193_v23 = vpop.f32.mrf.mxu0  ;;  %v2322_v37 = vmax.f32 %v2312_v60, 0.0 }
 0x194   : > { %v2307_v26 = vadd.f32 %v3977_v42, %v2270_v56  ;;  %v3205_v62 = vpop.f32.mrf.mxu1 }
 0x195   : > { %v2313_v31 = vadd.f32 %v3977_v42, %v2276_v9  ;;  %v2228_v32 = vpop.f32.mrf.mxu0 }
 0x196   : > { %v2317_v22 = vmax.f32 %v2307_v26, 0.0  ;;  %v2271_v61 = vadd.f32 %v2228_v32, %v2047_v27  ;;  %v2252_v36 = vpop.f32.mrf.mxu1 }
 0x197   : > { %v2323_v34 = vmax.f32 %v2313_v31, 0.0  ;;  %v2277_v11 = vadd.f32 %v2252_v36, %v2053_v16  ;;  %v3196_v15 = vpop.f32.mrf.mxu0 }
 0x198   : > { %v2743_v29 = vpack.c.bf16 %v2317_v22, %v2316_v28  ;;  %v3208_v1 = vpop.f32.mrf.mxu1  ;;  %v2308_v49 = vadd.f32 %v3977_v42, %v2271_v61 }
 0x199   : > { %v2758_v44 = vpack.c.bf16 %v2323_v34, %v2322_v37  ;;  %v2231_v38 = vpop.f32.mrf.mxu0  ;;  %v2314_v41 = vadd.f32 %v3977_v42, %v2277_v11 }
 0x19a   : > { %2744 = vst [vmem:[%s3991_s7] sm:$0xff] %v2743_v29   ;;  %v2272_v50 = vadd.f32 %v2231_v38, %v2048_v39  ;;  %v2255_v54 = vpop.f32.mrf.mxu1  ;;  %v2318_v53 = vmax.f32 %v2308_v49, 0.0 }
 0x19b   : > { %2767 = vst [vmem:[%s3991_s7 + $0x18] sm:$0xff] %v2758_v44   ;;  %v2278_v58 = vadd.f32 %v2255_v54, %v2054_v43  ;;  %v3197_v46 = vpop.f32.mrf.mxu0  ;;  %v2324_v7 = vmax.f32 %v2314_v41, 0.0 }
 0x19c   : > { %v2309_v19 = vadd.f32 %v3977_v42, %v2272_v50  ;;  %v3209_v47 = vpop.f32.mrf.mxu1 }
 0x19d   : > { %v2315_v52 = vadd.f32 %v3977_v42, %v2278_v58  ;;  %v2236_v3 = vpop.f32.mrf.mxu0 }
 0x19e   : > { %v2319_v35 = vmax.f32 %v2309_v19, 0.0  ;;  %v2273_v57 = vadd.f32 %v2236_v3, %v2049_v4 }
 0x19f   : > { %v2325_v48 = vmax.f32 %v2315_v52, 0.0  ;;  %v3200_v10 = vpop.f32.mrf.mxu0 }
 0x1a0   : > { %v2748_v59 = vpack.c.bf16 %v2319_v35, %v2318_v53  ;;  %v2310_v45 = vadd.f32 %v3977_v42, %v2273_v57 }
 0x1a1   : > { %v2763_v51 = vpack.c.bf16 %v2325_v48, %v2324_v7  ;;  %v2239_v14 = vpop.f32.mrf.mxu0 }
 0x1a2   : > { %2765 = vst [vmem:[%s3991_s7 + $0x8] sm:$0xff] %v2748_v59   ;;  %v2274_v24 = vadd.f32 %v2239_v14, %v2050_v21  ;;  %v2320_v63 = vmax.f32 %v2310_v45, 0.0 }
 0x1a3   : > { %2768 = vst [vmem:[%s3991_s7 + $0x20] sm:$0xff] %v2763_v51   ;;  %v3201_v2 = vpop.f32.mrf.mxu0 }
 0x1a4   : > { %v2311_v55 = vadd.f32 %v3977_v42, %v2274_v24 }
 0x1a6   : > { %v2321_v20 = vmax.f32 %v2311_v55, 0.0 }
 0x1a8   : > { %v2753_v0 = vpack.c.bf16 %v2321_v20, %v2320_v63 }
 0x1aa   : > { %2766 = vst [vmem:[%s3991_s7 + $0x10] sm:$0xff] %v2753_v0  }
 0x1ab PF: > { %s13_s14 = sadd.s32 1, %s3401_s14   ;;  %s4024_s12 = smov %s3397_s13 }
 0x1ac   : > { %p10_p5 = scmp.ge.s32.totalorder %s13_s14, 4   ;;  %s4025_s13 = smov %s4027_s15 }
 0x1ae   :  { %12 = sbr.rel (!%p10_p5) target bundleno = 2 (0x2), region = 70 }

// kernel: fwd.10
= control target key start
LH: loop header
LB: loop body
LE: loop exit
PB: predicated region body
PF: predicated region fallthrough
CT: control target
= control target key end

     0   :  { %s2289_s12 = smov 0   ;;  %s2291_s13 = smov 0   ;;  %s2602_s0 = inlined_call_operand.vmem [shape: bf16[2,100,128], index: 0, kind: input, shape index: {}]   ;;  %s2603_s1 = inlined_call_operand.vmem [shape: bf16[9,128,128], index: 1, kind: input, shape index: {}]   ;;  %s2604_s2 = inlined_call_operand.vmem [shape: f32[1,128], index: 2, kind: input, shape index: {}]   ;;  %s2605_s3 = inlined_call_operand.vmem [shape: bf16[2,20,128], index: 3, kind: output, shape index: {}]  }
   0x1   :  { %s2293_s14 = smov 0  }
   0x2 LB: > { %s25_s15 = sadd.s32 1, %s2263_s13  ;;  %p1624_p0 = scmp.ge.s32.totalorder %s2267_s14, 1  ;;  %s2267_s14 = sphi %s2293_s14, %s13_s14   ;;  %s2263_s13 = sphi %s2291_s13, %s2607_s13   ;;  %s2259_s12 = sphi %s2289_s12, %s2606_s12  }
   0x3   : > { %p27_p1 = scmp.ge.s32.totalorder %s25_s15, 2  ;;  %p151_p2 = scmp.lt.s32.totalorder %s2267_s14, 3 }
   0x5   : > { %s2609_s15 = smov (%p27_p1, %s25_s15), 0  ;;  %p152_p3 = pnand %p1624_p0, %p151_p2 }
   0x6   : > { %p179_p4 = scmp.lt.s32.totalorder (!%p152_p3), %s2259_s12, 1 }
   0x7   : > { %155 = sbr.rel (%p152_p3) target bundleno = 383 (0x17f), region = 32 }
   0xc   : > { %v2155_v0 = vld [vmem:[%s2603_s1 + $0x38] sm:$0xff]   ;;  %v2156_v1 = vld [vmem:[%s2603_s1 + $0x30] sm:$0xff]   ;;  %v2157_v3 = vld [vmem:[%s2603_s1 + $0x28] sm:$0xff]   ;;  %s2611_s12 = smov (!%p179_p4, %s2259_s12), 1  ;;  %vm351_vm0 = vsmask.f32 7424 }
   0xd   : > { %1949 = vmatprep.subr.bf16.mxu0 %v2155_v0  ;;  %v2158_v2 = vld [vmem:[%s2603_s1 + $0x78] sm:$0xff]   ;;  %v2160_v4 = vld [vmem:[%s2603_s1 + $0x70] sm:$0xff]   ;;  %v2162_v5 = vld [vmem:[%s2603_s1 + $0x68] sm:$0xff]   ;;  %s2129_s30 = smul.u32 52, %s2611_s12  ;;  %vm652_vm1 = vcmask 1046528   ;;  %vm1255_vm4 = vcmask 1044480  }
   0xe   : > { %1950 = vmatpush3.bf16.msra.mxu0 %v2155_v0  ;;  %1969 = vmatprep.subr.bf16.mxu1 %v2158_v2  ;;  %v2159_v6 = vld [vmem:[%s2603_s1 + $0x20] sm:$0xff]   ;;  %v2161_v8 = vld [vmem:[%s2603_s1 + $0x18] sm:$0xff]   ;;  %v2163_v10 = vld [vmem:[%s2603_s1 + $0x10] sm:$0xff]   ;;  %vm791_vm2 = vsmask.f32 6400  ;;  %s2130_s5 = smul.u32 12, %s2611_s12 }
   0xf   : > { %1951 = vmatprep.subr.bf16.mxu0 %v2156_v1  ;;  %1970 = vmatpush3.bf16.msra.mxu1 %v2158_v2  ;;  %v2164_v7 = vld [vmem:[%s2603_s1 + $0x60] sm:$0xff]   ;;  %s2340_s10 = scalar_lea.vmem %s2602_s0, %s2129_s30  ;;  %v2166_v11 = vld [vmem:[%s2603_s1 + $0x58] sm:$0xff]   ;;  %v2165_v12 = vld [vmem:[%s2603_s1 + $0x8] sm:$0xff]   ;;  %vm1099_vm3 = vsmask.f32 5376 }
  0x10   : > { %1971 = vmatprep.subr.bf16.mxu1 %v2160_v4  ;;  %v2169_v9 = vld [vmem:[%s2340_s10] sm:$0xff]   ;;  %v2168_v13 = vld [vmem:[%s2603_s1 + $0x50] sm:$0xff]   ;;  %v2171_v18 = vld [vmem:[%s2603_s1 + $0x48] sm:$0xff]   ;;  %s192_s8 = scalar_lea.vmem %s2605_s3, %s2130_s5 }
  0x11   : > { %1965 = vmatprep.mubr.bf16.mxu0 %v2169_v9  ;;  %v2175_v14 = vld [vmem:[%s2340_s10 + $0xc] sm:$0xff]   ;;  %v2176_v15 = vld [vmem:[%s2340_s10 + $0x14] ss:$0 sps:$4 sm:$0x77]   ;;  %v2167_v20 = vld [vmem:[%s2603_s1] sm:$0xff]  }
  0x12   : > { %1952 = vmatpush3.bf16.msra.mxu0 %v2156_v1  ;;  %v353_v16 = vshrl.u32 %v2175_v14, 16  ;;  %v355_v17 = vshll.u32 %v2175_v14, 16  ;;  %v360_v19 = vshll.u32 %v2176_v15, 16  ;;  %v2173_v24 = vld [vmem:[%s2603_s1 + $0x40] sm:$0xff]   ;;  %v2172_v26 = vld [vmem:[%s2603_s1 + $0xb8] sm:$0xff]   ;;  %v364_v28 = vshrl.u32 %v2176_v15, 16 }
  0x13   : > { %1953 = vmatprep.subr.bf16.mxu0 %v2157_v3  ;;  %1972 = vmatpush3.bf16.msra.mxu1 %v2160_v4  ;;  %v2170_v25 = vld [vmem:[%s2340_s10 + $0x8] ss:$0 sps:$4 sm:$0x33]   ;;  %v2178_v29 = vld [vmem:[%s2603_s1 + $0xf8] sm:$0xff]   ;;  %v2174_v30 = vld [vmem:[%s2603_s1 + $0xb0] sm:$0xff]  }
  0x14   : > { %1973 = vmatprep.subr.bf16.mxu1 %v2162_v5  ;;  %v357_v21 = vrot.slane %v355_v17, 1  ;;  %v362_v22 = vrot.slane %v360_v19, 1  ;;  %v2180_v32 = vld [vmem:[%s2603_s1 + $0xf0] sm:$0xff]   ;;  %v2189_v33 = vld [vmem:[%s2340_s10] sm:$0xff]   ;;  %v2177_v35 = vld [vmem:[%s2603_s1 + $0xa8] sm:$0xff]  }
  0x15   : > { %v2382_v34 = vld [vmem:[%s2340_s10 + $0x8] ss:$0 sps:$4 sm:$0x77]   ;;  %v503_v36 = vshrl.u32 %v2189_v33, 16  ;;  %v505_v37 = vshll.u32 %v2189_v33, 16  ;;  %v2179_v39 = vld [vmem:[%s2603_s1 + $0xa0] sm:$0xff]  }
  0x16   : > { %1954 = vmatpush3.bf16.msra.mxu0 %v2157_v3  ;;  %v358_v23 = vor.u32 %v357_v21, %v353_v16  ;;  %v366_v31 = vor.u32 %v364_v28, %v362_v22  ;;  %v510_v38 = vshll.u32 %v2382_v34, 16  ;;  %v2182_v40 = vld [vmem:[%s2603_s1 + $0xe8] sm:$0xff]   ;;  %v2196_v44 = vld [vmem:[%s2340_s10 + $0x18] sm:$0xfe]   ;;  %v2184_v45 = vld [vmem:[%s2603_s1 + $0xe0] sm:$0xff]   ;;  %v514_v60 = vshrl.u32 %v2382_v34, 16 }
  0x17   : > { %1955 = vmatprep.subr.bf16.mxu0 %v2159_v6  ;;  %1974 = vmatpush3.bf16.msra.mxu1 %v2162_v5  ;;  %v507_v41 = vrot.slane %v505_v37, 1  ;;  %v2400_v47 = vld [vmem:[%s2340_s10 + $0x20] ss:$0 sps:$4 sm:$0x77]   ;;  %v2181_v48 = vld [vmem:[%s2603_s1 + $0x98] sm:$0xff]   ;;  %v653_v49 = vrot.slane %v2196_v44, 1 }
  0x18   : > { %1975 = vmatprep.subr.bf16.mxu1 %v2164_v7  ;;  %v363_v27 = vsel %vm351_vm0, %v358_v23, %v362_v22  ;;  %v512_v42 = vrot.slane %v510_v38, 1  ;;  %v654_v50 = vrot.slane %v2400_v47, 1  ;;  %v2186_v51 = vld [vmem:[%s2603_s1 + $0xd8] sm:$0xff]   ;;  %v2183_v53 = vld [vmem:[%s2603_s1 + $0x90] sm:$0xff]   ;;  %v2185_v55 = vld [vmem:[%s2603_s1 + $0x88] sm:$0xff]  }
  0x19   : > { %1985 = vmatprep.mubr.bf16.mxu1 %v363_v27  ;;  %v508_v43 = vor.u32 %v507_v41, %v503_v36  ;;  %v2188_v54 = vld [vmem:[%s2603_s1 + $0xd0] sm:$0xff]   ;;  %v2192_v56 = vld [vmem:[%s2603_s1 + $0xc8] sm:$0xff]   ;;  %v2187_v59 = vld [vmem:[%s2603_s1 + $0x80] sm:$0xff]  }
  0x1a   : > { %1956 = vmatpush3.bf16.msra.mxu0 %v2159_v6  ;;  %v655_v52 = vsel %vm652_vm1, %v653_v49, %v654_v50  ;;  %v2209_v57 = vld [vmem:[%s2340_s10 + $0x24] sm:$0xfe]   ;;  %v2210_v58 = vld [vmem:[%s2340_s10 + $0x2c] ss:$0 sps:$4 sm:$0xff]   ;;  %v2191_v6 = vld [vmem:[%s2603_s1 + $0x138] sm:$0xff]   ;;  %v516_v9 = vor.u32 %v514_v60, %v512_v42 }
  0x1b   : > { %1957 = vmatprep.subr.bf16.mxu0 %v2161_v8  ;;  %1976 = vmatpush3.bf16.msra.mxu1 %v2164_v7  ;;  %v513_v46 = vsel %vm351_vm0, %v508_v43, %v512_v42  ;;  %v2194_v61 = vld [vmem:[%s2603_s1 + $0xc0] sm:$0xff]   ;;  %v793_v62 = vshrl.u32 %v2209_v57, 16  ;;  %v796_v63 = vshll.u32 %v2209_v57, 16  ;;  %v801_v0 = vshrl.u32 %v2210_v58, 16  ;;  %v2200_v19 = vld [vmem:[%s2603_s1 + $0x170] sm:$0xff]   ;;  %v2202_v27 = vld [vmem:[%s2603_s1 + $0x168] sm:$0xff]  }
  0x1c   : > { %1977 = vmatprep.subr.bf16.mxu1 %v2166_v11  ;;  %v804_v1 = vshll.u32 %v2210_v58, 16  ;;  %v2206_v33 = vld [vmem:[%s2603_s1 + $0x158] sm:$0xff]   ;;  %v2229_v34 = vld [vmem:[%s2340_s10] sm:$0xfc]   ;;  %v2205_v36 = vld [vmem:[%s2603_s1 + $0x108] sm:$0xff]  }
  0x1d   : > { %v795_v2 = vrot.slane %v793_v62, 1  ;;  %v798_v3 = vrot.slane %v796_v63, 2  ;;  %v803_v4 = vrot.slane %v801_v0, 1  ;;  %v2208_v37 = vld [vmem:[%s2603_s1 + $0x150] sm:$0xff]   ;;  %v1101_v38 = vshrl.u32 %v2229_v34, 16  ;;  %v2207_v42 = vld [vmem:[%s2603_s1 + $0x100] sm:$0xff]  }
  0x1e   : > { %1958 = vmatpush3.bf16.msra.mxu0 %v2161_v8  ;;  %v806_v5 = vrot.slane %v804_v1, 2  ;;  %v2212_v43 = vld [vmem:[%s2603_s1 + $0x148] sm:$0xff]   ;;  %v2213_v57 = vld [vmem:[%s2603_s1 + $0x1b0] sm:$0xff]   ;;  %v2219_v63 = vld [vmem:[%s2603_s1 + $0x1a0] sm:$0xff]  }
  0x1f   : > { %1959 = vmatprep.subr.bf16.mxu0 %v2163_v10  ;;  %1978 = vmatpush3.bf16.msra.mxu1 %v2166_v11  ;;  %v799_v7 = vor.u32 %v798_v3, %v795_v2  ;;  %v2216_v11 = vld [vmem:[%s2340_s10 + $0x18] sm:$0xfe]   ;;  %v1103_v44 = vrot.slane %v1101_v38, 2  ;;  %v2236_v49 = vld [vmem:[%s2340_s10 + $0xc] sm:$0xf8]   ;;  %v2224_v0 = vld [vmem:[%s2603_s1 + $0x1e0] sm:$0xff]  }
  0x20   : > { %1979 = vmatprep.subr.bf16.mxu1 %v2168_v13  ;;  %v2436_v8 = vor.u32 %v806_v5, %v803_v4  ;;  %v945_v15 = vshrl.u32 %v2216_v11, 16  ;;  %v948_v16 = vshll.u32 %v2216_v11, 16  ;;  %v2222_v62 = vld [vmem:[%s2603_s1 + $0x1e8] sm:$0xff]   ;;  %v2221_v1 = vld [vmem:[%s2603_s1 + $0x198] sm:$0xff]   ;;  %v2223_v3 = vld [vmem:[%s2603_s1 + $0x190] sm:$0xff]  }
  0x21   : > { %v2226_v2 = vld [vmem:[%s2603_s1 + $0x1d8] sm:$0xff]   ;;  %v2228_v4 = vld [vmem:[%s2603_s1 + $0x1d0] sm:$0xff]   ;;  %v2225_v5 = vld [vmem:[%s2603_s1 + $0x188] sm:$0xff]  }
  0x22   : > { %1960 = vmatpush3.bf16.msra.mxu0 %v2163_v10  ;;  %v2198_v10 = vld [vmem:[%s2603_s1 + $0x178] sm:$0xff]   ;;  %v808_v14 = vsel %vm791_vm2, %v799_v7, %v2436_v8  ;;  %v950_v21 = vrot.slane %v948_v16, 2  ;;  %v2227_v7 = vld [vmem:[%s2603_s1 + $0x180] sm:$0xff]   ;;  %v2235_v16 = vld [vmem:[%s2603_s1 + $0x228] sm:$0xff]  }
  0x23   : > { %1961 = vmatprep.subr.bf16.mxu0 %v2165_v12  ;;  %1980 = vmatpush3.bf16.msra.mxu1 %v2168_v13  ;;  %v2193_v13 = vld [vmem:[%s2603_s1 + $0x130] sm:$0xff]   ;;  %v2231_v11 = vld [vmem:[%s2603_s1 + $0x238] sm:$0xff]  }
  0x24   : > { %1981 = vmatprep.subr.bf16.mxu1 %v2171_v18 }
  0x26   : > { %1962 = vmatpush3.bf16.msra.mxu0 %v2165_v12  ;;  %v2217_v12 = vld [vmem:[%s2340_s10 + $0x20] ss:$0 sps:$4 sm:$0xff]  }
  0x27   : > { %1963 = vmatprep.subr.bf16.mxu0 %v2167_v20  ;;  %1982 = vmatpush3.bf16.msra.mxu1 %v2171_v18  ;;  %v953_v17 = vshrl.u32 %v2217_v12, 16  ;;  %v956_v18 = vshll.u32 %v2217_v12, 16 }
  0x28   : > { %1983 = vmatprep.subr.bf16.mxu1 %v2173_v24 }
  0x29   : > { %v955_v22 = vrot.slane %v953_v17, 1  ;;  %v958_v23 = vrot.slane %v956_v18, 2  ;;  %v2238_v17 = vld [vmem:[%s2603_s1 + $0x220] sm:$0xff]   ;;  %v2239_v18 = vld [vmem:[%s2603_s1 + $0x218] sm:$0xff]  }
  0x2a   : > { %1964 = vmatpush3.bf16.msra.mxu0 %v2167_v20  ;;  %v947_v20 = vrot.slane %v945_v15, 1 }
  0x2b   : > { %1989 = vmatprep.subr.bf16.mxu0 %v2172_v26  ;;  %1984 = vmatpush3.bf16.msra.mxu1 %v2173_v24  ;;  %v2195_v24 = vld [vmem:[%s2603_s1 + $0x128] sm:$0xff]  }
  0x2c   : > { %2009 = vmatprep.subr.bf16.mxu1 %v2178_v29 }
  0x2d   : > { %1966 = vmatmul.mubr.bf16.vlgmr.msra.gmra.mxu0 %v2170_v25  ;;  %v951_v25 = vor.u32 %v950_v21, %v947_v20  ;;  %v2241_v20 = vld [vmem:[%s2603_s1 + $0x208] sm:$0xff]   ;;  %v2242_v21 = vld [vmem:[%s2603_s1 + $0x200] sm:$0xff]  }
  0x2e   : > { %1990 = vmatpush3.bf16.msra.mxu0 %v2172_v26  ;;  %1986 = vmatmul.mubr.bf16.vlgmr.msra.gmra.mxu1 %v366_v31  ;;  %v2456_v26 = vor.u32 %v958_v23, %v955_v22  ;;  %v2201_v31 = vld [vmem:[%s2603_s1 + $0x118] sm:$0xff]  }
  0x2f   : > { %1991 = vmatprep.subr.bf16.mxu0 %v2174_v30  ;;  %2010 = vmatpush3.bf16.msra.mxu1 %v2178_v29  ;;  %v2199_v29 = vld [vmem:[%s2603_s1 + $0x120] sm:$0xff]  }
  0x30   : > { %2011 = vmatprep.subr.bf16.mxu1 %v2180_v32  ;;  %2005 = vmatprep.mubr.bf16.mxu0 %v513_v46  ;;  %v960_v28 = vsel %vm791_vm2, %v951_v25, %v2456_v26  ;;  %v2214_v46 = vld [vmem:[%s2603_s1 + $0x140] sm:$0xff]  }
  0x31   : > { %2025 = vmatprep.mubr.bf16.mxu1 %v655_v52 }
  0x32   : > { %1992 = vmatpush3.bf16.msra.mxu0 %v2174_v30  ;;  %v2204_v30 = vld [vmem:[%s2603_s1 + $0x160] sm:$0xff]  }
  0x33   : > { %1993 = vmatprep.subr.bf16.mxu0 %v2177_v35  ;;  %2012 = vmatpush3.bf16.msra.mxu1 %v2180_v32  ;;  %v2203_v32 = vld [vmem:[%s2603_s1 + $0x110] sm:$0xff]  }
  0x34   : > { %2013 = vmatprep.subr.bf16.mxu1 %v2182_v40 }
  0x36   : > { %1994 = vmatpush3.bf16.msra.mxu0 %v2177_v35  ;;  %v2230_v35 = vld [vmem:[%s2340_s10 + $0x8] sm:$0x1f]  }
  0x37   : > { %1995 = vmatprep.subr.bf16.mxu0 %v2179_v39  ;;  %2014 = vmatpush3.bf16.msra.mxu1 %v2182_v40  ;;  %v1109_v40 = vshrl.u32 %v2230_v35, 16  ;;  %v1112_v41 = vshll.u32 %v2230_v35, 16 }
  0x38   : > { %2015 = vmatprep.subr.bf16.mxu1 %v2184_v45 }
  0x39   : > { %v1111_v47 = vrot.slane %v1109_v40, 2 }
  0x3a   : > { %1996 = vmatpush3.bf16.msra.mxu0 %v2179_v39  ;;  %v1104_v39 = vshll.u32 %v2229_v34, 16 }
  0x3b   : > { %1997 = vmatprep.subr.bf16.mxu0 %v2181_v48  ;;  %2016 = vmatpush3.bf16.msra.mxu1 %v2184_v45 }
  0x3c   : > { %2017 = vmatprep.subr.bf16.mxu1 %v2186_v51  ;;  %v1106_v45 = vrot.slane %v1104_v39, 3 }
  0x3e   : > { %1998 = vmatpush3.bf16.msra.mxu0 %v2181_v48  ;;  %v1114_v48 = vrot.slane %v1112_v41, 3  ;;  %v1107_v52 = vor.u32 %v1106_v45, %v1103_v44 }
  0x3f   : > { %1999 = vmatprep.subr.bf16.mxu0 %v2183_v53  ;;  %2018 = vmatpush3.bf16.msra.mxu1 %v2186_v51  ;;  %v2211_v51 = vld [vmem:[%s2603_s1 + $0x1b8] sm:$0xff]  }
  0x40   : > { %2019 = vmatprep.subr.bf16.mxu1 %v2188_v54 }
  0x42   : > { %2000 = vmatpush3.bf16.msra.mxu0 %v2183_v53  ;;  %v2502_v53 = vor.u32 %v1114_v48, %v1111_v47 }
  0x43   : > { %2001 = vmatprep.subr.bf16.mxu0 %v2185_v55  ;;  %2020 = vmatpush3.bf16.msra.mxu1 %v2188_v54  ;;  %v2218_v54 = vld [vmem:[%s2603_s1 + $0x1f8] sm:$0xff]  }
  0x44   : > { %2021 = vmatprep.subr.bf16.mxu1 %v2192_v56  ;;  %v1116_v58 = vsel %vm1099_vm3, %v1107_v52, %v2502_v53 }
  0x46   : > { %2002 = vmatpush3.bf16.msra.mxu0 %v2185_v55  ;;  %v1256_v55 = vrot.slane %v2236_v49, 3 }
  0x47   : > { %2003 = vmatprep.subr.bf16.mxu0 %v2187_v59  ;;  %2022 = vmatpush3.bf16.msra.mxu1 %v2192_v56 }
  0x48   : > { %2023 = vmatprep.subr.bf16.mxu1 %v2194_v61 }
  0x4a   : > { %2004 = vmatpush3.bf16.msra.mxu0 %v2187_v59  ;;  %v2220_v59 = vld [vmem:[%s2603_s1 + $0x1f0] sm:$0xff]  }
  0x4b   : > { %2029 = vmatprep.subr.bf16.mxu0 %v2191_v6  ;;  %2024 = vmatpush3.bf16.msra.mxu1 %v2194_v61  ;;  %v2215_v61 = vld [vmem:[%s2603_s1 + $0x1a8] sm:$0xff]  }
  0x4c   : > { %2049 = vmatprep.subr.bf16.mxu1 %v2198_v10 }
  0x4d   : > { %2006 = vmatmul.mubr.bf16.vlgmr.msra.gmra.mxu0 %v516_v9  ;;  %v2244_v9 = vld [vmem:[%s2340_s10 + $0x8] sm:$0x1f]  }
  0x4e   : > { %2030 = vmatpush3.bf16.msra.mxu0 %v2191_v6  ;;  %2045 = vmatprep.mubr.bf16.mxu0 %v808_v14  ;;  %v2232_v6 = vld [vmem:[%s2603_s1 + $0x1c8] sm:$0xff]   ;;  %v2233_v14 = vld [vmem:[%s2603_s1 + $0x230] sm:$0xff]  }
  0x4f   : > { %2031 = vmatprep.subr.bf16.mxu0 %v2193_v13  ;;  %2026 = vmatmul.mubr.bf16.vlgmr.msra.gmra.mxu1 %v654_v50  ;;  %v2497_v50 = vld [vmem:[%s2340_s10 + $0x14] sm:$0x1f]  }
  0x50   : > { %2050 = vmatpush3.bf16.msra.mxu1 %v2198_v10  ;;  %2065 = vmatprep.mubr.bf16.mxu1 %v960_v28  ;;  %v1257_v56 = vrot.slane %v2497_v50, 3  ;;  %v2234_v10 = vld [vmem:[%s2603_s1 + $0x1c0] sm:$0xff]  }
  0x51   : > { %2051 = vmatprep.subr.bf16.mxu1 %v2200_v19 }
  0x52   : > { %2032 = vmatpush3.bf16.msra.mxu0 %v2193_v13  ;;  %v1258_v60 = vsel %vm1255_vm4, %v1256_v55, %v1257_v56  ;;  %v1398_v13 = vrot.slane %v2244_v9, 3 }
  0x53   : > { %2033 = vmatprep.subr.bf16.mxu0 %v2195_v24 }
  0x54   : > { %2052 = vmatpush3.bf16.msra.mxu1 %v2200_v19  ;;  %v2240_v19 = vld [vmem:[%s2603_s1 + $0x210] sm:$0xff]  }
  0x55   : > { %2053 = vmatprep.subr.bf16.mxu1 %v2202_v27 }
  0x56   : > { %2034 = vmatpush3.bf16.msra.mxu0 %v2195_v24 }
  0x57   : > { %2035 = vmatprep.subr.bf16.mxu0 %v2199_v29 }
  0x58   : > { %2054 = vmatpush3.bf16.msra.mxu1 %v2202_v27 }
  0x59   : > { %2055 = vmatprep.subr.bf16.mxu1 %v2204_v30 }
  0x5a   : > { %2036 = vmatpush3.bf16.msra.mxu0 %v2199_v29 }
  0x5b   : > { %2037 = vmatprep.subr.bf16.mxu0 %v2201_v31 }
  0x5c   : > { %2056 = vmatpush3.bf16.msra.mxu1 %v2204_v30 }
  0x5d   : > { %2057 = vmatprep.subr.bf16.mxu1 %v2206_v33 }
  0x5e   : > { %2038 = vmatpush3.bf16.msra.mxu0 %v2201_v31 }
  0x5f   : > { %2039 = vmatprep.subr.bf16.mxu0 %v2203_v32 }
  0x60   : > { %2058 = vmatpush3.bf16.msra.mxu1 %v2206_v33 }
  0x61   : > { %2059 = vmatprep.subr.bf16.mxu1 %v2208_v37 }
  0x62   : > { %2040 = vmatpush3.bf16.msra.mxu0 %v2203_v32 }
  0x63   : > { %2041 = vmatprep.subr.bf16.mxu0 %v2205_v36 }
  0x64   : > { %2060 = vmatpush3.bf16.msra.mxu1 %v2208_v37 }
  0x65   : > { %2061 = vmatprep.subr.bf16.mxu1 %v2212_v43 }
  0x66   : > { %2042 = vmatpush3.bf16.msra.mxu0 %v2205_v36 }
  0x67   : > { %2043 = vmatprep.subr.bf16.mxu0 %v2207_v42 }
  0x68   : > { %2062 = vmatpush3.bf16.msra.mxu1 %v2212_v43 }
  0x69   : > { %2063 = vmatprep.subr.bf16.mxu1 %v2214_v46 }
  0x6a   : > { %2044 = vmatpush3.bf16.msra.mxu0 %v2207_v42 }
  0x6b   : > { %2069 = vmatprep.subr.bf16.mxu0 %v2211_v51 }
  0x6c   : > { %2064 = vmatpush3.bf16.msra.mxu1 %v2214_v46 }
  0x6d   : > { %2046 = vmatmul.mubr.bf16.vlgmr.msra.gmra.mxu0 %v2436_v8  ;;  %2089 = vmatprep.subr.bf16.mxu1 %v2218_v54  ;;  %v2243_v8 = vld [vmem:[%s2340_s10] sm:$0xf8]  }
  0x6e   : > { %2070 = vmatpush3.bf16.msra.mxu0 %v2211_v51  ;;  %2085 = vmatprep.mubr.bf16.mxu0 %v1116_v58  ;;  %v1397_v12 = vrot.slane %v2243_v8, 3 }
  0x6f   : > { %2071 = vmatprep.subr.bf16.mxu0 %v2213_v57  ;;  %2066 = vmatmul.mubr.bf16.vlgmr.msra.gmra.mxu1 %v2456_v26 }
  0x70   : > { %2090 = vmatpush3.bf16.msra.mxu1 %v2218_v54  ;;  %2105 = vmatprep.mubr.bf16.mxu1 %v1258_v60  ;;  %v1399_v15 = vsel %vm1255_vm4, %v1397_v12, %v1398_v13 }
  0x71   : > { %2091 = vmatprep.subr.bf16.mxu1 %v2220_v59 }
  0x72   : > { %2072 = vmatpush3.bf16.msra.mxu0 %v2213_v57 }
  0x73   : > { %2073 = vmatprep.subr.bf16.mxu0 %v2215_v61 }
  0x74   : > { %2092 = vmatpush3.bf16.msra.mxu1 %v2220_v59 }
  0x75   : > { %2093 = vmatprep.subr.bf16.mxu1 %v2222_v62 }
  0x76   : > { %2074 = vmatpush3.bf16.msra.mxu0 %v2215_v61 }
  0x77   : > { %2075 = vmatprep.subr.bf16.mxu0 %v2219_v63 }
  0x78   : > { %2094 = vmatpush3.bf16.msra.mxu1 %v2222_v62 }
  0x79   : > { %2095 = vmatprep.subr.bf16.mxu1 %v2224_v0 }
  0x7a   : > { %2076 = vmatpush3.bf16.msra.mxu0 %v2219_v63 }
  0x7b   : > { %2077 = vmatprep.subr.bf16.mxu0 %v2221_v1 }
  0x7c   : > { %2096 = vmatpush3.bf16.msra.mxu1 %v2224_v0 }
  0x7d   : > { %2097 = vmatprep.subr.bf16.mxu1 %v2226_v2 }
  0x7e   : > { %2078 = vmatpush3.bf16.msra.mxu0 %v2221_v1 }
  0x7f   : > { %2079 = vmatprep.subr.bf16.mxu0 %v2223_v3 }
  0x80   : > { %2098 = vmatpush3.bf16.msra.mxu1 %v2226_v2 }
  0x81   : > { %2099 = vmatprep.subr.bf16.mxu1 %v2228_v4 }
  0x82   : > { %2080 = vmatpush3.bf16.msra.mxu0 %v2223_v3 }
  0x83   : > { %2081 = vmatprep.subr.bf16.mxu0 %v2225_v5 }
  0x84   : > { %2100 = vmatpush3.bf16.msra.mxu1 %v2228_v4 }
  0x85   : > { %2101 = vmatprep.subr.bf16.mxu1 %v2232_v6 }
  0x86   : > { %2082 = vmatpush3.bf16.msra.mxu0 %v2225_v5 }
  0x87   : > { %2083 = vmatprep.subr.bf16.mxu0 %v2227_v7 }
  0x88   : > { %2102 = vmatpush3.bf16.msra.mxu1 %v2232_v6 }
  0x89   : > { %2103 = vmatprep.subr.bf16.mxu1 %v2234_v10 }
  0x8a   : > { %2084 = vmatpush3.bf16.msra.mxu0 %v2227_v7 }
  0x8b   : > { %2109 = vmatprep.subr.bf16.mxu0 %v2231_v11 }
  0x8c   : > { %2104 = vmatpush3.bf16.msra.mxu1 %v2234_v10 }
  0x8d   : > { %2086 = vmatmul.mubr.bf16.vlgmr.msra.gmra.mxu0 %v2502_v53 }
  0x8e   : > { %2110 = vmatpush3.bf16.msra.mxu0 %v2231_v11  ;;  %2125 = vmatprep.mubr.bf16.mxu0 %v1399_v15 }
  0x8f   : > { %2111 = vmatprep.subr.bf16.mxu0 %v2233_v14  ;;  %2106 = vmatmul.mubr.bf16.vlgmr.msra.gmra.mxu1 %v1257_v56 }
  0x92   : > { %2112 = vmatpush3.bf16.msra.mxu0 %v2233_v14 }
  0x93   : > { %2113 = vmatprep.subr.bf16.mxu0 %v2235_v16 }
  0x96   : > { %2114 = vmatpush3.bf16.msra.mxu0 %v2235_v16 }
  0x97   : > { %2115 = vmatprep.subr.bf16.mxu0 %v2238_v17 }
  0x9a   : > { %2116 = vmatpush3.bf16.msra.mxu0 %v2238_v17 }
  0x9b   : > { %2117 = vmatprep.subr.bf16.mxu0 %v2239_v18 }
  0x9e   : > { %2118 = vmatpush3.bf16.msra.mxu0 %v2239_v18 }
  0x9f   : > { %2119 = vmatprep.subr.bf16.mxu0 %v2240_v19 }
  0xa2   : > { %2120 = vmatpush3.bf16.msra.mxu0 %v2240_v19 }
  0xa3   : > { %2121 = vmatprep.subr.bf16.mxu0 %v2241_v20 }
  0xa6   : > { %2122 = vmatpush3.bf16.msra.mxu0 %v2241_v20 }
  0xa7   : > { %2123 = vmatprep.subr.bf16.mxu0 %v2242_v21 }
  0xaa   : > { %2124 = vmatpush3.bf16.msra.mxu0 %v2242_v21 }
  0xad   : > { %2126 = vmatmul.mubr.bf16.vlgmr.msra.gmra.mxu0 %v1398_v13 }
  0xed   : > { %v1967_v22 = vpop.f32.mrf.mxu0 }
  0xee   : > { %322 = vst [vmem:[#allocation2 + $0x8] sm:$0xf] %v1967_v22  ;;  %v1987_v24 = vpop.f32.mrf.mxu1  ;;  %v1845_v22 = vld [vmem:[%s2604_s2] ss:$0 sm:$0xff] }
  0xef   : > { %v306_v23 = vpop.f32.mrf.mxu0 }
  0xf0   : > { %v451_v26 = vpop.f32.mrf.mxu1 }
  0xf1   : > { %v1968_v25 = vpop.f32.mrf.mxu0  ;;  %v468_v27 = vadd.f32 %v451_v26, %v306_v23 }
  0xf2   : > { %v1988_v29 = vpop.f32.mrf.mxu1 }
  0xf3   : > { %v309_v28 = vpop.f32.mrf.mxu0 }
  0xf4   : > { %v454_v32 = vpop.f32.mrf.mxu1 }
  0xf5   : > { %v467_v30 = vld [vmem:[#allocation2 + $0x8] sm:$0xf]  ;;  %v469_v33 = vadd.f32 %v454_v32, %v309_v28 }
  0xf6   : > { %v470_v31 = vadd.f32 %v1987_v24, %v467_v30 }
  0xf8   : > { %473 = vst [vmem:[#allocation2 + $0x8] sm:$0xf] %v470_v31 }
  0xff   : > { %v617_v35 = vld [vmem:[#allocation2 + $0x8] sm:$0xf] }
 0x10d   : > { %v2007_v34 = vpop.f32.mrf.mxu0 }
 0x10e   : > { %v620_v36 = vadd.f32 %v2007_v34, %v617_v35 }
 0x10f   : > { %v601_v37 = vpop.f32.mrf.mxu0  ;;  %v2027_v39 = vpop.f32.mrf.mxu1 }
 0x110   : > { %623 = vst [vmem:[#allocation2 + $0x8] sm:$0xf] %v620_v36  ;;  %v618_v38 = vadd.f32 %v601_v37, %v468_v27 }
 0x111   : > { %v2008_v40 = vpop.f32.mrf.mxu0  ;;  %v740_v41 = vpop.f32.mrf.mxu1 }
 0x112   : > { %v757_v42 = vadd.f32 %v740_v41, %v618_v38 }
 0x113   : > { %v2028_v43 = vpop.f32.mrf.mxu1  ;;  %v604_v46 = vpop.f32.mrf.mxu0 }
 0x114   : > { %v619_v6 = vadd.f32 %v604_v46, %v469_v33 }
 0x115   : > { %v743_v49 = vpop.f32.mrf.mxu1 }
 0x116   : > { %v758_v8 = vadd.f32 %v743_v49, %v619_v6 }
 0x117   : > { %v756_v44 = vld [vmem:[#allocation2 + $0x8] sm:$0xf] }
 0x118   : > { %v759_v45 = vadd.f32 %v2027_v39, %v756_v44 }
 0x11a   : > { %762 = vst [vmem:[#allocation2 + $0x8] sm:$0xf] %v759_v45 }
 0x121   : > { %v909_v48 = vld [vmem:[#allocation2 + $0x8] sm:$0xf] }
 0x12d   : > { %v2047_v47 = vpop.f32.mrf.mxu0 }
 0x12e   : > { %v912_v50 = vadd.f32 %v2047_v47, %v909_v48 }
 0x12f   : > { %v893_v51 = vpop.f32.mrf.mxu0  ;;  %v2067_v52 = vpop.f32.mrf.mxu1 }
 0x130   : > { %915 = vst [vmem:[#allocation2 + $0x8] sm:$0xf] %v912_v50  ;;  %v910_v7 = vadd.f32 %v893_v51, %v757_v42 }
 0x131   : > { %v2048_v53 = vpop.f32.mrf.mxu0  ;;  %v1045_v54 = vpop.f32.mrf.mxu1 }
 0x132   : > { %v1062_v10 = vadd.f32 %v1045_v54, %v910_v7 }
 0x133   : > { %v2068_v55 = vpop.f32.mrf.mxu1  ;;  %v896_v58 = vpop.f32.mrf.mxu0 }
 0x134   : > { %v911_v9 = vadd.f32 %v896_v58, %v758_v8 }
 0x135   : > { %v1048_v61 = vpop.f32.mrf.mxu1 }
 0x136   : > { %v1063_v13 = vadd.f32 %v1048_v61, %v911_v9 }
 0x137   : > { %v1061_v56 = vld [vmem:[#allocation2 + $0x8] sm:$0xf] }
 0x138   : > { %v1064_v57 = vadd.f32 %v2067_v52, %v1061_v56 }
 0x13a   : > { %1067 = vst [vmem:[#allocation2 + $0x8] sm:$0xf] %v1064_v57 }
 0x141   : > { %v1217_v60 = vld [vmem:[#allocation2 + $0x8] sm:$0xf] }
 0x14d   : > { %v2087_v59 = vpop.f32.mrf.mxu0 }
 0x14e   : > { %v1220_v62 = vadd.f32 %v2087_v59, %v1217_v60 }
 0x14f   : > { %v1201_v63 = vpop.f32.mrf.mxu0  ;;  %v2107_v0 = vpop.f32.mrf.mxu1 }
 0x150   : > { %1223 = vst [vmem:[#allocation2 + $0x8] sm:$0xf] %v1220_v62  ;;  %v1218_v11 = vadd.f32 %v1201_v63, %v1062_v10 }
 0x151   : > { %v2088_v1 = vpop.f32.mrf.mxu0  ;;  %v1343_v2 = vpop.f32.mrf.mxu1 }
 0x152   : > { %v1360_v17 = vadd.f32 %v1343_v2, %v1218_v11 }
 0x153   : > { %v2108_v3 = vpop.f32.mrf.mxu1  ;;  %v1204_v12 = vpop.f32.mrf.mxu0 }
 0x154   : > { %v1219_v16 = vadd.f32 %v1204_v12, %v1063_v13 }
 0x155   : > { %v1346_v19 = vpop.f32.mrf.mxu1 }
 0x156   : > { %v1361_v24 = vadd.f32 %v1346_v19, %v1219_v16 }
 0x157   : > { %v1359_v4 = vld [vmem:[#allocation2 + $0x8] sm:$0xf] }
 0x158   : > { %v1362_v5 = vadd.f32 %v2107_v0, %v1359_v4 }
 0x15a   : > { %1365 = vst [vmem:[#allocation2 + $0x8] sm:$0xf] %v1362_v5 }
 0x161   : > { %v1500_v15 = vld [vmem:[#allocation2 + $0x8] sm:$0xf] }
 0x16d   : > { %v2127_v14 = vpop.f32.mrf.mxu0 }
 0x16e   : > { %v1503_v18 = vadd.f32 %v2127_v14, %v1500_v15 }
 0x16f   : > { %v1484_v20 = vpop.f32.mrf.mxu0 }
 0x170   : > { %1506 = vst [vmem:[#allocation2 + $0x8] sm:$0xf] %v1503_v18  ;;  %v1501_v21 = vadd.f32 %v1484_v20, %v1360_v17 }
 0x171   : > { %v2128_v23 = vpop.f32.mrf.mxu0 }
 0x172   : > { %v1517_v26 = vadd.f32 %v1845_v22, %v1501_v21 }
 0x173   : > { %v1487_v25 = vpop.f32.mrf.mxu0 }
 0x174   : > { %v1502_v27 = vadd.f32 %v1487_v25, %v1361_v24  ;;  %v1520_v31 = vmax.f32 %v1517_v26, 0.0 }
 0x176   : > { %v1518_v28 = vadd.f32 %v1845_v22, %v1502_v27 }
 0x177   : > { %v1509_v29 = vld [vmem:[#allocation2 + $0x8] sm:$0xf] }
 0x178   : > { %v1519_v30 = vadd.f32 %v1845_v22, %v1509_v29  ;;  %v1521_v32 = vmax.f32 %v1518_v28, 0.0 }
 0x17a   : > { %v1522_v33 = vmax.f32 %v1519_v30, 0.0  ;;  %v1857_v34 = vpack.c.bf16 %v1521_v32, %v1520_v31 }
 0x17c   : > { %v1853_v35 = vpack.c.bf16 %v1522_v33, %v1522_v33  ;;  %1858 = vst [vmem:[%s192_s8] sm:$0xff] %v1857_v34  }
 0x17e   : > { %1538 = vst [vmem:[%s192_s8 + $0x8] sm:$0x3] %v1853_v35 }
 0x17f PF: > { %s13_s14 = sadd.s32 1, %s2267_s14   ;;  %s2606_s12 = smov %s2263_s13 }
 0x180   : > { %p10_p5 = scmp.ge.s32.totalorder %s13_s14, 4   ;;  %s2607_s13 = smov %s2609_s15 }
 0x182   :  { %12 = sbr.rel (!%p10_p5) target bundleno = 2 (0x2), region = 70 }

// kernel: fwd.11
= control target key start
LH: loop header
LB: loop body
LE: loop exit
PB: predicated region body
PF: predicated region fallthrough
CT: control target
= control target key end

     0   :  { %s1971_s12 = smov 0   ;;  %s1973_s13 = smov 0   ;;  %s2332_s0 = inlined_call_operand.vmem [shape: bf16[2,36,128], index: 0, kind: input, shape index: {}]   ;;  %s2333_s1 = inlined_call_operand.vmem [shape: bf16[9,128,128], index: 1, kind: input, shape index: {}]   ;;  %s2334_s2 = inlined_call_operand.vmem [shape: f32[1,128], index: 2, kind: input, shape index: {}]   ;;  %s2335_s3 = inlined_call_operand.vmem [shape: bf16[2,6,128], index: 3, kind: output, shape index: {}]  }
   0x1   :  { %s1975_s14 = smov 0  }
   0x2 LB: > { %s25_s15 = sadd.s32 1, %s1943_s13  ;;  %p1343_p0 = scmp.ge.s32.totalorder %s1947_s14, 1  ;;  %s1947_s14 = sphi %s1975_s14, %s13_s14   ;;  %s1943_s13 = sphi %s1973_s13, %s2337_s13   ;;  %s1939_s12 = sphi %s1971_s12, %s2336_s12  }
   0x3   : > { %p27_p1 = scmp.ge.s32.totalorder %s25_s15, 2  ;;  %p151_p2 = scmp.lt.s32.totalorder %s1947_s14, 3 }
   0x5   : > { %s2339_s15 = smov (%p27_p1, %s25_s15), 0  ;;  %p152_p3 = pnand %p1343_p0, %p151_p2 }
   0x6   : > { %p177_p4 = scmp.lt.s32.totalorder (!%p152_p3), %s1939_s12, 1 }
   0x7   : > { %155 = sbr.rel (%p152_p3) target bundleno = 383 (0x17f), region = 32 }
   0xc   : > { %v1845_v0 = vld [vmem:[%s2333_s1 + $0x38] sm:$0xff]   ;;  %v1949_v1 = vmov 0.0   ;;  %v1846_v2 = vld [vmem:[%s2333_s1 + $0x30] sm:$0xff]   ;;  %vm1950_vm0 = vmmov 0   ;;  %v1847_v5 = vld [vmem:[%s2333_s1 + $0x28] sm:$0xff]   ;;  %s2341_s12 = smov (!%p177_p4, %s1939_s12), 1 }
   0xd   : > { %1638 = vmatprep.subr.bf16.mxu0 %v1949_v1  ;;  %1658 = vmatprep.subr.bf16.mxu1 %v1949_v1  ;;  %v1848_v3 = vld [vmem:[%s2333_s1 + $0x78] sm:$0xff]   ;;  %v1850_v4 = vld [vmem:[%s2333_s1 + $0x70] sm:$0xff]   ;;  %v1852_v6 = vld [vmem:[%s2333_s1 + $0x68] sm:$0xff]   ;;  %s1818_s5 = smul.u32 20, %s2341_s12 }
   0xe   : > { %1639 = vmatpush3.bf16.msra.mxu0 %v1845_v0  ;;  %1654 = vmatprep.mubr.msk.bf16.mxu0 %vm1950_vm0, %v1949_v1  ;;  %v1849_v7 = vld [vmem:[%s2333_s1 + $0x20] sm:$0xff]   ;;  %v1851_v9 = vld [vmem:[%s2333_s1 + $0x18] sm:$0xff]   ;;  %v1853_v11 = vld [vmem:[%s2333_s1 + $0x10] sm:$0xff]  }
   0xf   : > { %1640 = vmatprep.subr.bf16.mxu0 %v1949_v1  ;;  %1674 = vmatprep.mubr.msk.bf16.mxu1 %vm1950_vm0, %v1949_v1  ;;  %v1854_v8 = vld [vmem:[%s2333_s1 + $0x60] sm:$0xff]   ;;  %v1856_v10 = vld [vmem:[%s2333_s1 + $0x58] sm:$0xff]   ;;  %s2042_s16 = scalar_lea.vmem %s2332_s0, %s1818_s5  ;;  %v1858_v13 = vld [vmem:[%s2333_s1 + $0x50] sm:$0xff]   ;;  %s1345_s5 = sshll.u32 %s2341_s12, 2 }
  0x10   : > { %1659 = vmatpush3.bf16.msra.mxu1 %v1848_v3  ;;  %v1863_v12 = vld [vmem:[%s2042_s16 + $0x4] ss:$0 sps:$4 sm:$0xff]   ;;  %v1855_v14 = vld [vmem:[%s2333_s1 + $0x8] sm:$0xff]   ;;  %v190_v18 = vld [vmem:[%s2042_s16] sm:$0x7]  ;;  %s188_s8 = scalar_lea.vmem %s2335_s3, %s1345_s5 }
  0x11   : > { %1660 = vmatprep.subr.bf16.mxu1 %v1949_v1  ;;  %v320_v15 = vshll.u32 %v1863_v12, 16  ;;  %v1860_v16 = vld [vmem:[%s2333_s1 + $0x48] sm:$0xff]   ;;  %v1857_v17 = vld [vmem:[%s2333_s1] sm:$0xff]   ;;  %v318_v19 = vshrl.u32 %v1863_v12, 16  ;;  %v1859_v22 = vld [vmem:[%s2333_s1 + $0xb8] sm:$0xff]  }
  0x12   : > { %1641 = vmatpush3.bf16.msra.mxu0 %v1846_v2  ;;  %v1862_v21 = vld [vmem:[%s2333_s1 + $0x40] sm:$0xff]   ;;  %v1865_v24 = vld [vmem:[%s2333_s1 + $0xf8] sm:$0xff]   ;;  %v1861_v25 = vld [vmem:[%s2333_s1 + $0xb0] sm:$0xff]  }
  0x13   : > { %1642 = vmatprep.subr.bf16.mxu0 %v1949_v1  ;;  %v322_v20 = vrot.slane %v320_v15, 1  ;;  %v1867_v26 = vld [vmem:[%s2333_s1 + $0xf0] sm:$0xff]   ;;  %v1864_v27 = vld [vmem:[%s2333_s1 + $0xa8] sm:$0xff]   ;;  %v1866_v29 = vld [vmem:[%s2333_s1 + $0xa0] sm:$0xff]  }
  0x14   : > { %1661 = vmatpush3.bf16.msra.mxu1 %v1850_v4  ;;  %v1869_v28 = vld [vmem:[%s2333_s1 + $0xe8] sm:$0xff]   ;;  %v1871_v30 = vld [vmem:[%s2333_s1 + $0xe0] sm:$0xff]   ;;  %v1868_v31 = vld [vmem:[%s2333_s1 + $0x98] sm:$0xff]  }
  0x15   : > { %1662 = vmatprep.subr.bf16.mxu1 %v1949_v1  ;;  %v323_v23 = vor.u32 %v322_v20, %v318_v19  ;;  %v1873_v32 = vld [vmem:[%s2333_s1 + $0xd8] sm:$0xff]   ;;  %v1876_v33 = vld [vmem:[%s2042_s16] ss:$0 sps:$4 sm:$0xff]   ;;  %v1870_v34 = vld [vmem:[%s2333_s1 + $0x90] sm:$0xff]  }
  0x16   : > { %1643 = vmatpush3.bf16.msra.mxu0 %v1847_v5  ;;  %v1872_v35 = vld [vmem:[%s2333_s1 + $0x88] sm:$0xff]   ;;  %v1875_v36 = vld [vmem:[%s2333_s1 + $0xd0] sm:$0xff]   ;;  %v440_v37 = vshll.u32 %v1876_v33, 16  ;;  %v438_v38 = vshrl.u32 %v1876_v33, 16  ;;  %v1874_v41 = vld [vmem:[%s2333_s1 + $0x80] sm:$0xff]  }
  0x17   : > { %1644 = vmatprep.subr.bf16.mxu0 %v1949_v1  ;;  %v1878_v40 = vld [vmem:[%s2333_s1 + $0xc8] sm:$0xff]   ;;  %v1880_v42 = vld [vmem:[%s2333_s1 + $0xc0] sm:$0xff]   ;;  %v1877_v45 = vld [vmem:[%s2333_s1 + $0x138] sm:$0xff]  }
  0x18   : > { %1663 = vmatpush3.bf16.msra.mxu1 %v1852_v6  ;;  %v442_v39 = vrot.slane %v440_v37, 1  ;;  %v1882_v43 = vld [vmem:[%s2042_s16 + $0x8] ss:$0 sps:$4 sm:$0xee]   ;;  %v1883_v47 = vld [vmem:[%s2333_s1 + $0x178] sm:$0xff]   ;;  %v1879_v48 = vld [vmem:[%s2333_s1 + $0x130] sm:$0xff]  }
  0x19   : > { %1664 = vmatprep.subr.bf16.mxu1 %v1949_v1  ;;  %v557_v46 = vrot.slane %v1882_v43, 1  ;;  %v1885_v49 = vld [vmem:[%s2333_s1 + $0x170] sm:$0xff]   ;;  %v1881_v50 = vld [vmem:[%s2333_s1 + $0x128] sm:$0xff]   ;;  %v1884_v52 = vld [vmem:[%s2333_s1 + $0x120] sm:$0xff]  }
  0x1a   : > { %1645 = vmatpush3.bf16.msra.mxu0 %v1849_v7  ;;  %v443_v44 = vor.u32 %v442_v39, %v438_v38  ;;  %v1887_v51 = vld [vmem:[%s2333_s1 + $0x168] sm:$0xff]   ;;  %v1889_v53 = vld [vmem:[%s2333_s1 + $0x160] sm:$0xff]   ;;  %v1886_v54 = vld [vmem:[%s2333_s1 + $0x118] sm:$0xff]  }
  0x1b   : > { %1646 = vmatprep.subr.bf16.mxu0 %v1949_v1  ;;  %v1891_v55 = vld [vmem:[%s2333_s1 + $0x158] sm:$0xff]   ;;  %v1894_v56 = vld [vmem:[%s2042_s16 + $0xc] sm:$0x1e]   ;;  %v1900_v58 = vld [vmem:[%s2042_s16 + $0x8] sm:$0x1e]  }
  0x1c   : > { %1665 = vmatpush3.bf16.msra.mxu1 %v1854_v8  ;;  %v1888_v57 = vld [vmem:[%s2333_s1 + $0x110] sm:$0xff]   ;;  %v675_v60 = vshrl.u32 %v1894_v56, 16  ;;  %v678_v61 = vshll.u32 %v1894_v56, 16  ;;  %v1890_v62 = vld [vmem:[%s2333_s1 + $0x108] sm:$0xff]   ;;  %v799_v63 = vshrl.u32 %v1900_v58, 16  ;;  %v802_v0 = vshll.u32 %v1900_v58, 16 }
  0x1d   : > { %1666 = vmatprep.subr.bf16.mxu1 %v1949_v1  ;;  %v1893_v59 = vld [vmem:[%s2333_s1 + $0x150] sm:$0xff]   ;;  %v1896_v4 = vld [vmem:[%s2333_s1 + $0x148] sm:$0xff]   ;;  %v1892_v5 = vld [vmem:[%s2333_s1 + $0x100] sm:$0xff]  }
  0x1e   : > { %1647 = vmatpush3.bf16.msra.mxu0 %v1851_v9  ;;  %v677_v2 = vrot.slane %v675_v60, 1  ;;  %v680_v3 = vrot.slane %v678_v61, 2  ;;  %v801_v6 = vrot.slane %v799_v63, 1  ;;  %v804_v7 = vrot.slane %v802_v0, 2  ;;  %v1898_v9 = vld [vmem:[%s2333_s1 + $0x140] sm:$0xff]   ;;  %v1901_v12 = vld [vmem:[%s2333_s1 + $0x1f8] sm:$0xff]  }
  0x1f   : > { %1648 = vmatprep.subr.bf16.mxu0 %v1949_v1  ;;  %v1899_v15 = vld [vmem:[%s2333_s1 + $0x1a8] sm:$0xff]   ;;  %v1904_v19 = vld [vmem:[%s2333_s1 + $0x198] sm:$0xff]   ;;  %v1916_v33 = vld [vmem:[%s2333_s1 + $0x1c0] sm:$0xff]  }
  0x20   : > { %1667 = vmatpush3.bf16.msra.mxu1 %v1856_v10  ;;  %v681_v8 = vor.u32 %v680_v3, %v677_v2  ;;  %v1895_v10 = vld [vmem:[%s2333_s1 + $0x1b8] sm:$0xff]   ;;  %v1917_v37 = vld [vmem:[%s2333_s1 + $0x228] sm:$0xff]   ;;  %v1919_v38 = vld [vmem:[%s2333_s1 + $0x220] sm:$0xff]  }
  0x21   : > { %1668 = vmatprep.subr.bf16.mxu1 %v1949_v1  ;;  %v1909_v20 = vld [vmem:[%s2333_s1 + $0x1d8] sm:$0xff]   ;;  %v1923_v43 = vld [vmem:[%s2333_s1 + $0x200] sm:$0xff]  }
  0x22   : > { %1649 = vmatpush3.bf16.msra.mxu0 %v1853_v11  ;;  %v805_v11 = vor.u32 %v804_v7, %v801_v6  ;;  %v1920_v39 = vld [vmem:[%s2333_s1 + $0x218] sm:$0xff]  }
  0x23   : > { %1650 = vmatprep.subr.bf16.mxu0 %v1949_v1 }
  0x24   : > { %1669 = vmatpush3.bf16.msra.mxu1 %v1858_v13  ;;  %v1897_v13 = vld [vmem:[%s2333_s1 + $0x1b0] sm:$0xff]  }
  0x25   : > { %1670 = vmatprep.subr.bf16.mxu1 %v1949_v1 }
  0x26   : > { %1651 = vmatpush3.bf16.msra.mxu0 %v1855_v14  ;;  %v1903_v14 = vld [vmem:[%s2333_s1 + $0x1f0] sm:$0xff]  }
  0x27   : > { %1652 = vmatprep.subr.bf16.mxu0 %v1949_v1 }
  0x28   : > { %1671 = vmatpush3.bf16.msra.mxu1 %v1860_v16  ;;  %v1905_v16 = vld [vmem:[%s2333_s1 + $0x1e8] sm:$0xff]  }
  0x29   : > { %1672 = vmatprep.subr.bf16.mxu1 %v1949_v1 }
  0x2a   : > { %1653 = vmatpush3.bf16.msra.mxu0 %v1857_v17  ;;  %v1902_v17 = vld [vmem:[%s2333_s1 + $0x1a0] sm:$0xff]  }
  0x2b   : > { %1678 = vmatprep.subr.bf16.mxu0 %v1949_v1 }
  0x2c   : > { %1673 = vmatpush3.bf16.msra.mxu1 %v1862_v21  ;;  %v1912_v21 = vld [vmem:[%s2042_s16] sm:$0x1e]  }
  0x2d   : > { %1655 = vmatmul.mubr.bf16.vlgmr.msra.gmra.mxu0 %v190_v18  ;;  %1698 = vmatprep.subr.bf16.mxu1 %v1949_v1  ;;  %v1907_v18 = vld [vmem:[%s2333_s1 + $0x1e0] sm:$0xff]  }
  0x2e   : > { %1679 = vmatpush3.bf16.msra.mxu0 %v1859_v22  ;;  %1694 = vmatprep.mubr.msk.bf16.mxu0 %vm1950_vm0, %v1949_v1  ;;  %v1906_v22 = vld [vmem:[%s2333_s1 + $0x190] sm:$0xff]  }
  0x2f   : > { %1680 = vmatprep.subr.bf16.mxu0 %v1949_v1  ;;  %1675 = vmatmul.mubr.bf16.vlgmr.msra.gmra.mxu1 %v323_v23  ;;  %v1911_v23 = vld [vmem:[%s2333_s1 + $0x1d0] sm:$0xff]  }
  0x30   : > { %1699 = vmatpush3.bf16.msra.mxu1 %v1865_v24  ;;  %1714 = vmatprep.mubr.msk.bf16.mxu1 %vm1950_vm0, %v1949_v1  ;;  %v923_v24 = vshrl.u32 %v1912_v21, 16 }
  0x31   : > { %1700 = vmatprep.subr.bf16.mxu1 %v1949_v1 }
  0x32   : > { %1681 = vmatpush3.bf16.msra.mxu0 %v1861_v25  ;;  %v926_v25 = vshll.u32 %v1912_v21, 16 }
  0x33   : > { %1682 = vmatprep.subr.bf16.mxu0 %v1949_v1 }
  0x34   : > { %1701 = vmatpush3.bf16.msra.mxu1 %v1867_v26  ;;  %v1908_v26 = vld [vmem:[%s2333_s1 + $0x188] sm:$0xff]  }
  0x35   : > { %1702 = vmatprep.subr.bf16.mxu1 %v1949_v1 }
  0x36   : > { %1683 = vmatpush3.bf16.msra.mxu0 %v1864_v27  ;;  %v925_v27 = vrot.slane %v923_v24, 1 }
  0x37   : > { %1684 = vmatprep.subr.bf16.mxu0 %v1949_v1 }
  0x38   : > { %1703 = vmatpush3.bf16.msra.mxu1 %v1869_v28  ;;  %v928_v28 = vrot.slane %v926_v25, 2 }
  0x39   : > { %1704 = vmatprep.subr.bf16.mxu1 %v1949_v1 }
  0x3a   : > { %1685 = vmatpush3.bf16.msra.mxu0 %v1866_v29  ;;  %v1914_v29 = vld [vmem:[%s2333_s1 + $0x1c8] sm:$0xff]  }
  0x3b   : > { %1686 = vmatprep.subr.bf16.mxu0 %v1949_v1 }
  0x3c   : > { %1705 = vmatpush3.bf16.msra.mxu1 %v1871_v30  ;;  %v1910_v30 = vld [vmem:[%s2333_s1 + $0x180] sm:$0xff]  }
  0x3d   : > { %1706 = vmatprep.subr.bf16.mxu1 %v1949_v1 }
  0x3e   : > { %1687 = vmatpush3.bf16.msra.mxu0 %v1868_v31  ;;  %v1918_v31 = vld [vmem:[%s2042_s16 + $0x4] sm:$0x1c]  }
  0x3f   : > { %1688 = vmatprep.subr.bf16.mxu0 %v1949_v1 }
  0x40   : > { %1707 = vmatpush3.bf16.msra.mxu1 %v1873_v32  ;;  %v929_v32 = vor.u32 %v928_v28, %v925_v27 }
  0x41   : > { %1708 = vmatprep.subr.bf16.mxu1 %v1949_v1 }
  0x42   : > { %1689 = vmatpush3.bf16.msra.mxu0 %v1870_v34  ;;  %v1913_v34 = vld [vmem:[%s2333_s1 + $0x238] sm:$0xff]  }
  0x43   : > { %1690 = vmatprep.subr.bf16.mxu0 %v1949_v1 }
  0x44   : > { %1709 = vmatpush3.bf16.msra.mxu1 %v1875_v36  ;;  %v1915_v36 = vld [vmem:[%s2333_s1 + $0x230] sm:$0xff]  }
  0x45   : > { %1710 = vmatprep.subr.bf16.mxu1 %v1949_v1 }
  0x46   : > { %1691 = vmatpush3.bf16.msra.mxu0 %v1872_v35  ;;  %v1046_v35 = vrot.slane %v1918_v31, 2 }
  0x47   : > { %1692 = vmatprep.subr.bf16.mxu0 %v1949_v1 }
  0x48   : > { %1711 = vmatpush3.bf16.msra.mxu1 %v1878_v40  ;;  %v1921_v40 = vld [vmem:[%s2333_s1 + $0x210] sm:$0xff]  }
  0x49   : > { %1712 = vmatprep.subr.bf16.mxu1 %v1949_v1 }
  0x4a   : > { %1693 = vmatpush3.bf16.msra.mxu0 %v1874_v41  ;;  %v1922_v41 = vld [vmem:[%s2333_s1 + $0x208] sm:$0xff]  }
  0x4b   : > { %1718 = vmatprep.subr.bf16.mxu0 %v1949_v1 }
  0x4c   : > { %1713 = vmatpush3.bf16.msra.mxu1 %v1880_v42  ;;  %v1924_v42 = vld [vmem:[%s2042_s16] sm:$0x1c]  }
  0x4d   : > { %1695 = vmatmul.mubr.bf16.vlgmr.msra.gmra.mxu0 %v443_v44  ;;  %1738 = vmatprep.subr.bf16.mxu1 %v1949_v1  ;;  %v1163_v44 = vrot.slane %v1924_v42, 2 }
  0x4e   : > { %1719 = vmatpush3.bf16.msra.mxu0 %v1877_v45  ;;  %1734 = vmatprep.mubr.msk.bf16.mxu0 %vm1950_vm0, %v1949_v1 }
  0x4f   : > { %1720 = vmatprep.subr.bf16.mxu0 %v1949_v1  ;;  %1715 = vmatmul.mubr.bf16.vlgmr.msra.gmra.mxu1 %v557_v46 }
  0x50   : > { %1739 = vmatpush3.bf16.msra.mxu1 %v1883_v47  ;;  %1754 = vmatprep.mubr.msk.bf16.mxu1 %vm1950_vm0, %v1949_v1 }
  0x51   : > { %1740 = vmatprep.subr.bf16.mxu1 %v1949_v1 }
  0x52   : > { %1721 = vmatpush3.bf16.msra.mxu0 %v1879_v48 }
  0x53   : > { %1722 = vmatprep.subr.bf16.mxu0 %v1949_v1 }
  0x54   : > { %1741 = vmatpush3.bf16.msra.mxu1 %v1885_v49 }
  0x55   : > { %1742 = vmatprep.subr.bf16.mxu1 %v1949_v1 }
  0x56   : > { %1723 = vmatpush3.bf16.msra.mxu0 %v1881_v50 }
  0x57   : > { %1724 = vmatprep.subr.bf16.mxu0 %v1949_v1 }
  0x58   : > { %1743 = vmatpush3.bf16.msra.mxu1 %v1887_v51 }
  0x59   : > { %1744 = vmatprep.subr.bf16.mxu1 %v1949_v1 }
  0x5a   : > { %1725 = vmatpush3.bf16.msra.mxu0 %v1884_v52 }
  0x5b   : > { %1726 = vmatprep.subr.bf16.mxu0 %v1949_v1 }
  0x5c   : > { %1745 = vmatpush3.bf16.msra.mxu1 %v1889_v53 }
  0x5d   : > { %1746 = vmatprep.subr.bf16.mxu1 %v1949_v1 }
  0x5e   : > { %1727 = vmatpush3.bf16.msra.mxu0 %v1886_v54 }
  0x5f   : > { %1728 = vmatprep.subr.bf16.mxu0 %v1949_v1 }
  0x60   : > { %1747 = vmatpush3.bf16.msra.mxu1 %v1891_v55 }
  0x61   : > { %1748 = vmatprep.subr.bf16.mxu1 %v1949_v1 }
  0x62   : > { %1729 = vmatpush3.bf16.msra.mxu0 %v1888_v57 }
  0x63   : > { %1730 = vmatprep.subr.bf16.mxu0 %v1949_v1 }
  0x64   : > { %1749 = vmatpush3.bf16.msra.mxu1 %v1893_v59 }
  0x65   : > { %1750 = vmatprep.subr.bf16.mxu1 %v1949_v1 }
  0x66   : > { %1731 = vmatpush3.bf16.msra.mxu0 %v1890_v62 }
  0x67   : > { %1732 = vmatprep.subr.bf16.mxu0 %v1949_v1 }
  0x68   : > { %1751 = vmatpush3.bf16.msra.mxu1 %v1896_v4 }
  0x69   : > { %1752 = vmatprep.subr.bf16.mxu1 %v1949_v1 }
  0x6a   : > { %1733 = vmatpush3.bf16.msra.mxu0 %v1892_v5 }
  0x6b   : > { %1758 = vmatprep.subr.bf16.mxu0 %v1949_v1 }
  0x6c   : > { %1753 = vmatpush3.bf16.msra.mxu1 %v1898_v9 }
  0x6d   : > { %1735 = vmatmul.mubr.bf16.vlgmr.msra.gmra.mxu0 %v681_v8  ;;  %1778 = vmatprep.subr.bf16.mxu1 %v1949_v1 }
  0x6e   : > { %1759 = vmatpush3.bf16.msra.mxu0 %v1895_v10  ;;  %1774 = vmatprep.mubr.msk.bf16.mxu0 %vm1950_vm0, %v1949_v1 }
  0x6f   : > { %1760 = vmatprep.subr.bf16.mxu0 %v1949_v1  ;;  %1755 = vmatmul.mubr.bf16.vlgmr.msra.gmra.mxu1 %v805_v11 }
  0x70   : > { %1779 = vmatpush3.bf16.msra.mxu1 %v1901_v12  ;;  %1794 = vmatprep.mubr.msk.bf16.mxu1 %vm1950_vm0, %v1949_v1 }
  0x71   : > { %1780 = vmatprep.subr.bf16.mxu1 %v1949_v1 }
  0x72   : > { %1761 = vmatpush3.bf16.msra.mxu0 %v1897_v13 }
  0x73   : > { %1762 = vmatprep.subr.bf16.mxu0 %v1949_v1 }
  0x74   : > { %1781 = vmatpush3.bf16.msra.mxu1 %v1903_v14 }
  0x75   : > { %1782 = vmatprep.subr.bf16.mxu1 %v1949_v1 }
  0x76   : > { %1763 = vmatpush3.bf16.msra.mxu0 %v1899_v15 }
  0x77   : > { %1764 = vmatprep.subr.bf16.mxu0 %v1949_v1 }
  0x78   : > { %1783 = vmatpush3.bf16.msra.mxu1 %v1905_v16 }
  0x79   : > { %1784 = vmatprep.subr.bf16.mxu1 %v1949_v1 }
  0x7a   : > { %1765 = vmatpush3.bf16.msra.mxu0 %v1902_v17 }
  0x7b   : > { %1766 = vmatprep.subr.bf16.mxu0 %v1949_v1 }
  0x7c   : > { %1785 = vmatpush3.bf16.msra.mxu1 %v1907_v18 }
  0x7d   : > { %1786 = vmatprep.subr.bf16.mxu1 %v1949_v1 }
  0x7e   : > { %1767 = vmatpush3.bf16.msra.mxu0 %v1904_v19 }
  0x7f   : > { %1768 = vmatprep.subr.bf16.mxu0 %v1949_v1 }
  0x80   : > { %1787 = vmatpush3.bf16.msra.mxu1 %v1909_v20 }
  0x81   : > { %1788 = vmatprep.subr.bf16.mxu1 %v1949_v1 }
  0x82   : > { %1769 = vmatpush3.bf16.msra.mxu0 %v1906_v22 }
  0x83   : > { %1770 = vmatprep.subr.bf16.mxu0 %v1949_v1 }
  0x84   : > { %1789 = vmatpush3.bf16.msra.mxu1 %v1911_v23 }
  0x85   : > { %1790 = vmatprep.subr.bf16.mxu1 %v1949_v1 }
  0x86   : > { %1771 = vmatpush3.bf16.msra.mxu0 %v1908_v26 }
  0x87   : > { %1772 = vmatprep.subr.bf16.mxu0 %v1949_v1 }
  0x88   : > { %1791 = vmatpush3.bf16.msra.mxu1 %v1914_v29 }
  0x89   : > { %1792 = vmatprep.subr.bf16.mxu1 %v1949_v1 }
  0x8a   : > { %1773 = vmatpush3.bf16.msra.mxu0 %v1910_v30 }
  0x8b   : > { %1798 = vmatprep.subr.bf16.mxu0 %v1949_v1 }
  0x8c   : > { %1793 = vmatpush3.bf16.msra.mxu1 %v1916_v33  ;;  %v1554_v33 = vld [vmem:[%s2334_s2] ss:$0 sm:$0xff] }
  0x8d   : > { %1775 = vmatmul.mubr.bf16.vlgmr.msra.gmra.mxu0 %v929_v32 }
  0x8e   : > { %1799 = vmatpush3.bf16.msra.mxu0 %v1913_v34  ;;  %1814 = vmatprep.mubr.msk.bf16.mxu0 %vm1950_vm0, %v1949_v1 }
  0x8f   : > { %1800 = vmatprep.subr.bf16.mxu0 %v1949_v1  ;;  %1795 = vmatmul.mubr.bf16.vlgmr.msra.gmra.mxu1 %v1046_v35 }
  0x92   : > { %1801 = vmatpush3.bf16.msra.mxu0 %v1915_v36 }
  0x93   : > { %1802 = vmatprep.subr.bf16.mxu0 %v1949_v1 }
  0x96   : > { %1803 = vmatpush3.bf16.msra.mxu0 %v1917_v37 }
  0x97   : > { %1804 = vmatprep.subr.bf16.mxu0 %v1949_v1 }
  0x9a   : > { %1805 = vmatpush3.bf16.msra.mxu0 %v1919_v38 }
  0x9b   : > { %1806 = vmatprep.subr.bf16.mxu0 %v1949_v1 }
  0x9e   : > { %1807 = vmatpush3.bf16.msra.mxu0 %v1920_v39 }
  0x9f   : > { %1808 = vmatprep.subr.bf16.mxu0 %v1949_v1 }
  0xa2   : > { %1809 = vmatpush3.bf16.msra.mxu0 %v1921_v40 }
  0xa3   : > { %1810 = vmatprep.subr.bf16.mxu0 %v1949_v1 }
  0xa6   : > { %1811 = vmatpush3.bf16.msra.mxu0 %v1922_v41 }
  0xa7   : > { %1812 = vmatprep.subr.bf16.mxu0 %v1949_v1 }
  0xaa   : > { %1813 = vmatpush3.bf16.msra.mxu0 %v1923_v43 }
  0xad   : > { %1815 = vmatmul.mubr.bf16.vlgmr.msra.gmra.mxu0 %v1163_v44 }
  0xed   : > { %v289_v45 = vpop.f32.mrf.mxu0 }
  0xee   : > { %295 = vst [vmem:[#allocation2] sm:$0x3f] %v289_v45 }
  0xef   : > { %v1656_v46 = vpop.f32.mrf.mxu0  ;;  %v407_v47 = vpop.f32.mrf.mxu1 }
  0xf1   : > { %v292_v48 = vpop.f32.mrf.mxu0  ;;  %v1676_v49 = vpop.f32.mrf.mxu1 }
  0xf3   : > { %v1657_v50 = vpop.f32.mrf.mxu0  ;;  %v410_v51 = vpop.f32.mrf.mxu1 }
  0xf5   : > { %v413_v52 = vld [vmem:[#allocation2] sm:$0x3f]  ;;  %v1677_v54 = vpop.f32.mrf.mxu1 }
  0xf6   : > { %v414_v53 = vadd.f32 %v413_v52, %v407_v47 }
  0xf8   : > { %415 = vst [vmem:[#allocation2] sm:$0x3f] %v414_v53 }
  0xff   : > { %v533_v56 = vld [vmem:[#allocation2] sm:$0x3f] }
 0x10d   : > { %v527_v55 = vpop.f32.mrf.mxu0 }
 0x10e   : > { %v534_v57 = vadd.f32 %v533_v56, %v527_v55 }
 0x10f   : > { %v1696_v58 = vpop.f32.mrf.mxu0  ;;  %v641_v1 = vpop.f32.mrf.mxu1 }
 0x110   : > { %535 = vst [vmem:[#allocation2] sm:$0x3f] %v534_v57 }
 0x111   : > { %v530_v59 = vpop.f32.mrf.mxu0  ;;  %v1716_v60 = vpop.f32.mrf.mxu1 }
 0x113   : > { %v1697_v61 = vpop.f32.mrf.mxu0  ;;  %v644_v62 = vpop.f32.mrf.mxu1 }
 0x115   : > { %v1717_v63 = vpop.f32.mrf.mxu1 }
 0x117   : > { %v647_v0 = vld [vmem:[#allocation2] sm:$0x3f] }
 0x118   : > { %v648_v2 = vadd.f32 %v647_v0, %v641_v1 }
 0x11a   : > { %649 = vst [vmem:[#allocation2] sm:$0x3f] %v648_v2 }
 0x121   : > { %v771_v4 = vld [vmem:[#allocation2] sm:$0x3f] }
 0x12d   : > { %v765_v3 = vpop.f32.mrf.mxu0 }
 0x12e   : > { %v772_v5 = vadd.f32 %v771_v4, %v765_v3 }
 0x12f   : > { %v1736_v6 = vpop.f32.mrf.mxu0  ;;  %v889_v7 = vpop.f32.mrf.mxu1 }
 0x130   : > { %773 = vst [vmem:[#allocation2] sm:$0x3f] %v772_v5 }
 0x131   : > { %v768_v8 = vpop.f32.mrf.mxu0  ;;  %v1756_v9 = vpop.f32.mrf.mxu1 }
 0x133   : > { %v1737_v10 = vpop.f32.mrf.mxu0  ;;  %v892_v11 = vpop.f32.mrf.mxu1 }
 0x135   : > { %v1757_v12 = vpop.f32.mrf.mxu1 }
 0x137   : > { %v895_v13 = vld [vmem:[#allocation2] sm:$0x3f] }
 0x138   : > { %v896_v14 = vadd.f32 %v895_v13, %v889_v7 }
 0x13a   : > { %897 = vst [vmem:[#allocation2] sm:$0x3f] %v896_v14 }
 0x141   : > { %v1019_v16 = vld [vmem:[#allocation2] sm:$0x3f] }
 0x14d   : > { %v1013_v15 = vpop.f32.mrf.mxu0 }
 0x14e   : > { %v1020_v17 = vadd.f32 %v1019_v16, %v1013_v15 }
 0x14f   : > { %v1776_v18 = vpop.f32.mrf.mxu0  ;;  %v1130_v19 = vpop.f32.mrf.mxu1 }
 0x150   : > { %1021 = vst [vmem:[#allocation2] sm:$0x3f] %v1020_v17 }
 0x151   : > { %v1016_v20 = vpop.f32.mrf.mxu0  ;;  %v1796_v21 = vpop.f32.mrf.mxu1 }
 0x153   : > { %v1777_v22 = vpop.f32.mrf.mxu0  ;;  %v1133_v23 = vpop.f32.mrf.mxu1 }
 0x155   : > { %v1797_v24 = vpop.f32.mrf.mxu1 }
 0x157   : > { %v1136_v25 = vld [vmem:[#allocation2] sm:$0x3f] }
 0x158   : > { %v1137_v26 = vadd.f32 %v1136_v25, %v1130_v19 }
 0x15a   : > { %1138 = vst [vmem:[#allocation2] sm:$0x3f] %v1137_v26 }
 0x161   : > { %v1253_v28 = vld [vmem:[#allocation2] sm:$0x3f] }
 0x16d   : > { %v1247_v27 = vpop.f32.mrf.mxu0 }
 0x16e   : > { %v1254_v29 = vadd.f32 %v1253_v28, %v1247_v27 }
 0x16f   : > { %v1816_v30 = vpop.f32.mrf.mxu0 }
 0x170   : > { %1255 = vst [vmem:[#allocation2] sm:$0x3f] %v1254_v29 }
 0x171   : > { %v1250_v31 = vpop.f32.mrf.mxu0 }
 0x173   : > { %v1817_v32 = vpop.f32.mrf.mxu0 }
 0x177   : > { %v1256_v34 = vld [vmem:[#allocation2] sm:$0x3f] }
 0x178   : > { %v1264_v35 = vadd.f32 %v1554_v33, %v1256_v34 }
 0x17a   : > { %v1265_v36 = vmax.f32 %v1264_v35, 0.0 }
 0x17c   : > { %v1266_v37 = vpack.c.bf16 %v1265_v36, %v1265_v36 }
 0x17e   : > { %1267 = vst [vmem:[%s188_s8] sm:$0x7] %v1266_v37 }
 0x17f PF: > { %s13_s14 = sadd.s32 1, %s1947_s14   ;;  %s2336_s12 = smov %s1943_s13 }
 0x180   : > { %p10_p5 = scmp.ge.s32.totalorder %s13_s14, 4   ;;  %s2337_s13 = smov %s2339_s15 }
 0x182   :  { %12 = sbr.rel (!%p10_p5) target bundleno = 2 (0x2), region = 70 }

// kernel: fwd.13
= control target key start
LH: loop header
LB: loop body
LE: loop exit
PB: predicated region body
PF: predicated region fallthrough
CT: control target
= control target key end

     0   :  { %v30_v1 = vlaneseq  ;;  %v245_v2 = vmov 0.0   ;;  %vm246_vm0 = vmmov 0   ;;  %s304_s0 = inlined_call_operand.vmem [shape: bf16[2,1,128], index: 0, kind: input, shape index: {}]   ;;  %s305_s1 = inlined_call_operand.vmem [shape: bf16[128,128], index: 1, kind: input, shape index: {}]   ;;  %s306_s2 = inlined_call_operand.vmem [shape: f32[1,128], index: 2, kind: input, shape index: {}]   ;;  %s307_s3 = inlined_call_operand.hbm [shape: f32[2,128], index: 3, kind: output, shape index: {}]  }
   0x1   :  { %v215_v0 = vld [vmem:[%s305_s1 + $0x38] sm:$0xff]   ;;  %192 = vmatprep.subr.bf16.mxu0 %v245_v2  ;;  %20 = vst [vmem:[#allocation2] sm:$0x3] %v245_v2  ;;  %v216_v3 = vld [vmem:[%s305_s1 + $0x30] sm:$0xff]   ;;  %208 = vmatprep.mubr.msk.bf16.mxu0 %vm246_vm0, %v245_v2  ;;  %v217_v5 = vld [vmem:[%s305_s1 + $0x28] sm:$0xff]  }
   0x2   :  { %193 = vmatpush3.bf16.msra.mxu0 %v215_v0  ;;  %v31_v4 = vshrl.u32 %v30_v1, 7  ;;  %v22_v7 = vld [vmem:[%s304_s0] sm:$0x1]  ;;  %v23_v8 = vld [vmem:[%s304_s0 + $0x1] sm:$0x1] }
   0x3   :  { %194 = vmatprep.subr.bf16.mxu0 %v245_v2  ;;  %v24_v9 = vunpack.c.l.bf16 %v22_v7  ;;  %v25_v10 = vunpack.c.l.bf16 %v23_v8 }
   0x4   :  { %v32_v6 = vsub.s32 0, %v31_v4 }
   0x6   :  { %195 = vmatpush3.bf16.msra.mxu0 %v216_v3 }
   0x7   :  { %196 = vmatprep.subr.bf16.mxu0 %v245_v2 }
   0x8   :  { %8 = vsyncpa [#allocation4], 0  ;;  %v218_v11 = vld [vmem:[%s305_s1 + $0x20] sm:$0xff]   ;;  %vm38_vm1 = vcmask 1041409   ;;  %v33_v13 = vrot.slane %v24_v9, %v32_v6  ;;  %v37_v14 = vrot.slane %v25_v10, %v32_v6  ;;  %v219_v16 = vld [vmem:[%s305_s1 + $0x18] sm:$0xff]   ;;  %s247_s6 = smov [#allocation3]  }
   0x9   :  { %v21_v12 = vld [vmem:[#allocation2] sm:$0x3]  ;;  %v220_v18 = vld [vmem:[%s305_s1 + $0x10] sm:$0xff]   ;;  %v221_v19 = vld [vmem:[%s305_s1 + $0x8] sm:$0xff]   ;;  %s166_s7 = sshll.u32 %s247_s6, 4  ;;  %s167_s7 = int_to_ptr.vmem [resolvable:$true] %s166_s7 }
   0xa   :  { %197 = vmatpush3.bf16.msra.mxu0 %v217_v5  ;;  %v39_v15 = vsel %vm38_vm1, %v37_v14, %v33_v13  ;;  %v222_v20 = vld [vmem:[%s305_s1] sm:$0xff]   ;;  %s223_s8 = scalar_lea.vmem %s167_s7, 32  ;;  %p228_p1 = scmp.lt.s32.totalorder %s167_s7, %s167_s7 }
   0xb   :  { %198 = vmatprep.subr.bf16.mxu0 %v245_v2  ;;  %v41_v17 = vadd.f32 %v39_v15, %v21_v12  ;;  %v174_v23 = vld [vmem:[%s306_s2] ss:$0 sm:$0xff]  ;;  %p224_p0 = scmp.ne.s32.totalorder %s167_s7, %s223_s8  ;;  %p229_p2 = scmp.lt.s32.totalorder %s223_s8, %s223_s8 }
   0xd   :  { %42 = vst [vmem:[#allocation2] sm:$0x3] %v41_v17  ;;  %p230_p3 = por %p229_p2, %p228_p1 }
   0xe   :  { %199 = vmatpush3.bf16.msra.mxu0 %v218_v11 }
   0xf   :  { %200 = vmatprep.subr.bf16.mxu0 %v245_v2  ;;  %p231_p4 = pnand %p230_p3, %p224_p0 }
  0x12   :  { %201 = vmatpush3.bf16.msra.mxu0 %v219_v16 }
  0x13   :  { %202 = vmatprep.subr.bf16.mxu0 %v245_v2 }
  0x14   :  { %v46_v21 = vld [vmem:[#allocation2] sm:$0x3] }
  0x15   :  { %v47_v22 = vpack.c.bf16 %v46_v21, %v46_v21 }
  0x16   :  { %203 = vmatpush3.bf16.msra.mxu0 %v220_v18 }
  0x17   :  { %204 = vmatprep.subr.bf16.mxu0 %v245_v2 }
  0x1a   :  { %205 = vmatpush3.bf16.msra.mxu0 %v221_v19 }
  0x1b   :  { %206 = vmatprep.subr.bf16.mxu0 %v245_v2 }
  0x1e   :  { %207 = vmatpush3.bf16.msra.mxu0 %v222_v20 }
  0x21   :  { %209 = vmatmul.mubr.bf16.vlgmr.msra.gmra.mxu0 %v47_v22 }
  0xe1   :  { %v153_v24 = vpop.f32.mrf.mxu0 }
  0xe2   :  { %v154_v25 = vadd.f32 %v174_v23, %v153_v24 }
  0xe3   :  { %v210_v26 = vpop.f32.mrf.mxu0 }
  0xe4   :  { %159 = vst [vmem:[#allocation3] sm:$0x3] %v154_v25 }
  0xe5   :  { %v156_v27 = vpop.f32.mrf.mxu0 }
  0xe6   :  { %234 = shalt.err (!%p231_p4)
}
  0xe7   :  { %169 = dma.vmem_to_hbm [thread:$0]  %s167_s7, 32, %s307_s3, [#allocation4]   ;;  %v211_v28 = vpop.f32.mrf.mxu0 }
  0xe8   :  { %243 = dma.done.wait [#allocation4], 32  }
  0xe9   :  { %244 = vsyncadd [#allocation4], 4294967264 }
  0xea   :  { %173 = vsyncpa [#allocation4], 1 }

// kernel: fwd.12
= control target key start
LH: loop header
LB: loop body
LE: loop exit
PB: predicated region body
PF: predicated region fallthrough
CT: control target
= control target key end

     0   :  { %s1927_s12 = smov 0   ;;  %s1929_s13 = smov 0   ;;  %s2288_s0 = inlined_call_operand.vmem [shape: bf16[2,16,128], index: 0, kind: input, shape index: {}]   ;;  %s2289_s1 = inlined_call_operand.vmem [shape: bf16[9,128,128], index: 1, kind: input, shape index: {}]   ;;  %s2290_s2 = inlined_call_operand.vmem [shape: f32[1,128], index: 2, kind: input, shape index: {}]   ;;  %s2291_s3 = inlined_call_operand.vmem [shape: bf16[2,2,128], index: 3, kind: output, shape index: {}]  }
   0x1   :  { %s1931_s14 = smov 0  }
   0x2 LB: > { %s25_s15 = sadd.s32 1, %s1899_s13  ;;  %p1301_p0 = scmp.ge.s32.totalorder %s1903_s14, 1  ;;  %s1903_s14 = sphi %s1931_s14, %s13_s14   ;;  %s1899_s13 = sphi %s1929_s13, %s2293_s13   ;;  %s1895_s12 = sphi %s1927_s12, %s2292_s12  }
   0x3   : > { %p27_p1 = scmp.ge.s32.totalorder %s25_s15, 2  ;;  %p151_p2 = scmp.lt.s32.totalorder %s1903_s14, 3 }
   0x5   : > { %s2295_s15 = smov (%p27_p1, %s25_s15), 0  ;;  %p152_p3 = pnand %p1301_p0, %p151_p2 }
   0x6   : > { %p176_p4 = scmp.lt.s32.totalorder (!%p152_p3), %s1895_s12, 1 }
   0x7   : > { %155 = sbr.rel (%p152_p3) target bundleno = 383 (0x17f), region = 32 }
   0xc   : > { %v1802_v0 = vld [vmem:[%s2289_s1 + $0x38] sm:$0xff]   ;;  %v1905_v1 = vmov 0.0   ;;  %v1803_v2 = vld [vmem:[%s2289_s1 + $0x30] sm:$0xff]   ;;  %vm1906_vm0 = vmmov 0   ;;  %v1804_v5 = vld [vmem:[%s2289_s1 + $0x28] sm:$0xff]   ;;  %s2297_s12 = smov (!%p176_p4, %s1895_s12), 1 }
   0xd   : > { %1596 = vmatprep.subr.bf16.mxu0 %v1905_v1  ;;  %1616 = vmatprep.subr.bf16.mxu1 %v1905_v1  ;;  %v1805_v3 = vld [vmem:[%s2289_s1 + $0x78] sm:$0xff]   ;;  %v1807_v4 = vld [vmem:[%s2289_s1 + $0x70] sm:$0xff]   ;;  %v1809_v6 = vld [vmem:[%s2289_s1 + $0x68] sm:$0xff]   ;;  %s1514_s7 = sshll.u32 %s2297_s12, 3 }
   0xe   : > { %1597 = vmatpush3.bf16.msra.mxu0 %v1802_v0  ;;  %1612 = vmatprep.mubr.msk.bf16.mxu0 %vm1906_vm0, %v1905_v1  ;;  %v1806_v7 = vld [vmem:[%s2289_s1 + $0x20] sm:$0xff]   ;;  %v1808_v9 = vld [vmem:[%s2289_s1 + $0x18] sm:$0xff]   ;;  %s1998_s16 = scalar_lea.vmem %s2288_s0, %s1514_s7  ;;  %v1810_v11 = vld [vmem:[%s2289_s1 + $0x10] sm:$0xff]   ;;  %s186_s7 = scalar_lea.vmem %s2291_s3, %s2297_s12 }
   0xf   : > { %1598 = vmatprep.subr.bf16.mxu0 %v1905_v1  ;;  %1632 = vmatprep.mubr.msk.bf16.mxu1 %vm1906_vm0, %v1905_v1  ;;  %v1811_v8 = vld [vmem:[%s2289_s1 + $0x60] sm:$0xff]   ;;  %v1813_v10 = vld [vmem:[%s2289_s1 + $0x58] sm:$0xff]   ;;  %v1815_v12 = vld [vmem:[%s2289_s1 + $0x50] sm:$0xff]  }
  0x10   : > { %1617 = vmatpush3.bf16.msra.mxu1 %v1805_v3  ;;  %v1812_v13 = vld [vmem:[%s2289_s1 + $0x8] sm:$0xff]   ;;  %v1820_v15 = vld [vmem:[%s1998_s16] ss:$0 sps:$4 sm:$0x44]   ;;  %v1816_v19 = vld [vmem:[%s2289_s1 + $0xb8] sm:$0xff]  }
  0x11   : > { %1618 = vmatprep.subr.bf16.mxu1 %v1905_v1  ;;  %v1817_v14 = vld [vmem:[%s2289_s1 + $0x48] sm:$0xff]   ;;  %v1814_v16 = vld [vmem:[%s2289_s1] sm:$0xff]   ;;  %v315_v20 = vrot.slane %v1820_v15, 2  ;;  %v1818_v21 = vld [vmem:[%s2289_s1 + $0xb0] sm:$0xff]  }
  0x12   : > { %1599 = vmatpush3.bf16.msra.mxu0 %v1803_v2  ;;  %v188_v17 = vld [vmem:[%s1998_s16] sm:$0x1]  ;;  %v1822_v22 = vld [vmem:[%s2289_s1 + $0xf8] sm:$0xff]   ;;  %v1824_v23 = vld [vmem:[%s2289_s1 + $0xf0] sm:$0xff]  }
  0x13   : > { %1600 = vmatprep.subr.bf16.mxu0 %v1905_v1  ;;  %v1819_v18 = vld [vmem:[%s2289_s1 + $0x40] sm:$0xff]   ;;  %v1821_v24 = vld [vmem:[%s2289_s1 + $0xa8] sm:$0xff]   ;;  %v1825_v28 = vld [vmem:[%s2289_s1 + $0x98] sm:$0xff]  }
  0x14   : > { %1619 = vmatpush3.bf16.msra.mxu1 %v1807_v4  ;;  %v1826_v25 = vld [vmem:[%s2289_s1 + $0xe8] sm:$0xff]   ;;  %v1823_v26 = vld [vmem:[%s2289_s1 + $0xa0] sm:$0xff]   ;;  %v1830_v29 = vld [vmem:[%s2289_s1 + $0xd8] sm:$0xff]  }
  0x15   : > { %1620 = vmatprep.subr.bf16.mxu1 %v1905_v1  ;;  %v1828_v27 = vld [vmem:[%s2289_s1 + $0xe0] sm:$0xff]   ;;  %v1827_v31 = vld [vmem:[%s2289_s1 + $0x90] sm:$0xff]   ;;  %v1829_v34 = vld [vmem:[%s2289_s1 + $0x88] sm:$0xff]  }
  0x16   : > { %1601 = vmatpush3.bf16.msra.mxu0 %v1804_v5  ;;  %v1833_v30 = vld [vmem:[%s1998_s16] ss:$0 sps:$4 sm:$0x33]   ;;  %v1832_v33 = vld [vmem:[%s2289_s1 + $0xd0] sm:$0xff]   ;;  %v1835_v37 = vld [vmem:[%s2289_s1 + $0xc8] sm:$0xff]  }
  0x17   : > { %1602 = vmatprep.subr.bf16.mxu0 %v1905_v1  ;;  %v432_v32 = vshll.u32 %v1833_v30, 16  ;;  %v430_v35 = vshrl.u32 %v1833_v30, 16  ;;  %v1831_v38 = vld [vmem:[%s2289_s1 + $0x80] sm:$0xff]   ;;  %v1834_v41 = vld [vmem:[%s2289_s1 + $0x138] sm:$0xff]   ;;  %v1836_v44 = vld [vmem:[%s2289_s1 + $0x130] sm:$0xff]  }
  0x18   : > { %1621 = vmatpush3.bf16.msra.mxu1 %v1809_v6  ;;  %v1837_v40 = vld [vmem:[%s2289_s1 + $0xc0] sm:$0xff]   ;;  %v1839_v43 = vld [vmem:[%s2289_s1 + $0x178] sm:$0xff]   ;;  %v1841_v45 = vld [vmem:[%s2289_s1 + $0x170] sm:$0xff]  }
  0x19   : > { %1622 = vmatprep.subr.bf16.mxu1 %v1905_v1  ;;  %v434_v36 = vrot.slane %v432_v32, 1  ;;  %v528_v42 = vld [vmem:[%s1998_s16 + $0x4] sm:$0x1]  ;;  %v1838_v46 = vld [vmem:[%s2289_s1 + $0x128] sm:$0xff]   ;;  %v1842_v50 = vld [vmem:[%s2289_s1 + $0x118] sm:$0xff]  }
  0x1a   : > { %1603 = vmatpush3.bf16.msra.mxu0 %v1806_v7  ;;  %v1843_v47 = vld [vmem:[%s2289_s1 + $0x168] sm:$0xff]   ;;  %v1840_v48 = vld [vmem:[%s2289_s1 + $0x120] sm:$0xff]   ;;  %v1847_v51 = vld [vmem:[%s2289_s1 + $0x158] sm:$0xff]  }
  0x1b   : > { %1604 = vmatprep.subr.bf16.mxu0 %v1905_v1  ;;  %v435_v39 = vor.u32 %v434_v36, %v430_v35  ;;  %v1845_v49 = vld [vmem:[%s2289_s1 + $0x160] sm:$0xff]   ;;  %v1844_v52 = vld [vmem:[%s2289_s1 + $0x110] sm:$0xff]   ;;  %v1846_v55 = vld [vmem:[%s2289_s1 + $0x108] sm:$0xff]  }
  0x1c   : > { %1623 = vmatpush3.bf16.msra.mxu1 %v1811_v8  ;;  %v1856_v53 = vld [vmem:[%s1998_s16 + $0x4] ss:$0 sps:$4 sm:$0x33]   ;;  %v1849_v54 = vld [vmem:[%s2289_s1 + $0x150] sm:$0xff]   ;;  %v1852_v58 = vld [vmem:[%s2289_s1 + $0x148] sm:$0xff]  }
  0x1d   : > { %1624 = vmatprep.subr.bf16.mxu1 %v1905_v1  ;;  %v775_v56 = vshll.u32 %v1856_v53, 16  ;;  %v1850_v57 = vld [vmem:[%s1998_s16 + $0x4] ss:$0 sps:$4 sm:$0x44]   ;;  %v773_v60 = vshrl.u32 %v1856_v53, 16  ;;  %v1851_v0 = vld [vmem:[%s2289_s1 + $0x1b8] sm:$0xff]  }
  0x1e   : > { %1605 = vmatpush3.bf16.msra.mxu0 %v1808_v9  ;;  %v1848_v59 = vld [vmem:[%s2289_s1 + $0x100] sm:$0xff]   ;;  %v658_v62 = vrot.slane %v1850_v57, 2  ;;  %v1857_v3 = vld [vmem:[%s2289_s1 + $0x1f8] sm:$0xff]   ;;  %v1853_v4 = vld [vmem:[%s2289_s1 + $0x1b0] sm:$0xff]  }
  0x1f   : > { %1606 = vmatprep.subr.bf16.mxu0 %v1905_v1  ;;  %v777_v61 = vrot.slane %v775_v56, 1  ;;  %v1854_v63 = vld [vmem:[%s2289_s1 + $0x140] sm:$0xff]   ;;  %v1859_v5 = vld [vmem:[%s2289_s1 + $0x1f0] sm:$0xff]   ;;  %v1855_v6 = vld [vmem:[%s2289_s1 + $0x1a8] sm:$0xff]  }
  0x20   : > { %1625 = vmatpush3.bf16.msra.mxu1 %v1813_v10  ;;  %v1861_v7 = vld [vmem:[%s2289_s1 + $0x1e8] sm:$0xff]   ;;  %v1858_v8 = vld [vmem:[%s2289_s1 + $0x1a0] sm:$0xff]   ;;  %v1860_v10 = vld [vmem:[%s2289_s1 + $0x198] sm:$0xff]  }
  0x21   : > { %1626 = vmatprep.subr.bf16.mxu1 %v1905_v1  ;;  %v778_v2 = vor.u32 %v777_v61, %v773_v60  ;;  %v1863_v9 = vld [vmem:[%s2289_s1 + $0x1e0] sm:$0xff]  }
  0x22   : > { %1607 = vmatpush3.bf16.msra.mxu0 %v1810_v11  ;;  %v1865_v11 = vld [vmem:[%s2289_s1 + $0x1d8] sm:$0xff]   ;;  %v1868_v15 = vld [vmem:[%s1998_s16] ss:$0 sps:$4 sm:$0x22]  }
  0x23   : > { %1608 = vmatprep.subr.bf16.mxu0 %v1905_v1 }
  0x24   : > { %1627 = vmatpush3.bf16.msra.mxu1 %v1815_v12  ;;  %v1862_v12 = vld [vmem:[%s2289_s1 + $0x190] sm:$0xff]  }
  0x25   : > { %1628 = vmatprep.subr.bf16.mxu1 %v1905_v1 }
  0x26   : > { %1609 = vmatpush3.bf16.msra.mxu0 %v1812_v13  ;;  %v1867_v13 = vld [vmem:[%s2289_s1 + $0x1d0] sm:$0xff]  }
  0x27   : > { %1610 = vmatprep.subr.bf16.mxu0 %v1905_v1 }
  0x28   : > { %1629 = vmatpush3.bf16.msra.mxu1 %v1817_v14  ;;  %v1864_v14 = vld [vmem:[%s2289_s1 + $0x188] sm:$0xff]  }
  0x29   : > { %1630 = vmatprep.subr.bf16.mxu1 %v1905_v1 }
  0x2a   : > { %1611 = vmatpush3.bf16.msra.mxu0 %v1814_v16  ;;  %v1870_v16 = vld [vmem:[%s2289_s1 + $0x1c8] sm:$0xff]  }
  0x2b   : > { %1636 = vmatprep.subr.bf16.mxu0 %v1905_v1 }
  0x2c   : > { %1631 = vmatpush3.bf16.msra.mxu1 %v1819_v18  ;;  %v1874_v18 = vld [vmem:[%s1998_s16] ss:$0 sps:$4 sm:$0x88]  }
  0x2d   : > { %1613 = vmatmul.mubr.bf16.vlgmr.msra.gmra.mxu0 %v188_v17  ;;  %1656 = vmatprep.subr.bf16.mxu1 %v1905_v1  ;;  %v1866_v17 = vld [vmem:[%s2289_s1 + $0x180] sm:$0xff]  }
  0x2e   : > { %1637 = vmatpush3.bf16.msra.mxu0 %v1816_v19  ;;  %1652 = vmatprep.mubr.msk.bf16.mxu0 %vm1906_vm0, %v1905_v1  ;;  %v892_v19 = vrot.slane %v1868_v15, 1 }
  0x2f   : > { %1638 = vmatprep.subr.bf16.mxu0 %v1905_v1  ;;  %1633 = vmatmul.mubr.bf16.vlgmr.msra.gmra.mxu1 %v315_v20  ;;  %v1872_v20 = vld [vmem:[%s2289_s1 + $0x1c0] sm:$0xff]  }
  0x30   : > { %1657 = vmatpush3.bf16.msra.mxu1 %v1822_v22  ;;  %1672 = vmatprep.mubr.msk.bf16.mxu1 %vm1906_vm0, %v1905_v1  ;;  %v1006_v22 = vrot.slane %v1874_v18, 3 }
  0x31   : > { %1658 = vmatprep.subr.bf16.mxu1 %v1905_v1 }
  0x32   : > { %1639 = vmatpush3.bf16.msra.mxu0 %v1818_v21  ;;  %v1869_v21 = vld [vmem:[%s2289_s1 + $0x238] sm:$0xff]  }
  0x33   : > { %1640 = vmatprep.subr.bf16.mxu0 %v1905_v1 }
  0x34   : > { %1659 = vmatpush3.bf16.msra.mxu1 %v1824_v23  ;;  %v1871_v23 = vld [vmem:[%s2289_s1 + $0x230] sm:$0xff]  }
  0x35   : > { %1660 = vmatprep.subr.bf16.mxu1 %v1905_v1 }
  0x36   : > { %1641 = vmatpush3.bf16.msra.mxu0 %v1821_v24  ;;  %v1873_v24 = vld [vmem:[%s2289_s1 + $0x228] sm:$0xff]  }
  0x37   : > { %1642 = vmatprep.subr.bf16.mxu0 %v1905_v1 }
  0x38   : > { %1661 = vmatpush3.bf16.msra.mxu1 %v1826_v25  ;;  %v1875_v25 = vld [vmem:[%s2289_s1 + $0x220] sm:$0xff]  }
  0x39   : > { %1662 = vmatprep.subr.bf16.mxu1 %v1905_v1 }
  0x3a   : > { %1643 = vmatpush3.bf16.msra.mxu0 %v1823_v26  ;;  %v1876_v26 = vld [vmem:[%s2289_s1 + $0x218] sm:$0xff]  }
  0x3b   : > { %1644 = vmatprep.subr.bf16.mxu0 %v1905_v1 }
  0x3c   : > { %1663 = vmatpush3.bf16.msra.mxu1 %v1828_v27  ;;  %v1880_v27 = vld [vmem:[%s1998_s16] ss:$0 sps:$4 sm:$0x66]  }
  0x3d   : > { %1664 = vmatprep.subr.bf16.mxu1 %v1905_v1  ;;  %v1124_v30 = vshll.u32 %v1880_v27, 16 }
  0x3e   : > { %1645 = vmatpush3.bf16.msra.mxu0 %v1825_v28  ;;  %v1877_v28 = vld [vmem:[%s2289_s1 + $0x210] sm:$0xff]  }
  0x3f   : > { %1646 = vmatprep.subr.bf16.mxu0 %v1905_v1 }
  0x40   : > { %1665 = vmatpush3.bf16.msra.mxu1 %v1830_v29  ;;  %v1121_v29 = vshrl.u32 %v1880_v27, 16 }
  0x41   : > { %1666 = vmatprep.subr.bf16.mxu1 %v1905_v1 }
  0x42   : > { %1647 = vmatpush3.bf16.msra.mxu0 %v1827_v31  ;;  %v1878_v31 = vld [vmem:[%s2289_s1 + $0x208] sm:$0xff]   ;;  %v1123_v32 = vrot.slane %v1121_v29, 1 }
  0x43   : > { %1648 = vmatprep.subr.bf16.mxu0 %v1905_v1 }
  0x44   : > { %1667 = vmatpush3.bf16.msra.mxu1 %v1832_v33  ;;  %v1126_v33 = vrot.slane %v1124_v30, 2 }
  0x45   : > { %1668 = vmatprep.subr.bf16.mxu1 %v1905_v1 }
  0x46   : > { %1649 = vmatpush3.bf16.msra.mxu0 %v1829_v34  ;;  %v1879_v34 = vld [vmem:[%s2289_s1 + $0x200] sm:$0xff]   ;;  %v1127_v35 = vor.u32 %v1126_v33, %v1123_v32 }
  0x47   : > { %1650 = vmatprep.subr.bf16.mxu0 %v1905_v1 }
  0x48   : > { %1669 = vmatpush3.bf16.msra.mxu1 %v1835_v37 }
  0x49   : > { %1670 = vmatprep.subr.bf16.mxu1 %v1905_v1 }
  0x4a   : > { %1651 = vmatpush3.bf16.msra.mxu0 %v1831_v38 }
  0x4b   : > { %1676 = vmatprep.subr.bf16.mxu0 %v1905_v1 }
  0x4c   : > { %1671 = vmatpush3.bf16.msra.mxu1 %v1837_v40 }
  0x4d   : > { %1653 = vmatmul.mubr.bf16.vlgmr.msra.gmra.mxu0 %v435_v39  ;;  %1696 = vmatprep.subr.bf16.mxu1 %v1905_v1 }
  0x4e   : > { %1677 = vmatpush3.bf16.msra.mxu0 %v1834_v41  ;;  %1692 = vmatprep.mubr.msk.bf16.mxu0 %vm1906_vm0, %v1905_v1 }
  0x4f   : > { %1678 = vmatprep.subr.bf16.mxu0 %v1905_v1  ;;  %1673 = vmatmul.mubr.bf16.vlgmr.msra.gmra.mxu1 %v528_v42 }
  0x50   : > { %1697 = vmatpush3.bf16.msra.mxu1 %v1839_v43  ;;  %1712 = vmatprep.mubr.msk.bf16.mxu1 %vm1906_vm0, %v1905_v1 }
  0x51   : > { %1698 = vmatprep.subr.bf16.mxu1 %v1905_v1 }
  0x52   : > { %1679 = vmatpush3.bf16.msra.mxu0 %v1836_v44 }
  0x53   : > { %1680 = vmatprep.subr.bf16.mxu0 %v1905_v1 }
  0x54   : > { %1699 = vmatpush3.bf16.msra.mxu1 %v1841_v45 }
  0x55   : > { %1700 = vmatprep.subr.bf16.mxu1 %v1905_v1 }
  0x56   : > { %1681 = vmatpush3.bf16.msra.mxu0 %v1838_v46 }
  0x57   : > { %1682 = vmatprep.subr.bf16.mxu0 %v1905_v1 }
  0x58   : > { %1701 = vmatpush3.bf16.msra.mxu1 %v1843_v47 }
  0x59   : > { %1702 = vmatprep.subr.bf16.mxu1 %v1905_v1 }
  0x5a   : > { %1683 = vmatpush3.bf16.msra.mxu0 %v1840_v48 }
  0x5b   : > { %1684 = vmatprep.subr.bf16.mxu0 %v1905_v1 }
  0x5c   : > { %1703 = vmatpush3.bf16.msra.mxu1 %v1845_v49 }
  0x5d   : > { %1704 = vmatprep.subr.bf16.mxu1 %v1905_v1 }
  0x5e   : > { %1685 = vmatpush3.bf16.msra.mxu0 %v1842_v50 }
  0x5f   : > { %1686 = vmatprep.subr.bf16.mxu0 %v1905_v1 }
  0x60   : > { %1705 = vmatpush3.bf16.msra.mxu1 %v1847_v51 }
  0x61   : > { %1706 = vmatprep.subr.bf16.mxu1 %v1905_v1 }
  0x62   : > { %1687 = vmatpush3.bf16.msra.mxu0 %v1844_v52 }
  0x63   : > { %1688 = vmatprep.subr.bf16.mxu0 %v1905_v1 }
  0x64   : > { %1707 = vmatpush3.bf16.msra.mxu1 %v1849_v54 }
  0x65   : > { %1708 = vmatprep.subr.bf16.mxu1 %v1905_v1 }
  0x66   : > { %1689 = vmatpush3.bf16.msra.mxu0 %v1846_v55 }
  0x67   : > { %1690 = vmatprep.subr.bf16.mxu0 %v1905_v1 }
  0x68   : > { %1709 = vmatpush3.bf16.msra.mxu1 %v1852_v58 }
  0x69   : > { %1710 = vmatprep.subr.bf16.mxu1 %v1905_v1 }
  0x6a   : > { %1691 = vmatpush3.bf16.msra.mxu0 %v1848_v59 }
  0x6b   : > { %1716 = vmatprep.subr.bf16.mxu0 %v1905_v1 }
  0x6c   : > { %1711 = vmatpush3.bf16.msra.mxu1 %v1854_v63 }
  0x6d   : > { %1693 = vmatmul.mubr.bf16.vlgmr.msra.gmra.mxu0 %v658_v62  ;;  %1736 = vmatprep.subr.bf16.mxu1 %v1905_v1 }
  0x6e   : > { %1717 = vmatpush3.bf16.msra.mxu0 %v1851_v0  ;;  %1732 = vmatprep.mubr.msk.bf16.mxu0 %vm1906_vm0, %v1905_v1 }
  0x6f   : > { %1718 = vmatprep.subr.bf16.mxu0 %v1905_v1  ;;  %1713 = vmatmul.mubr.bf16.vlgmr.msra.gmra.mxu1 %v778_v2 }
  0x70   : > { %1737 = vmatpush3.bf16.msra.mxu1 %v1857_v3  ;;  %1752 = vmatprep.mubr.msk.bf16.mxu1 %vm1906_vm0, %v1905_v1 }
  0x71   : > { %1738 = vmatprep.subr.bf16.mxu1 %v1905_v1 }
  0x72   : > { %1719 = vmatpush3.bf16.msra.mxu0 %v1853_v4 }
  0x73   : > { %1720 = vmatprep.subr.bf16.mxu0 %v1905_v1 }
  0x74   : > { %1739 = vmatpush3.bf16.msra.mxu1 %v1859_v5 }
  0x75   : > { %1740 = vmatprep.subr.bf16.mxu1 %v1905_v1 }
  0x76   : > { %1721 = vmatpush3.bf16.msra.mxu0 %v1855_v6 }
  0x77   : > { %1722 = vmatprep.subr.bf16.mxu0 %v1905_v1 }
  0x78   : > { %1741 = vmatpush3.bf16.msra.mxu1 %v1861_v7 }
  0x79   : > { %1742 = vmatprep.subr.bf16.mxu1 %v1905_v1 }
  0x7a   : > { %1723 = vmatpush3.bf16.msra.mxu0 %v1858_v8 }
  0x7b   : > { %1724 = vmatprep.subr.bf16.mxu0 %v1905_v1 }
  0x7c   : > { %1743 = vmatpush3.bf16.msra.mxu1 %v1863_v9 }
  0x7d   : > { %1744 = vmatprep.subr.bf16.mxu1 %v1905_v1 }
  0x7e   : > { %1725 = vmatpush3.bf16.msra.mxu0 %v1860_v10 }
  0x7f   : > { %1726 = vmatprep.subr.bf16.mxu0 %v1905_v1 }
  0x80   : > { %1745 = vmatpush3.bf16.msra.mxu1 %v1865_v11 }
  0x81   : > { %1746 = vmatprep.subr.bf16.mxu1 %v1905_v1 }
  0x82   : > { %1727 = vmatpush3.bf16.msra.mxu0 %v1862_v12 }
  0x83   : > { %1728 = vmatprep.subr.bf16.mxu0 %v1905_v1 }
  0x84   : > { %1747 = vmatpush3.bf16.msra.mxu1 %v1867_v13 }
  0x85   : > { %1748 = vmatprep.subr.bf16.mxu1 %v1905_v1 }
  0x86   : > { %1729 = vmatpush3.bf16.msra.mxu0 %v1864_v14 }
  0x87   : > { %1730 = vmatprep.subr.bf16.mxu0 %v1905_v1 }
  0x88   : > { %1749 = vmatpush3.bf16.msra.mxu1 %v1870_v16 }
  0x89   : > { %1750 = vmatprep.subr.bf16.mxu1 %v1905_v1 }
  0x8a   : > { %1731 = vmatpush3.bf16.msra.mxu0 %v1866_v17 }
  0x8b   : > { %1756 = vmatprep.subr.bf16.mxu0 %v1905_v1 }
  0x8c   : > { %1751 = vmatpush3.bf16.msra.mxu1 %v1872_v20 }
  0x8d   : > { %1733 = vmatmul.mubr.bf16.vlgmr.msra.gmra.mxu0 %v892_v19 }
  0x8e   : > { %1757 = vmatpush3.bf16.msra.mxu0 %v1869_v21  ;;  %1772 = vmatprep.mubr.msk.bf16.mxu0 %vm1906_vm0, %v1905_v1 }
  0x8f   : > { %1758 = vmatprep.subr.bf16.mxu0 %v1905_v1  ;;  %1753 = vmatmul.mubr.bf16.vlgmr.msra.gmra.mxu1 %v1006_v22 }
  0x92   : > { %1759 = vmatpush3.bf16.msra.mxu0 %v1871_v23 }
  0x93   : > { %1760 = vmatprep.subr.bf16.mxu0 %v1905_v1 }
  0x96   : > { %1761 = vmatpush3.bf16.msra.mxu0 %v1873_v24  ;;  %v1511_v24 = vld [vmem:[%s2290_s2] ss:$0 sm:$0xff] }
  0x97   : > { %1762 = vmatprep.subr.bf16.mxu0 %v1905_v1 }
  0x9a   : > { %1763 = vmatpush3.bf16.msra.mxu0 %v1875_v25 }
  0x9b   : > { %1764 = vmatprep.subr.bf16.mxu0 %v1905_v1 }
  0x9e   : > { %1765 = vmatpush3.bf16.msra.mxu0 %v1876_v26 }
  0x9f   : > { %1766 = vmatprep.subr.bf16.mxu0 %v1905_v1 }
  0xa2   : > { %1767 = vmatpush3.bf16.msra.mxu0 %v1877_v28 }
  0xa3   : > { %1768 = vmatprep.subr.bf16.mxu0 %v1905_v1 }
  0xa6   : > { %1769 = vmatpush3.bf16.msra.mxu0 %v1878_v31 }
  0xa7   : > { %1770 = vmatprep.subr.bf16.mxu0 %v1905_v1 }
  0xaa   : > { %1771 = vmatpush3.bf16.msra.mxu0 %v1879_v34 }
  0xad   : > { %1773 = vmatmul.mubr.bf16.vlgmr.msra.gmra.mxu0 %v1127_v35 }
  0xed   : > { %v287_v36 = vpop.f32.mrf.mxu0 }
  0xee   : > { %293 = vst [vmem:[#allocation2] sm:$0x3] %v287_v36 }
  0xef   : > { %v1614_v37 = vpop.f32.mrf.mxu0  ;;  %v399_v38 = vpop.f32.mrf.mxu1 }
  0xf1   : > { %v290_v39 = vpop.f32.mrf.mxu0  ;;  %v1634_v40 = vpop.f32.mrf.mxu1 }
  0xf3   : > { %v1615_v41 = vpop.f32.mrf.mxu0  ;;  %v402_v42 = vpop.f32.mrf.mxu1 }
  0xf5   : > { %v405_v43 = vld [vmem:[#allocation2] sm:$0x3]  ;;  %v1635_v45 = vpop.f32.mrf.mxu1 }
  0xf6   : > { %v406_v44 = vadd.f32 %v405_v43, %v399_v38 }
  0xf8   : > { %407 = vst [vmem:[#allocation2] sm:$0x3] %v406_v44 }
  0xff   : > { %v525_v47 = vld [vmem:[#allocation2] sm:$0x3] }
 0x10d   : > { %v519_v46 = vpop.f32.mrf.mxu0 }
 0x10e   : > { %v526_v48 = vadd.f32 %v525_v47, %v519_v46 }
 0x10f   : > { %v1654_v49 = vpop.f32.mrf.mxu0  ;;  %v628_v1 = vpop.f32.mrf.mxu1 }
 0x110   : > { %527 = vst [vmem:[#allocation2] sm:$0x3] %v526_v48 }
 0x111   : > { %v522_v50 = vpop.f32.mrf.mxu0  ;;  %v1674_v51 = vpop.f32.mrf.mxu1 }
 0x113   : > { %v1655_v52 = vpop.f32.mrf.mxu0  ;;  %v631_v53 = vpop.f32.mrf.mxu1 }
 0x115   : > { %v1675_v54 = vpop.f32.mrf.mxu1 }
 0x117   : > { %v634_v55 = vld [vmem:[#allocation2] sm:$0x3] }
 0x118   : > { %v635_v56 = vadd.f32 %v634_v55, %v628_v1 }
 0x11a   : > { %636 = vst [vmem:[#allocation2] sm:$0x3] %v635_v56 }
 0x121   : > { %v748_v58 = vld [vmem:[#allocation2] sm:$0x3] }
 0x12d   : > { %v742_v57 = vpop.f32.mrf.mxu0 }
 0x12e   : > { %v749_v59 = vadd.f32 %v748_v58, %v742_v57 }
 0x12f   : > { %v1694_v60 = vpop.f32.mrf.mxu0  ;;  %v862_v61 = vpop.f32.mrf.mxu1 }
 0x130   : > { %750 = vst [vmem:[#allocation2] sm:$0x3] %v749_v59 }
 0x131   : > { %v745_v62 = vpop.f32.mrf.mxu0  ;;  %v1714_v63 = vpop.f32.mrf.mxu1 }
 0x133   : > { %v1695_v0 = vpop.f32.mrf.mxu0  ;;  %v865_v2 = vpop.f32.mrf.mxu1 }
 0x135   : > { %v1715_v3 = vpop.f32.mrf.mxu1 }
 0x137   : > { %v868_v4 = vld [vmem:[#allocation2] sm:$0x3] }
 0x138   : > { %v869_v5 = vadd.f32 %v868_v4, %v862_v61 }
 0x13a   : > { %870 = vst [vmem:[#allocation2] sm:$0x3] %v869_v5 }
 0x141   : > { %v982_v7 = vld [vmem:[#allocation2] sm:$0x3] }
 0x14d   : > { %v976_v6 = vpop.f32.mrf.mxu0 }
 0x14e   : > { %v983_v8 = vadd.f32 %v982_v7, %v976_v6 }
 0x14f   : > { %v1734_v9 = vpop.f32.mrf.mxu0  ;;  %v1090_v10 = vpop.f32.mrf.mxu1 }
 0x150   : > { %984 = vst [vmem:[#allocation2] sm:$0x3] %v983_v8 }
 0x151   : > { %v979_v11 = vpop.f32.mrf.mxu0  ;;  %v1754_v12 = vpop.f32.mrf.mxu1 }
 0x153   : > { %v1735_v13 = vpop.f32.mrf.mxu0  ;;  %v1093_v14 = vpop.f32.mrf.mxu1 }
 0x155   : > { %v1755_v15 = vpop.f32.mrf.mxu1 }
 0x157   : > { %v1096_v16 = vld [vmem:[#allocation2] sm:$0x3] }
 0x158   : > { %v1097_v17 = vadd.f32 %v1096_v16, %v1090_v10 }
 0x15a   : > { %1098 = vst [vmem:[#allocation2] sm:$0x3] %v1097_v17 }
 0x161   : > { %v1217_v19 = vld [vmem:[#allocation2] sm:$0x3] }
 0x16d   : > { %v1211_v18 = vpop.f32.mrf.mxu0 }
 0x16e   : > { %v1218_v20 = vadd.f32 %v1217_v19, %v1211_v18 }
 0x16f   : > { %v1774_v21 = vpop.f32.mrf.mxu0 }
 0x170   : > { %1219 = vst [vmem:[#allocation2] sm:$0x3] %v1218_v20 }
 0x171   : > { %v1214_v22 = vpop.f32.mrf.mxu0 }
 0x173   : > { %v1775_v23 = vpop.f32.mrf.mxu0 }
 0x177   : > { %v1220_v25 = vld [vmem:[#allocation2] sm:$0x3] }
 0x178   : > { %v1228_v26 = vadd.f32 %v1511_v24, %v1220_v25 }
 0x17a   : > { %v1229_v27 = vmax.f32 %v1228_v26, 0.0 }
 0x17c   : > { %v1230_v28 = vpack.c.bf16 %v1229_v27, %v1229_v27 }
 0x17e   : > { %1231 = vst [vmem:[%s186_s7] sm:$0x1] %v1230_v28 }
 0x17f PF: > { %s13_s14 = sadd.s32 1, %s1903_s14   ;;  %s2292_s12 = smov %s1899_s13 }
 0x180   : > { %p10_p5 = scmp.ge.s32.totalorder %s13_s14, 4   ;;  %s2293_s13 = smov %s2295_s15 }
 0x182   :  { %12 = sbr.rel (!%p10_p5) target bundleno = 2 (0x2), region = 70 }

</bundles_post_ra>
